<compile_context>
chip_gen: v7x
topology: tpu7x:2x2x1
jax: 0.10.0
libtpu: 0.0.40
codegen_flags: <defaults>
</compile_context>

<pallas_src>
import jax
import jax.numpy as jnp
from jax.experimental import pallas as pl
from jax.experimental.pallas import tpu as pltpu


# ----------------------------------------------------------------------------
# helpers
# ----------------------------------------------------------------------------
def _round_up(x, m):
    return (x + m - 1) // m * m


def _pad_rows(x, multiple, value=0):
    r = x.shape[0]
    rp = _round_up(r, multiple)
    if rp == r:
        return x
    pad = ((0, rp - r),) + ((0, 0),) * (x.ndim - 1)
    return jnp.pad(x, pad, constant_values=value)


def _vmem_limit_bytes():
    """Generation-aware VMEM budget: ~75% of physical, capped at 100 MiB."""
    try:
        cap = int(getattr(pltpu.get_tpu_info(), "vmem_capacity_bytes",
                          64 * 1024 * 1024))
    except Exception:
        cap = 64 * 1024 * 1024           # conservative (v7x-sized) fallback
    return min(cap * 3 // 4, 100 * 1024 * 1024)


# ----------------------------------------------------------------------------
# Fully fused forward: one pallas_call, everything resident in VMEM.
# ----------------------------------------------------------------------------
def buildnet_enc_edge_forward(node_features, nodepair, edge_attribute,
                              node_neighbour_index, edge_mlps, gnn_edge_mlps,
                              prob_retained=1.0):
    assert len(gnn_edge_mlps) >= 1
    N, Cn0 = node_features.shape
    E, Ce0 = edge_attribute.shape
    _, K = node_neighbour_index.shape

    Np = _round_up(N, 8)
    Ep = _round_up(E, 8)

    nf_p = _pad_rows(node_features, 8)
    np_p = _pad_rows(nodepair.astype(jnp.int32), 8)            # pad rows -> node 0 (unused)
    ea_p = _pad_rows(edge_attribute, 8)
    nbr_p = _pad_rows(node_neighbour_index.astype(jnp.int32), 8, value=-1)  # [Np, K]
    # k-major flattening so the kernel can reduce over K with static sublane
    # slices (no in-kernel 3-D reshape):  row k*Np + n == neighbour slot k of node n.
    nbr_km = jnp.transpose(nbr_p).reshape(K * Np, 1)

    # ---- flatten parameters; split each GNN first layer into src/dst/edge blocks ----
    operands = [nf_p, np_p, ea_p, nbr_km]
    flops = 0

    edge_nlayers = []
    ce = Ce0
    for params in edge_mlps:
        edge_nlayers.append(len(params))
        for (w, b) in params:
            operands += [w, b]
            flops += 2 * Ep * w.shape[0] * w.shape[1]
        ce = params[-1][0].shape[1]

    gnn_nlayers = []
    cn = Cn0
    for params in gnn_edge_mlps:
        w0, b0 = params[0]
        assert w0.shape[0] == 2 * cn + ce, "first-layer weight does not match concat width"
        operands += [w0[:cn], w0[cn:2 * cn], w0[2 * cn:], b0]
        flops += 4 * Ep * Np * cn                              # src/dst one-hot gathers
        flops += 2 * Ep * w0.shape[0] * w0.shape[1]
        for (w, b) in params[1:]:
            operands += [w, b]
            flops += 2 * Ep * w.shape[0] * w.shape[1]
        gnn_nlayers.append(len(params))
        cn = ce = params[-1][0].shape[1]
        flops += 2 * (K * Np) * Ep * cn                        # batched gather-max matmul

    c_out = cn
    n_updates = len(gnn_nlayers)

    def kernel(*refs):
        nf_ref, pair_ref, ea_ref, nbr_ref = refs[:4]
        o_ref = refs[-1]
        w_refs = refs[4:-1]

        cursor = [0]

        def nxt():
            r = w_refs[cursor[0]]
            cursor[0] += 1
            return r[...]

        pair = pair_ref[...]                       # [Ep, 2] int32
        nbr = nbr_ref[...]                         # [K*Np, 1] int32

        # ---- GNN_Node edge-attribute encoders (bf16 activations, f32 acc) ----
        h = ea_ref[...]                            # [Ep, Ce0] f32
        for nl in edge_nlayers:
            for _ in range(nl):
                w = nxt()
                b = nxt()
                h = jnp.dot(h.astype(w.dtype), w,
                            preferred_element_type=jnp.float32) + b
                h = jnp.maximum(h, 0.0).astype(jnp.bfloat16)
        edges = h                                  # [Ep, Ce] (bf16 if any encoder ran)

        # One-hot gather operands depend only on the (static) graph: build once
        # in bf16 (0/1 exact) and reuse across every update.
        src_iota = jax.lax.broadcasted_iota(jnp.int32, (Ep, Np), 1)
        nbr_iota = jax.lax.broadcasted_iota(jnp.int32, (K * Np, Ep), 1)
        src_1h = (src_iota == pair[:, 0:1]).astype(jnp.bfloat16)    # [Ep, Np]
        dst_1h = (src_iota == pair[:, 1:2]).astype(jnp.bfloat16)    # [Ep, Np]
        nbr_1h = (nbr_iota == nbr).astype(jnp.bfloat16)             # [K*Np, Ep]
        nbr_valid = nbr >= 0                                        # [K*Np, 1]

        nodes = nf_ref[...].astype(jnp.bfloat16)                    # [Np, Cn0]
        neg = jnp.float32(-3.4e38)

        for u, nl in enumerate(gnn_nlayers):
            final = (u == n_updates - 1)

            # --- per-edge MLP; first layer split (concat never materialized) ---
            src = jnp.dot(src_1h, nodes, preferred_element_type=jnp.float32)
            dst = jnp.dot(dst_1h, nodes, preferred_element_type=jnp.float32)
            w_src = nxt()
            w_dst = nxt()
            w_edge = nxt()
            b0 = nxt()
            h = (jnp.dot(src.astype(w_src.dtype), w_src,
                         preferred_element_type=jnp.float32)
                 + jnp.dot(dst.astype(w_dst.dtype), w_dst,
                           preferred_element_type=jnp.float32)
                 + jnp.dot(edges.astype(w_edge.dtype), w_edge,
                           preferred_element_type=jnp.float32)
                 + b0)
            h = jnp.maximum(h, 0.0)
            if not (final and nl == 1):
                h = h.astype(jnp.bfloat16)
            for li in range(1, nl):
                w = nxt()
                b = nxt()
                h = jnp.dot(h.astype(w.dtype), w,
                            preferred_element_type=jnp.float32) + b
                h = jnp.maximum(h, 0.0)
                if not (final and li == nl - 1):
                    h = h.astype(jnp.bfloat16)
            # edges: bf16 for intermediate updates, f32 for the final one
            edges = h                               # [Ep, C]

            # --- per-node max aggregation over incident edges ---
            # one batched one-hot matmul (all K gathers fused), K-way max on VPU
            oh = nbr_1h.astype(edges.dtype)
            g = jnp.dot(oh, edges, preferred_element_type=jnp.float32)  # [K*Np, C]
            g = jnp.where(nbr_valid, g, neg)        # negative index = padding
            m = g[0:Np, :]
            for k in range(1, K):
                m = jnp.maximum(m, g[k * Np:(k + 1) * Np, :])
            # nodes whose neighbour slots are all padding get 0, not -inf
            m = jnp.where(m <= jnp.float32(-1e38), jnp.float32(0.0), m)

            if final:
                o_ref[...] = m.astype(o_ref.dtype)
            else:
                nodes = m.astype(jnp.bfloat16)

    bytes_accessed = (sum(int(op.size) * op.dtype.itemsize for op in operands)
                      + Np * c_out * 4)

    out = pl.pallas_call(
        kernel,
        out_shape=jax.ShapeDtypeStruct((Np, c_out), jnp.float32),
        compiler_params=pltpu.CompilerParams(
            vmem_limit_bytes=_vmem_limit_bytes()),
        cost_estimate=pl.CostEstimate(
            flops=int(flops), transcendentals=0,
            bytes_accessed=int(bytes_accessed)),
    )(*operands)
    return out[:N]


# ----------------------------------------------------------------------------
# Model definition (deterministic synthetic parameters)
# ----------------------------------------------------------------------------
class ChannelCfg:
    def __init__(self, in_channel, hidden_channel, out_channel, num_hidden):
        self.in_channel = in_channel
        self.hidden_channel = hidden_channel
        self.out_channel = out_channel
        self.num_hidden = num_hidden


def make_mlp_params(key, cfg, weight_dtype=jnp.bfloat16):
    """MLP layer dims: in -> hidden x num_hidden -> out, ReLU after each.

    Weights stored bf16 (f32 accumulation on the MXU), biases f32.
    """
    dims = [cfg.in_channel] + [cfg.hidden_channel] * cfg.num_hidden + [cfg.out_channel]
    params = []
    for i in range(len(dims) - 1):
        key, kw, kb = jax.random.split(key, 3)
        w = (jax.random.normal(kw, (dims[i], dims[i + 1]), jnp.float32)
             / jnp.sqrt(jnp.float32(dims[i]))).astype(weight_dtype)
        b = 0.01 * jax.random.normal(kb, (1, dims[i + 1]), jnp.float32)
        params.append((w, b))
    return params, key


# ----------------------------------------------------------------------------
# Pure-JAX reference for correctness checking
# ----------------------------------------------------------------------------
def reference_forward(node_features, nodepair, edge_attribute,
                      node_neighbour_index, edge_mlps, gnn_edge_mlps):
    def mlp(x, params):
        for (w, b) in params:
            x = jnp.maximum(
                jnp.dot(x.astype(w.dtype), w, preferred_element_type=jnp.float32) + b,
                0.0)
        return x

    for params in edge_mlps:
        edge_attribute = mlp(edge_attribute, params)
    for params in gnn_edge_mlps:
        src = node_features[nodepair[:, 0]]
        dst = node_features[nodepair[:, 1]]
        x = jnp.concatenate([src, dst, edge_attribute], axis=1)
        edge_attribute = mlp(x, params)
        node_features = jnp.max(edge_attribute[node_neighbour_index], axis=1)
    return node_features


# ----------------------------------------------------------------------------
if __name__ == "__main__":
    # Small synthetic graph: N nodes, K edges per node, E = N*K directed edges.
    N, K = 64, 8
    E = N * K
    CN0, CE0 = 16, 8  # initial node / edge feature channels

    # modelmeta_edge: one GNN_Node edge encoder  8 -> 32 -> 32
    edge_cfgs = [ChannelCfg(CE0, 32, 32, 1)]
    # modelmeta: two GNN_Edge updates
    #   update 1: in = 2*16 + 32 = 64 -> 16 ; update 2: in = 2*16 + 16 = 48 -> 16
    gnn_cfgs = [ChannelCfg(2 * CN0 + 32, 64, 16, 1),
                ChannelCfg(2 * CN0 + 16, 64, 16, 1)]

    key = jax.random.PRNGKey(0)
    edge_mlps = []
    for cfg in edge_cfgs:
        p, key = make_mlp_params(key, cfg)
        edge_mlps.append(p)
    gnn_edge_mlps = []
    for cfg in gnn_cfgs:
        p, key = make_mlp_params(key, cfg)
        gnn_edge_mlps.append(p)

    key, k1, k2, k3 = jax.random.split(key, 4)
    node_features = jax.random.normal(k1, (N, CN0), jnp.float32)
    edge_attribute = jax.random.normal(k2, (E, CE0), jnp.float32)

    # edge e = (src = e // K, dst = random node)
    src = jnp.repeat(jnp.arange(N, dtype=jnp.int32), K)
    dst = jax.random.randint(k3, (E,), 0, N, dtype=jnp.int32)
    nodepair = jnp.stack([src, dst], axis=1)                              # [E, 2]
    node_neighbour_index = jnp.arange(E, dtype=jnp.int32).reshape(N, K)   # [N, K]

    fwd = jax.jit(buildnet_enc_edge_forward)
    out = fwd(node_features, nodepair, edge_attribute, node_neighbour_index,
              edge_mlps, gnn_edge_mlps)
    out = jax.block_until_ready(out)
    assert out.shape == (N, 16) and out.dtype == jnp.float32

    ref = reference_forward(node_features, nodepair, edge_attribute,
                            node_neighbour_index, edge_mlps, gnn_edge_mlps)
    err = float(jnp.max(jnp.abs(out - ref)))
    assert err < 1e-2, f"max abs error vs reference: {err}"

    print("KERNEL_OK")
</pallas_src>

<mosaic_0001>
module attributes {stable_mosaic.version = 11 : i64} {
  func.func @kernel(%arg0: memref<64x16xf32, #tpu.memory_space<vmem>>, %arg1: memref<512x2xi32, #tpu.memory_space<vmem>>, %arg2: memref<512x8xf32, #tpu.memory_space<vmem>>, %arg3: memref<512x1xi32, #tpu.memory_space<vmem>>, %arg4: memref<8x32xbf16, #tpu.memory_space<vmem>>, %arg5: memref<1x32xf32, #tpu.memory_space<vmem>>, %arg6: memref<32x32xbf16, #tpu.memory_space<vmem>>, %arg7: memref<1x32xf32, #tpu.memory_space<vmem>>, %arg8: memref<16x64xbf16, #tpu.memory_space<vmem>>, %arg9: memref<16x64xbf16, #tpu.memory_space<vmem>>, %arg10: memref<32x64xbf16, #tpu.memory_space<vmem>>, %arg11: memref<1x64xf32, #tpu.memory_space<vmem>>, %arg12: memref<64x16xbf16, #tpu.memory_space<vmem>>, %arg13: memref<1x16xf32, #tpu.memory_space<vmem>>, %arg14: memref<16x64xbf16, #tpu.memory_space<vmem>>, %arg15: memref<16x64xbf16, #tpu.memory_space<vmem>>, %arg16: memref<16x64xbf16, #tpu.memory_space<vmem>>, %arg17: memref<1x64xf32, #tpu.memory_space<vmem>>, %arg18: memref<64x16xbf16, #tpu.memory_space<vmem>>, %arg19: memref<1x16xf32, #tpu.memory_space<vmem>>, %arg20: memref<64x16xf32, #tpu.memory_space<vmem>>) attributes {dimension_semantics = [], scalar_prefetch = 0 : i64, scratch_operands = 0 : i64, tpu.core_type = #tpu.core_type<tc>} {
    %c0 = arith.constant 0 : index
    %c0_0 = arith.constant 0 : index
    %0 = vector.load %arg1[%c0, %c0_0] : memref<512x2xi32, #tpu.memory_space<vmem>>, vector<512x2xi32>
    %c0_1 = arith.constant 0 : index
    %c0_2 = arith.constant 0 : index
    %1 = vector.load %arg3[%c0_1, %c0_2] : memref<512x1xi32, #tpu.memory_space<vmem>>, vector<512x1xi32>
    %c0_3 = arith.constant 0 : index
    %c0_4 = arith.constant 0 : index
    %2 = vector.load %arg2[%c0_3, %c0_4] : memref<512x8xf32, #tpu.memory_space<vmem>>, vector<512x8xf32>
    %c0_5 = arith.constant 0 : index
    %c0_6 = arith.constant 0 : index
    %3 = vector.load %arg4[%c0_5, %c0_6] : memref<8x32xbf16, #tpu.memory_space<vmem>>, vector<8x32xbf16>
    %c0_7 = arith.constant 0 : index
    %c0_8 = arith.constant 0 : index
    %4 = vector.load %arg5[%c0_7, %c0_8] : memref<1x32xf32, #tpu.memory_space<vmem>>, vector<1x32xf32>
    %5 = arith.truncf %2 : vector<512x8xf32> to vector<512x8xbf16>
    %cst = arith.constant dense<0.000000e+00> : vector<512x32xf32>
    %6 = tpu.matmul %5, %3, %cst {dimension_numbers = #tpu.dot_dimension_numbers<[1], [0], [0], [1], [0, 0, 1, 1], [], []>} : vector<512x8xbf16>, vector<8x32xbf16>, vector<512x32xf32> -> vector<512x32xf32>
    %7 = vector.broadcast %4 : vector<1x32xf32> to vector<512x32xf32>
    %8 = arith.addf %6, %7 : vector<512x32xf32>
    %cst_9 = arith.constant 0.000000e+00 : f32
    %9 = vector.broadcast %cst_9 : f32 to vector<512x32xf32>
    %10 = arith.maximumf %8, %9 : vector<512x32xf32>
    %11 = arith.truncf %10 : vector<512x32xf32> to vector<512x32xbf16>
    %c0_10 = arith.constant 0 : index
    %c0_11 = arith.constant 0 : index
    %12 = vector.load %arg6[%c0_10, %c0_11] : memref<32x32xbf16, #tpu.memory_space<vmem>>, vector<32x32xbf16>
    %c0_12 = arith.constant 0 : index
    %c0_13 = arith.constant 0 : index
    %13 = vector.load %arg7[%c0_12, %c0_13] : memref<1x32xf32, #tpu.memory_space<vmem>>, vector<1x32xf32>
    %cst_14 = arith.constant dense<0.000000e+00> : vector<512x32xf32>
    %14 = tpu.matmul %11, %12, %cst_14 {dimension_numbers = #tpu.dot_dimension_numbers<[1], [0], [0], [1], [0, 0, 1, 1], [], []>} : vector<512x32xbf16>, vector<32x32xbf16>, vector<512x32xf32> -> vector<512x32xf32>
    %15 = vector.broadcast %13 : vector<1x32xf32> to vector<512x32xf32>
    %16 = arith.addf %14, %15 : vector<512x32xf32>
    %cst_15 = arith.constant 0.000000e+00 : f32
    %17 = vector.broadcast %cst_15 : f32 to vector<512x32xf32>
    %18 = arith.maximumf %16, %17 : vector<512x32xf32>
    %19 = arith.truncf %18 : vector<512x32xf32> to vector<512x32xbf16>
    %20 = tpu.iota {dimensions = array<i32: 1>} : vector<512x64xi32>
    %21 = tpu.iota {dimensions = array<i32: 1>} : vector<512x512xi32>
    %22 = vector.extract_strided_slice %0 {offsets = [0, 0], sizes = [512, 1], strides = [1, 1]} : vector<512x2xi32> to vector<512x1xi32>
    %23 = vector.broadcast %22 : vector<512x1xi32> to vector<512x64xi32>
    %24 = arith.cmpi eq, %20, %23 : vector<512x64xi32>
    %25 = arith.extui %24 : vector<512x64xi1> to vector<512x64xi32>
    %26 = arith.sitofp %25 : vector<512x64xi32> to vector<512x64xf32>
    %27 = arith.truncf %26 : vector<512x64xf32> to vector<512x64xbf16>
    %28 = vector.extract_strided_slice %0 {offsets = [0, 1], sizes = [512, 1], strides = [1, 1]} : vector<512x2xi32> to vector<512x1xi32>
    %29 = vector.broadcast %28 : vector<512x1xi32> to vector<512x64xi32>
    %30 = arith.cmpi eq, %20, %29 : vector<512x64xi32>
    %31 = arith.extui %30 : vector<512x64xi1> to vector<512x64xi32>
    %32 = arith.sitofp %31 : vector<512x64xi32> to vector<512x64xf32>
    %33 = arith.truncf %32 : vector<512x64xf32> to vector<512x64xbf16>
    %34 = vector.broadcast %1 : vector<512x1xi32> to vector<512x512xi32>
    %35 = arith.cmpi eq, %21, %34 : vector<512x512xi32>
    %36 = arith.extui %35 : vector<512x512xi1> to vector<512x512xi32>
    %37 = arith.sitofp %36 : vector<512x512xi32> to vector<512x512xf32>
    %38 = arith.truncf %37 : vector<512x512xf32> to vector<512x512xbf16>
    %c0_i32 = arith.constant 0 : i32
    %39 = vector.broadcast %c0_i32 : i32 to vector<512x1xi32>
    %40 = arith.cmpi sge, %1, %39 : vector<512x1xi32>
    %c0_16 = arith.constant 0 : index
    %c0_17 = arith.constant 0 : index
    %41 = vector.load %arg0[%c0_16, %c0_17] : memref<64x16xf32, #tpu.memory_space<vmem>>, vector<64x16xf32>
    %42 = arith.truncf %41 : vector<64x16xf32> to vector<64x16xbf16>
    %cst_18 = arith.constant dense<0.000000e+00> : vector<512x16xf32>
    %43 = tpu.matmul %27, %42, %cst_18 {dimension_numbers = #tpu.dot_dimension_numbers<[1], [0], [0], [1], [0, 0, 1, 1], [], []>} : vector<512x64xbf16>, vector<64x16xbf16>, vector<512x16xf32> -> vector<512x16xf32>
    %cst_19 = arith.constant dense<0.000000e+00> : vector<512x16xf32>
    %44 = tpu.matmul %33, %42, %cst_19 {dimension_numbers = #tpu.dot_dimension_numbers<[1], [0], [0], [1], [0, 0, 1, 1], [], []>} : vector<512x64xbf16>, vector<64x16xbf16>, vector<512x16xf32> -> vector<512x16xf32>
    %c0_20 = arith.constant 0 : index
    %c0_21 = arith.constant 0 : index
    %45 = vector.load %arg8[%c0_20, %c0_21] : memref<16x64xbf16, #tpu.memory_space<vmem>>, vector<16x64xbf16>
    %c0_22 = arith.constant 0 : index
    %c0_23 = arith.constant 0 : index
    %46 = vector.load %arg9[%c0_22, %c0_23] : memref<16x64xbf16, #tpu.memory_space<vmem>>, vector<16x64xbf16>
    %c0_24 = arith.constant 0 : index
    %c0_25 = arith.constant 0 : index
    %47 = vector.load %arg10[%c0_24, %c0_25] : memref<32x64xbf16, #tpu.memory_space<vmem>>, vector<32x64xbf16>
    %c0_26 = arith.constant 0 : index
    %c0_27 = arith.constant 0 : index
    %48 = vector.load %arg11[%c0_26, %c0_27] : memref<1x64xf32, #tpu.memory_space<vmem>>, vector<1x64xf32>
    %49 = arith.truncf %43 : vector<512x16xf32> to vector<512x16xbf16>
    %cst_28 = arith.constant dense<0.000000e+00> : vector<512x64xf32>
    %50 = tpu.matmul %49, %45, %cst_28 {dimension_numbers = #tpu.dot_dimension_numbers<[1], [0], [0], [1], [0, 0, 1, 1], [], []>} : vector<512x16xbf16>, vector<16x64xbf16>, vector<512x64xf32> -> vector<512x64xf32>
    %51 = arith.truncf %44 : vector<512x16xf32> to vector<512x16xbf16>
    %cst_29 = arith.constant dense<0.000000e+00> : vector<512x64xf32>
    %52 = tpu.matmul %51, %46, %cst_29 {dimension_numbers = #tpu.dot_dimension_numbers<[1], [0], [0], [1], [0, 0, 1, 1], [], []>} : vector<512x16xbf16>, vector<16x64xbf16>, vector<512x64xf32> -> vector<512x64xf32>
    %53 = arith.addf %50, %52 : vector<512x64xf32>
    %cst_30 = arith.constant dense<0.000000e+00> : vector<512x64xf32>
    %54 = tpu.matmul %19, %47, %cst_30 {dimension_numbers = #tpu.dot_dimension_numbers<[1], [0], [0], [1], [0, 0, 1, 1], [], []>} : vector<512x32xbf16>, vector<32x64xbf16>, vector<512x64xf32> -> vector<512x64xf32>
    %55 = arith.addf %53, %54 : vector<512x64xf32>
    %56 = vector.broadcast %48 : vector<1x64xf32> to vector<512x64xf32>
    %57 = arith.addf %55, %56 : vector<512x64xf32>
    %cst_31 = arith.constant 0.000000e+00 : f32
    %58 = vector.broadcast %cst_31 : f32 to vector<512x64xf32>
    %59 = arith.maximumf %57, %58 : vector<512x64xf32>
    %60 = arith.truncf %59 : vector<512x64xf32> to vector<512x64xbf16>
    %c0_32 = arith.constant 0 : index
    %c0_33 = arith.constant 0 : index
    %61 = vector.load %arg12[%c0_32, %c0_33] : memref<64x16xbf16, #tpu.memory_space<vmem>>, vector<64x16xbf16>
    %c0_34 = arith.constant 0 : index
    %c0_35 = arith.constant 0 : index
    %62 = vector.load %arg13[%c0_34, %c0_35] : memref<1x16xf32, #tpu.memory_space<vmem>>, vector<1x16xf32>
    %cst_36 = arith.constant dense<0.000000e+00> : vector<512x16xf32>
    %63 = tpu.matmul %60, %61, %cst_36 {dimension_numbers = #tpu.dot_dimension_numbers<[1], [0], [0], [1], [0, 0, 1, 1], [], []>} : vector<512x64xbf16>, vector<64x16xbf16>, vector<512x16xf32> -> vector<512x16xf32>
    %64 = vector.broadcast %62 : vector<1x16xf32> to vector<512x16xf32>
    %65 = arith.addf %63, %64 : vector<512x16xf32>
    %cst_37 = arith.constant 0.000000e+00 : f32
    %66 = vector.broadcast %cst_37 : f32 to vector<512x16xf32>
    %67 = arith.maximumf %65, %66 : vector<512x16xf32>
    %68 = arith.truncf %67 : vector<512x16xf32> to vector<512x16xbf16>
    %cst_38 = arith.constant dense<0.000000e+00> : vector<512x16xf32>
    %69 = tpu.matmul %38, %68, %cst_38 {dimension_numbers = #tpu.dot_dimension_numbers<[1], [0], [0], [1], [0, 0, 1, 1], [], []>} : vector<512x512xbf16>, vector<512x16xbf16>, vector<512x16xf32> -> vector<512x16xf32>
    %cst_39 = arith.constant -3.400000e+38 : f32
    %70 = vector.shape_cast %40 : vector<512x1xi1> to vector<512x1xi1>
    %71 = vector.broadcast %70 : vector<512x1xi1> to vector<512x16xi1>
    %72 = vector.broadcast %cst_39 : f32 to vector<512x16xf32>
    %73 = arith.select %71, %69, %72 : vector<512x16xi1>, vector<512x16xf32>
    %74 = vector.extract_strided_slice %73 {offsets = [0, 0], sizes = [64, 16], strides = [1, 1]} : vector<512x16xf32> to vector<64x16xf32>
    %75 = vector.extract_strided_slice %73 {offsets = [64, 0], sizes = [64, 16], strides = [1, 1]} : vector<512x16xf32> to vector<64x16xf32>
    %76 = arith.maximumf %74, %75 : vector<64x16xf32>
    %77 = vector.extract_strided_slice %73 {offsets = [128, 0], sizes = [64, 16], strides = [1, 1]} : vector<512x16xf32> to vector<64x16xf32>
    %78 = arith.maximumf %76, %77 : vector<64x16xf32>
    %79 = vector.extract_strided_slice %73 {offsets = [192, 0], sizes = [64, 16], strides = [1, 1]} : vector<512x16xf32> to vector<64x16xf32>
    %80 = arith.maximumf %78, %79 : vector<64x16xf32>
    %81 = vector.extract_strided_slice %73 {offsets = [256, 0], sizes = [64, 16], strides = [1, 1]} : vector<512x16xf32> to vector<64x16xf32>
    %82 = arith.maximumf %80, %81 : vector<64x16xf32>
    %83 = vector.extract_strided_slice %73 {offsets = [320, 0], sizes = [64, 16], strides = [1, 1]} : vector<512x16xf32> to vector<64x16xf32>
    %84 = arith.maximumf %82, %83 : vector<64x16xf32>
    %85 = vector.extract_strided_slice %73 {offsets = [384, 0], sizes = [64, 16], strides = [1, 1]} : vector<512x16xf32> to vector<64x16xf32>
    %86 = arith.maximumf %84, %85 : vector<64x16xf32>
    %87 = vector.extract_strided_slice %73 {offsets = [448, 0], sizes = [64, 16], strides = [1, 1]} : vector<512x16xf32> to vector<64x16xf32>
    %88 = arith.maximumf %86, %87 : vector<64x16xf32>
    %cst_40 = arith.constant -9.99999968E+37 : f32
    %89 = vector.broadcast %cst_40 : f32 to vector<64x16xf32>
    %90 = arith.cmpf ole, %88, %89 : vector<64x16xf32>
    %cst_41 = arith.constant 0.000000e+00 : f32
    %91 = vector.broadcast %cst_41 : f32 to vector<64x16xf32>
    %92 = arith.select %90, %91, %88 : vector<64x16xi1>, vector<64x16xf32>
    %93 = arith.truncf %92 : vector<64x16xf32> to vector<64x16xbf16>
    %cst_42 = arith.constant dense<0.000000e+00> : vector<512x16xf32>
    %94 = tpu.matmul %27, %93, %cst_42 {dimension_numbers = #tpu.dot_dimension_numbers<[1], [0], [0], [1], [0, 0, 1, 1], [], []>} : vector<512x64xbf16>, vector<64x16xbf16>, vector<512x16xf32> -> vector<512x16xf32>
    %cst_43 = arith.constant dense<0.000000e+00> : vector<512x16xf32>
    %95 = tpu.matmul %33, %93, %cst_43 {dimension_numbers = #tpu.dot_dimension_numbers<[1], [0], [0], [1], [0, 0, 1, 1], [], []>} : vector<512x64xbf16>, vector<64x16xbf16>, vector<512x16xf32> -> vector<512x16xf32>
    %c0_44 = arith.constant 0 : index
    %c0_45 = arith.constant 0 : index
    %96 = vector.load %arg14[%c0_44, %c0_45] : memref<16x64xbf16, #tpu.memory_space<vmem>>, vector<16x64xbf16>
    %c0_46 = arith.constant 0 : index
    %c0_47 = arith.constant 0 : index
    %97 = vector.load %arg15[%c0_46, %c0_47] : memref<16x64xbf16, #tpu.memory_space<vmem>>, vector<16x64xbf16>
    %c0_48 = arith.constant 0 : index
    %c0_49 = arith.constant 0 : index
    %98 = vector.load %arg16[%c0_48, %c0_49] : memref<16x64xbf16, #tpu.memory_space<vmem>>, vector<16x64xbf16>
    %c0_50 = arith.constant 0 : index
    %c0_51 = arith.constant 0 : index
    %99 = vector.load %arg17[%c0_50, %c0_51] : memref<1x64xf32, #tpu.memory_space<vmem>>, vector<1x64xf32>
    %100 = arith.truncf %94 : vector<512x16xf32> to vector<512x16xbf16>
    %cst_52 = arith.constant dense<0.000000e+00> : vector<512x64xf32>
    %101 = tpu.matmul %100, %96, %cst_52 {dimension_numbers = #tpu.dot_dimension_numbers<[1], [0], [0], [1], [0, 0, 1, 1], [], []>} : vector<512x16xbf16>, vector<16x64xbf16>, vector<512x64xf32> -> vector<512x64xf32>
    %102 = arith.truncf %95 : vector<512x16xf32> to vector<512x16xbf16>
    %cst_53 = arith.constant dense<0.000000e+00> : vector<512x64xf32>
    %103 = tpu.matmul %102, %97, %cst_53 {dimension_numbers = #tpu.dot_dimension_numbers<[1], [0], [0], [1], [0, 0, 1, 1], [], []>} : vector<512x16xbf16>, vector<16x64xbf16>, vector<512x64xf32> -> vector<512x64xf32>
    %104 = arith.addf %101, %103 : vector<512x64xf32>
    %cst_54 = arith.constant dense<0.000000e+00> : vector<512x64xf32>
    %105 = tpu.matmul %68, %98, %cst_54 {dimension_numbers = #tpu.dot_dimension_numbers<[1], [0], [0], [1], [0, 0, 1, 1], [], []>} : vector<512x16xbf16>, vector<16x64xbf16>, vector<512x64xf32> -> vector<512x64xf32>
    %106 = arith.addf %104, %105 : vector<512x64xf32>
    %107 = vector.broadcast %99 : vector<1x64xf32> to vector<512x64xf32>
    %108 = arith.addf %106, %107 : vector<512x64xf32>
    %cst_55 = arith.constant 0.000000e+00 : f32
    %109 = vector.broadcast %cst_55 : f32 to vector<512x64xf32>
    %110 = arith.maximumf %108, %109 : vector<512x64xf32>
    %111 = arith.truncf %110 : vector<512x64xf32> to vector<512x64xbf16>
    %c0_56 = arith.constant 0 : index
    %c0_57 = arith.constant 0 : index
    %112 = vector.load %arg18[%c0_56, %c0_57] : memref<64x16xbf16, #tpu.memory_space<vmem>>, vector<64x16xbf16>
    %c0_58 = arith.constant 0 : index
    %c0_59 = arith.constant 0 : index
    %113 = vector.load %arg19[%c0_58, %c0_59] : memref<1x16xf32, #tpu.memory_space<vmem>>, vector<1x16xf32>
    %cst_60 = arith.constant dense<0.000000e+00> : vector<512x16xf32>
    %114 = tpu.matmul %111, %112, %cst_60 {dimension_numbers = #tpu.dot_dimension_numbers<[1], [0], [0], [1], [0, 0, 1, 1], [], []>} : vector<512x64xbf16>, vector<64x16xbf16>, vector<512x16xf32> -> vector<512x16xf32>
    %115 = vector.broadcast %113 : vector<1x16xf32> to vector<512x16xf32>
    %116 = arith.addf %114, %115 : vector<512x16xf32>
    %cst_61 = arith.constant 0.000000e+00 : f32
    %117 = vector.broadcast %cst_61 : f32 to vector<512x16xf32>
    %118 = arith.maximumf %116, %117 : vector<512x16xf32>
    %119 = arith.extf %38 : vector<512x512xbf16> to vector<512x512xf32>
    %cst_62 = arith.constant dense<0.000000e+00> : vector<512x16xf32>
    %120 = tpu.matmul %119, %118, %cst_62 {dimension_numbers = #tpu.dot_dimension_numbers<[1], [0], [0], [1], [0, 0, 1, 1], [], []>} : vector<512x512xf32>, vector<512x16xf32>, vector<512x16xf32> -> vector<512x16xf32>
    %cst_63 = arith.constant -3.400000e+38 : f32
    %121 = vector.shape_cast %40 : vector<512x1xi1> to vector<512x1xi1>
    %122 = vector.broadcast %121 : vector<512x1xi1> to vector<512x16xi1>
    %123 = vector.broadcast %cst_63 : f32 to vector<512x16xf32>
    %124 = arith.select %122, %120, %123 : vector<512x16xi1>, vector<512x16xf32>
    %125 = vector.extract_strided_slice %124 {offsets = [0, 0], sizes = [64, 16], strides = [1, 1]} : vector<512x16xf32> to vector<64x16xf32>
    %126 = vector.extract_strided_slice %124 {offsets = [64, 0], sizes = [64, 16], strides = [1, 1]} : vector<512x16xf32> to vector<64x16xf32>
    %127 = arith.maximumf %125, %126 : vector<64x16xf32>
    %128 = vector.extract_strided_slice %124 {offsets = [128, 0], sizes = [64, 16], strides = [1, 1]} : vector<512x16xf32> to vector<64x16xf32>
    %129 = arith.maximumf %127, %128 : vector<64x16xf32>
    %130 = vector.extract_strided_slice %124 {offsets = [192, 0], sizes = [64, 16], strides = [1, 1]} : vector<512x16xf32> to vector<64x16xf32>
    %131 = arith.maximumf %129, %130 : vector<64x16xf32>
    %132 = vector.extract_strided_slice %124 {offsets = [256, 0], sizes = [64, 16], strides = [1, 1]} : vector<512x16xf32> to vector<64x16xf32>
    %133 = arith.maximumf %131, %132 : vector<64x16xf32>
    %134 = vector.extract_strided_slice %124 {offsets = [320, 0], sizes = [64, 16], strides = [1, 1]} : vector<512x16xf32> to vector<64x16xf32>
    %135 = arith.maximumf %133, %134 : vector<64x16xf32>
    %136 = vector.extract_strided_slice %124 {offsets = [384, 0], sizes = [64, 16], strides = [1, 1]} : vector<512x16xf32> to vector<64x16xf32>
    %137 = arith.maximumf %135, %136 : vector<64x16xf32>
    %138 = vector.extract_strided_slice %124 {offsets = [448, 0], sizes = [64, 16], strides = [1, 1]} : vector<512x16xf32> to vector<64x16xf32>
    %139 = arith.maximumf %137, %138 : vector<64x16xf32>
    %cst_64 = arith.constant -9.99999968E+37 : f32
    %140 = vector.broadcast %cst_64 : f32 to vector<64x16xf32>
    %141 = arith.cmpf ole, %139, %140 : vector<64x16xf32>
    %cst_65 = arith.constant 0.000000e+00 : f32
    %142 = vector.broadcast %cst_65 : f32 to vector<64x16xf32>
    %143 = arith.select %141, %142, %139 : vector<64x16xi1>, vector<64x16xf32>
    %c0_66 = arith.constant 0 : index
    %c0_67 = arith.constant 0 : index
    %144 = vector.load %arg20[%c0_66, %c0_67] : memref<64x16xf32, #tpu.memory_space<vmem>>, vector<64x16xf32>
    tpu.vector_store %arg20[%c0_66, %c0_67], %143 {strides = array<i32>} : memref<64x16xf32, #tpu.memory_space<vmem>>, vector<64x16xf32>,
    return
  }
}

</mosaic_0001>

<bundles_post_ra>
// kernel: buildnet_enc_edge_forward.1
= control target key start
LH: loop header
LB: loop body
LE: loop exit
PB: predicated region body
PF: predicated region fallthrough
CT: control target
= control target key end

     0   :  { %vm395_vm0 = vcmask 1043456   ;;  %v21184_v0 = vmov 0   ;;  %vm298_vm1 = vcmask 64512   ;;  %vm3290_vm6 = vcmask 523264   ;;  %s21159_s4 = inlined_call_operand.vmem [shape: bf16[8,32], index: 4, kind: input, shape index: {}]   ;;  %s21160_s1 = inlined_call_operand.vmem [shape: s32[512,2], index: 1, kind: input, shape index: {}]   ;;  %s21161_s2 = inlined_call_operand.vmem [shape: f32[512,8], index: 2, kind: input, shape index: {}]   ;;  %s21162_s0 = inlined_call_operand.vmem [shape: f32[64,16], index: 0, kind: input, shape index: {}]   ;;  %s21163_s6 = inlined_call_operand.vmem [shape: bf16[32,32], index: 6, kind: input, shape index: {}]   ;;  %s21164_s5 = inlined_call_operand.vmem [shape: f32[1,32], index: 5, kind: input, shape index: {}]   ;;  %s21165_s9 = inlined_call_operand.vmem [shape: bf16[16,64], index: 9, kind: input, shape index: {}]   ;;  %s21166_s7 = inlined_call_operand.vmem [shape: f32[1,32], index: 7, kind: input, shape index: {}]   ;;  %s21167_s8 = inlined_call_operand.vmem [shape: bf16[16,64], index: 8, kind: input, shape index: {}]   ;;  %s21168_s10 = inlined_call_operand.vmem [shape: bf16[32,64], index: 10, kind: input, shape index: {}]   ;;  %s21169_s3 = inlined_call_operand.vmem [shape: s32[512,1], index: 3, kind: input, shape index: {}]   ;;  %s21170_s12 = inlined_call_operand.vmem [shape: bf16[64,16], index: 12, kind: input, shape index: {}]   ;;  %s21171_s11 = inlined_call_operand.vmem [shape: f32[1,64], index: 11, kind: input, shape index: {}]   ;;  %s21172_s13 = inlined_call_operand.vmem [shape: f32[1,16], index: 13, kind: input, shape index: {}]   ;;  %s21173_s15 = inlined_call_operand.vmem [shape: bf16[16,64], index: 15, kind: input, shape index: {}]   ;;  %s21174_s14 = inlined_call_operand.vmem [shape: bf16[16,64], index: 14, kind: input, shape index: {}]   ;;  %s21175_s16 = inlined_call_operand.vmem [shape: bf16[16,64], index: 16, kind: input, shape index: {}]   ;;  %s21176_s18 = inlined_call_operand.vmem [shape: bf16[64,16], index: 18, kind: input, shape index: {}]   ;;  %s21177_s17 = inlined_call_operand.vmem [shape: f32[1,64], index: 17, kind: input, shape index: {}]   ;;  %s21178_s19 = inlined_call_operand.vmem [shape: f32[1,16], index: 19, kind: input, shape index: {}]   ;;  %s21179_s20 = inlined_call_operand.vmem [shape: f32[64,16], index: 20, kind: output, shape index: {}]  }
   0x1   :  { %21867 = sst [smem:[#allocation229_spill]] %s21159_s4  ;;  %14285 = vset.pattern.permute.xlu1 %v21184_v0  ;;  %14284 = vset.pattern.permute.xlu0 %v21184_v0 }
   0x2   :  { %21868 = sst [smem:[#allocation230_spill]] %s21160_s1  ;;  %s21872_s23 = sld [smem:[#allocation229_spill]] }
   0x3   :  { %21869 = sst [smem:[#allocation231_spill]] %s21161_s2  ;;  %s21873_s25 = sld [smem:[#allocation230_spill]] }
   0x4   :  { %21870 = sst [smem:[#allocation232_spill]] %s21162_s0 }
   0x5   :  { %21871 = sst [smem:[#allocation233_spill]] %s21163_s6  ;;  %s21874_s6 = sld [smem:[#allocation231_spill]] }
   0x6   :  { %s21875_s1 = sld [smem:[#allocation232_spill]]  ;;  %s21876_s30 = sld [smem:[#allocation233_spill]] }
   0x8   :  { %v258_v1 = vld [vmem:[%s21872_s23] sm:$0xf] }
   0x9   :  { %v14427_v2 = vld [vmem:[%s21873_s25 + $0x10] sm:$0xff]  ;;  %v14432_v3 = vld [vmem:[%s21873_s25] sm:$0xff]  ;;  %14277 = vmatprep.subr.msk.bf16.mxu0 %vm395_vm0, %v258_v1  ;;  %v397_v4 = vsel %vm395_vm0, %v258_v1, 0  ;;  %v14451_v10 = vld [vmem:[%s21873_s25 + $0x18] sm:$0xff] }
   0xa   :  { %1301 = vperm.xlu1 %14285, %v14427_v2   ;;  %1295 = vperm.xlu0 %14284, %v14432_v3   ;;  %v14456_v12 = vld [vmem:[%s21873_s25 + $0x8] sm:$0xff]  ;;  %v14482_v19 = vld [vmem:[%s21873_s25 + $0x20] sm:$0xff]  ;;  %v14496_v23 = vld [vmem:[%s21873_s25 + $0x38] sm:$0xff] }
   0xb   :  { %v194_v5 = vld [vmem:[%s21874_s6] sm:$0xff]  ;;  %v195_v6 = vld [vmem:[%s21874_s6 + $0x8] sm:$0xff]  ;;  %v196_v7 = vld [vmem:[%s21874_s6 + $0x10] sm:$0xff]  ;;  %12706 = vmatpush3.bf16.msra.mxu0 %v397_v4 }
   0xc   :  { %v260_v8 = vpack.c.bf16 %v195_v6, %v194_v5  ;;  %v197_v9 = vld [vmem:[%s21874_s6 + $0x18] sm:$0xff]  ;;  %v198_v13 = vld [vmem:[%s21874_s6 + $0x20] sm:$0xff]  ;;  %v199_v14 = vld [vmem:[%s21874_s6 + $0x28] sm:$0xff] }
   0xd   :  { %v261_v11 = vpack.c.bf16 %v197_v9, %v196_v7  ;;  %v262_v15 = vpack.c.bf16 %v199_v14, %v198_v13  ;;  %v14471_v16 = vld [vmem:[%s21873_s25 + $0x28] sm:$0xff]  ;;  %v200_v17 = vld [vmem:[%s21874_s6 + $0x30] sm:$0xff]  ;;  %v201_v18 = vld [vmem:[%s21874_s6 + $0x38] sm:$0xff] }
   0xe   :  { %12707 = vmatprep.mubr.msk.bf16.mxu0 %vm298_vm1, %v260_v8  ;;  %1304 = vperm.xlu1 %14285, %v14451_v10   ;;  %v202_v20 = vld [vmem:[%s21874_s6 + $0x40] sm:$0xff]  ;;  %v203_v21 = vld [vmem:[%s21874_s6 + $0x48] sm:$0xff]  ;;  %v263_v22 = vpack.c.bf16 %v201_v18, %v200_v17  ;;  %v14501_v25 = vld [vmem:[%s21873_s25 + $0x30] sm:$0xff] }
   0xf   :  { %12708 = vmatmul.mubr.msk.bf16.vlgmr.msra.gmra.mrb[0].mxu0 %vm298_vm1, %v261_v11  ;;  %1298 = vperm.xlu0 %14284, %v14456_v12   ;;  %v264_v24 = vpack.c.bf16 %v203_v21, %v202_v20  ;;  %v14509_v26 = vld [vmem:[%s21873_s25 + $0x48] sm:$0xff]  ;;  %v204_v27 = vld [vmem:[%s21874_s6 + $0x50] sm:$0xff]  ;;  %v205_v28 = vld [vmem:[%s21874_s6 + $0x58] sm:$0xff] }
  0x10   :  { %12711 = vmatprep.mubr.msk.bf16.mxu0 %vm298_vm1, %v262_v15  ;;  %v14521_v29 = vld [vmem:[%s21873_s25 + $0x40] sm:$0xff]  ;;  %v207_v31 = vld [vmem:[%s21874_s6 + $0x68] sm:$0xff]  ;;  %v265_v32 = vpack.c.bf16 %v205_v28, %v204_v27  ;;  %v14534_v33 = vld [vmem:[%s21873_s25 + $0x58] sm:$0xff] }
  0x11   :  { %v206_v30 = vld [vmem:[%s21874_s6 + $0x60] sm:$0xff]  ;;  %v14539_v35 = vld [vmem:[%s21873_s25 + $0x50] sm:$0xff]  ;;  %v14547_v36 = vld [vmem:[%s21873_s25 + $0x68] sm:$0xff] }
  0x12   :  { %1310 = vperm.xlu1 %14285, %v14471_v16   ;;  %v266_v34 = vpack.c.bf16 %v207_v31, %v206_v30  ;;  %v208_v37 = vld [vmem:[%s21874_s6 + $0x70] sm:$0xff]  ;;  %v209_v38 = vld [vmem:[%s21874_s6 + $0x78] sm:$0xff]  ;;  %v14559_v39 = vld [vmem:[%s21873_s25 + $0x60] sm:$0xff] }
  0x13   :  { %1307 = vperm.xlu0 %14284, %v14482_v19   ;;  %v210_v40 = vld [vmem:[%s21874_s6 + $0x80] sm:$0xff]  ;;  %v211_v41 = vld [vmem:[%s21874_s6 + $0x88] sm:$0xff]  ;;  %v267_v42 = vpack.c.bf16 %v209_v38, %v208_v37  ;;  %v14572_v43 = vld [vmem:[%s21873_s25 + $0x78] sm:$0xff] }
  0x14   :  { %v268_v44 = vpack.c.bf16 %v211_v41, %v210_v40  ;;  %v14577_v45 = vld [vmem:[%s21873_s25 + $0x70] sm:$0xff]  ;;  %v14585_v46 = vld [vmem:[%s21873_s25 + $0x88] sm:$0xff]  ;;  %v213_v48 = vld [vmem:[%s21874_s6 + $0x98] sm:$0xff] }
  0x15   :  { %v212_v47 = vld [vmem:[%s21874_s6 + $0x90] sm:$0xff]  ;;  %v14597_v49 = vld [vmem:[%s21873_s25 + $0x80] sm:$0xff]  ;;  %v215_v51 = vld [vmem:[%s21874_s6 + $0xa8] sm:$0xff] }
  0x16   :  { %1316 = vperm.xlu1 %14285, %v14496_v23   ;;  %v214_v50 = vld [vmem:[%s21874_s6 + $0xa0] sm:$0xff]  ;;  %v269_v52 = vpack.c.bf16 %v213_v48, %v212_v47  ;;  %v14610_v53 = vld [vmem:[%s21873_s25 + $0x98] sm:$0xff]  ;;  %v14615_v55 = vld [vmem:[%s21873_s25 + $0x90] sm:$0xff] }
  0x17   :  { %12712 = vmatmul.mubr.msk.bf16.gmra.mrb[4].mxu0 %vm298_vm1, %v263_v22  ;;  %1313 = vperm.xlu0 %14284, %v14501_v25   ;;  %v270_v54 = vpack.c.bf16 %v215_v51, %v214_v50  ;;  %v14622_v56 = vld [vmem:[%s21873_s25 + $0xa8] sm:$0xff]  ;;  %v3278_v57 = vld [vmem:[%s21875_s1] sm:$0xff]  ;;  %v216_v58 = vld [vmem:[%s21874_s6 + $0xb0] sm:$0xff] }
  0x18   :  { %12715 = vmatprep.mubr.msk.bf16.mxu0 %vm298_vm1, %v264_v24  ;;  %v217_v59 = vld [vmem:[%s21874_s6 + $0xb8] sm:$0xff]  ;;  %v3279_v60 = vld [vmem:[%s21875_s1 + $0x8] sm:$0xff]  ;;  %v14641_v61 = vld [vmem:[%s21873_s25 + $0xa0] sm:$0xff] }
  0x19   :  { %v218_v62 = vld [vmem:[%s21874_s6 + $0xc0] sm:$0xff]  ;;  %v219_v63 = vld [vmem:[%s21874_s6 + $0xc8] sm:$0xff]  ;;  %v14649_v1 = vpack.c.bf16 %v3279_v60, %v3278_v57  ;;  %v271_v4 = vpack.c.bf16 %v217_v59, %v216_v58  ;;  %v14657_v5 = vld [vmem:[%s21873_s25 + $0xb8] sm:$0xff] }
  0x1a   :  { %1322 = vperm.xlu1 %14285, %v14509_v26   ;;  %v272_v6 = vpack.c.bf16 %v219_v63, %v218_v62  ;;  %v14663_v7 = vld [vmem:[%s21873_s25 + $0xb0] sm:$0xff]  ;;  %v3281_v9 = vld [vmem:[%s21875_s1 + $0x18] sm:$0xff]  ;;  %v3282_v11 = vld [vmem:[%s21875_s1 + $0x20] sm:$0xff] }
  0x1b   :  { %1319 = vperm.xlu0 %14284, %v14521_v29   ;;  %12839 = vmatprep.subr.bf16.mxu0 %v14649_v1  ;;  %v3280_v8 = vld [vmem:[%s21875_s1 + $0x10] sm:$0xff]  ;;  %v3283_v13 = vld [vmem:[%s21875_s1 + $0x28] sm:$0xff]  ;;  %v221_v20 = vld [vmem:[%s21874_s6 + $0xd8] sm:$0xff] }
  0x1c   :  { %12840 = vmatpush3.bf16.msra.mxu0 %v14649_v1  ;;  %v14679_v14 = vpack.c.bf16 %v3281_v9, %v3280_v8  ;;  %v14681_v15 = vpack.c.bf16 %v3283_v13, %v3282_v11  ;;  %v14687_v17 = vld [vmem:[%s21873_s25 + $0xc8] sm:$0xff]  ;;  %v220_v18 = vld [vmem:[%s21874_s6 + $0xd0] sm:$0xff]  ;;  %v14699_v21 = vld [vmem:[%s21873_s25 + $0xc0] sm:$0xff] }
  0x1d   :  { %v222_v22 = vld [vmem:[%s21874_s6 + $0xe0] sm:$0xff]  ;;  %v223_v24 = vld [vmem:[%s21874_s6 + $0xe8] sm:$0xff]  ;;  %v3284_v27 = vld [vmem:[%s21875_s1 + $0x30] sm:$0xff]  ;;  %v273_v30 = vpack.c.bf16 %v221_v20, %v220_v18 }
  0x1e   :  { %1328 = vperm.xlu1 %14285, %v14534_v33   ;;  %12841 = vmatprep.subr.bf16.mxu0 %v14679_v14  ;;  %v3285_v28 = vld [vmem:[%s21875_s1 + $0x38] sm:$0xff]  ;;  %v14737_v38 = vld [vmem:[%s21873_s25 + $0xe8] sm:$0xff]  ;;  %v224_v40 = vld [vmem:[%s21874_s6 + $0xf0] sm:$0xff] }
  0x1f   :  { %12716 = vmatmul.mubr.msk.bf16.gmra.mrb[8].mxu0 %vm298_vm1, %v265_v32  ;;  %1325 = vperm.xlu0 %14284, %v14539_v35   ;;  %v14721_v31 = vld [vmem:[%s21873_s25 + $0xd8] sm:$0xff]  ;;  %v274_v32 = vpack.c.bf16 %v223_v24, %v222_v22  ;;  %v14728_v37 = vpack.c.bf16 %v3285_v28, %v3284_v27  ;;  %v227_v47 = vld [vmem:[%s21874_s6 + $0x108] sm:$0xff]  ;;  %v228_v57 = vld [vmem:[%s21874_s6 + $0x110] sm:$0xff] }
  0x20   :  { %12719 = vmatprep.mubr.msk.bf16.mxu0 %vm298_vm1, %v266_v34  ;;  %12842 = vmatpush3.bf16.msra.mxu0 %v14679_v14  ;;  %v14726_v34 = vld [vmem:[%s21873_s25 + $0xd0] sm:$0xff]  ;;  %v225_v41 = vld [vmem:[%s21874_s6 + $0xf8] sm:$0xff]  ;;  %v14790_v59 = vld [vmem:[%s21873_s25 + $0x100] sm:$0xff] }
  0x21   :  { %12843 = vmatprep.subr.bf16.mxu0 %v14681_v15  ;;  %v275_v48 = vpack.c.bf16 %v225_v41, %v224_v40  ;;  %v14765_v50 = vld [vmem:[%s21873_s25 + $0xf8] sm:$0xff]  ;;  %v230_v60 = vld [vmem:[%s21874_s6 + $0x120] sm:$0xff]  ;;  %v231_v62 = vld [vmem:[%s21874_s6 + $0x128] sm:$0xff] }
  0x22   :  { %1334 = vperm.xlu1 %14285, %v14547_v36   ;;  %v229_v58 = vld [vmem:[%s21874_s6 + $0x118] sm:$0xff]  ;;  %v14808_v8 = vld [vmem:[%s21873_s25 + $0x110] sm:$0xff]  ;;  %v14816_v9 = vld [vmem:[%s21873_s25 + $0x128] sm:$0xff] }
  0x23   :  { %1331 = vperm.xlu0 %14284, %v14559_v39   ;;  %v277_v63 = vpack.c.bf16 %v229_v58, %v228_v57  ;;  %v232_v11 = vld [vmem:[%s21874_s6 + $0x130] sm:$0xff]  ;;  %v233_v13 = vld [vmem:[%s21874_s6 + $0x138] sm:$0xff]  ;;  %v14828_v18 = vld [vmem:[%s21873_s25 + $0x120] sm:$0xff] }
  0x24   :  { %12844 = vmatpush3.bf16.msra.mxu0 %v14681_v15  ;;  %v234_v20 = vld [vmem:[%s21874_s6 + $0x140] sm:$0xff]  ;;  %v235_v22 = vld [vmem:[%s21874_s6 + $0x148] sm:$0xff]  ;;  %v279_v24 = vpack.c.bf16 %v233_v13, %v232_v11  ;;  %v14841_v27 = vld [vmem:[%s21873_s25 + $0x138] sm:$0xff] }
  0x25   :  { %12845 = vmatprep.subr.bf16.mxu0 %v14728_v37  ;;  %v280_v28 = vpack.c.bf16 %v235_v22, %v234_v20  ;;  %v236_v40 = vld [vmem:[%s21874_s6 + $0x150] sm:$0xff]  ;;  %v237_v41 = vld [vmem:[%s21874_s6 + $0x158] sm:$0xff]  ;;  %v14904_v11 = vld [vmem:[%s21873_s25 + $0x160] sm:$0xff] }
  0x26   :  { %1340 = vperm.xlu1 %14285, %v14572_v43   ;;  %v14879_v57 = vld [vmem:[%s21873_s25 + $0x158] sm:$0xff]  ;;  %v242_v13 = vld [vmem:[%s21874_s6 + $0x180] sm:$0xff]  ;;  %v243_v20 = vld [vmem:[%s21874_s6 + $0x188] sm:$0xff] }
  0x27   :  { %12720 = vmatmul.mubr.msk.bf16.gmra.mrb[12].mxu0 %vm298_vm1, %v267_v42  ;;  %1337 = vperm.xlu0 %14284, %v14577_v45   ;;  %v14749_v42 = vld [vmem:[%s21873_s25 + $0xe0] sm:$0xff]  ;;  %v14966_v0 = vld [vmem:[%s21873_s25 + $0x190] sm:$0xff] }
  0x28   :  { %12723 = vmatprep.mubr.msk.bf16.mxu0 %vm298_vm1, %v268_v44  ;;  %v226_v44 = vld [vmem:[%s21874_s6 + $0x100] sm:$0xff]  ;;  %12846 = vmatpush3.bf16.msra.mxu0 %v14728_v37  ;;  %21878 = vst [vmem:[#allocation3_spill] sm:$0xff] %v14966_v0 }
  0x29   :  { %12911 = vmatprep.subr.bf16.mxu0 %v14649_v1  ;;  %v276_v51 = vpack.c.bf16 %v227_v47, %v226_v44  ;;  %v14866_v44 = vld [vmem:[%s21873_s25 + $0x140] sm:$0xff] }
  0x2a   :  { %1346 = vperm.xlu1 %14285, %v14585_v46   ;;  %v238_v47 = vld [vmem:[%s21874_s6 + $0x160] sm:$0xff] }
  0x2b   :  { %1343 = vperm.xlu0 %14284, %v14597_v49  }
  0x2e   :  { %1352 = vperm.xlu1 %14285, %v14610_v53  }
  0x2f   :  { %12724 = vmatmul.mubr.msk.bf16.gmra.mrb[16].mxu0 %vm298_vm1, %v269_v52  ;;  %1349 = vperm.xlu0 %14284, %v14615_v55   ;;  %v14770_v52 = vld [vmem:[%s21873_s25 + $0xf0] sm:$0xff] }
  0x30   :  { %12727 = vmatprep.mubr.msk.bf16.mxu0 %vm298_vm1, %v270_v54  ;;  %v14778_v54 = vld [vmem:[%s21873_s25 + $0x108] sm:$0xff] }
  0x32   :  { %1358 = vperm.xlu1 %14285, %v14622_v56  }
  0x33   :  { %1355 = vperm.xlu0 %14284, %v14641_v61  }
  0x36   :  { %1364 = vperm.xlu1 %14285, %v14657_v5  }
  0x37   :  { %12728 = vmatmul.mubr.msk.bf16.gmra.mrb[20].mxu0 %vm298_vm1, %v271_v4  ;;  %1361 = vperm.xlu0 %14284, %v14663_v7   ;;  %v14803_v4 = vld [vmem:[%s21873_s25 + $0x118] sm:$0xff] }
  0x38   :  { %12731 = vmatprep.mubr.msk.bf16.mxu0 %vm298_vm1, %v272_v6  ;;  %v278_v6 = vpack.c.bf16 %v231_v62, %v230_v60  ;;  %v14884_v60 = vld [vmem:[%s21873_s25 + $0x150] sm:$0xff]  ;;  %v14892_v62 = vld [vmem:[%s21873_s25 + $0x168] sm:$0xff] }
  0x3a   :  { %1370 = vperm.xlu1 %14285, %v14687_v17  }
  0x3b   :  { %1367 = vperm.xlu0 %14284, %v14699_v21  }
  0x3e   :  { %1376 = vperm.xlu1 %14285, %v14721_v31  }
  0x3f   :  { %12732 = vmatmul.mubr.msk.bf16.gmra.mrb[24].mxu0 %vm298_vm1, %v273_v30  ;;  %1373 = vperm.xlu0 %14284, %v14726_v34   ;;  %v14846_v30 = vld [vmem:[%s21873_s25 + $0x130] sm:$0xff] }
  0x40   :  { %12735 = vmatprep.mubr.msk.bf16.mxu0 %vm298_vm1, %v274_v32  ;;  %v14854_v32 = vld [vmem:[%s21873_s25 + $0x148] sm:$0xff] }
  0x42   :  { %1382 = vperm.xlu1 %14285, %v14737_v38  }
  0x43   :  { %1379 = vperm.xlu0 %14284, %v14749_v42  }
  0x46   :  { %1388 = vperm.xlu1 %14285, %v14765_v50  }
  0x47   :  { %12736 = vmatmul.mubr.msk.bf16.gmra.mrb[28].mxu0 %vm298_vm1, %v275_v48  ;;  %1385 = vperm.xlu0 %14284, %v14770_v52   ;;  %v239_v48 = vld [vmem:[%s21874_s6 + $0x168] sm:$0xff] }
  0x48   :  { %12739 = vmatprep.mubr.msk.bf16.mxu0 %vm298_vm1, %v276_v51  ;;  %v281_v51 = vpack.c.bf16 %v237_v41, %v236_v40  ;;  %v282_v58 = vpack.c.bf16 %v239_v48, %v238_v47  ;;  %v14290_v40 = vld [vmem:[%s21876_s30] sm:$0xff]   ;;  %v14925_v41 = vld [vmem:[%s21873_s25 + $0x170] sm:$0xff]  ;;  %v14932_v47 = vld [vmem:[%s21873_s25 + $0x188] sm:$0xff] }
  0x49   :  { %12771 = vmatprep.subr.bf16.mxu1 %v14290_v40  ;;  %v244_v48 = vld [vmem:[%s21874_s6 + $0x190] sm:$0xff] }
  0x4a   :  { %1394 = vperm.xlu1 %14285, %v14778_v54   ;;  %12772 = vmatpush3.bf16.msra.mxu1 %v14290_v40  ;;  %v14974_v40 = vld [vmem:[%s21873_s25 + $0x1a8] sm:$0xff] }
  0x4b   :  { %1391 = vperm.xlu0 %14284, %v14790_v59   ;;  %21879 = vst [vmem:[#allocation4_spill] sm:$0xff] %v14974_v40 }
  0x4e   :  { %1400 = vperm.xlu1 %14285, %v14803_v4  }
  0x4f   :  { %12740 = vmatmul.mubr.msk.bf16.gmra.mrb[32].mxu0 %vm298_vm1, %v277_v63  ;;  %1397 = vperm.xlu0 %14284, %v14808_v8   ;;  %v240_v63 = vld [vmem:[%s21874_s6 + $0x170] sm:$0xff] }
  0x50   :  { %12743 = vmatprep.mubr.msk.bf16.mxu0 %vm298_vm1, %v278_v6  ;;  %v241_v6 = vld [vmem:[%s21874_s6 + $0x178] sm:$0xff] }
  0x51   :  { %v283_v22 = vpack.c.bf16 %v241_v6, %v240_v63  ;;  %v14948_v63 = vld [vmem:[%s21873_s25 + $0x180] sm:$0xff] }
  0x52   :  { %1406 = vperm.xlu1 %14285, %v14816_v9   ;;  %v246_v6 = vld [vmem:[%s21874_s6 + $0x1a0] sm:$0xff] }
  0x53   :  { %1403 = vperm.xlu0 %14284, %v14828_v18  }
  0x56   :  { %1412 = vperm.xlu1 %14285, %v14841_v27  }
  0x57   :  { %12744 = vmatmul.mubr.msk.bf16.gmra.mrb[36].mxu0 %vm298_vm1, %v279_v24  ;;  %1409 = vperm.xlu0 %14284, %v14846_v30   ;;  %v14916_v24 = vld [vmem:[%s21873_s25 + $0x178] sm:$0xff] }
  0x58   :  { %12747 = vmatprep.mubr.msk.bf16.mxu0 %vm298_vm1, %v280_v28  ;;  %v284_v28 = vpack.c.bf16 %v243_v20, %v242_v13  ;;  %v247_v13 = vld [vmem:[%s21874_s6 + $0x1a8] sm:$0xff] }
  0x5a   :  { %1418 = vperm.xlu1 %14285, %v14854_v32  }
  0x5b   :  { %1415 = vperm.xlu0 %14284, %v14866_v44  }
  0x5e   :  { %1424 = vperm.xlu1 %14285, %v14879_v57  }
  0x5f   :  { %12748 = vmatmul.mubr.msk.bf16.gmra.mrb[40].mxu0 %vm298_vm1, %v281_v51  ;;  %1421 = vperm.xlu0 %14284, %v14884_v60   ;;  %v245_v51 = vld [vmem:[%s21874_s6 + $0x198] sm:$0xff] }
  0x60   :  { %12751 = vmatprep.mubr.msk.bf16.mxu0 %vm298_vm1, %v282_v58  ;;  %v14291_v58 = vld [vmem:[%s21876_s30 + $0x8] sm:$0xff]   ;;  %v285_v20 = vpack.c.bf16 %v245_v51, %v244_v48  ;;  %v248_v48 = vld [vmem:[%s21874_s6 + $0x1b0] sm:$0xff]  ;;  %v249_v51 = vld [vmem:[%s21874_s6 + $0x1b8] sm:$0xff] }
  0x61   :  { %12773 = vmatprep.subr.bf16.mxu1 %v14291_v58 }
  0x62   :  { %1430 = vperm.xlu1 %14285, %v14892_v62   ;;  %12774 = vmatpush3.bf16.msra.mxu1 %v14291_v58  ;;  %v14986_v58 = vld [vmem:[%s21873_s25 + $0x1a0] sm:$0xff] }
  0x63   :  { %1427 = vperm.xlu0 %14284, %v14904_v11   ;;  %21880 = vst [vmem:[#allocation5_spill] sm:$0xff] %v14986_v58 }
  0x66   :  { %1436 = vperm.xlu1 %14285, %v14916_v24  }
  0x67   :  { %12752 = vmatmul.mubr.msk.bf16.gmra.mrb[44].mxu0 %vm298_vm1, %v283_v22  ;;  %1433 = vperm.xlu0 %14284, %v14925_v41   ;;  %v14961_v22 = vld [vmem:[%s21873_s25 + $0x198] sm:$0xff] }
  0x68   :  { %12755 = vmatprep.mubr.msk.bf16.mxu0 %vm298_vm1, %v284_v28  ;;  %21877 = vst [vmem:[#allocation2_spill] sm:$0xff] %v14961_v22  ;;  %v286_v28 = vpack.c.bf16 %v247_v13, %v246_v6  ;;  %v250_v6 = vld [vmem:[%s21874_s6 + $0x1c0] sm:$0xff]  ;;  %v251_v13 = vld [vmem:[%s21874_s6 + $0x1c8] sm:$0xff] }
  0x6a   :  { %1442 = vperm.xlu1 %14285, %v14932_v47  }
  0x6b   :  { %1439 = vperm.xlu0 %14284, %v14948_v63  }
  0x6e   :  { %1448 = vperm.xlu1 %14285, %v14961_v22   ;;  %v288_v22 = vpack.c.bf16 %v251_v13, %v250_v6  ;;  %v253_v6 = vld [vmem:[%s21874_s6 + $0x1d8] sm:$0xff]  ;;  %v15024_v13 = vld [vmem:[%s21873_s25 + $0x1c0] sm:$0xff] }
  0x6f   :  { %12756 = vmatmul.mubr.msk.bf16.gmra.mrb[48].mxu0 %vm298_vm1, %v285_v20  ;;  %1445 = vperm.xlu0 %14284, %v14966_v0   ;;  %v287_v20 = vpack.c.bf16 %v249_v51, %v248_v48  ;;  %v15004_v0 = vld [vmem:[%s21873_s25 + $0x1b0] sm:$0xff]  ;;  %v15012_v48 = vld [vmem:[%s21873_s25 + $0x1c8] sm:$0xff]  ;;  %21884 = vst [vmem:[#allocation9_spill] sm:$0xff] %v15024_v13 }
  0x70   :  { %12759 = vmatprep.mubr.msk.bf16.mxu0 %vm298_vm1, %v286_v28  ;;  %v14999_v28 = vld [vmem:[%s21873_s25 + $0x1b8] sm:$0xff]  ;;  %21882 = vst [vmem:[#allocation7_spill] sm:$0xff] %v15004_v0  ;;  %21883 = vst [vmem:[#allocation8_spill] sm:$0xff] %v15012_v48  ;;  %v252_v51 = vld [vmem:[%s21874_s6 + $0x1d0] sm:$0xff] }
  0x71   :  { %21881 = vst [vmem:[#allocation6_spill] sm:$0xff] %v14999_v28 }
  0x72   :  { %1454 = vperm.xlu1 %14285, %v14974_v40  }
  0x73   :  { %1451 = vperm.xlu0 %14284, %v14986_v58   ;;  %v15042_v58 = vld [vmem:[%s21873_s25 + $0x1d0] sm:$0xff] }
  0x74   :  { %21886 = vst [vmem:[#allocation11_spill] sm:$0xff] %v15042_v58 }
  0x76   :  { %1460 = vperm.xlu1 %14285, %v14999_v28   ;;  %v289_v28 = vpack.c.bf16 %v253_v6, %v252_v51  ;;  %v15050_v51 = vld [vmem:[%s21873_s25 + $0x1e8] sm:$0xff]  ;;  %v256_v6 = vld [vmem:[%s21874_s6 + $0x1f0] sm:$0xff] }
  0x77   :  { %12760 = vmatmul.mubr.msk.bf16.gmra.mrb[52].mxu0 %vm298_vm1, %v287_v20  ;;  %1457 = vperm.xlu0 %14284, %v15004_v0   ;;  %v254_v20 = vld [vmem:[%s21874_s6 + $0x1e0] sm:$0xff]  ;;  %v15037_v0 = vld [vmem:[%s21873_s25 + $0x1d8] sm:$0xff]  ;;  %21887 = vst [vmem:[#allocation12_spill] sm:$0xff] %v15050_v51 }
  0x78   :  { %12763 = vmatprep.mubr.msk.bf16.mxu0 %vm298_vm1, %v288_v22  ;;  %v255_v22 = vld [vmem:[%s21874_s6 + $0x1e8] sm:$0xff]  ;;  %21885 = vst [vmem:[#allocation10_spill] sm:$0xff] %v15037_v0 }
  0x79   :  { %v290_v40 = vpack.c.bf16 %v255_v22, %v254_v20  ;;  %v257_v20 = vld [vmem:[%s21874_s6 + $0x1f8] sm:$0xff] }
  0x7a   :  { %1466 = vperm.xlu1 %14285, %v15012_v48   ;;  %v291_v22 = vpack.c.bf16 %v257_v20, %v256_v6 }
  0x7b   :  { %1463 = vperm.xlu0 %14284, %v15024_v13  }
  0x7e   :  { %1472 = vperm.xlu1 %14285, %v15037_v0   ;;  %v15074_v0 = vld [vmem:[%s21873_s25 + $0x1f0] sm:$0xff] }
  0x7f   :  { %12764 = vmatmul.mubr.msk.bf16.gmra.mrb[56].mxu0 %vm298_vm1, %v289_v28  ;;  %1469 = vperm.xlu0 %14284, %v15042_v58   ;;  %v15062_v28 = vld [vmem:[%s21873_s25 + $0x1e0] sm:$0xff]  ;;  %21890 = vst [vmem:[#allocation15_spill] sm:$0xff] %v15074_v0  ;;  %v1289_v58 = vlaneseq }
  0x80   :  { %12767 = vmatprep.mubr.msk.bf16.mxu0 %vm298_vm1, %v290_v40  ;;  %21888 = vst [vmem:[#allocation13_spill] sm:$0xff] %v15062_v28  ;;  %v15069_v40 = vld [vmem:[%s21873_s25 + $0x1f8] sm:$0xff] }
  0x81   :  { %21889 = vst [vmem:[#allocation14_spill] sm:$0xff] %v15069_v40  ;;  %v15079_v6 = vand.u32 127, %v1289_v58 }
  0x82   :  { %1478 = vperm.xlu1 %14285, %v15050_v51  }
  0x83   :  { %1475 = vperm.xlu0 %14284, %v15062_v28   ;;  %21891 = vst [vmem:[#allocation16_spill] sm:$0xff] %v15079_v6  ;;  %v14309_v28 = vmov 1  }
  0x86   :  { %1484 = vperm.xlu1 %14285, %v15069_v40  }
  0x87   :  { %12768 = vmatmul.mubr.msk.bf16.gmra.mrb[60].mxu0 %vm298_vm1, %v291_v22  ;;  %1481 = vperm.xlu0 %14284, %v15074_v0   ;;  %v14310_v0 = vmov 0.0  }
  0x89   :  { %v1302_v20 = vpop.permute.xlu1 %1301  ;;  %v1296_v51 = vpop.permute.xlu0 %1295 }
  0x8a   :  { %14287 = vset.pattern.permute.xlu1 %v14309_v28  ;;  %vm1488_vm2 = vcmp.eq.s32.totalorder %v15079_v6, %v1302_v20  ;;  %vm1486_vm3 = vcmp.eq.s32.totalorder %v15079_v6, %v1296_v51 }
  0x8b   :  { %14286 = vset.pattern.permute.xlu0 %v14309_v28  ;;  %1714 = vperm.xlu1 %14287, %v14456_v12   ;;  %v10886_v58 = vsel %vm1488_vm2, 1.0, %v14310_v0  ;;  %v10884_v12 = vsel %vm1486_vm3, 1.0, %v14310_v0 }
  0x8c   :  { %1711 = vperm.xlu0 %14286, %v14432_v3  }
  0x8d   :  { %v1305_v22 = vpop.permute.xlu1 %1304 }
  0x8e   :  { %vm1489_vm4 = vcmp.eq.s32.totalorder %v15079_v6, %v1305_v22  ;;  %v1299_v40 = vpop.permute.xlu0 %1298 }
  0x8f   :  { %v10887_v48 = vsel %vm1489_vm4, 1.0, %v14310_v0  ;;  %vm1487_vm5 = vcmp.eq.s32.totalorder %v15079_v6, %v1299_v40  ;;  %1717 = vperm.xlu1 %14287, %v14427_v2  }
  0x90   :  { %v15091_v28 = vpack.c.bf16 %v10887_v48, %v10886_v58  ;;  %v10885_v3 = vsel %vm1487_vm5, 1.0, %v14310_v0  ;;  %1720 = vperm.xlu0 %14286, %v14451_v10  }
  0x91   :  { %v15095_v51 = vpack.c.bf16 %v10885_v3, %v10884_v12  ;;  %v1311_v20 = vpop.permute.xlu1 %1310 }
  0x92   :  { %21892 = vst [vmem:[#allocation17_spill] sm:$0xff] %v15091_v28  ;;  %vm1491_vm7 = vcmp.eq.s32.totalorder %v15079_v6, %v1311_v20  ;;  %v1308_v22 = vpop.permute.xlu0 %1307 }
  0x93   :  { %21893 = vst [vmem:[#allocation18_spill] sm:$0xff] %v15095_v51  ;;  %v10889_v13 = vsel %vm1491_vm7, 1.0, %v14310_v0  ;;  %vm1490_vm8 = vcmp.eq.s32.totalorder %v15079_v6, %v1308_v22  ;;  %12847 = vmatprep.mubr.msk.bf16.mxu0 %vm3290_vm6, %v15095_v51  ;;  %1723 = vperm.xlu1 %14287, %v14482_v19  }
  0x94   :  { %v10888_v2 = vsel %vm1490_vm8, 1.0, %v14310_v0  ;;  %1726 = vperm.xlu0 %14286, %v14471_v16   ;;  %12848 = vmatmul.mubr.msk.bf16.vlgmr.msra.gmra.mrb[64].mxu0 %vm3290_vm6, %v15091_v28 }
  0x95   :  { %v15107_v10 = vpack.c.bf16 %v10889_v13, %v10888_v2  ;;  %v1317_v48 = vpop.permute.xlu1 %1316  ;;  %12912 = vmatpush3.bf16.msra.mxu0 %v14649_v1 }
  0x96   :  { %vm1493_vm9 = vcmp.eq.s32.totalorder %v15079_v6, %v1317_v48  ;;  %v1314_v40 = vpop.permute.xlu0 %1313  ;;  %12913 = vmatprep.subr.bf16.mxu0 %v14679_v14 }
  0x97   :  { %21894 = vst [vmem:[#allocation19_spill] sm:$0xff] %v15107_v10  ;;  %v10891_v58 = vsel %vm1493_vm9, 1.0, %v14310_v0  ;;  %vm1492_vm10 = vcmp.eq.s32.totalorder %v15079_v6, %v1314_v40  ;;  %12851 = vmatprep.mubr.msk.bf16.mxu0 %vm3290_vm6, %v15107_v10  ;;  %1729 = vperm.xlu1 %14287, %v14501_v25  }
  0x98   :  { %v10890_v16 = vsel %vm1492_vm10, 1.0, %v14310_v0  ;;  %1732 = vperm.xlu0 %14286, %v14496_v23  }
  0x99   :  { %v15119_v19 = vpack.c.bf16 %v10891_v58, %v10890_v16  ;;  %v1323_v1 = vpop.permute.xlu1 %1322  ;;  %12914 = vmatpush3.bf16.msra.mxu0 %v14679_v14 }
  0x9a   :  { %vm1495_vm11 = vcmp.eq.s32.totalorder %v15079_v6, %v1323_v1  ;;  %v1320_v13 = vpop.permute.xlu0 %1319  ;;  %12915 = vmatprep.subr.bf16.mxu0 %v14681_v15 }
  0x9b   :  { %21895 = vst [vmem:[#allocation20_spill] sm:$0xff] %v15119_v19  ;;  %v10893_v12 = vsel %vm1495_vm11, 1.0, %v14310_v0  ;;  %vm1494_vm12 = vcmp.eq.s32.totalorder %v15079_v6, %v1320_v13  ;;  %1735 = vperm.xlu1 %14287, %v14521_v29  }
  0x9c   :  { %v10892_v25 = vsel %vm1494_vm12, 1.0, %v14310_v0  ;;  %1738 = vperm.xlu0 %14286, %v14509_v26   ;;  %12852 = vmatmul.mubr.msk.bf16.gmra.mrb[68].mxu0 %vm3290_vm6, %v15119_v19 }
  0x9d   :  { %v15131_v23 = vpack.c.bf16 %v10893_v12, %v10892_v25  ;;  %v1329_v14 = vpop.permute.xlu1 %1328  ;;  %12916 = vmatpush3.bf16.msra.mxu0 %v14681_v15 }
  0x9e   :  { %vm1497_vm13 = vcmp.eq.s32.totalorder %v15079_v6, %v1329_v14  ;;  %v1326_v3 = vpop.permute.xlu0 %1325  ;;  %12917 = vmatprep.subr.bf16.mxu0 %v14728_v37 }
  0x9f   :  { %21896 = vst [vmem:[#allocation21_spill] sm:$0xff] %v15131_v23  ;;  %v10895_v20 = vsel %vm1497_vm13, 1.0, %v14310_v0  ;;  %vm1496_vm14 = vcmp.eq.s32.totalorder %v15079_v6, %v1326_v3  ;;  %12855 = vmatprep.mubr.msk.bf16.mxu0 %vm3290_vm6, %v15131_v23  ;;  %1741 = vperm.xlu1 %14287, %v14539_v35  }
  0xa0   :  { %v10894_v26 = vsel %vm1496_vm14, 1.0, %v14310_v0  ;;  %1744 = vperm.xlu0 %14286, %v14534_v33  }
  0xa1   :  { %v15143_v29 = vpack.c.bf16 %v10895_v20, %v10894_v26  ;;  %v1335_v15 = vpop.permute.xlu1 %1334  ;;  %12918 = vmatpush3.bf16.msra.mxu0 %v14728_v37 }
  0xa2   :  { %vm1499_vm15 = vcmp.eq.s32.totalorder %v15079_v6, %v1335_v15  ;;  %v1332_v22 = vpop.permute.xlu0 %1331 }
  0xa3   :  { %21897 = vst [vmem:[#allocation22_spill] sm:$0xff] %v15143_v29  ;;  %v10897_v2 = vsel %vm1499_vm15, 1.0, %v14310_v0  ;;  %vm1498_vm0 = vcmp.eq.s32.totalorder %v15079_v6, %v1332_v22  ;;  %1747 = vperm.xlu1 %14287, %v14559_v39  }
  0xa4   :  { %v10896_v35 = vsel %vm1498_vm0, 1.0, %v14310_v0  ;;  %1750 = vperm.xlu0 %14286, %v14547_v36   ;;  %12856 = vmatmul.mubr.msk.bf16.gmra.mrb[72].mxu0 %vm3290_vm6, %v15143_v29 }
  0xa5   :  { %v15154_v33 = vpack.c.bf16 %v10897_v2, %v10896_v35  ;;  %v1341_v48 = vpop.permute.xlu1 %1340 }
  0xa6   :  { %vm1501_vm1 = vcmp.eq.s32.totalorder %v15079_v6, %v1341_v48  ;;  %v1338_v37 = vpop.permute.xlu0 %1337 }
  0xa7   :  { %21898 = vst [vmem:[#allocation23_spill] sm:$0xff] %v15154_v33  ;;  %v10899_v40 = vsel %vm1501_vm1, 1.0, %v14310_v0  ;;  %vm1500_vm2 = vcmp.eq.s32.totalorder %v15079_v6, %v1338_v37  ;;  %12859 = vmatprep.mubr.msk.bf16.mxu0 %vm3290_vm6, %v15154_v33  ;;  %1753 = vperm.xlu1 %14287, %v14577_v45  }
  0xa8   :  { %v10898_v36 = vsel %vm1500_vm2, 1.0, %v14310_v0  ;;  %1756 = vperm.xlu0 %14286, %v14572_v43  }
  0xa9   :  { %v15164_v39 = vpack.c.bf16 %v10899_v40, %v10898_v36  ;;  %v1347_v58 = vpop.permute.xlu1 %1346 }
  0xaa   :  { %vm1503_vm3 = vcmp.eq.s32.totalorder %v15079_v6, %v1347_v58  ;;  %v1344_v16 = vpop.permute.xlu0 %1343 }
  0xab   :  { %21899 = vst [vmem:[#allocation24_spill] sm:$0xff] %v15164_v39  ;;  %v10901_v1 = vsel %vm1503_vm3, 1.0, %v14310_v0  ;;  %vm1502_vm4 = vcmp.eq.s32.totalorder %v15079_v6, %v1344_v16  ;;  %1759 = vperm.xlu1 %14287, %v14597_v49  }
  0xac   :  { %v10900_v13 = vsel %vm1502_vm4, 1.0, %v14310_v0  ;;  %1762 = vperm.xlu0 %14286, %v14585_v46   ;;  %12860 = vmatmul.mubr.msk.bf16.gmra.mrb[76].mxu0 %vm3290_vm6, %v15164_v39 }
  0xad   :  { %v15174_v43 = vpack.c.bf16 %v10901_v1, %v10900_v13  ;;  %v1353_v45 = vpop.permute.xlu1 %1352 }
  0xae   :  { %vm1505_vm5 = vcmp.eq.s32.totalorder %v15079_v6, %v1353_v45  ;;  %v1350_v12 = vpop.permute.xlu0 %1349 }
  0xaf   :  { %21900 = vst [vmem:[#allocation25_spill] sm:$0xff] %v15174_v43  ;;  %v10903_v25 = vsel %vm1505_vm5, 1.0, %v14310_v0  ;;  %vm1504_vm7 = vcmp.eq.s32.totalorder %v15079_v6, %v1350_v12  ;;  %12863 = vmatprep.mubr.msk.bf16.mxu0 %vm3290_vm6, %v15174_v43  ;;  %1765 = vperm.xlu1 %14287, %v14615_v55  }
  0xb0   :  { %v10902_v46 = vsel %vm1504_vm7, 1.0, %v14310_v0  ;;  %1768 = vperm.xlu0 %14286, %v14610_v53  }
  0xb1   :  { %v15184_v49 = vpack.c.bf16 %v10903_v25, %v10902_v46  ;;  %v1359_v14 = vpop.permute.xlu1 %1358 }
  0xb2   :  { %vm1507_vm8 = vcmp.eq.s32.totalorder %v15079_v6, %v1359_v14  ;;  %v1356_v3 = vpop.permute.xlu0 %1355 }
  0xb3   :  { %21901 = vst [vmem:[#allocation26_spill] sm:$0xff] %v15184_v49  ;;  %v10905_v20 = vsel %vm1507_vm8, 1.0, %v14310_v0  ;;  %vm1506_vm9 = vcmp.eq.s32.totalorder %v15079_v6, %v1356_v3  ;;  %1771 = vperm.xlu1 %14287, %v14641_v61  }
  0xb4   :  { %v10904_v26 = vsel %vm1506_vm9, 1.0, %v14310_v0  ;;  %1774 = vperm.xlu0 %14286, %v14622_v56   ;;  %12864 = vmatmul.mubr.msk.bf16.gmra.mrb[80].mxu0 %vm3290_vm6, %v15184_v49 }
  0xb5   :  { %v15194_v53 = vpack.c.bf16 %v10905_v20, %v10904_v26  ;;  %v1365_v55 = vpop.permute.xlu1 %1364 }
  0xb6   :  { %vm1509_vm10 = vcmp.eq.s32.totalorder %v15079_v6, %v1365_v55  ;;  %v1362_v15 = vpop.permute.xlu0 %1361 }
  0xb7   :  { %21902 = vst [vmem:[#allocation27_spill] sm:$0xff] %v15194_v53  ;;  %v10907_v22 = vsel %vm1509_vm10, 1.0, %v14310_v0  ;;  %vm1508_vm11 = vcmp.eq.s32.totalorder %v15079_v6, %v1362_v15  ;;  %12867 = vmatprep.mubr.msk.bf16.mxu0 %vm3290_vm6, %v15194_v53  ;;  %1777 = vperm.xlu1 %14287, %v14663_v7  }
  0xb8   :  { %v10906_v56 = vsel %vm1508_vm11, 1.0, %v14310_v0  ;;  %1780 = vperm.xlu0 %14286, %v14657_v5  }
  0xb9   :  { %v15204_v61 = vpack.c.bf16 %v10907_v22, %v10906_v56  ;;  %v1371_v2 = vpop.permute.xlu1 %1370 }
  0xba   :  { %vm1511_vm12 = vcmp.eq.s32.totalorder %v15079_v6, %v1371_v2  ;;  %v1368_v35 = vpop.permute.xlu0 %1367 }
  0xbb   :  { %21903 = vst [vmem:[#allocation28_spill] sm:$0xff] %v15204_v61  ;;  %v10909_v48 = vsel %vm1511_vm12, 1.0, %v14310_v0  ;;  %vm1510_vm13 = vcmp.eq.s32.totalorder %v15079_v6, %v1368_v35  ;;  %1783 = vperm.xlu1 %14287, %v14699_v21  }
  0xbc   :  { %v10908_v37 = vsel %vm1510_vm13, 1.0, %v14310_v0  ;;  %1786 = vperm.xlu0 %14286, %v14687_v17   ;;  %12868 = vmatmul.mubr.msk.bf16.gmra.mrb[84].mxu0 %vm3290_vm6, %v15204_v61 }
  0xbd   :  { %v15214_v5 = vpack.c.bf16 %v10909_v48, %v10908_v37  ;;  %v1377_v7 = vpop.permute.xlu1 %1376 }
  0xbe   :  { %vm1513_vm14 = vcmp.eq.s32.totalorder %v15079_v6, %v1377_v7  ;;  %v1374_v40 = vpop.permute.xlu0 %1373 }
  0xbf   :  { %21904 = vst [vmem:[#allocation29_spill] sm:$0xff] %v15214_v5  ;;  %v10911_v36 = vsel %vm1513_vm14, 1.0, %v14310_v0  ;;  %vm1512_vm15 = vcmp.eq.s32.totalorder %v15079_v6, %v1374_v40  ;;  %12871 = vmatprep.mubr.msk.bf16.mxu0 %vm3290_vm6, %v15214_v5  ;;  %1789 = vperm.xlu1 %14287, %v14726_v34  }
  0xc0   :  { %v10910_v17 = vsel %vm1512_vm15, 1.0, %v14310_v0  ;;  %1792 = vperm.xlu0 %14286, %v14721_v31  }
  0xc1   :  { %v15224_v21 = vpack.c.bf16 %v10911_v36, %v10910_v17  ;;  %v1383_v58 = vpop.permute.xlu1 %1382 }
  0xc2   :  { %vm1515_vm0 = vcmp.eq.s32.totalorder %v15079_v6, %v1383_v58  ;;  %v1380_v16 = vpop.permute.xlu0 %1379 }
  0xc3   :  { %21905 = vst [vmem:[#allocation30_spill] sm:$0xff] %v15224_v21  ;;  %v10913_v1 = vsel %vm1515_vm0, 1.0, %v14310_v0  ;;  %vm1514_vm1 = vcmp.eq.s32.totalorder %v15079_v6, %v1380_v16  ;;  %1795 = vperm.xlu1 %14287, %v14749_v42  }
  0xc4   :  { %v10912_v13 = vsel %vm1514_vm1, 1.0, %v14310_v0  ;;  %1798 = vperm.xlu0 %14286, %v14737_v38   ;;  %12872 = vmatmul.mubr.msk.bf16.gmra.mrb[88].mxu0 %vm3290_vm6, %v15224_v21 }
  0xc5   :  { %v15234_v31 = vpack.c.bf16 %v10913_v1, %v10912_v13  ;;  %v1389_v34 = vpop.permute.xlu1 %1388 }
  0xc6   :  { %vm1517_vm2 = vcmp.eq.s32.totalorder %v15079_v6, %v1389_v34  ;;  %v1386_v45 = vpop.permute.xlu0 %1385 }
  0xc7   :  { %21906 = vst [vmem:[#allocation31_spill] sm:$0xff] %v15234_v31  ;;  %v10915_v12 = vsel %vm1517_vm2, 1.0, %v14310_v0  ;;  %vm1516_vm3 = vcmp.eq.s32.totalorder %v15079_v6, %v1386_v45  ;;  %12875 = vmatprep.mubr.msk.bf16.mxu0 %vm3290_vm6, %v15234_v31  ;;  %1801 = vperm.xlu1 %14287, %v14770_v52  }
  0xc8   :  { %v10914_v38 = vsel %vm1516_vm3, 1.0, %v14310_v0  ;;  %1804 = vperm.xlu0 %14286, %v14765_v50  }
  0xc9   :  { %v15244_v42 = vpack.c.bf16 %v10915_v12, %v10914_v38  ;;  %v1395_v25 = vpop.permute.xlu1 %1394 }
  0xca   :  { %vm1519_vm4 = vcmp.eq.s32.totalorder %v15079_v6, %v1395_v25  ;;  %v1392_v46 = vpop.permute.xlu0 %1391 }
  0xcb   :  { %21907 = vst [vmem:[#allocation32_spill] sm:$0xff] %v15244_v42  ;;  %v10917_v14 = vsel %vm1519_vm4, 1.0, %v14310_v0  ;;  %vm1518_vm5 = vcmp.eq.s32.totalorder %v15079_v6, %v1392_v46  ;;  %1807 = vperm.xlu1 %14287, %v14790_v59  }
  0xcc   :  { %v10916_v3 = vsel %vm1518_vm5, 1.0, %v14310_v0  ;;  %1810 = vperm.xlu0 %14286, %v14778_v54   ;;  %12876 = vmatmul.mubr.msk.bf16.gmra.mrb[92].mxu0 %vm3290_vm6, %v15244_v42  ;;  %vm807_vm5 = vcmask 261120  }
  0xcd   :  { %v15254_v50 = vpack.c.bf16 %v10917_v14, %v10916_v3  ;;  %v1401_v52 = vpop.permute.xlu1 %1400 }
  0xce   :  { %vm1521_vm7 = vcmp.eq.s32.totalorder %v15079_v6, %v1401_v52  ;;  %v1398_v20 = vpop.permute.xlu0 %1397 }
  0xcf   :  { %21908 = vst [vmem:[#allocation33_spill] sm:$0xff] %v15254_v50  ;;  %v10919_v26 = vsel %vm1521_vm7, 1.0, %v14310_v0  ;;  %vm1520_vm8 = vcmp.eq.s32.totalorder %v15079_v6, %v1398_v20  ;;  %12879 = vmatprep.mubr.msk.bf16.mxu0 %vm3290_vm6, %v15254_v50  ;;  %1813 = vperm.xlu1 %14287, %v14808_v8  }
  0xd0   :  { %v10918_v54 = vsel %vm1520_vm8, 1.0, %v14310_v0  ;;  %1816 = vperm.xlu0 %14286, %v14803_v4  }
  0xd1   :  { %v15264_v59 = vpack.c.bf16 %v10919_v26, %v10918_v54  ;;  %v1407_v55 = vpop.permute.xlu1 %1406 }
  0xd2   :  { %vm1523_vm9 = vcmp.eq.s32.totalorder %v15079_v6, %v1407_v55  ;;  %v1404_v15 = vpop.permute.xlu0 %1403 }
  0xd3   :  { %21909 = vst [vmem:[#allocation34_spill] sm:$0xff] %v15264_v59  ;;  %v10921_v22 = vsel %vm1523_vm9, 1.0, %v14310_v0  ;;  %vm1522_vm10 = vcmp.eq.s32.totalorder %v15079_v6, %v1404_v15  ;;  %1819 = vperm.xlu1 %14287, %v14828_v18  }
  0xd4   :  { %v10920_v56 = vsel %vm1522_vm10, 1.0, %v14310_v0  ;;  %1822 = vperm.xlu0 %14286, %v14816_v9   ;;  %12880 = vmatmul.mubr.msk.bf16.gmra.mrb[96].mxu0 %vm3290_vm6, %v15264_v59 }
  0xd5   :  { %v15274_v4 = vpack.c.bf16 %v10921_v22, %v10920_v56  ;;  %v1413_v8 = vpop.permute.xlu1 %1412 }
  0xd6   :  { %vm1525_vm11 = vcmp.eq.s32.totalorder %v15079_v6, %v1413_v8  ;;  %v1410_v2 = vpop.permute.xlu0 %1409 }
  0xd7   :  { %21910 = vst [vmem:[#allocation35_spill] sm:$0xff] %v15274_v4  ;;  %v10923_v35 = vsel %vm1525_vm11, 1.0, %v14310_v0  ;;  %vm1524_vm12 = vcmp.eq.s32.totalorder %v15079_v6, %v1410_v2  ;;  %12883 = vmatprep.mubr.msk.bf16.mxu0 %vm3290_vm6, %v15274_v4  ;;  %1825 = vperm.xlu1 %14287, %v14846_v30  }
  0xd8   :  { %v10922_v9 = vsel %vm1524_vm12, 1.0, %v14310_v0  ;;  %1828 = vperm.xlu0 %14286, %v14841_v27  }
  0xd9   :  { %v15284_v18 = vpack.c.bf16 %v10923_v35, %v10922_v9  ;;  %v1419_v48 = vpop.permute.xlu1 %1418 }
  0xda   :  { %vm1527_vm13 = vcmp.eq.s32.totalorder %v15079_v6, %v1419_v48  ;;  %v1416_v37 = vpop.permute.xlu0 %1415 }
  0xdb   :  { %21911 = vst [vmem:[#allocation36_spill] sm:$0xff] %v15284_v18  ;;  %v10925_v7 = vsel %vm1527_vm13, 1.0, %v14310_v0  ;;  %vm1526_vm14 = vcmp.eq.s32.totalorder %v15079_v6, %v1416_v37  ;;  %1831 = vperm.xlu1 %14287, %v14866_v44  }
  0xdc   :  { %v10924_v40 = vsel %vm1526_vm14, 1.0, %v14310_v0  ;;  %1834 = vperm.xlu0 %14286, %v14854_v32   ;;  %12884 = vmatmul.mubr.msk.bf16.gmra.mrb[100].mxu0 %vm3290_vm6, %v15284_v18  ;;  %v15305_v32 = vld [vmem:[%s21164_s5] ss:$0 sm:$0xff] }
  0xdd   :  { %v15294_v27 = vpack.c.bf16 %v10925_v7, %v10924_v40  ;;  %v1425_v30 = vpop.permute.xlu1 %1424 }
  0xde   :  { %vm1529_vm15 = vcmp.eq.s32.totalorder %v15079_v6, %v1425_v30  ;;  %v1422_v36 = vpop.permute.xlu0 %1421 }
  0xdf   :  { %21912 = vst [vmem:[#allocation37_spill] sm:$0xff] %v15294_v27  ;;  %v10927_v17 = vsel %vm1529_vm15, 1.0, %v14310_v0  ;;  %vm1528_vm0 = vcmp.eq.s32.totalorder %v15079_v6, %v1422_v36  ;;  %12887 = vmatprep.mubr.msk.bf16.mxu0 %vm3290_vm6, %v15294_v27  ;;  %1837 = vperm.xlu1 %14287, %v14884_v60  }
  0xe0   :  { %v10926_v44 = vsel %vm1528_vm0, 1.0, %v14310_v0  ;;  %1840 = vperm.xlu0 %14286, %v14879_v57  }
  0xe1   :  { %v15309_v58 = vpack.c.bf16 %v10927_v17, %v10926_v44  ;;  %v1431_v1 = vpop.permute.xlu1 %1430 }
  0xe2   :  { %v12709_v16 = vpop.f32.mrb[0].mxu0  ;;  %vm1531_vm1 = vcmp.eq.s32.totalorder %v15079_v6, %v1431_v1  ;;  %v1428_v34 = vpop.permute.xlu0 %1427 }
  0xe3   :  { %21913 = vst [vmem:[#allocation38_spill] sm:$0xff] %v15309_v58  ;;  %v442_v13 = vadd.f32 %v12709_v16, %v15305_v32  ;;  %v433_v45 = vpop.f32.mrb[1].mxu0  ;;  %v10929_v60 = vsel %vm1531_vm1, 1.0, %v14310_v0  ;;  %vm1530_vm2 = vcmp.eq.s32.totalorder %v15079_v6, %v1428_v34  ;;  %1843 = vperm.xlu1 %14287, %v14904_v11  }
  0xe4   :  { %v434_v12 = vadd.f32 %v15305_v32, %v433_v45  ;;  %v12710_v38 = vpop.f32.mrb[2].mxu0  ;;  %v10928_v25 = vsel %vm1530_vm2, 1.0, %v14310_v0  ;;  %1846 = vperm.xlu0 %14286, %v14892_v62   ;;  %12888 = vmatmul.mubr.msk.bf16.gmra.mrb[104].mxu0 %vm3290_vm6, %v15309_v58 }
  0xe5   :  { %v690_v57 = vmax.f32 %v442_v13, 0.0  ;;  %v445_v46 = vadd.f32 %v12710_v38, %v15305_v32  ;;  %v436_v14 = vpop.f32.mrb[3].mxu0  ;;  %v15322_v3 = vpack.c.bf16 %v10929_v60, %v10928_v25  ;;  %v1437_v20 = vpop.permute.xlu1 %1436 }
  0xe6   :  { %v437_v52 = vadd.f32 %v15305_v32, %v436_v14  ;;  %v688_v26 = vmax.f32 %v434_v12, 0.0  ;;  %vm1533_vm3 = vcmp.eq.s32.totalorder %v15079_v6, %v1437_v20  ;;  %v1434_v11 = vpop.permute.xlu0 %1433 }
  0xe7   :  { %21914 = vst [vmem:[#allocation39_spill] sm:$0xff] %v15322_v3  ;;  %v691_v54 = vmax.f32 %v445_v46, 0.0  ;;  %v10931_v55 = vsel %vm1533_vm3, 1.0, %v14310_v0  ;;  %vm1532_vm4 = vcmp.eq.s32.totalorder %v15079_v6, %v1434_v11  ;;  %12891 = vmatprep.mubr.msk.bf16.mxu0 %vm3290_vm6, %v15322_v3  ;;  %1849 = vperm.xlu1 %14287, %v14925_v41  }
  0xe8   :  { %v689_v62 = vmax.f32 %v437_v52, 0.0  ;;  %v10930_v22 = vsel %vm1532_vm4, 1.0, %v14310_v0  ;;  %1852 = vperm.xlu0 %14286, %v14916_v24  }
  0xe9   :  { %v753_v15 = vpack.c.bf16 %v691_v54, %v690_v57  ;;  %v15333_v56 = vpack.c.bf16 %v10931_v55, %v10930_v22  ;;  %v1443_v2 = vpop.permute.xlu1 %1442  ;;  %v21918_v57 = vld [vmem:[#allocation2_spill] sm:$0xff] }
  0xea   :  { %v12713_v8 = vpop.f32.mrb[4].mxu0  ;;  %v752_v35 = vpack.c.bf16 %v689_v62, %v688_v26  ;;  %vm1535_vm7 = vcmp.eq.s32.totalorder %v15079_v6, %v1443_v2  ;;  %v1440_v48 = vpop.permute.xlu0 %1439 }
  0xeb   :  { %21915 = vst [vmem:[#allocation40_spill] sm:$0xff] %v15333_v56  ;;  %v458_v9 = vadd.f32 %v12713_v8, %v15305_v32  ;;  %v449_v37 = vpop.f32.mrb[5].mxu0  ;;  %v10933_v41 = vsel %vm1535_vm7, 1.0, %v14310_v0  ;;  %vm1534_vm8 = vcmp.eq.s32.totalorder %v15079_v6, %v1440_v48  ;;  %1855 = vperm.xlu1 %14287, %v14948_v63  }
  0xec   :  { %v450_v7 = vadd.f32 %v15305_v32, %v449_v37  ;;  %v12714_v40 = vpop.f32.mrb[6].mxu0  ;;  %12775 = vmatprep.mubr.msk.bf16.mxu1 %vm807_vm5, %v752_v35  ;;  %v10932_v30 = vsel %vm1534_vm8, 1.0, %v14310_v0  ;;  %1858 = vperm.xlu0 %14286, %v14932_v47   ;;  %v21917_v47 = vld [vmem:[#allocation3_spill] sm:$0xff]  ;;  %v21921_v35 = vld [vmem:[#allocation4_spill] sm:$0xff] }
  0xed   :  { %v694_v24 = vmax.f32 %v458_v9, 0.0  ;;  %v461_v36 = vadd.f32 %v12714_v40, %v15305_v32  ;;  %12892 = vmatmul.mubr.msk.bf16.gmra.mrb[108].mxu0 %vm3290_vm6, %v15333_v56  ;;  %v452_v17 = vpop.f32.mrb[7].mxu0  ;;  %v15347_v44 = vpack.c.bf16 %v10933_v41, %v10932_v30  ;;  %12776 = vmatmul.mubr.msk.bf16.vlgmr.msra.gmra.mrb[0].mxu1 %vm807_vm5, %v753_v15  ;;  %v1449_v13 = vpop.permute.xlu1 %1448  ;;  %v21920_v15 = vld [vmem:[#allocation5_spill] sm:$0xff] }
  0xee   :  { %v692_v16 = vmax.f32 %v450_v7, 0.0  ;;  %v453_v1 = vadd.f32 %v15305_v32, %v452_v17  ;;  %vm1537_vm9 = vcmp.eq.s32.totalorder %v15079_v6, %v1449_v13  ;;  %v1446_v34 = vpop.permute.xlu0 %1445  ;;  %v21923_v17 = vld [vmem:[#allocation7_spill] sm:$0xff]  ;;  %v21924_v13 = vld [vmem:[#allocation6_spill] sm:$0xff] }
  0xef   :  { %21916 = vst [vmem:[#allocation41_spill] sm:$0xff] %v15347_v44  ;;  %v695_v63 = vmax.f32 %v461_v36, 0.0  ;;  %v10935_v60 = vsel %vm1537_vm9, 1.0, %v14310_v0  ;;  %vm1536_vm10 = vcmp.eq.s32.totalorder %v15079_v6, %v1446_v34  ;;  %12895 = vmatprep.mubr.msk.bf16.mxu0 %vm3290_vm6, %v15347_v44  ;;  %1861 = vperm.xlu1 %14287, %v21917_v47  }
  0xf0   :  { %v693_v45 = vmax.f32 %v453_v1, 0.0  ;;  %v10934_v38 = vsel %vm1536_vm10, 1.0, %v14310_v0  ;;  %1864 = vperm.xlu0 %14286, %v21918_v57  }
  0xf1   :  { %v755_v12 = vpack.c.bf16 %v695_v63, %v694_v24  ;;  %v15359_v46 = vpack.c.bf16 %v10935_v60, %v10934_v38  ;;  %v1455_v52 = vpop.permute.xlu1 %1454 }
  0xf2   :  { %v754_v25 = vpack.c.bf16 %v693_v45, %v692_v16  ;;  %v12717_v14 = vpop.f32.mrb[8].mxu0  ;;  %vm1539_vm11 = vcmp.eq.s32.totalorder %v15079_v6, %v1455_v52  ;;  %v1452_v26 = vpop.permute.xlu0 %1451  ;;  %v21926_v52 = vld [vmem:[#allocation9_spill] sm:$0xff] }
  0xf3   :  { %21919 = vst [vmem:[#allocation3_spill] sm:$0xff] %v15359_v46  ;;  %v474_v20 = vadd.f32 %v12717_v14, %v15305_v32  ;;  %v465_v54 = vpop.f32.mrb[9].mxu0  ;;  %v10937_v11 = vsel %vm1539_vm11, 1.0, %v14310_v0  ;;  %vm1538_vm12 = vcmp.eq.s32.totalorder %v15079_v6, %v1452_v26  ;;  %1867 = vperm.xlu1 %14287, %v21920_v15  }
  0xf4   :  { %v466_v55 = vadd.f32 %v15305_v32, %v465_v54  ;;  %v12718_v62 = vpop.f32.mrb[10].mxu0  ;;  %12779 = vmatprep.mubr.msk.bf16.mxu1 %vm807_vm5, %v754_v25  ;;  %v10936_v8 = vsel %vm1538_vm12, 1.0, %v14310_v0  ;;  %1870 = vperm.xlu0 %14286, %v21921_v35  }
  0xf5   :  { %v698_v22 = vmax.f32 %v474_v20, 0.0  ;;  %v477_v2 = vadd.f32 %v12718_v62, %v15305_v32  ;;  %12896 = vmatmul.mubr.msk.bf16.gmra.mrb[112].mxu0 %vm3290_vm6, %v15359_v46  ;;  %v468_v9 = vpop.f32.mrb[11].mxu0  ;;  %v15373_v48 = vpack.c.bf16 %v10937_v11, %v10936_v8  ;;  %12780 = vmatmul.mubr.msk.bf16.gmra.mrb[4].mxu1 %vm807_vm5, %v755_v12  ;;  %v1461_v7 = vpop.permute.xlu1 %1460  ;;  %v21927_v11 = vld [vmem:[#allocation8_spill] sm:$0xff] }
  0xf6   :  { %v696_v37 = vmax.f32 %v466_v55, 0.0  ;;  %v469_v41 = vadd.f32 %v15305_v32, %v468_v9  ;;  %vm1541_vm13 = vcmp.eq.s32.totalorder %v15079_v6, %v1461_v7  ;;  %v1458_v24 = vpop.permute.xlu0 %1457 }
  0xf7   :  { %21922 = vst [vmem:[#allocation2_spill] sm:$0xff] %v15373_v48  ;;  %v699_v40 = vmax.f32 %v477_v2, 0.0  ;;  %v10939_v36 = vsel %vm1541_vm13, 1.0, %v14310_v0  ;;  %vm1540_vm14 = vcmp.eq.s32.totalorder %v15079_v6, %v1458_v24  ;;  %12899 = vmatprep.mubr.msk.bf16.mxu0 %vm3290_vm6, %v15373_v48  ;;  %1873 = vperm.xlu1 %14287, %v21923_v17   ;;  %v21930_v24 = vld [vmem:[#allocation10_spill] sm:$0xff] }
  0xf8   :  { %v697_v30 = vmax.f32 %v469_v41, 0.0  ;;  %v10938_v1 = vsel %vm1540_vm14, 1.0, %v14310_v0  ;;  %1876 = vperm.xlu0 %14286, %v21924_v13   ;;  %v21929_v41 = vld [vmem:[#allocation11_spill] sm:$0xff]  ;;  %v15905_v48 = vld [vmem:[%s21166_s7] ss:$0 sm:$0xff] }
  0xf9   :  { %v757_v16 = vpack.c.bf16 %v699_v40, %v698_v22  ;;  %v15385_v34 = vpack.c.bf16 %v10939_v36, %v10938_v1  ;;  %v1467_v60 = vpop.permute.xlu1 %1466 }
  0xfa   :  { %v756_v63 = vpack.c.bf16 %v697_v30, %v696_v37  ;;  %v12721_v45 = vpop.f32.mrb[12].mxu0  ;;  %vm1543_vm15 = vcmp.eq.s32.totalorder %v15079_v6, %v1467_v60  ;;  %v1464_v12 = vpop.permute.xlu0 %1463 }
  0xfb   :  { %21925 = vst [vmem:[#allocation5_spill] sm:$0xff] %v15385_v34  ;;  %v490_v47 = vadd.f32 %v12721_v45, %v15305_v32  ;;  %v481_v38 = vpop.f32.mrb[13].mxu0  ;;  %v10941_v57 = vsel %vm1543_vm15, 1.0, %v14310_v0  ;;  %vm1542_vm0 = vcmp.eq.s32.totalorder %v15079_v6, %v1464_v12  ;;  %1879 = vperm.xlu1 %14287, %v21926_v52   ;;  %v21932_v12 = vld [vmem:[#allocation13_spill] sm:$0xff] }
  0xfc   :  { %v482_v25 = vadd.f32 %v15305_v32, %v481_v38  ;;  %v12722_v14 = vpop.f32.mrb[14].mxu0  ;;  %12783 = vmatprep.mubr.msk.bf16.mxu1 %vm807_vm5, %v756_v63  ;;  %v10940_v26 = vsel %vm1542_vm0, 1.0, %v14310_v0  ;;  %1882 = vperm.xlu0 %14286, %v21927_v11  }
  0xfd   :  { %v702_v20 = vmax.f32 %v490_v47, 0.0  ;;  %v493_v54 = vadd.f32 %v12722_v14, %v15305_v32  ;;  %12900 = vmatmul.mubr.msk.bf16.gmra.mrb[116].mxu0 %vm3290_vm6, %v15385_v34  ;;  %v484_v55 = vpop.f32.mrb[15].mxu0  ;;  %v15399_v62 = vpack.c.bf16 %v10941_v57, %v10940_v26  ;;  %12784 = vmatmul.mubr.msk.bf16.gmra.mrb[8].mxu1 %vm807_vm5, %v757_v16  ;;  %v1473_v8 = vpop.permute.xlu1 %1472  ;;  %v21933_v14 = vld [vmem:[#allocation12_spill] sm:$0xff] }
  0xfe   :  { %v700_v15 = vmax.f32 %v482_v25, 0.0  ;;  %v485_v22 = vadd.f32 %v15305_v32, %v484_v55  ;;  %vm1545_vm1 = vcmp.eq.s32.totalorder %v15079_v6, %v1473_v8  ;;  %v1470_v35 = vpop.permute.xlu0 %1469 }
  0xff   :  { %21928 = vst [vmem:[#allocation4_spill] sm:$0xff] %v15399_v62  ;;  %v703_v2 = vmax.f32 %v493_v54, 0.0  ;;  %v10943_v37 = vsel %vm1545_vm1, 1.0, %v14310_v0  ;;  %vm1544_vm2 = vcmp.eq.s32.totalorder %v15079_v6, %v1470_v35  ;;  %12903 = vmatprep.mubr.msk.bf16.mxu0 %vm3290_vm6, %v15399_v62  ;;  %1885 = vperm.xlu1 %14287, %v21929_v41  }
 0x100   :  { %v701_v9 = vmax.f32 %v485_v22, 0.0  ;;  %v10942_v40 = vsel %vm1544_vm2, 1.0, %v14310_v0  ;;  %1888 = vperm.xlu0 %14286, %v21930_v24  }
 0x101   :  { %v759_v7 = vpack.c.bf16 %v703_v2, %v702_v20  ;;  %v15411_v36 = vpack.c.bf16 %v10943_v37, %v10942_v40  ;;  %v1479_v16 = vpop.permute.xlu1 %1478  ;;  %v21935_v2 = vld [vmem:[#allocation15_spill] sm:$0xff]  ;;  %v21936_v37 = vld [vmem:[#allocation14_spill] sm:$0xff] }
 0x102   :  { %v758_v30 = vpack.c.bf16 %v701_v9, %v700_v15  ;;  %v12725_v17 = vpop.f32.mrb[16].mxu0  ;;  %vm1547_vm3 = vcmp.eq.s32.totalorder %v15079_v6, %v1479_v16  ;;  %v1476_v13 = vpop.permute.xlu0 %1475 }
 0x103   :  { %21931 = vst [vmem:[#allocation7_spill] sm:$0xff] %v15411_v36  ;;  %v506_v1 = vadd.f32 %v12725_v17, %v15305_v32  ;;  %v497_v63 = vpop.f32.mrb[17].mxu0  ;;  %v10945_v45 = vsel %vm1547_vm3, 1.0, %v14310_v0  ;;  %vm1546_vm4 = vcmp.eq.s32.totalorder %v15079_v6, %v1476_v13  ;;  %1891 = vperm.xlu1 %14287, %v21932_v12  }
 0x104   :  { %v498_v60 = vadd.f32 %v15305_v32, %v497_v63  ;;  %v12726_v47 = vpop.f32.mrb[18].mxu0  ;;  %12787 = vmatprep.mubr.msk.bf16.mxu1 %vm807_vm5, %v758_v30  ;;  %v10944_v57 = vsel %vm1546_vm4, 1.0, %v14310_v0  ;;  %1894 = vperm.xlu0 %14286, %v21933_v14   ;;  %v21938_v63 = vmov 0  }
 0x105   :  { %v706_v38 = vmax.f32 %v506_v1, 0.0  ;;  %v509_v25 = vadd.f32 %v12726_v47, %v15305_v32  ;;  %12904 = vmatmul.mubr.msk.bf16.gmra.mrb[120].mxu0 %vm3290_vm6, %v15411_v36  ;;  %v500_v52 = vpop.f32.mrb[19].mxu0  ;;  %v15425_v20 = vpack.c.bf16 %v10945_v45, %v10944_v57  ;;  %12788 = vmatmul.mubr.msk.bf16.gmra.mrb[12].mxu1 %vm807_vm5, %v759_v7  ;;  %v1485_v11 = vpop.permute.xlu1 %1484 }
 0x106   :  { %v704_v26 = vmax.f32 %v498_v60, 0.0  ;;  %v501_v54 = vadd.f32 %v15305_v32, %v500_v52  ;;  %vm1549_vm7 = vcmp.eq.s32.totalorder %v15079_v6, %v1485_v11  ;;  %v1482_v15 = vpop.permute.xlu0 %1481 }
 0x107   :  { %21934 = vst [vmem:[#allocation6_spill] sm:$0xff] %v15425_v20  ;;  %v707_v55 = vmax.f32 %v509_v25, 0.0  ;;  %v10947_v8 = vsel %vm1549_vm7, 1.0, %v14310_v0  ;;  %vm1548_vm8 = vcmp.eq.s32.totalorder %v15079_v6, %v1482_v15  ;;  %12907 = vmatprep.mubr.msk.bf16.mxu0 %vm3290_vm6, %v15425_v20  ;;  %1897 = vperm.xlu1 %14287, %v21935_v2  }
 0x108   :  { %v705_v22 = vmax.f32 %v501_v54, 0.0  ;;  %v10946_v9 = vsel %vm1548_vm8, 1.0, %v14310_v0  ;;  %1900 = vperm.xlu0 %14286, %v21936_v37  }
 0x109   :  { %v761_v35 = vpack.c.bf16 %v707_v55, %v706_v38  ;;  %v15437_v7 = vpack.c.bf16 %v10947_v8, %v10946_v9 }
 0x10a   :  { %v760_v41 = vpack.c.bf16 %v705_v22, %v704_v26  ;;  %v12729_v40 = vpop.f32.mrb[20].mxu0  ;;  %v1715_v17 = vpop.permute.xlu1 %1714 }
 0x10b   :  { %21937 = vst [vmem:[#allocation9_spill] sm:$0xff] %v15437_v7  ;;  %v522_v24 = vadd.f32 %v12729_v40, %v15305_v32  ;;  %v513_v30 = vpop.f32.mrb[21].mxu0  ;;  %vm1903_vm9 = vcmp.eq.s32.totalorder %v15079_v6, %v1715_v17  ;;  %v1712_v1 = vpop.permute.xlu0 %1711  ;;  %14288 = vset.pattern.permute.xlu1 %v21938_v63 }
 0x10c   :  { %v514_v16 = vadd.f32 %v15305_v32, %v513_v30  ;;  %v12730_v13 = vpop.f32.mrb[22].mxu0  ;;  %12791 = vmatprep.mubr.msk.bf16.mxu1 %vm807_vm5, %v760_v41  ;;  %v10949_v60 = vsel %vm1903_vm9, 1.0, %v14310_v0  ;;  %vm1902_vm10 = vcmp.eq.s32.totalorder %v15079_v6, %v1712_v1  ;;  %14289 = vset.pattern.permute.xlu0 %v21938_v63 }
 0x10d   :  { %v710_v45 = vmax.f32 %v522_v24, 0.0  ;;  %v525_v47 = vadd.f32 %v12730_v13, %v15305_v32  ;;  %12908 = vmatmul.mubr.msk.bf16.gmra.mrb[124].mxu0 %vm3290_vm6, %v15437_v7  ;;  %v516_v12 = vpop.f32.mrb[23].mxu0  ;;  %v10948_v57 = vsel %vm1902_vm10, 1.0, %v14310_v0  ;;  %12792 = vmatmul.mubr.msk.bf16.gmra.mrb[16].mxu1 %vm807_vm5, %v761_v35 }
 0x10e   :  { %v708_v38 = vmax.f32 %v514_v16, 0.0  ;;  %v517_v25 = vadd.f32 %v15305_v32, %v516_v12  ;;  %v15453_v14 = vpack.c.bf16 %v10949_v60, %v10948_v57  ;;  %v1718_v26 = vpop.permute.xlu1 %1717 }
 0x10f   :  { %v711_v52 = vmax.f32 %v525_v47, 0.0  ;;  %vm1904_vm11 = vcmp.eq.s32.totalorder %v15079_v6, %v1718_v26  ;;  %v1721_v11 = vpop.permute.xlu0 %1720 }
 0x110   :  { %21939 = vst [vmem:[#allocation8_spill] sm:$0xff] %v15453_v14  ;;  %v709_v54 = vmax.f32 %v517_v25, 0.0  ;;  %v10950_v15 = vsel %vm1904_vm11, 1.0, %v14310_v0  ;;  %vm1905_vm12 = vcmp.eq.s32.totalorder %v15079_v6, %v1721_v11  ;;  %12919 = vmatprep.mubr.msk.bf16.mxu0 %vm3290_vm6, %v15453_v14 }
 0x111   :  { %v763_v55 = vpack.c.bf16 %v711_v52, %v710_v45  ;;  %v10951_v8 = vsel %vm1905_vm12, 1.0, %v14310_v0 }
 0x112   :  { %v762_v22 = vpack.c.bf16 %v709_v54, %v708_v38  ;;  %v12733_v2 = vpop.f32.mrb[24].mxu0  ;;  %v15461_v35 = vpack.c.bf16 %v10951_v8, %v10950_v15  ;;  %v1724_v41 = vpop.permute.xlu1 %1723 }
 0x113   :  { %v538_v9 = vadd.f32 %v12733_v2, %v15305_v32  ;;  %v529_v37 = vpop.f32.mrb[25].mxu0  ;;  %vm1906_vm13 = vcmp.eq.s32.totalorder %v15079_v6, %v1724_v41  ;;  %v1727_v24 = vpop.permute.xlu0 %1726 }
 0x114   :  { %21940 = vst [vmem:[#allocation11_spill] sm:$0xff] %v15461_v35  ;;  %v530_v40 = vadd.f32 %v15305_v32, %v529_v37  ;;  %v12734_v30 = vpop.f32.mrb[26].mxu0  ;;  %12795 = vmatprep.mubr.msk.bf16.mxu1 %vm807_vm5, %v762_v22  ;;  %v10952_v16 = vsel %vm1906_vm13, 1.0, %v14310_v0  ;;  %vm1907_vm14 = vcmp.eq.s32.totalorder %v15079_v6, %v1727_v24 }
 0x115   :  { %v714_v17 = vmax.f32 %v538_v9, 0.0  ;;  %v541_v1 = vadd.f32 %v12734_v30, %v15305_v32  ;;  %12920 = vmatmul.mubr.msk.bf16.vlgmr.msra.gmra.mrb[128].mxu0 %vm3290_vm6, %v15461_v35  ;;  %v532_v13 = vpop.f32.mrb[27].mxu0  ;;  %v10953_v60 = vsel %vm1907_vm14, 1.0, %v14310_v0  ;;  %12796 = vmatmul.mubr.msk.bf16.gmra.mrb[20].mxu1 %vm807_vm5, %v763_v55 }
 0x116   :  { %v712_v45 = vmax.f32 %v530_v40, 0.0  ;;  %v533_v47 = vadd.f32 %v15305_v32, %v532_v13  ;;  %v15475_v12 = vpack.c.bf16 %v10953_v60, %v10952_v16  ;;  %v1730_v57 = vpop.permute.xlu1 %1729 }
 0x117   :  { %v715_v38 = vmax.f32 %v541_v1, 0.0  ;;  %vm1908_vm15 = vcmp.eq.s32.totalorder %v15079_v6, %v1730_v57  ;;  %v1733_v52 = vpop.permute.xlu0 %1732 }
 0x118   :  { %21941 = vst [vmem:[#allocation10_spill] sm:$0xff] %v15475_v12  ;;  %v713_v25 = vmax.f32 %v533_v47, 0.0  ;;  %v10954_v54 = vsel %vm1908_vm15, 1.0, %v14310_v0  ;;  %vm1909_vm0 = vcmp.eq.s32.totalorder %v15079_v6, %v1733_v52  ;;  %12923 = vmatprep.mubr.msk.bf16.mxu0 %vm3290_vm6, %v15475_v12 }
 0x119   :  { %v765_v26 = vpack.c.bf16 %v715_v38, %v714_v17  ;;  %v10955_v15 = vsel %vm1909_vm0, 1.0, %v14310_v0 }
 0x11a   :  { %v764_v11 = vpack.c.bf16 %v713_v25, %v712_v45  ;;  %v12737_v55 = vpop.f32.mrb[28].mxu0  ;;  %v15483_v22 = vpack.c.bf16 %v10955_v15, %v10954_v54  ;;  %v1736_v9 = vpop.permute.xlu1 %1735 }
 0x11b   :  { %v554_v8 = vadd.f32 %v12737_v55, %v15305_v32  ;;  %v545_v2 = vpop.f32.mrb[29].mxu0  ;;  %vm1910_vm1 = vcmp.eq.s32.totalorder %v15079_v6, %v1736_v9  ;;  %v1739_v41 = vpop.permute.xlu0 %1738 }
 0x11c   :  { %21942 = vst [vmem:[#allocation13_spill] sm:$0xff] %v15483_v22  ;;  %v546_v37 = vadd.f32 %v15305_v32, %v545_v2  ;;  %v12738_v40 = vpop.f32.mrb[30].mxu0  ;;  %12799 = vmatprep.mubr.msk.bf16.mxu1 %vm807_vm5, %v764_v11  ;;  %v10956_v30 = vsel %vm1910_vm1, 1.0, %v14310_v0  ;;  %vm1911_vm2 = vcmp.eq.s32.totalorder %v15079_v6, %v1739_v41 }
 0x11d   :  { %v718_v24 = vmax.f32 %v554_v8, 0.0  ;;  %v557_v17 = vadd.f32 %v12738_v40, %v15305_v32  ;;  %12924 = vmatmul.mubr.msk.bf16.gmra.mrb[132].mxu0 %vm3290_vm6, %v15483_v22  ;;  %v548_v16 = vpop.f32.mrb[31].mxu0  ;;  %v10957_v13 = vsel %vm1911_vm2, 1.0, %v14310_v0  ;;  %12800 = vmatmul.mubr.msk.bf16.gmra.mrb[24].mxu1 %vm807_vm5, %v765_v26 }
 0x11e   :  { %v716_v1 = vmax.f32 %v546_v37, 0.0  ;;  %v549_v45 = vadd.f32 %v15305_v32, %v548_v16  ;;  %v15497_v60 = vpack.c.bf16 %v10957_v13, %v10956_v30  ;;  %v1742_v38 = vpop.permute.xlu1 %1741 }
 0x11f   :  { %v719_v47 = vmax.f32 %v557_v17, 0.0  ;;  %vm1912_vm3 = vcmp.eq.s32.totalorder %v15079_v6, %v1742_v38  ;;  %v1745_v25 = vpop.permute.xlu0 %1744 }
 0x120   :  { %21943 = vst [vmem:[#allocation12_spill] sm:$0xff] %v15497_v60  ;;  %v717_v57 = vmax.f32 %v549_v45, 0.0  ;;  %v10958_v54 = vsel %vm1912_vm3, 1.0, %v14310_v0  ;;  %vm1913_vm4 = vcmp.eq.s32.totalorder %v15079_v6, %v1745_v25  ;;  %12927 = vmatprep.mubr.msk.bf16.mxu0 %vm3290_vm6, %v15497_v60 }
 0x121   :  { %v767_v52 = vpack.c.bf16 %v719_v47, %v718_v24  ;;  %v10959_v15 = vsel %vm1913_vm4, 1.0, %v14310_v0 }
 0x122   :  { %v766_v11 = vpack.c.bf16 %v717_v57, %v716_v1  ;;  %v12741_v26 = vpop.f32.mrb[32].mxu0  ;;  %v15505_v55 = vpack.c.bf16 %v10959_v15, %v10958_v54  ;;  %v1748_v9 = vpop.permute.xlu1 %1747 }
 0x123   :  { %v570_v8 = vadd.f32 %v12741_v26, %v15305_v32  ;;  %v561_v2 = vpop.f32.mrb[33].mxu0  ;;  %vm1914_vm7 = vcmp.eq.s32.totalorder %v15079_v6, %v1748_v9  ;;  %v1751_v41 = vpop.permute.xlu0 %1750 }
 0x124   :  { %21944 = vst [vmem:[#allocation15_spill] sm:$0xff] %v15505_v55  ;;  %v562_v37 = vadd.f32 %v15305_v32, %v561_v2  ;;  %v12742_v40 = vpop.f32.mrb[34].mxu0  ;;  %12803 = vmatprep.mubr.msk.bf16.mxu1 %vm807_vm5, %v766_v11  ;;  %v10960_v30 = vsel %vm1914_vm7, 1.0, %v14310_v0  ;;  %vm1915_vm8 = vcmp.eq.s32.totalorder %v15079_v6, %v1751_v41 }
 0x125   :  { %v722_v24 = vmax.f32 %v570_v8, 0.0  ;;  %v573_v17 = vadd.f32 %v12742_v40, %v15305_v32  ;;  %12928 = vmatmul.mubr.msk.bf16.gmra.mrb[136].mxu0 %vm3290_vm6, %v15505_v55  ;;  %v564_v16 = vpop.f32.mrb[35].mxu0  ;;  %v10961_v13 = vsel %vm1915_vm8, 1.0, %v14310_v0  ;;  %12804 = vmatmul.mubr.msk.bf16.gmra.mrb[28].mxu1 %vm807_vm5, %v767_v52 }
 0x126   :  { %v720_v1 = vmax.f32 %v562_v37, 0.0  ;;  %v565_v45 = vadd.f32 %v15305_v32, %v564_v16  ;;  %v15519_v47 = vpack.c.bf16 %v10961_v13, %v10960_v30  ;;  %v1754_v57 = vpop.permute.xlu1 %1753 }
 0x127   :  { %v723_v38 = vmax.f32 %v573_v17, 0.0  ;;  %vm1916_vm9 = vcmp.eq.s32.totalorder %v15079_v6, %v1754_v57  ;;  %v1757_v54 = vpop.permute.xlu0 %1756 }
 0x128   :  { %21945 = vst [vmem:[#allocation14_spill] sm:$0xff] %v15519_v47  ;;  %v721_v25 = vmax.f32 %v565_v45, 0.0  ;;  %v10962_v15 = vsel %vm1916_vm9, 1.0, %v14310_v0  ;;  %vm1917_vm10 = vcmp.eq.s32.totalorder %v15079_v6, %v1757_v54  ;;  %12931 = vmatprep.mubr.msk.bf16.mxu0 %vm3290_vm6, %v15519_v47 }
 0x129   :  { %v769_v11 = vpack.c.bf16 %v723_v38, %v722_v24  ;;  %v10963_v8 = vsel %vm1917_vm10, 1.0, %v14310_v0 }
 0x12a   :  { %v768_v26 = vpack.c.bf16 %v721_v25, %v720_v1  ;;  %v12745_v52 = vpop.f32.mrb[36].mxu0  ;;  %v15527_v2 = vpack.c.bf16 %v10963_v8, %v10962_v15  ;;  %v1760_v41 = vpop.permute.xlu1 %1759 }
 0x12b   :  { %v586_v9 = vadd.f32 %v12745_v52, %v15305_v32  ;;  %v577_v37 = vpop.f32.mrb[37].mxu0  ;;  %vm1918_vm11 = vcmp.eq.s32.totalorder %v15079_v6, %v1760_v41  ;;  %v1763_v24 = vpop.permute.xlu0 %1762 }
 0x12c   :  { %21946 = vst [vmem:[#allocation42_spill] sm:$0xff] %v15527_v2  ;;  %v578_v40 = vadd.f32 %v15305_v32, %v577_v37  ;;  %v12746_v30 = vpop.f32.mrb[38].mxu0  ;;  %12807 = vmatprep.mubr.msk.bf16.mxu1 %vm807_vm5, %v768_v26  ;;  %v10964_v16 = vsel %vm1918_vm11, 1.0, %v14310_v0  ;;  %vm1919_vm12 = vcmp.eq.s32.totalorder %v15079_v6, %v1763_v24 }
 0x12d   :  { %v726_v17 = vmax.f32 %v586_v9, 0.0  ;;  %v589_v1 = vadd.f32 %v12746_v30, %v15305_v32  ;;  %12932 = vmatmul.mubr.msk.bf16.gmra.mrb[140].mxu0 %vm3290_vm6, %v15527_v2  ;;  %v580_v13 = vpop.f32.mrb[39].mxu0  ;;  %v10965_v38 = vsel %vm1919_vm12, 1.0, %v14310_v0  ;;  %12808 = vmatmul.mubr.msk.bf16.gmra.mrb[32].mxu1 %vm807_vm5, %v769_v11 }
 0x12e   :  { %v724_v45 = vmax.f32 %v578_v40, 0.0  ;;  %v581_v57 = vadd.f32 %v15305_v32, %v580_v13  ;;  %v15541_v25 = vpack.c.bf16 %v10965_v38, %v10964_v16  ;;  %v1766_v15 = vpop.permute.xlu1 %1765 }
 0x12f   :  { %v727_v54 = vmax.f32 %v589_v1, 0.0  ;;  %vm1920_vm13 = vcmp.eq.s32.totalorder %v15079_v6, %v1766_v15  ;;  %v1769_v8 = vpop.permute.xlu0 %1768 }
 0x130   :  { %21947 = vst [vmem:[#allocation43_spill] sm:$0xff] %v15541_v25  ;;  %v725_v26 = vmax.f32 %v581_v57, 0.0  ;;  %v10966_v9 = vsel %vm1920_vm13, 1.0, %v14310_v0  ;;  %vm1921_vm14 = vcmp.eq.s32.totalorder %v15079_v6, %v1769_v8  ;;  %12935 = vmatprep.mubr.msk.bf16.mxu0 %vm3290_vm6, %v15541_v25 }
 0x131   :  { %v771_v52 = vpack.c.bf16 %v727_v54, %v726_v17  ;;  %v10967_v41 = vsel %vm1921_vm14, 1.0, %v14310_v0 }
 0x132   :  { %v770_v37 = vpack.c.bf16 %v725_v26, %v724_v45  ;;  %v12749_v11 = vpop.f32.mrb[40].mxu0  ;;  %v15549_v40 = vpack.c.bf16 %v10967_v41, %v10966_v9  ;;  %v1772_v16 = vpop.permute.xlu1 %1771 }
 0x133   :  { %v602_v24 = vadd.f32 %v12749_v11, %v15305_v32  ;;  %v593_v30 = vpop.f32.mrb[41].mxu0  ;;  %vm1922_vm15 = vcmp.eq.s32.totalorder %v15079_v6, %v1772_v16  ;;  %v1775_v17 = vpop.permute.xlu0 %1774 }
 0x134   :  { %21948 = vst [vmem:[#allocation44_spill] sm:$0xff] %v15549_v40  ;;  %v594_v1 = vadd.f32 %v15305_v32, %v593_v30  ;;  %v12750_v13 = vpop.f32.mrb[42].mxu0  ;;  %12811 = vmatprep.mubr.msk.bf16.mxu1 %vm807_vm5, %v770_v37  ;;  %v10968_v45 = vsel %vm1922_vm15, 1.0, %v14310_v0  ;;  %vm1923_vm0 = vcmp.eq.s32.totalorder %v15079_v6, %v1775_v17 }
 0x135   :  { %v730_v38 = vmax.f32 %v602_v24, 0.0  ;;  %v605_v57 = vadd.f32 %v12750_v13, %v15305_v32  ;;  %12936 = vmatmul.mubr.msk.bf16.gmra.mrb[144].mxu0 %vm3290_vm6, %v15549_v40  ;;  %v596_v54 = vpop.f32.mrb[43].mxu0  ;;  %v10969_v26 = vsel %vm1923_vm0, 1.0, %v14310_v0  ;;  %12812 = vmatmul.mubr.msk.bf16.gmra.mrb[36].mxu1 %vm807_vm5, %v771_v52 }
 0x136   :  { %v728_v15 = vmax.f32 %v594_v1, 0.0  ;;  %v597_v8 = vadd.f32 %v15305_v32, %v596_v54  ;;  %v15563_v9 = vpack.c.bf16 %v10969_v26, %v10968_v45  ;;  %v1778_v41 = vpop.permute.xlu1 %1777 }
 0x137   :  { %v731_v37 = vmax.f32 %v605_v57, 0.0  ;;  %vm1924_vm1 = vcmp.eq.s32.totalorder %v15079_v6, %v1778_v41  ;;  %v1781_v24 = vpop.permute.xlu0 %1780 }
 0x138   :  { %21949 = vst [vmem:[#allocation45_spill] sm:$0xff] %v15563_v9  ;;  %v729_v11 = vmax.f32 %v597_v8, 0.0  ;;  %v10970_v16 = vsel %vm1924_vm1, 1.0, %v14310_v0  ;;  %vm1925_vm2 = vcmp.eq.s32.totalorder %v15079_v6, %v1781_v24  ;;  %12939 = vmatprep.mubr.msk.bf16.mxu0 %vm3290_vm6, %v15563_v9 }
 0x139   :  { %v773_v30 = vpack.c.bf16 %v731_v37, %v730_v38  ;;  %v10971_v17 = vsel %vm1925_vm2, 1.0, %v14310_v0 }
 0x13a   :  { %v772_v1 = vpack.c.bf16 %v729_v11, %v728_v15  ;;  %v12753_v52 = vpop.f32.mrb[44].mxu0  ;;  %v15571_v13 = vpack.c.bf16 %v10971_v17, %v10970_v16  ;;  %v1784_v54 = vpop.permute.xlu1 %1783 }
 0x13b   :  { %v618_v45 = vadd.f32 %v12753_v52, %v15305_v32  ;;  %v609_v57 = vpop.f32.mrb[45].mxu0  ;;  %vm1926_vm3 = vcmp.eq.s32.totalorder %v15079_v6, %v1784_v54  ;;  %v1787_v38 = vpop.permute.xlu0 %1786 }
 0x13c   :  { %21950 = vst [vmem:[#allocation46_spill] sm:$0xff] %v15571_v13  ;;  %v610_v26 = vadd.f32 %v15305_v32, %v609_v57  ;;  %v12754_v8 = vpop.f32.mrb[46].mxu0  ;;  %12815 = vmatprep.mubr.msk.bf16.mxu1 %vm807_vm5, %v772_v1  ;;  %v10972_v15 = vsel %vm1926_vm3, 1.0, %v14310_v0  ;;  %vm1927_vm4 = vcmp.eq.s32.totalorder %v15079_v6, %v1787_v38 }
 0x13d   :  { %v734_v37 = vmax.f32 %v618_v45, 0.0  ;;  %v621_v41 = vadd.f32 %v12754_v8, %v15305_v32  ;;  %12940 = vmatmul.mubr.msk.bf16.gmra.mrb[148].mxu0 %vm3290_vm6, %v15571_v13  ;;  %v612_v11 = vpop.f32.mrb[47].mxu0  ;;  %v10973_v16 = vsel %vm1927_vm4, 1.0, %v14310_v0  ;;  %12816 = vmatmul.mubr.msk.bf16.gmra.mrb[40].mxu1 %vm807_vm5, %v773_v30 }
 0x13e   :  { %v732_v24 = vmax.f32 %v610_v26, 0.0  ;;  %v613_v17 = vadd.f32 %v15305_v32, %v612_v11  ;;  %v15585_v52 = vpack.c.bf16 %v10973_v16, %v10972_v15  ;;  %v1790_v45 = vpop.permute.xlu1 %1789 }
 0x13f   :  { %v735_v1 = vmax.f32 %v621_v41, 0.0  ;;  %vm1928_vm7 = vcmp.eq.s32.totalorder %v15079_v6, %v1790_v45  ;;  %v1793_v54 = vpop.permute.xlu0 %1792 }
 0x140   :  { %21951 = vst [vmem:[#allocation47_spill] sm:$0xff] %v15585_v52  ;;  %v733_v57 = vmax.f32 %v613_v17, 0.0  ;;  %v10974_v8 = vsel %vm1928_vm7, 1.0, %v14310_v0  ;;  %vm1929_vm8 = vcmp.eq.s32.totalorder %v15079_v6, %v1793_v54  ;;  %12943 = vmatprep.mubr.msk.bf16.mxu0 %vm3290_vm6, %v15585_v52 }
 0x141   :  { %v775_v38 = vpack.c.bf16 %v735_v1, %v734_v37  ;;  %v10975_v11 = vsel %vm1929_vm8, 1.0, %v14310_v0 }
 0x142   :  { %v774_v26 = vpack.c.bf16 %v733_v57, %v732_v24  ;;  %v12757_v30 = vpop.f32.mrb[48].mxu0  ;;  %v15593_v15 = vpack.c.bf16 %v10975_v11, %v10974_v8  ;;  %v1796_v17 = vpop.permute.xlu1 %1795 }
 0x143   :  { %v634_v41 = vadd.f32 %v12757_v30, %v15305_v32  ;;  %v625_v16 = vpop.f32.mrb[49].mxu0  ;;  %vm1930_vm9 = vcmp.eq.s32.totalorder %v15079_v6, %v1796_v17  ;;  %v1799_v37 = vpop.permute.xlu0 %1798 }
 0x144   :  { %21952 = vst [vmem:[#allocation48_spill] sm:$0xff] %v15593_v15  ;;  %v626_v45 = vadd.f32 %v15305_v32, %v625_v16  ;;  %v12758_v1 = vpop.f32.mrb[50].mxu0  ;;  %12819 = vmatprep.mubr.msk.bf16.mxu1 %vm807_vm5, %v774_v26  ;;  %v10976_v24 = vsel %vm1930_vm9, 1.0, %v14310_v0  ;;  %vm1931_vm10 = vcmp.eq.s32.totalorder %v15079_v6, %v1799_v37 }
 0x145   :  { %v738_v54 = vmax.f32 %v634_v41, 0.0  ;;  %v637_v57 = vadd.f32 %v12758_v1, %v15305_v32  ;;  %12944 = vmatmul.mubr.msk.bf16.gmra.mrb[152].mxu0 %vm3290_vm6, %v15593_v15  ;;  %v628_v8 = vpop.f32.mrb[51].mxu0  ;;  %v10977_v30 = vsel %vm1931_vm10, 1.0, %v14310_v0  ;;  %12820 = vmatmul.mubr.msk.bf16.gmra.mrb[44].mxu1 %vm807_vm5, %v775_v38 }
 0x146   :  { %v736_v11 = vmax.f32 %v626_v45, 0.0  ;;  %v629_v16 = vadd.f32 %v15305_v32, %v628_v8  ;;  %v15607_v17 = vpack.c.bf16 %v10977_v30, %v10976_v24  ;;  %v1802_v41 = vpop.permute.xlu1 %1801 }
 0x147   :  { %v739_v26 = vmax.f32 %v637_v57, 0.0  ;;  %vm1932_vm11 = vcmp.eq.s32.totalorder %v15079_v6, %v1802_v41  ;;  %v1805_v37 = vpop.permute.xlu0 %1804 }
 0x148   :  { %21953 = vst [vmem:[#allocation49_spill] sm:$0xff] %v15607_v17  ;;  %v737_v52 = vmax.f32 %v629_v16, 0.0  ;;  %v10978_v13 = vsel %vm1932_vm11, 1.0, %v14310_v0  ;;  %vm1933_vm12 = vcmp.eq.s32.totalorder %v15079_v6, %v1805_v37  ;;  %12947 = vmatprep.mubr.msk.bf16.mxu0 %vm3290_vm6, %v15607_v17 }
 0x149   :  { %v777_v1 = vpack.c.bf16 %v739_v26, %v738_v54  ;;  %v10979_v8 = vsel %vm1933_vm12, 1.0, %v14310_v0 }
 0x14a   :  { %v776_v45 = vpack.c.bf16 %v737_v52, %v736_v11  ;;  %v12761_v38 = vpop.f32.mrb[52].mxu0  ;;  %v15615_v24 = vpack.c.bf16 %v10979_v8, %v10978_v13  ;;  %v1808_v16 = vpop.permute.xlu1 %1807 }
 0x14b   :  { %v650_v57 = vadd.f32 %v12761_v38, %v15305_v32  ;;  %v641_v30 = vpop.f32.mrb[53].mxu0  ;;  %vm1934_vm13 = vcmp.eq.s32.totalorder %v15079_v6, %v1808_v16  ;;  %v1811_v54 = vpop.permute.xlu0 %1810 }
 0x14c   :  { %21954 = vst [vmem:[#allocation50_spill] sm:$0xff] %v15615_v24  ;;  %v642_v41 = vadd.f32 %v15305_v32, %v641_v30  ;;  %v12762_v26 = vpop.f32.mrb[54].mxu0  ;;  %12823 = vmatprep.mubr.msk.bf16.mxu1 %vm807_vm5, %v776_v45  ;;  %v10980_v52 = vsel %vm1934_vm13, 1.0, %v14310_v0  ;;  %vm1935_vm14 = vcmp.eq.s32.totalorder %v15079_v6, %v1811_v54 }
 0x14d   :  { %v742_v37 = vmax.f32 %v650_v57, 0.0  ;;  %v653_v13 = vadd.f32 %v12762_v26, %v15305_v32  ;;  %12948 = vmatmul.mubr.msk.bf16.gmra.mrb[156].mxu0 %vm3290_vm6, %v15615_v24  ;;  %v644_v11 = vpop.f32.mrb[55].mxu0  ;;  %v10981_v38 = vsel %vm1935_vm14, 1.0, %v14310_v0  ;;  %12824 = vmatmul.mubr.msk.bf16.gmra.mrb[48].mxu1 %vm807_vm5, %v777_v1 }
 0x14e   :  { %v740_v8 = vmax.f32 %v642_v41, 0.0  ;;  %v645_v30 = vadd.f32 %v15305_v32, %v644_v11  ;;  %v15629_v16 = vpack.c.bf16 %v10981_v38, %v10980_v52  ;;  %v1814_v57 = vpop.permute.xlu1 %1813 }
 0x14f   :  { %v743_v45 = vmax.f32 %v653_v13, 0.0  ;;  %vm1936_vm15 = vcmp.eq.s32.totalorder %v15079_v6, %v1814_v57  ;;  %v1817_v54 = vpop.permute.xlu0 %1816 }
 0x150   :  { %21955 = vst [vmem:[#allocation51_spill] sm:$0xff] %v15629_v16  ;;  %v741_v17 = vmax.f32 %v645_v30, 0.0  ;;  %v10982_v15 = vsel %vm1936_vm15, 1.0, %v14310_v0  ;;  %vm1937_vm0 = vcmp.eq.s32.totalorder %v15079_v6, %v1817_v54  ;;  %12951 = vmatprep.mubr.msk.bf16.mxu0 %vm3290_vm6, %v15629_v16 }
 0x151   :  { %v779_v26 = vpack.c.bf16 %v743_v45, %v742_v37  ;;  %v10983_v11 = vsel %vm1937_vm0, 1.0, %v14310_v0 }
 0x152   :  { %v778_v41 = vpack.c.bf16 %v741_v17, %v740_v8  ;;  %v12765_v1 = vpop.f32.mrb[56].mxu0  ;;  %v15637_v52 = vpack.c.bf16 %v10983_v11, %v10982_v15  ;;  %v1820_v30 = vpop.permute.xlu1 %1819 }
 0x153   :  { %v666_v13 = vadd.f32 %v12765_v1, %v15305_v32  ;;  %v657_v38 = vpop.f32.mrb[57].mxu0  ;;  %vm1938_vm1 = vcmp.eq.s32.totalorder %v15079_v6, %v1820_v30  ;;  %v1823_v37 = vpop.permute.xlu0 %1822 }
 0x154   :  { %21956 = vst [vmem:[#allocation52_spill] sm:$0xff] %v15637_v52  ;;  %v658_v57 = vadd.f32 %v15305_v32, %v657_v38  ;;  %v12766_v45 = vpop.f32.mrb[58].mxu0  ;;  %12827 = vmatprep.mubr.msk.bf16.mxu1 %vm807_vm5, %v778_v41  ;;  %v10984_v17 = vsel %vm1938_vm1, 1.0, %v14310_v0  ;;  %vm1939_vm2 = vcmp.eq.s32.totalorder %v15079_v6, %v1823_v37 }
 0x155   :  { %v746_v54 = vmax.f32 %v666_v13, 0.0  ;;  %v669_v15 = vadd.f32 %v12766_v45, %v15305_v32  ;;  %12952 = vmatmul.mubr.msk.bf16.gmra.mrb[160].mxu0 %vm3290_vm6, %v15637_v52  ;;  %v660_v8 = vpop.f32.mrb[59].mxu0  ;;  %v10985_v1 = vsel %vm1939_vm2, 1.0, %v14310_v0  ;;  %12828 = vmatmul.mubr.msk.bf16.gmra.mrb[52].mxu1 %vm807_vm5, %v779_v26  ;;  %v14292_v26 = vld [vmem:[%s21165_s9] sm:$0xff]  }
 0x156   :  { %v744_v11 = vmax.f32 %v658_v57, 0.0  ;;  %v661_v38 = vadd.f32 %v15305_v32, %v660_v8  ;;  %v15651_v30 = vpack.c.bf16 %v10985_v1, %v10984_v17  ;;  %v1826_v13 = vpop.permute.xlu1 %1825  ;;  %12983 = vmatprep.subr.bf16.mxu0 %v14292_v26 }
 0x157   :  { %v747_v41 = vmax.f32 %v669_v15, 0.0  ;;  %vm1940_vm3 = vcmp.eq.s32.totalorder %v15079_v6, %v1826_v13  ;;  %v1829_v37 = vpop.permute.xlu0 %1828  ;;  %12984 = vmatpush3.bf16.msra.mxu0 %v14292_v26 }
 0x158   :  { %21957 = vst [vmem:[#allocation53_spill] sm:$0xff] %v15651_v30  ;;  %v745_v16 = vmax.f32 %v661_v38, 0.0  ;;  %v10986_v24 = vsel %vm1940_vm3, 1.0, %v14310_v0  ;;  %vm1941_vm4 = vcmp.eq.s32.totalorder %v15079_v6, %v1829_v37  ;;  %12955 = vmatprep.mubr.msk.bf16.mxu0 %vm3290_vm6, %v15651_v30 }
 0x159   :  { %v781_v45 = vpack.c.bf16 %v747_v41, %v746_v54  ;;  %v10987_v17 = vsel %vm1941_vm4, 1.0, %v14310_v0  ;;  %v14307_v41 = vld [vmem:[%s21164_s5] ss:$0 sm:$0xff] }
 0x15a   :  { %v780_v57 = vpack.c.bf16 %v745_v16, %v744_v11  ;;  %v12769_v15 = vpop.f32.mrb[60].mxu0  ;;  %v15662_v8 = vpack.c.bf16 %v10987_v17, %v10986_v24  ;;  %v1832_v38 = vpop.permute.xlu1 %1831 }
 0x15b   :  { %v682_v1 = vadd.f32 %v12769_v15, %v15305_v32  ;;  %v673_v54 = vpop.f32.mrb[61].mxu0  ;;  %vm1942_vm7 = vcmp.eq.s32.totalorder %v15079_v6, %v1832_v38  ;;  %v1835_v37 = vpop.permute.xlu0 %1834 }
 0x15c   :  { %21958 = vst [vmem:[#allocation54_spill] sm:$0xff] %v15662_v8  ;;  %v674_v13 = vadd.f32 %v14307_v41, %v673_v54  ;;  %v12770_v30 = vpop.f32.mrb[62].mxu0  ;;  %12831 = vmatprep.mubr.msk.bf16.mxu1 %vm807_vm5, %v780_v57  ;;  %v10988_v24 = vsel %vm1942_vm7, 1.0, %v14310_v0  ;;  %vm1943_vm8 = vcmp.eq.s32.totalorder %v15079_v6, %v1835_v37 }
 0x15d   :  { %v750_v16 = vmax.f32 %v682_v1, 0.0  ;;  %v685_v32 = vadd.f32 %v14307_v41, %v12770_v30  ;;  %12956 = vmatmul.mubr.msk.bf16.gmra.mrb[164].mxu0 %vm3290_vm6, %v15662_v8  ;;  %v676_v11 = vpop.f32.mrb[63].mxu0  ;;  %v10989_v15 = vsel %vm1943_vm8, 1.0, %v14310_v0  ;;  %12832 = vmatmul.mubr.msk.bf16.gmra.mrb[56].mxu1 %vm807_vm5, %v781_v45 }
 0x15e   :  { %v748_v17 = vmax.f32 %v674_v13, 0.0  ;;  %v677_v54 = vadd.f32 %v14307_v41, %v676_v11  ;;  %v15676_v38 = vpack.c.bf16 %v10989_v15, %v10988_v24  ;;  %v1838_v26 = vpop.permute.xlu1 %1837 }
 0x15f   :  { %v751_v57 = vmax.f32 %v685_v32, 0.0  ;;  %vm1944_vm9 = vcmp.eq.s32.totalorder %v15079_v6, %v1838_v26  ;;  %v1841_v52 = vpop.permute.xlu0 %1840 }
 0x160   :  { %21959 = vst [vmem:[#allocation55_spill] sm:$0xff] %v15676_v38  ;;  %v749_v1 = vmax.f32 %v677_v54, 0.0  ;;  %v10990_v30 = vsel %vm1944_vm9, 1.0, %v14310_v0  ;;  %vm1945_vm10 = vcmp.eq.s32.totalorder %v15079_v6, %v1841_v52  ;;  %12959 = vmatprep.mubr.msk.bf16.mxu0 %vm3290_vm6, %v15676_v38 }
 0x161   :  { %v783_v37 = vpack.c.bf16 %v751_v57, %v750_v16  ;;  %v10991_v41 = vsel %vm1945_vm10, 1.0, %v14310_v0 }
 0x162   :  { %v782_v13 = vpack.c.bf16 %v749_v1, %v748_v17  ;;  %v15684_v45 = vpack.c.bf16 %v10991_v41, %v10990_v30  ;;  %v1844_v24 = vpop.permute.xlu1 %1843 }
 0x163   :  { %vm1946_vm11 = vcmp.eq.s32.totalorder %v15079_v6, %v1844_v24  ;;  %v1847_v32 = vpop.permute.xlu0 %1846 }
 0x164   :  { %21960 = vst [vmem:[#allocation56_spill] sm:$0xff] %v15684_v45  ;;  %12835 = vmatprep.mubr.msk.bf16.mxu1 %vm807_vm5, %v782_v13  ;;  %v10992_v16 = vsel %vm1946_vm11, 1.0, %v14310_v0  ;;  %vm1947_vm12 = vcmp.eq.s32.totalorder %v15079_v6, %v1847_v32 }
 0x165   :  { %12960 = vmatmul.mubr.msk.bf16.gmra.mrb[168].mxu0 %vm3290_vm6, %v15684_v45  ;;  %v10993_v52 = vsel %vm1947_vm12, 1.0, %v14310_v0  ;;  %12836 = vmatmul.mubr.msk.bf16.gmra.mrb[60].mxu1 %vm807_vm5, %v783_v37 }
 0x166   :  { %v15694_v11 = vpack.c.bf16 %v10993_v52, %v10992_v16  ;;  %v1850_v17 = vpop.permute.xlu1 %1849 }
 0x167   :  { %vm1948_vm13 = vcmp.eq.s32.totalorder %v15079_v6, %v1850_v17  ;;  %v1853_v15 = vpop.permute.xlu0 %1852  ;;  %v15697_v54 = vpop.f32.mrb[64].mxu0 }
 0x168   :  { %21961 = vst [vmem:[#allocation57_spill] sm:$0xff] %v15694_v11  ;;  %v10994_v57 = vsel %vm1948_vm13, 1.0, %v14310_v0  ;;  %vm1949_vm14 = vcmp.eq.s32.totalorder %v15079_v6, %v1853_v15  ;;  %v15701_v26 = vpop.f32.mrb[65].mxu0  ;;  %12963 = vmatprep.mubr.msk.bf16.mxu0 %vm3290_vm6, %v15694_v11 }
 0x169   :  { %v10995_v1 = vsel %vm1949_vm14, 1.0, %v14310_v0  ;;  %v15706_v37 = vpop.f32.mrb[66].mxu0 }
 0x16a   :  { %v15708_v30 = vpack.c.bf16 %v10995_v1, %v10994_v57  ;;  %v15712_v41 = vpop.f32.mrb[67].mxu0  ;;  %v1856_v24 = vpop.permute.xlu1 %1855 }
 0x16b   :  { %vm1950_vm15 = vcmp.eq.s32.totalorder %v15079_v6, %v1856_v24  ;;  %v1859_v16 = vpop.permute.xlu0 %1858 }
 0x16c   :  { %21962 = vst [vmem:[#allocation58_spill] sm:$0xff] %v15708_v30  ;;  %v10996_v52 = vsel %vm1950_vm15, 1.0, %v14310_v0  ;;  %vm1951_vm0 = vcmp.eq.s32.totalorder %v15079_v6, %v1859_v16 }
 0x16d   :  { %12964 = vmatmul.mubr.msk.bf16.gmra.mrb[172].mxu0 %vm3290_vm6, %v15708_v30  ;;  %v10997_v17 = vsel %vm1951_vm0, 1.0, %v14310_v0 }
 0x16e   :  { %v15722_v15 = vpack.c.bf16 %v10997_v17, %v10996_v52  ;;  %v1862_v57 = vpop.permute.xlu1 %1861 }
 0x16f   :  { %vm1952_vm1 = vcmp.eq.s32.totalorder %v15079_v6, %v1862_v57  ;;  %v1865_v1 = vpop.permute.xlu0 %1864  ;;  %v15725_v13 = vpop.f32.mrb[68].mxu0 }
 0x170   :  { %21963 = vst [vmem:[#allocation59_spill] sm:$0xff] %v15722_v15  ;;  %v10998_v24 = vsel %vm1952_vm1, 1.0, %v14310_v0  ;;  %vm1953_vm2 = vcmp.eq.s32.totalorder %v15079_v6, %v1865_v1  ;;  %v15729_v32 = vpop.f32.mrb[69].mxu0  ;;  %12967 = vmatprep.mubr.msk.bf16.mxu0 %vm3290_vm6, %v15722_v15  ;;  %vm4140_vm1 = vcmask 130048  }
 0x171   :  { %v10999_v16 = vsel %vm1953_vm2, 1.0, %v14310_v0  ;;  %v15734_v30 = vpop.f32.mrb[70].mxu0 }
 0x172   :  { %v15736_v52 = vpack.c.bf16 %v10999_v16, %v10998_v24  ;;  %v15740_v57 = vpop.f32.mrb[71].mxu0  ;;  %v1868_v11 = vpop.permute.xlu1 %1867 }
 0x173   :  { %vm1954_vm3 = vcmp.eq.s32.totalorder %v15079_v6, %v1868_v11  ;;  %v1871_v45 = vpop.permute.xlu0 %1870 }
 0x174   :  { %21964 = vst [vmem:[#allocation60_spill] sm:$0xff] %v15736_v52  ;;  %v11000_v15 = vsel %vm1954_vm3, 1.0, %v14310_v0  ;;  %vm1955_vm4 = vcmp.eq.s32.totalorder %v15079_v6, %v1871_v45 }
 0x175   :  { %12968 = vmatmul.mubr.msk.bf16.gmra.mrb[176].mxu0 %vm3290_vm6, %v15736_v52  ;;  %v11001_v24 = vsel %vm1955_vm4, 1.0, %v14310_v0 }
 0x176   :  { %v15750_v16 = vpack.c.bf16 %v11001_v24, %v11000_v15  ;;  %v1874_v17 = vpop.permute.xlu1 %1873 }
 0x177   :  { %vm1956_vm7 = vcmp.eq.s32.totalorder %v15079_v6, %v1874_v17  ;;  %v1877_v38 = vpop.permute.xlu0 %1876  ;;  %v15753_v8 = vpop.f32.mrb[72].mxu0 }
 0x178   :  { %21965 = vst [vmem:[#allocation61_spill] sm:$0xff] %v15750_v16  ;;  %v11002_v11 = vsel %vm1956_vm7, 1.0, %v14310_v0  ;;  %vm1957_vm8 = vcmp.eq.s32.totalorder %v15079_v6, %v1877_v38  ;;  %v15757_v1 = vpop.f32.mrb[73].mxu0  ;;  %12971 = vmatprep.mubr.msk.bf16.mxu0 %vm3290_vm6, %v15750_v16 }
 0x179   :  { %v11003_v45 = vsel %vm1957_vm8, 1.0, %v14310_v0  ;;  %v15762_v52 = vpop.f32.mrb[74].mxu0 }
 0x17a   :  { %v15764_v15 = vpack.c.bf16 %v11003_v45, %v11002_v11  ;;  %v15768_v24 = vpop.f32.mrb[75].mxu0  ;;  %v1880_v9 = vpop.permute.xlu1 %1879 }
 0x17b   :  { %vm1958_vm9 = vcmp.eq.s32.totalorder %v15079_v6, %v1880_v9  ;;  %v1883_v40 = vpop.permute.xlu0 %1882 }
 0x17c   :  { %21966 = vst [vmem:[#allocation62_spill] sm:$0xff] %v15764_v15  ;;  %v11004_v16 = vsel %vm1958_vm9, 1.0, %v14310_v0  ;;  %vm1959_vm10 = vcmp.eq.s32.totalorder %v15079_v6, %v1883_v40 }
 0x17d   :  { %12972 = vmatmul.mubr.msk.bf16.gmra.mrb[180].mxu0 %vm3290_vm6, %v15764_v15  ;;  %v11005_v11 = vsel %vm1959_vm10, 1.0, %v14310_v0 }
 0x17e   :  { %v15778_v45 = vpack.c.bf16 %v11005_v11, %v11004_v16  ;;  %v1886_v17 = vpop.permute.xlu1 %1885 }
 0x17f   :  { %vm1960_vm11 = vcmp.eq.s32.totalorder %v15079_v6, %v1886_v17  ;;  %v1889_v25 = vpop.permute.xlu0 %1888  ;;  %v15781_v2 = vpop.f32.mrb[76].mxu0 }
 0x180   :  { %21967 = vst [vmem:[#allocation63_spill] sm:$0xff] %v15778_v45  ;;  %v11006_v9 = vsel %vm1960_vm11, 1.0, %v14310_v0  ;;  %vm1961_vm12 = vcmp.eq.s32.totalorder %v15079_v6, %v1889_v25  ;;  %v15785_v38 = vpop.f32.mrb[77].mxu0  ;;  %12975 = vmatprep.mubr.msk.bf16.mxu0 %vm3290_vm6, %v15778_v45 }
 0x181   :  { %v11007_v40 = vsel %vm1961_vm12, 1.0, %v14310_v0  ;;  %v15790_v15 = vpop.f32.mrb[78].mxu0 }
 0x182   :  { %v15792_v16 = vpack.c.bf16 %v11007_v40, %v11006_v9  ;;  %v15796_v11 = vpop.f32.mrb[79].mxu0  ;;  %v1892_v47 = vpop.permute.xlu1 %1891 }
 0x183   :  { %vm1962_vm13 = vcmp.eq.s32.totalorder %v15079_v6, %v1892_v47  ;;  %v1895_v55 = vpop.permute.xlu0 %1894 }
 0x184   :  { %21968 = vst [vmem:[#allocation64_spill] sm:$0xff] %v15792_v16  ;;  %v11008_v45 = vsel %vm1962_vm13, 1.0, %v14310_v0  ;;  %vm1963_vm14 = vcmp.eq.s32.totalorder %v15079_v6, %v1895_v55 }
 0x185   :  { %12976 = vmatmul.mubr.msk.bf16.gmra.mrb[184].mxu0 %vm3290_vm6, %v15792_v16  ;;  %v11009_v9 = vsel %vm1963_vm14, 1.0, %v14310_v0 }
 0x186   :  { %v15806_v40 = vpack.c.bf16 %v11009_v9, %v11008_v45  ;;  %v1898_v17 = vpop.permute.xlu1 %1897 }
 0x187   :  { %vm1964_vm15 = vcmp.eq.s32.totalorder %v15079_v6, %v1898_v17  ;;  %v1901_v60 = vpop.permute.xlu0 %1900  ;;  %v15809_v22 = vpop.f32.mrb[80].mxu0 }
 0x188   :  { %21969 = vst [vmem:[#allocation65_spill] sm:$0xff] %v15806_v40  ;;  %v11010_v47 = vsel %vm1964_vm15, 1.0, %v14310_v0  ;;  %vm1965_vm0 = vcmp.eq.s32.totalorder %v15079_v6, %v1901_v60  ;;  %v15813_v25 = vpop.f32.mrb[81].mxu0  ;;  %12979 = vmatprep.mubr.msk.bf16.mxu0 %vm3290_vm6, %v15806_v40 }
 0x189   :  { %v11011_v55 = vsel %vm1965_vm0, 1.0, %v14310_v0  ;;  %v15818_v16 = vpop.f32.mrb[82].mxu0 }
 0x18a   :  { %v15820_v45 = vpack.c.bf16 %v11011_v55, %v11010_v47  ;;  %v15824_v9 = vpop.f32.mrb[83].mxu0 }
 0x18c   :  { %21970 = vst [vmem:[#allocation66_spill] sm:$0xff] %v15820_v45 }
 0x18d   :  { %12980 = vmatmul.mubr.msk.bf16.gmra.mrb[188].mxu0 %vm3290_vm6, %v15820_v45 }
 0x18f   :  { %v15830_v60 = vpop.f32.mrb[84].mxu0 }
 0x190   :  { %v15832_v40 = vpop.f32.mrb[85].mxu0 }
 0x191   :  { %v15834_v0 = vpop.f32.mrb[86].mxu0 }
 0x192   :  { %v15838_v55 = vpop.f32.mrb[87].mxu0 }
 0x197   :  { %v15842_v35 = vpop.f32.mrb[88].mxu0 }
 0x198   :  { %v15844_v12 = vpop.f32.mrb[89].mxu0 }
 0x199   :  { %v15846_v14 = vpop.f32.mrb[90].mxu0 }
 0x19a   :  { %v15850_v7 = vpop.f32.mrb[91].mxu0 }
 0x19f   :  { %v15854_v47 = vpop.f32.mrb[92].mxu0 }
 0x1a0   :  { %v15856_v36 = vpop.f32.mrb[93].mxu0 }
 0x1a1   :  { %v15858_v62 = vpop.f32.mrb[94].mxu0 }
 0x1a2   :  { %v15862_v34 = vpop.f32.mrb[95].mxu0 }
 0x1a7   :  { %v15866_v45 = vpop.f32.mrb[96].mxu0 }
 0x1a8   :  { %v15868_v46 = vpop.f32.mrb[97].mxu0 }
 0x1a9   :  { %v15870_v44 = vpop.f32.mrb[98].mxu0 }
 0x1aa   :  { %v15874_v56 = vpop.f32.mrb[99].mxu0 }
 0x1af   :  { %v15878_v17 = vpop.f32.mrb[100].mxu0 }
 0x1b0   :  { %v15880_v58 = vpop.f32.mrb[101].mxu0 }
 0x1b1   :  { %v15882_v27 = vpop.f32.mrb[102].mxu0 }
 0x1b2   :  { %v15886_v18 = vpop.f32.mrb[103].mxu0 }
 0x1b7   :  { %v15890_v20 = vpop.f32.mrb[104].mxu0 }
 0x1b8   :  { %21971 = vst [vmem:[#allocation67_spill] sm:$0xff] %v15890_v20  ;;  %v15892_v59 = vpop.f32.mrb[105].mxu0 }
 0x1b9   :  { %v15894_v50 = vpop.f32.mrb[106].mxu0 }
 0x1ba   :  { %21972 = vst [vmem:[#allocation68_spill] sm:$0xff] %v15894_v50  ;;  %v15898_v42 = vpop.f32.mrb[107].mxu0 }
 0x1c0   :  { %v15907_v4 = vpop.f32.mrb[108].mxu0  ;;  %v12777_v21 = vpop.f32.mrb[0].mxu1 }
 0x1c1   :  { %21973 = vst [vmem:[#allocation69_spill] sm:$0xff] %v15907_v4  ;;  %v15909_v5 = vpop.f32.mrb[109].mxu0  ;;  %v947_v61 = vadd.f32 %v12777_v21, %v15905_v48  ;;  %v938_v53 = vpop.f32.mrb[1].mxu1 }
 0x1c2   :  { %21974 = vst [vmem:[#allocation70_spill] sm:$0xff] %v15909_v5  ;;  %v15912_v49 = vpop.f32.mrb[110].mxu0  ;;  %v939_v3 = vadd.f32 %v15905_v48, %v938_v53  ;;  %v12778_v43 = vpop.f32.mrb[2].mxu1 }
 0x1c3   :  { %21975 = vst [vmem:[#allocation71_spill] sm:$0xff] %v15912_v49  ;;  %v15917_v39 = vpop.f32.mrb[111].mxu0  ;;  %v1195_v33 = vmax.f32 %v947_v61, 0.0  ;;  %v950_v29 = vadd.f32 %v12778_v43, %v15905_v48  ;;  %v941_v19 = vpop.f32.mrb[3].mxu1 }
 0x1c4   :  { %21976 = vst [vmem:[#allocation72_spill] sm:$0xff] %v15917_v39  ;;  %v942_v21 = vadd.f32 %v15905_v48, %v941_v19  ;;  %v1193_v28 = vmax.f32 %v939_v3, 0.0 }
 0x1c5   :  { %v1196_v10 = vmax.f32 %v950_v29, 0.0 }
 0x1c6   :  { %v1194_v6 = vmax.f32 %v942_v21, 0.0 }
 0x1c7   :  { %v15923_v51 = vpack.c.bf16 %v1196_v10, %v1195_v33 }
 0x1c8   :  { %v15925_v53 = vpop.f32.mrb[112].mxu0  ;;  %v15927_v31 = vpack.c.bf16 %v1194_v6, %v1193_v28  ;;  %v12781_v63 = vpop.f32.mrb[4].mxu1 }
 0x1c9   :  { %21977 = vst [vmem:[#allocation73_spill] sm:$0xff] %v15923_v51  ;;  %21978 = vst [vmem:[#allocation74_spill] sm:$0xff] %v15925_v53  ;;  %v15929_v4 = vpop.f32.mrb[113].mxu0  ;;  %v963_v43 = vadd.f32 %v12781_v63, %v15905_v48  ;;  %v954_v61 = vpop.f32.mrb[5].mxu1 }
 0x1ca   :  { %21979 = vst [vmem:[#allocation75_spill] sm:$0xff] %v15927_v31  ;;  %21980 = vst [vmem:[#allocation76_spill] sm:$0xff] %v15929_v4  ;;  %v15932_v49 = vpop.f32.mrb[114].mxu0  ;;  %v955_v23 = vadd.f32 %v15905_v48, %v954_v61  ;;  %v12782_v29 = vpop.f32.mrb[6].mxu1 }
 0x1cb   :  { %21981 = vst [vmem:[#allocation77_spill] sm:$0xff] %v15932_v49  ;;  %v15937_v10 = vpop.f32.mrb[115].mxu0  ;;  %v1199_v33 = vmax.f32 %v963_v43, 0.0  ;;  %v966_v6 = vadd.f32 %v12782_v29, %v15905_v48  ;;  %v957_v3 = vpop.f32.mrb[7].mxu1 }
 0x1cc   :  { %21982 = vst [vmem:[#allocation78_spill] sm:$0xff] %v15937_v10  ;;  %v958_v63 = vadd.f32 %v15905_v48, %v957_v3  ;;  %v1197_v51 = vmax.f32 %v955_v23, 0.0 }
 0x1cd   :  { %v1200_v21 = vmax.f32 %v966_v6, 0.0 }
 0x1ce   :  { %v1198_v31 = vmax.f32 %v958_v63, 0.0 }
 0x1cf   :  { %v15943_v5 = vpack.c.bf16 %v1200_v21, %v1199_v33  ;;  %v15966_v21 = vld [vmem:[%s21167_s8] sm:$0xff]  }
 0x1d0   :  { %v15945_v61 = vpop.f32.mrb[116].mxu0  ;;  %v15947_v19 = vpack.c.bf16 %v1198_v31, %v1197_v51  ;;  %v12785_v53 = vpop.f32.mrb[8].mxu1  ;;  %13049 = vmatprep.subr.bf16.mxu0 %v15966_v21 }
 0x1d1   :  { %21983 = vst [vmem:[#allocation79_spill] sm:$0xff] %v15943_v5  ;;  %21984 = vst [vmem:[#allocation80_spill] sm:$0xff] %v15945_v61  ;;  %v15949_v49 = vpop.f32.mrb[117].mxu0  ;;  %v979_v43 = vadd.f32 %v12785_v53, %v15905_v48  ;;  %v970_v29 = vpop.f32.mrb[9].mxu1 }
 0x1d2   :  { %21985 = vst [vmem:[#allocation81_spill] sm:$0xff] %v15947_v19  ;;  %21986 = vst [vmem:[#allocation82_spill] sm:$0xff] %v15949_v49  ;;  %v15952_v39 = vpop.f32.mrb[118].mxu0  ;;  %v971_v28 = vadd.f32 %v15905_v48, %v970_v29  ;;  %v12786_v6 = vpop.f32.mrb[10].mxu1 }
 0x1d3   :  { %21987 = vst [vmem:[#allocation83_spill] sm:$0xff] %v15952_v39  ;;  %v15957_v33 = vpop.f32.mrb[119].mxu0  ;;  %v1203_v3 = vmax.f32 %v979_v43, 0.0  ;;  %v982_v51 = vadd.f32 %v12786_v6, %v15905_v48  ;;  %v973_v63 = vpop.f32.mrb[11].mxu1 }
 0x1d4   :  { %21988 = vst [vmem:[#allocation84_spill] sm:$0xff] %v15957_v33  ;;  %v974_v53 = vadd.f32 %v15905_v48, %v973_v63  ;;  %v1201_v5 = vmax.f32 %v971_v28, 0.0 }
 0x1d5   :  { %v1204_v29 = vmax.f32 %v982_v51, 0.0 }
 0x1d6   :  { %v1202_v23 = vmax.f32 %v974_v53, 0.0 }
 0x1d7   :  { %v15969_v19 = vpack.c.bf16 %v1204_v29, %v1203_v3 }
 0x1d8   :  { %v15971_v43 = vpop.f32.mrb[120].mxu0  ;;  %v15973_v6 = vpack.c.bf16 %v1202_v23, %v1201_v5  ;;  %v12789_v31 = vpop.f32.mrb[12].mxu1 }
 0x1d9   :  { %21989 = vst [vmem:[#allocation85_spill] sm:$0xff] %v15969_v19  ;;  %21990 = vst [vmem:[#allocation86_spill] sm:$0xff] %v15971_v43  ;;  %v15975_v61 = vpop.f32.mrb[121].mxu0  ;;  %v995_v63 = vadd.f32 %v12789_v31, %v15905_v48  ;;  %v986_v39 = vpop.f32.mrb[13].mxu1 }
 0x1da   :  { %21991 = vst [vmem:[#allocation87_spill] sm:$0xff] %v15973_v6  ;;  %21992 = vst [vmem:[#allocation88_spill] sm:$0xff] %v15975_v61  ;;  %v15978_v49 = vpop.f32.mrb[122].mxu0  ;;  %v987_v51 = vadd.f32 %v15905_v48, %v986_v39  ;;  %v12790_v53 = vpop.f32.mrb[14].mxu1 }
 0x1db   :  { %21993 = vst [vmem:[#allocation89_spill] sm:$0xff] %v15978_v49  ;;  %v15983_v3 = vpop.f32.mrb[123].mxu0  ;;  %v1207_v29 = vmax.f32 %v995_v63, 0.0  ;;  %v998_v5 = vadd.f32 %v12790_v53, %v15905_v48  ;;  %v989_v19 = vpop.f32.mrb[15].mxu1 }
 0x1dc   :  { %21994 = vst [vmem:[#allocation90_spill] sm:$0xff] %v15983_v3  ;;  %v990_v31 = vadd.f32 %v15905_v48, %v989_v19  ;;  %v1205_v33 = vmax.f32 %v987_v51, 0.0 }
 0x1dd   :  { %v1208_v6 = vmax.f32 %v998_v5, 0.0 }
 0x1de   :  { %v1206_v4 = vmax.f32 %v990_v31, 0.0 }
 0x1df   :  { %v15989_v10 = vpack.c.bf16 %v1208_v6, %v1207_v29 }
 0x1e0   :  { %v15991_v39 = vpop.f32.mrb[124].mxu0  ;;  %v15993_v28 = vpack.c.bf16 %v1206_v4, %v1205_v33  ;;  %v12793_v43 = vpop.f32.mrb[16].mxu1 }
 0x1e1   :  { %21995 = vst [vmem:[#allocation91_spill] sm:$0xff] %v15989_v10  ;;  %21996 = vst [vmem:[#allocation92_spill] sm:$0xff] %v15991_v39  ;;  %v15995_v49 = vpop.f32.mrb[125].mxu0  ;;  %v1011_v63 = vadd.f32 %v12793_v43, %v15905_v48  ;;  %v1002_v53 = vpop.f32.mrb[17].mxu1 }
 0x1e2   :  { %21997 = vst [vmem:[#allocation93_spill] sm:$0xff] %v15993_v28  ;;  %21998 = vst [vmem:[#allocation94_spill] sm:$0xff] %v15995_v49  ;;  %v15998_v20 = vpop.f32.mrb[126].mxu0  ;;  %v1003_v23 = vadd.f32 %v15905_v48, %v1002_v53  ;;  %v12794_v51 = vpop.f32.mrb[18].mxu1 }
 0x1e3   :  { %21999 = vst [vmem:[#allocation95_spill] sm:$0xff] %v15998_v20  ;;  %v16003_v6 = vpop.f32.mrb[127].mxu0  ;;  %v1211_v29 = vmax.f32 %v1011_v63, 0.0  ;;  %v1014_v4 = vadd.f32 %v12794_v51, %v15905_v48  ;;  %v1005_v5 = vpop.f32.mrb[19].mxu1 }
 0x1e4   :  { %22000 = vst [vmem:[#allocation96_spill] sm:$0xff] %v16003_v6  ;;  %v1006_v43 = vadd.f32 %v15905_v48, %v1005_v5  ;;  %v1209_v10 = vmax.f32 %v1003_v23, 0.0 }
 0x1e5   :  { %v1212_v31 = vmax.f32 %v1014_v4, 0.0 }
 0x1e6   :  { %v1210_v28 = vmax.f32 %v1006_v43, 0.0 }
 0x1e7   :  { %v16009_v61 = vpack.c.bf16 %v1212_v31, %v1211_v29 }
 0x1e8   :  { %v12921_v53 = vpop.f32.mrb[128].mxu0  ;;  %v16011_v3 = vpack.c.bf16 %v1210_v28, %v1209_v10  ;;  %v12797_v19 = vpop.f32.mrb[20].mxu1 }
 0x1e9   :  { %22001 = vst [vmem:[#allocation97_spill] sm:$0xff] %v16009_v61  ;;  %v3806_v39 = vpop.f32.mrb[129].mxu0  ;;  %v1027_v63 = vadd.f32 %v12797_v19, %v15905_v48  ;;  %v1018_v20 = vpop.f32.mrb[21].mxu1 }
 0x1ea   :  { %v12922_v51 = vpop.f32.mrb[130].mxu0  ;;  %v1019_v50 = vadd.f32 %v15905_v48, %v1018_v20  ;;  %v12798_v49 = vpop.f32.mrb[22].mxu1 }
 0x1eb   :  { %v4103_v33 = vpack.c.bf16 %v12922_v51, %v12921_v53  ;;  %v3809_v6 = vpop.f32.mrb[131].mxu0  ;;  %v1215_v4 = vmax.f32 %v1027_v63, 0.0  ;;  %v1030_v23 = vadd.f32 %v12798_v49, %v15905_v48  ;;  %v1021_v29 = vpop.f32.mrb[23].mxu1 }
 0x1ec   :  { %v4102_v5 = vpack.c.bf16 %v3809_v6, %v3806_v39  ;;  %v1022_v10 = vadd.f32 %v15905_v48, %v1021_v29  ;;  %v1213_v43 = vmax.f32 %v1019_v50, 0.0 }
 0x1ed   :  { %v1216_v28 = vmax.f32 %v1030_v23, 0.0 }
 0x1ee   :  { %12985 = vmatprep.mubr.msk.bf16.mxu0 %vm4140_vm1, %v4102_v5  ;;  %v1214_v19 = vmax.f32 %v1022_v10, 0.0 }
 0x1ef   :  { %12986 = vmatmul.mubr.msk.bf16.vlgmr.msra.gmra.mrb[192].mxu0 %vm4140_vm1, %v4103_v33  ;;  %v16019_v31 = vpack.c.bf16 %v1216_v28, %v1215_v4 }
 0x1f0   :  { %v12925_v20 = vpop.f32.mrb[132].mxu0  ;;  %13050 = vmatpush3.bf16.msra.mxu0 %v15966_v21  ;;  %v16022_v53 = vpack.c.bf16 %v1214_v19, %v1213_v43  ;;  %v12801_v63 = vpop.f32.mrb[24].mxu1 }
 0x1f1   :  { %22002 = vst [vmem:[#allocation98_spill] sm:$0xff] %v16019_v31  ;;  %v3822_v49 = vpop.f32.mrb[133].mxu0  ;;  %v1043_v39 = vadd.f32 %v12801_v63, %v15905_v48  ;;  %v1034_v6 = vpop.f32.mrb[25].mxu1 }
 0x1f2   :  { %22003 = vst [vmem:[#allocation99_spill] sm:$0xff] %v16022_v53  ;;  %v12926_v51 = vpop.f32.mrb[134].mxu0  ;;  %v1035_v23 = vadd.f32 %v15905_v48, %v1034_v6  ;;  %v12802_v29 = vpop.f32.mrb[26].mxu1 }
 0x1f3   :  { %v3825_v50 = vpop.f32.mrb[135].mxu0  ;;  %v4105_v5 = vpack.c.bf16 %v12926_v51, %v12925_v20  ;;  %v1219_v10 = vmax.f32 %v1043_v39, 0.0  ;;  %v1046_v33 = vadd.f32 %v12802_v29, %v15905_v48  ;;  %v1037_v4 = vpop.f32.mrb[27].mxu1 }
 0x1f4   :  { %v4104_v28 = vpack.c.bf16 %v3825_v50, %v3822_v49  ;;  %v1038_v21 = vadd.f32 %v15905_v48, %v1037_v4  ;;  %v1217_v19 = vmax.f32 %v1035_v23, 0.0 }
 0x1f5   :  { %v1220_v43 = vmax.f32 %v1046_v33, 0.0 }
 0x1f6   :  { %12989 = vmatprep.mubr.msk.bf16.mxu0 %vm4140_vm1, %v4104_v28  ;;  %v1218_v31 = vmax.f32 %v1038_v21, 0.0 }
 0x1f7   :  { %12990 = vmatmul.mubr.msk.bf16.gmra.mrb[196].mxu0 %vm4140_vm1, %v4105_v5  ;;  %v16030_v63 = vpack.c.bf16 %v1220_v43, %v1219_v10 }
 0x1f8   :  { %v12929_v6 = vpop.f32.mrb[136].mxu0  ;;  %v16032_v53 = vpack.c.bf16 %v1218_v31, %v1217_v19  ;;  %v12805_v20 = vpop.f32.mrb[28].mxu1 }
 0x1f9   :  { %22004 = vst [vmem:[#allocation100_spill] sm:$0xff] %v16030_v63  ;;  %v3838_v39 = vpop.f32.mrb[137].mxu0  ;;  %v1059_v51 = vadd.f32 %v12805_v20, %v15905_v48  ;;  %v1050_v29 = vpop.f32.mrb[29].mxu1 }
 0x1fa   :  { %22005 = vst [vmem:[#allocation101_spill] sm:$0xff] %v16032_v53  ;;  %v12930_v49 = vpop.f32.mrb[138].mxu0  ;;  %v1051_v50 = vadd.f32 %v15905_v48, %v1050_v29  ;;  %v12806_v33 = vpop.f32.mrb[30].mxu1 }
 0x1fb   :  { %v3841_v4 = vpop.f32.mrb[139].mxu0  ;;  %v4107_v28 = vpack.c.bf16 %v12930_v49, %v12929_v6  ;;  %v1223_v23 = vmax.f32 %v1059_v51, 0.0  ;;  %v1062_v21 = vadd.f32 %v12806_v33, %v15905_v48  ;;  %v1053_v5 = vpop.f32.mrb[31].mxu1 }
 0x1fc   :  { %v4106_v10 = vpack.c.bf16 %v3841_v4, %v3838_v39  ;;  %v1054_v43 = vadd.f32 %v15905_v48, %v1053_v5  ;;  %v1221_v19 = vmax.f32 %v1051_v50, 0.0 }
 0x1fd   :  { %v1224_v31 = vmax.f32 %v1062_v21, 0.0 }
 0x1fe   :  { %12993 = vmatprep.mubr.msk.bf16.mxu0 %vm4140_vm1, %v4106_v10  ;;  %v1222_v63 = vmax.f32 %v1054_v43, 0.0 }
 0x1ff   :  { %12994 = vmatmul.mubr.msk.bf16.gmra.mrb[200].mxu0 %vm4140_vm1, %v4107_v28  ;;  %v16040_v20 = vpack.c.bf16 %v1224_v31, %v1223_v23 }
 0x200   :  { %v12933_v29 = vpop.f32.mrb[140].mxu0  ;;  %v16042_v53 = vpack.c.bf16 %v1222_v63, %v1221_v19  ;;  %v12809_v6 = vpop.f32.mrb[32].mxu1 }
 0x201   :  { %22006 = vst [vmem:[#allocation102_spill] sm:$0xff] %v16040_v20  ;;  %v3854_v51 = vpop.f32.mrb[141].mxu0  ;;  %v1075_v49 = vadd.f32 %v12809_v6, %v15905_v48  ;;  %v1066_v33 = vpop.f32.mrb[33].mxu1 }
 0x202   :  { %22007 = vst [vmem:[#allocation103_spill] sm:$0xff] %v16042_v53  ;;  %v12934_v39 = vpop.f32.mrb[142].mxu0  ;;  %v1067_v4 = vadd.f32 %v15905_v48, %v1066_v33  ;;  %v12810_v21 = vpop.f32.mrb[34].mxu1 }
 0x203   :  { %v3857_v5 = vpop.f32.mrb[143].mxu0  ;;  %v4109_v10 = vpack.c.bf16 %v12934_v39, %v12933_v29  ;;  %v1227_v50 = vmax.f32 %v1075_v49, 0.0  ;;  %v1078_v43 = vadd.f32 %v12810_v21, %v15905_v48  ;;  %v1069_v28 = vpop.f32.mrb[35].mxu1 }
 0x204   :  { %v4108_v23 = vpack.c.bf16 %v3857_v5, %v3854_v51  ;;  %v1070_v31 = vadd.f32 %v15905_v48, %v1069_v28  ;;  %v1225_v19 = vmax.f32 %v1067_v4, 0.0 }
 0x205   :  { %v1228_v63 = vmax.f32 %v1078_v43, 0.0 }
 0x206   :  { %12997 = vmatprep.mubr.msk.bf16.mxu0 %vm4140_vm1, %v4108_v23  ;;  %v1226_v20 = vmax.f32 %v1070_v31, 0.0 }
 0x207   :  { %12998 = vmatmul.mubr.msk.bf16.gmra.mrb[204].mxu0 %vm4140_vm1, %v4109_v10  ;;  %v16050_v6 = vpack.c.bf16 %v1228_v63, %v1227_v50 }
 0x208   :  { %v12937_v33 = vpop.f32.mrb[144].mxu0  ;;  %v16052_v53 = vpack.c.bf16 %v1226_v20, %v1225_v19  ;;  %v12813_v29 = vpop.f32.mrb[36].mxu1 }
 0x209   :  { %22008 = vst [vmem:[#allocation104_spill] sm:$0xff] %v16050_v6  ;;  %v3870_v49 = vpop.f32.mrb[145].mxu0  ;;  %v1091_v39 = vadd.f32 %v12813_v29, %v15905_v48  ;;  %v1082_v21 = vpop.f32.mrb[37].mxu1 }
 0x20a   :  { %22009 = vst [vmem:[#allocation105_spill] sm:$0xff] %v16052_v53  ;;  %v12938_v51 = vpop.f32.mrb[146].mxu0  ;;  %v1083_v5 = vadd.f32 %v15905_v48, %v1082_v21  ;;  %v12814_v43 = vpop.f32.mrb[38].mxu1 }
 0x20b   :  { %v3873_v28 = vpop.f32.mrb[147].mxu0  ;;  %v4111_v23 = vpack.c.bf16 %v12938_v51, %v12937_v33  ;;  %v1231_v4 = vmax.f32 %v1091_v39, 0.0  ;;  %v1094_v31 = vadd.f32 %v12814_v43, %v15905_v48  ;;  %v1085_v10 = vpop.f32.mrb[39].mxu1 }
 0x20c   :  { %v4110_v50 = vpack.c.bf16 %v3873_v28, %v3870_v49  ;;  %v1086_v63 = vadd.f32 %v15905_v48, %v1085_v10  ;;  %v1229_v19 = vmax.f32 %v1083_v5, 0.0 }
 0x20d   :  { %v1232_v20 = vmax.f32 %v1094_v31, 0.0 }
 0x20e   :  { %13001 = vmatprep.mubr.msk.bf16.mxu0 %vm4140_vm1, %v4110_v50  ;;  %v1230_v6 = vmax.f32 %v1086_v63, 0.0 }
 0x20f   :  { %13002 = vmatmul.mubr.msk.bf16.gmra.mrb[208].mxu0 %vm4140_vm1, %v4111_v23  ;;  %v16060_v29 = vpack.c.bf16 %v1232_v20, %v1231_v4 }
 0x210   :  { %v12941_v21 = vpop.f32.mrb[148].mxu0  ;;  %v16062_v53 = vpack.c.bf16 %v1230_v6, %v1229_v19  ;;  %v12817_v33 = vpop.f32.mrb[40].mxu1 }
 0x211   :  { %22010 = vst [vmem:[#allocation106_spill] sm:$0xff] %v16060_v29  ;;  %v3886_v39 = vpop.f32.mrb[149].mxu0  ;;  %v1107_v51 = vadd.f32 %v12817_v33, %v15905_v48  ;;  %v1098_v43 = vpop.f32.mrb[41].mxu1 }
 0x212   :  { %22011 = vst [vmem:[#allocation107_spill] sm:$0xff] %v16062_v53  ;;  %v12942_v49 = vpop.f32.mrb[150].mxu0  ;;  %v1099_v28 = vadd.f32 %v15905_v48, %v1098_v43  ;;  %v12818_v31 = vpop.f32.mrb[42].mxu1 }
 0x213   :  { %v3889_v10 = vpop.f32.mrb[151].mxu0  ;;  %v4113_v50 = vpack.c.bf16 %v12942_v49, %v12941_v21  ;;  %v1235_v5 = vmax.f32 %v1107_v51, 0.0  ;;  %v1110_v63 = vadd.f32 %v12818_v31, %v15905_v48  ;;  %v1101_v23 = vpop.f32.mrb[43].mxu1 }
 0x214   :  { %v4112_v4 = vpack.c.bf16 %v3889_v10, %v3886_v39  ;;  %v1102_v20 = vadd.f32 %v15905_v48, %v1101_v23  ;;  %v1233_v19 = vmax.f32 %v1099_v28, 0.0 }
 0x215   :  { %v1236_v6 = vmax.f32 %v1110_v63, 0.0 }
 0x216   :  { %13005 = vmatprep.mubr.msk.bf16.mxu0 %vm4140_vm1, %v4112_v4  ;;  %v1234_v29 = vmax.f32 %v1102_v20, 0.0 }
 0x217   :  { %13006 = vmatmul.mubr.msk.bf16.gmra.mrb[212].mxu0 %vm4140_vm1, %v4113_v50  ;;  %v16070_v33 = vpack.c.bf16 %v1236_v6, %v1235_v5 }
 0x218   :  { %v12945_v43 = vpop.f32.mrb[152].mxu0  ;;  %v16072_v53 = vpack.c.bf16 %v1234_v29, %v1233_v19  ;;  %v12821_v21 = vpop.f32.mrb[44].mxu1 }
 0x219   :  { %22012 = vst [vmem:[#allocation108_spill] sm:$0xff] %v16070_v33  ;;  %v3902_v51 = vpop.f32.mrb[153].mxu0  ;;  %v1123_v49 = vadd.f32 %v12821_v21, %v15905_v48  ;;  %v1114_v31 = vpop.f32.mrb[45].mxu1 }
 0x21a   :  { %22013 = vst [vmem:[#allocation109_spill] sm:$0xff] %v16072_v53  ;;  %v12946_v39 = vpop.f32.mrb[154].mxu0  ;;  %v1115_v10 = vadd.f32 %v15905_v48, %v1114_v31  ;;  %v12822_v63 = vpop.f32.mrb[46].mxu1 }
 0x21b   :  { %v3905_v23 = vpop.f32.mrb[155].mxu0  ;;  %v4115_v4 = vpack.c.bf16 %v12946_v39, %v12945_v43  ;;  %v1239_v28 = vmax.f32 %v1123_v49, 0.0  ;;  %v1126_v20 = vadd.f32 %v12822_v63, %v15905_v48  ;;  %v1117_v50 = vpop.f32.mrb[47].mxu1 }
 0x21c   :  { %v4114_v5 = vpack.c.bf16 %v3905_v23, %v3902_v51  ;;  %v1118_v6 = vadd.f32 %v15905_v48, %v1117_v50  ;;  %v1237_v19 = vmax.f32 %v1115_v10, 0.0 }
 0x21d   :  { %v1240_v29 = vmax.f32 %v1126_v20, 0.0 }
 0x21e   :  { %13009 = vmatprep.mubr.msk.bf16.mxu0 %vm4140_vm1, %v4114_v5  ;;  %v1238_v33 = vmax.f32 %v1118_v6, 0.0 }
 0x21f   :  { %13010 = vmatmul.mubr.msk.bf16.gmra.mrb[216].mxu0 %vm4140_vm1, %v4115_v4  ;;  %v16080_v21 = vpack.c.bf16 %v1240_v29, %v1239_v28 }
 0x220   :  { %v12949_v31 = vpop.f32.mrb[156].mxu0  ;;  %v16082_v53 = vpack.c.bf16 %v1238_v33, %v1237_v19  ;;  %v12825_v43 = vpop.f32.mrb[48].mxu1 }
 0x221   :  { %22014 = vst [vmem:[#allocation110_spill] sm:$0xff] %v16080_v21  ;;  %v3918_v49 = vpop.f32.mrb[157].mxu0  ;;  %v1139_v39 = vadd.f32 %v12825_v43, %v15905_v48  ;;  %v1130_v63 = vpop.f32.mrb[49].mxu1 }
 0x222   :  { %22015 = vst [vmem:[#allocation111_spill] sm:$0xff] %v16082_v53  ;;  %v12950_v51 = vpop.f32.mrb[158].mxu0  ;;  %v1131_v23 = vadd.f32 %v15905_v48, %v1130_v63  ;;  %v12826_v20 = vpop.f32.mrb[50].mxu1 }
 0x223   :  { %v3921_v50 = vpop.f32.mrb[159].mxu0  ;;  %v4117_v5 = vpack.c.bf16 %v12950_v51, %v12949_v31  ;;  %v1243_v10 = vmax.f32 %v1139_v39, 0.0  ;;  %v1142_v6 = vadd.f32 %v12826_v20, %v15905_v48  ;;  %v1133_v4 = vpop.f32.mrb[51].mxu1 }
 0x224   :  { %v4116_v28 = vpack.c.bf16 %v3921_v50, %v3918_v49  ;;  %v1134_v29 = vadd.f32 %v15905_v48, %v1133_v4  ;;  %v1241_v19 = vmax.f32 %v1131_v23, 0.0 }
 0x225   :  { %v1244_v33 = vmax.f32 %v1142_v6, 0.0 }
 0x226   :  { %13013 = vmatprep.mubr.msk.bf16.mxu0 %vm4140_vm1, %v4116_v28  ;;  %v1242_v21 = vmax.f32 %v1134_v29, 0.0 }
 0x227   :  { %13014 = vmatmul.mubr.msk.bf16.gmra.mrb[220].mxu0 %vm4140_vm1, %v4117_v5  ;;  %v16090_v43 = vpack.c.bf16 %v1244_v33, %v1243_v10 }
 0x228   :  { %v12953_v63 = vpop.f32.mrb[160].mxu0  ;;  %v16092_v53 = vpack.c.bf16 %v1242_v21, %v1241_v19  ;;  %v12829_v31 = vpop.f32.mrb[52].mxu1 }
 0x229   :  { %22016 = vst [vmem:[#allocation112_spill] sm:$0xff] %v16090_v43  ;;  %v3934_v39 = vpop.f32.mrb[161].mxu0  ;;  %v1155_v51 = vadd.f32 %v12829_v31, %v15905_v48  ;;  %v1146_v20 = vpop.f32.mrb[53].mxu1 }
 0x22a   :  { %22017 = vst [vmem:[#allocation113_spill] sm:$0xff] %v16092_v53  ;;  %v12954_v49 = vpop.f32.mrb[162].mxu0  ;;  %v1147_v50 = vadd.f32 %v15905_v48, %v1146_v20  ;;  %v12830_v6 = vpop.f32.mrb[54].mxu1 }
 0x22b   :  { %v3937_v4 = vpop.f32.mrb[163].mxu0  ;;  %v4119_v28 = vpack.c.bf16 %v12954_v49, %v12953_v63  ;;  %v1247_v23 = vmax.f32 %v1155_v51, 0.0  ;;  %v1158_v29 = vadd.f32 %v12830_v6, %v15905_v48  ;;  %v1149_v5 = vpop.f32.mrb[55].mxu1 }
 0x22c   :  { %v4118_v10 = vpack.c.bf16 %v3937_v4, %v3934_v39  ;;  %v1150_v33 = vadd.f32 %v15905_v48, %v1149_v5  ;;  %v1245_v19 = vmax.f32 %v1147_v50, 0.0 }
 0x22d   :  { %v1248_v21 = vmax.f32 %v1158_v29, 0.0 }
 0x22e   :  { %13017 = vmatprep.mubr.msk.bf16.mxu0 %vm4140_vm1, %v4118_v10  ;;  %v1246_v43 = vmax.f32 %v1150_v33, 0.0 }
 0x22f   :  { %13018 = vmatmul.mubr.msk.bf16.gmra.mrb[224].mxu0 %vm4140_vm1, %v4119_v28  ;;  %v16100_v31 = vpack.c.bf16 %v1248_v21, %v1247_v23 }
 0x230   :  { %v12957_v20 = vpop.f32.mrb[164].mxu0  ;;  %v16102_v53 = vpack.c.bf16 %v1246_v43, %v1245_v19  ;;  %v12833_v63 = vpop.f32.mrb[56].mxu1 }
 0x231   :  { %22018 = vst [vmem:[#allocation114_spill] sm:$0xff] %v16100_v31  ;;  %v3950_v51 = vpop.f32.mrb[165].mxu0  ;;  %v1171_v49 = vadd.f32 %v12833_v63, %v15905_v48  ;;  %v1162_v6 = vpop.f32.mrb[57].mxu1 }
 0x232   :  { %22019 = vst [vmem:[#allocation115_spill] sm:$0xff] %v16102_v53  ;;  %v12958_v39 = vpop.f32.mrb[166].mxu0  ;;  %v1163_v4 = vadd.f32 %v15905_v48, %v1162_v6  ;;  %v12834_v29 = vpop.f32.mrb[58].mxu1 }
 0x233   :  { %v3953_v5 = vpop.f32.mrb[167].mxu0  ;;  %v4121_v10 = vpack.c.bf16 %v12958_v39, %v12957_v20  ;;  %v1251_v50 = vmax.f32 %v1171_v49, 0.0  ;;  %v1174_v33 = vadd.f32 %v12834_v29, %v15905_v48  ;;  %v1165_v28 = vpop.f32.mrb[59].mxu1 }
 0x234   :  { %v4120_v23 = vpack.c.bf16 %v3953_v5, %v3950_v51  ;;  %v1166_v21 = vadd.f32 %v15905_v48, %v1165_v28  ;;  %v1249_v19 = vmax.f32 %v1163_v4, 0.0 }
 0x235   :  { %v1252_v43 = vmax.f32 %v1174_v33, 0.0 }
 0x236   :  { %13021 = vmatprep.mubr.msk.bf16.mxu0 %vm4140_vm1, %v4120_v23  ;;  %v1250_v31 = vmax.f32 %v1166_v21, 0.0 }
 0x237   :  { %13022 = vmatmul.mubr.msk.bf16.gmra.mrb[228].mxu0 %vm4140_vm1, %v4121_v10  ;;  %v16110_v63 = vpack.c.bf16 %v1252_v43, %v1251_v50 }
 0x238   :  { %v12961_v6 = vpop.f32.mrb[168].mxu0  ;;  %v16112_v53 = vpack.c.bf16 %v1250_v31, %v1249_v19  ;;  %v12837_v20 = vpop.f32.mrb[60].mxu1 }
 0x239   :  { %22020 = vst [vmem:[#allocation116_spill] sm:$0xff] %v16110_v63  ;;  %v3966_v49 = vpop.f32.mrb[169].mxu0  ;;  %v1187_v39 = vadd.f32 %v12837_v20, %v15905_v48  ;;  %v1178_v29 = vpop.f32.mrb[61].mxu1 }
 0x23a   :  { %22021 = vst [vmem:[#allocation117_spill] sm:$0xff] %v16112_v53  ;;  %v12962_v51 = vpop.f32.mrb[170].mxu0  ;;  %v1179_v5 = vadd.f32 %v15905_v48, %v1178_v29  ;;  %v12838_v33 = vpop.f32.mrb[62].mxu1 }
 0x23b   :  { %v3969_v28 = vpop.f32.mrb[171].mxu0  ;;  %v4123_v23 = vpack.c.bf16 %v12962_v51, %v12961_v6  ;;  %v1255_v4 = vmax.f32 %v1187_v39, 0.0  ;;  %v1190_v21 = vadd.f32 %v12838_v33, %v15905_v48  ;;  %v1181_v10 = vpop.f32.mrb[63].mxu1 }
 0x23c   :  { %v4122_v50 = vpack.c.bf16 %v3969_v28, %v3966_v49  ;;  %v1182_v43 = vadd.f32 %v15905_v48, %v1181_v10  ;;  %v1253_v19 = vmax.f32 %v1179_v5, 0.0  ;;  %v14294_v10 = vld [vmem:[%s21168_s10] sm:$0xff]  }
 0x23d   :  { %v1256_v31 = vmax.f32 %v1190_v21, 0.0  ;;  %13115 = vmatprep.subr.bf16.mxu0 %v14294_v10 }
 0x23e   :  { %13025 = vmatprep.mubr.msk.bf16.mxu0 %vm4140_vm1, %v4122_v50  ;;  %v1254_v63 = vmax.f32 %v1182_v43, 0.0 }
 0x23f   :  { %13026 = vmatmul.mubr.msk.bf16.gmra.mrb[232].mxu0 %vm4140_vm1, %v4123_v23  ;;  %v16120_v20 = vpack.c.bf16 %v1256_v31, %v1255_v4 }
 0x240   :  { %v12965_v29 = vpop.f32.mrb[172].mxu0  ;;  %v16122_v53 = vpack.c.bf16 %v1254_v63, %v1253_v19 }
 0x241   :  { %v3982_v6 = vpop.f32.mrb[173].mxu0 }
 0x242   :  { %v12966_v39 = vpop.f32.mrb[174].mxu0 }
 0x243   :  { %v3985_v51 = vpop.f32.mrb[175].mxu0  ;;  %v4125_v33 = vpack.c.bf16 %v12966_v39, %v12965_v29 }
 0x244   :  { %v4124_v61 = vpack.c.bf16 %v3985_v51, %v3982_v6 }
 0x246   :  { %13029 = vmatprep.mubr.msk.bf16.mxu0 %vm4140_vm1, %v4124_v61 }
 0x247   :  { %13030 = vmatmul.mubr.msk.bf16.gmra.mrb[236].mxu0 %vm4140_vm1, %v4125_v33 }
 0x248   :  { %v12969_v48 = vpop.f32.mrb[176].mxu0 }
 0x249   :  { %v3998_v49 = vpop.f32.mrb[177].mxu0 }
 0x24a   :  { %v12970_v5 = vpop.f32.mrb[178].mxu0 }
 0x24b   :  { %v4001_v28 = vpop.f32.mrb[179].mxu0  ;;  %v4127_v21 = vpack.c.bf16 %v12970_v5, %v12969_v48 }
 0x24c   :  { %v4126_v23 = vpack.c.bf16 %v4001_v28, %v3998_v49 }
 0x24e   :  { %13033 = vmatprep.mubr.msk.bf16.mxu0 %vm4140_vm1, %v4126_v23 }
 0x24f   :  { %13034 = vmatmul.mubr.msk.bf16.gmra.mrb[240].mxu0 %vm4140_vm1, %v4127_v21 }
 0x250   :  { %v12973_v63 = vpop.f32.mrb[180].mxu0 }
 0x251   :  { %v4014_v4 = vpop.f32.mrb[181].mxu0 }
 0x252   :  { %v12974_v50 = vpop.f32.mrb[182].mxu0 }
 0x253   :  { %v4017_v61 = vpop.f32.mrb[183].mxu0  ;;  %v4129_v43 = vpack.c.bf16 %v12974_v50, %v12973_v63  ;;  %v22022_v63 = vpack.c.bf16 %v15712_v41, %v15701_v26  ;;  %v22023_v50 = vpack.c.bf16 %v15706_v37, %v15697_v54  ;;  %v22025_v26 = vpack.c.bf16 %v15734_v30, %v15725_v13 }
 0x254   :  { %v4128_v31 = vpack.c.bf16 %v4017_v61, %v4014_v4  ;;  %v14295_v4 = vld [vmem:[%s21168_s10 + $0x8] sm:$0xff]   ;;  %v22024_v61 = vpack.c.bf16 %v15740_v57, %v15729_v32  ;;  %v22026_v41 = vpack.c.bf16 %v15768_v24, %v15757_v1  ;;  %v22027_v54 = vpack.c.bf16 %v15762_v52, %v15753_v8  ;;  %v22052_v24 = vld [vmem:[#allocation78_spill] sm:$0xff] }
 0x255   :  { %v22028_v37 = vpack.c.bf16 %v15796_v11, %v15785_v38  ;;  %v22029_v30 = vpack.c.bf16 %v15790_v15, %v15781_v2  ;;  %v22030_v13 = vpack.c.bf16 %v15824_v9, %v15813_v25  ;;  %v22031_v8 = vpack.c.bf16 %v15818_v16, %v15809_v22  ;;  %v22050_v15 = vld [vmem:[#allocation69_spill] sm:$0xff]  ;;  %v22053_v38 = vld [vmem:[#allocation76_spill] sm:$0xff]  ;;  %v22056_v16 = vld [vmem:[#allocation74_spill] sm:$0xff] }
 0x256   :  { %13037 = vmatprep.mubr.msk.bf16.mxu0 %vm4140_vm1, %v4128_v31  ;;  %v22032_v32 = vpack.c.bf16 %v15838_v55, %v15832_v40  ;;  %v22033_v2 = vpack.c.bf16 %v15834_v0, %v15830_v60  ;;  %v22034_v52 = vpack.c.bf16 %v15850_v7, %v15844_v12  ;;  %v22035_v22 = vpack.c.bf16 %v15846_v14, %v15842_v35  ;;  %v22046_v35 = vld [vmem:[#allocation72_spill] sm:$0xff]  ;;  %v22047_v12 = vld [vmem:[#allocation70_spill] sm:$0xff] }
 0x257   :  { %13038 = vmatmul.mubr.msk.bf16.gmra.mrb[244].mxu0 %vm4140_vm1, %v4129_v43  ;;  %v22036_v57 = vpack.c.bf16 %v15862_v34, %v15856_v36  ;;  %v22037_v1 = vpack.c.bf16 %v15858_v62, %v15854_v47  ;;  %v22038_v7 = vpack.c.bf16 %v15874_v56, %v15868_v46  ;;  %v22039_v14 = vpack.c.bf16 %v15870_v44, %v15866_v45  ;;  %v22043_v46 = vld [vmem:[#allocation68_spill] sm:$0xff]  ;;  %v22044_v36 = vld [vmem:[#allocation67_spill] sm:$0xff]  ;;  %v22059_v40 = vld [vmem:[#allocation82_spill] sm:$0xff] }
 0x258   :  { %v12977_v19 = vpop.f32.mrb[184].mxu0  ;;  %v22040_v34 = vpack.c.bf16 %v15886_v18, %v15880_v58  ;;  %v22041_v62 = vpack.c.bf16 %v15882_v27, %v15878_v17  ;;  %v22042_v56 = vpack.c.bf16 %v15898_v42, %v15892_v59  ;;  %v22045_v44 = vpack.c.bf16 %v22043_v46, %v22044_v36  ;;  %v22049_v58 = vld [vmem:[#allocation71_spill] sm:$0xff]  ;;  %v22055_v59 = vld [vmem:[#allocation77_spill] sm:$0xff]  ;;  %v22058_v25 = vld [vmem:[#allocation84_spill] sm:$0xff] }
 0x259   :  { %v4030_v29 = vpop.f32.mrb[185].mxu0  ;;  %v22048_v18 = vpack.c.bf16 %v22046_v35, %v22047_v12  ;;  %v22051_v27 = vpack.c.bf16 %v22049_v58, %v22050_v15  ;;  %v22054_v42 = vpack.c.bf16 %v22052_v24, %v22053_v38  ;;  %v22057_v11 = vpack.c.bf16 %v22055_v59, %v22056_v16  ;;  %v22061_v17 = vld [vmem:[#allocation83_spill] sm:$0xff]  ;;  %v22062_v9 = vld [vmem:[#allocation80_spill] sm:$0xff]  ;;  %v22064_v0 = vld [vmem:[#allocation90_spill] sm:$0xff] }
 0x25a   :  { %v12978_v6 = vpop.f32.mrb[186].mxu0  ;;  %v22060_v45 = vpack.c.bf16 %v22058_v25, %v22059_v40  ;;  %v22063_v60 = vpack.c.bf16 %v22061_v17, %v22062_v9  ;;  %v22065_v47 = vld [vmem:[#allocation88_spill] sm:$0xff]  ;;  %v22068_v43 = vld [vmem:[#allocation86_spill] sm:$0xff]  ;;  %v22083_v46 = vld [vmem:[#allocation91_spill] sm:$0xff] }
 0x25b   :  { %v4033_v39 = vpop.f32.mrb[187].mxu0  ;;  %v4131_v51 = vpack.c.bf16 %v12978_v6, %v12977_v19  ;;  %v22066_v55 = vpack.c.bf16 %v22064_v0, %v22065_v47  ;;  %v22070_v19 = vld [vmem:[#allocation96_spill] sm:$0xff]  ;;  %v16409_v36 = vld [vmem:[%s21169_s3 + $0x98] sm:$0xff]  ;;  %v16442_v15 = vld [vmem:[%s21169_s3 + $0xc0] sm:$0xff] }
 0x25c   :  { %v4130_v33 = vpack.c.bf16 %v4033_v39, %v4030_v29  ;;  %v22071_v29 = vld [vmem:[#allocation94_spill] sm:$0xff]  ;;  %v16426_v35 = vld [vmem:[%s21169_s3 + $0xb0] sm:$0xff]  ;;  %v22084_v12 = vld [vmem:[#allocation97_spill] sm:$0xff]  ;;  %vm3238_vm14 = vcmp.ge.s32.totalorder %v16442_v15, 0  ;;  %vm3233_vm15 = vcmp.ge.s32.totalorder %v16409_v36, 0 }
 0x25d   :  { %v22072_v6 = vpack.c.bf16 %v22070_v19, %v22071_v29  ;;  %v16267_v39 = vld [vmem:[%s21169_s3] sm:$0xff]  ;;  %v16437_v58 = vld [vmem:[%s21169_s3 + $0xb8] sm:$0xff]  ;;  %v16454_v24 = vld [vmem:[%s21169_s3 + $0xd0] sm:$0xff] }
 0x25e   :  { %13041 = vmatprep.mubr.msk.bf16.mxu0 %vm4140_vm1, %v4130_v33  ;;  %2127 = vperm.xlu1 %14288, %v16267_v39   ;;  %v22074_v33 = vld [vmem:[#allocation92_spill] sm:$0xff]  ;;  %v22086_v38 = vld [vmem:[#allocation98_spill] sm:$0xff]  ;;  %v16465_v59 = vld [vmem:[%s21169_s3 + $0xd8] sm:$0xff]  ;;  %vm3214_vm3 = vcmp.ge.s32.totalorder %v16267_v39, 0 }
 0x25f   :  { %13042 = vmatmul.mubr.msk.bf16.gmra.mrb[248].mxu0 %vm4140_vm1, %v4131_v51  ;;  %v22073_v51 = vld [vmem:[#allocation95_spill] sm:$0xff]  ;;  %v16470_v16 = vld [vmem:[%s21169_s3 + $0xe0] sm:$0xff]  ;;  %v16482_v25 = vld [vmem:[%s21169_s3 + $0xf0] sm:$0xff] }
 0x260   :  { %v12981_v48 = vpop.f32.mrb[188].mxu0  ;;  %v22088_v40 = vld [vmem:[#allocation100_spill] sm:$0xff]  ;;  %v16493_v17 = vld [vmem:[%s21169_s3 + $0xf8] sm:$0xff]  ;;  %v16498_v9 = vld [vmem:[%s21169_s3 + $0x100] sm:$0xff] }
 0x261   :  { %v4046_v49 = vpop.f32.mrb[189].mxu0  ;;  %v16510_v0 = vld [vmem:[%s21169_s3 + $0x110] sm:$0xff]  ;;  %v22090_v47 = vld [vmem:[#allocation102_spill] sm:$0xff] }
 0x262   :  { %v12982_v5 = vpop.f32.mrb[190].mxu0  ;;  %v16538_v19 = vld [vmem:[%s21169_s3 + $0x130] sm:$0xff] }
 0x263   :  { %v4049_v28 = vpop.f32.mrb[191].mxu0  ;;  %v4133_v21 = vpack.c.bf16 %v12982_v5, %v12981_v48  ;;  %v22075_v48 = vpack.c.bf16 %v22073_v51, %v22074_v33  ;;  %v16279_v5 = vld [vmem:[%s21169_s3 + $0x10] sm:$0xff]  ;;  %v16549_v51 = vld [vmem:[%s21169_s3 + $0x138] sm:$0xff]  ;;  %v16554_v33 = vld [vmem:[%s21169_s3 + $0x140] sm:$0xff] }
 0x264   :  { %v4132_v23 = vpack.c.bf16 %v4049_v28, %v4046_v49  ;;  %v22076_v49 = vld [vmem:[#allocation75_spill] sm:$0xff]  ;;  %2133 = vperm.xlu1 %14288, %v16279_v5   ;;  %v22092_v29 = vld [vmem:[#allocation104_spill] sm:$0xff]  ;;  %vm3216_vm10 = vcmp.ge.s32.totalorder %v16279_v5, 0 }
 0x265   :  { %v16284_v28 = vld [vmem:[%s21169_s3 + $0x8] sm:$0xff] }
 0x266   :  { %13045 = vmatprep.mubr.msk.bf16.mxu0 %vm4140_vm1, %v4132_v23  ;;  %2130 = vperm.xlu0 %14289, %v16284_v28   ;;  %v16296_v23 = vld [vmem:[%s21169_s3 + $0x20] sm:$0xff]  ;;  %vm3215_vm2 = vcmp.ge.s32.totalorder %v16284_v28, 0 }
 0x267   :  { %13046 = vmatmul.mubr.msk.bf16.gmra.mrb[252].mxu0 %vm4140_vm1, %v4133_v21  ;;  %v16291_v21 = vld [vmem:[%s21169_s3 + $0x18] sm:$0xff] }
 0x268   :  { %13051 = vmatprep.mubr.msk.bf16.mxu0 %vm4140_vm1, %v22022_v63  ;;  %2136 = vperm.xlu1 %14288, %v16291_v21   ;;  %v16303_v63 = vld [vmem:[%s21169_s3 + $0x28] sm:$0xff]  ;;  %vm3217_vm9 = vcmp.ge.s32.totalorder %v16291_v21, 0 }
 0x26a   :  { %2139 = vperm.xlu0 %14289, %v16296_v23  }
 0x26c   :  { %2142 = vperm.xlu1 %14288, %v16303_v63  }
 0x26f   :  { %13052 = vmatmul.mubr.msk.bf16.vlgmr.msra.gmra.mrb[192].mxu0 %vm4140_vm1, %v22023_v50  ;;  %v22077_v50 = vld [vmem:[#allocation73_spill] sm:$0xff] }
 0x270   :  { %13055 = vmatprep.mubr.msk.bf16.mxu0 %vm4140_vm1, %v22024_v61  ;;  %13116 = vmatpush3.bf16.msra.mxu0 %v14294_v10  ;;  %v22067_v10 = vld [vmem:[#allocation89_spill] sm:$0xff] }
 0x271   :  { %13117 = vmatprep.subr.bf16.mxu0 %v14295_v4  ;;  %v22069_v31 = vpack.c.bf16 %v22067_v10, %v22068_v43  ;;  %v22078_v61 = vld [vmem:[#allocation81_spill] sm:$0xff]  ;;  %v16526_v43 = vld [vmem:[%s21169_s3 + $0x120] sm:$0xff] }
 0x272   :  { %v16521_v10 = vld [vmem:[%s21169_s3 + $0x118] sm:$0xff] }
 0x274   :  { %13118 = vmatpush3.bf16.msra.mxu0 %v14295_v4  ;;  %v16308_v4 = vld [vmem:[%s21169_s3 + $0x30] sm:$0xff] }
 0x275   :  { %2145 = vperm.xlu0 %14289, %v16308_v4  }
 0x277   :  { %13056 = vmatmul.mubr.msk.bf16.gmra.mrb[196].mxu0 %vm4140_vm1, %v22025_v26  ;;  %v16319_v26 = vld [vmem:[%s21169_s3 + $0x38] sm:$0xff] }
 0x278   :  { %13059 = vmatprep.mubr.msk.bf16.mxu0 %vm4140_vm1, %v22026_v41  ;;  %v16324_v41 = vld [vmem:[%s21169_s3 + $0x40] sm:$0xff]  ;;  %2148 = vperm.xlu1 %14288, %v16319_v26  }
 0x279   :  { %2151 = vperm.xlu0 %14289, %v16324_v41   ;;  %vm3222_vm7 = vcmp.ge.s32.totalorder %v16324_v41, 0 }
 0x27f   :  { %13060 = vmatmul.mubr.msk.bf16.gmra.mrb[200].mxu0 %vm4140_vm1, %v22027_v54  ;;  %v14296_v54 = vld [vmem:[%s21170_s12] sm:$0xff]  }
 0x280   :  { %13063 = vmatprep.mubr.msk.bf16.mxu0 %vm4140_vm1, %v22028_v37  ;;  %v16334_v37 = vld [vmem:[%s21169_s3 + $0x48] sm:$0xff]  ;;  %13183 = vmatprep.subr.bf16.mxu1 %v14296_v54 }
 0x281   :  { %13184 = vmatpush3.bf16.msra.mxu1 %v14296_v54  ;;  %2154 = vperm.xlu1 %14288, %v16334_v37   ;;  %v16577_v54 = vld [vmem:[%s21169_s3 + $0x158] sm:$0xff]  ;;  %vm3223_vm4 = vcmp.ge.s32.totalorder %v16334_v37, 0 }
 0x287   :  { %13064 = vmatmul.mubr.msk.bf16.gmra.mrb[204].mxu0 %vm4140_vm1, %v22029_v30  ;;  %v16339_v30 = vld [vmem:[%s21169_s3 + $0x50] sm:$0xff] }
 0x288   :  { %13067 = vmatprep.mubr.msk.bf16.mxu0 %vm4140_vm1, %v22030_v13  ;;  %v22079_v13 = vld [vmem:[#allocation79_spill] sm:$0xff]  ;;  %2157 = vperm.xlu0 %14289, %v16339_v30   ;;  %vm3224_vm12 = vcmp.ge.s32.totalorder %v16339_v30, 0 }
 0x28f   :  { %13068 = vmatmul.mubr.msk.bf16.gmra.mrb[208].mxu0 %vm4140_vm1, %v22031_v8  ;;  %v22080_v8 = vld [vmem:[#allocation87_spill] sm:$0xff] }
 0x290   :  { %13071 = vmatprep.mubr.msk.bf16.mxu0 %vm4140_vm1, %v22032_v32  ;;  %v14297_v32 = vld [vmem:[%s21170_s12 + $0x8] sm:$0xff]  }
 0x291   :  { %13185 = vmatprep.subr.bf16.mxu1 %v14297_v32 }
 0x292   :  { %13186 = vmatpush3.bf16.msra.mxu1 %v14297_v32  ;;  %v22096_v32 = vld [vmem:[#allocation108_spill] sm:$0xff] }
 0x297   :  { %13072 = vmatmul.mubr.msk.bf16.gmra.mrb[212].mxu0 %vm4140_vm1, %v22033_v2  ;;  %v16352_v2 = vld [vmem:[%s21169_s3 + $0x58] sm:$0xff] }
 0x298   :  { %13075 = vmatprep.mubr.msk.bf16.mxu0 %vm4140_vm1, %v22034_v52  ;;  %v16358_v52 = vld [vmem:[%s21169_s3 + $0x60] sm:$0xff]  ;;  %2160 = vperm.xlu1 %14288, %v16352_v2   ;;  %vm3225_vm11 = vcmp.ge.s32.totalorder %v16352_v2, 0 }
 0x299   :  { %2163 = vperm.xlu0 %14289, %v16358_v52  }
 0x29f   :  { %13076 = vmatmul.mubr.msk.bf16.gmra.mrb[216].mxu0 %vm4140_vm1, %v22035_v22  ;;  %v16365_v22 = vld [vmem:[%s21169_s3 + $0x68] sm:$0xff] }
 0x2a0   :  { %13079 = vmatprep.mubr.msk.bf16.mxu0 %vm4140_vm1, %v22036_v57  ;;  %v16370_v57 = vld [vmem:[%s21169_s3 + $0x70] sm:$0xff]  ;;  %2166 = vperm.xlu1 %14288, %v16365_v22  }
 0x2a1   :  { %2169 = vperm.xlu0 %14289, %v16370_v57  }
 0x2a7   :  { %13080 = vmatmul.mubr.msk.bf16.gmra.mrb[220].mxu0 %vm4140_vm1, %v22037_v1  ;;  %v22081_v1 = vld [vmem:[#allocation85_spill] sm:$0xff] }
 0x2a8   :  { %13083 = vmatprep.mubr.msk.bf16.mxu0 %vm4140_vm1, %v22038_v7  ;;  %v22082_v7 = vld [vmem:[#allocation93_spill] sm:$0xff] }
 0x2af   :  { %13084 = vmatmul.mubr.msk.bf16.gmra.mrb[224].mxu0 %vm4140_vm1, %v22039_v14  ;;  %v16381_v14 = vld [vmem:[%s21169_s3 + $0x78] sm:$0xff] }
 0x2b0   :  { %13087 = vmatprep.mubr.msk.bf16.mxu0 %vm4140_vm1, %v22040_v34  ;;  %v16386_v34 = vld [vmem:[%s21169_s3 + $0x80] sm:$0xff]  ;;  %2172 = vperm.xlu1 %14288, %v16381_v14  }
 0x2b1   :  { %2175 = vperm.xlu0 %14289, %v16386_v34   ;;  %vm3230_vm8 = vcmp.ge.s32.totalorder %v16386_v34, 0 }
 0x2b7   :  { %13088 = vmatmul.mubr.msk.bf16.gmra.mrb[228].mxu0 %vm4140_vm1, %v22041_v62  ;;  %v16393_v62 = vld [vmem:[%s21169_s3 + $0x88] sm:$0xff] }
 0x2b8   :  { %13091 = vmatprep.mubr.msk.bf16.mxu0 %vm4140_vm1, %v22042_v56  ;;  %v16398_v56 = vld [vmem:[%s21169_s3 + $0x90] sm:$0xff]  ;;  %2178 = vperm.xlu1 %14288, %v16393_v62  }
 0x2b9   :  { %2181 = vperm.xlu0 %14289, %v16398_v56   ;;  %vm3232_vm0 = vcmp.ge.s32.totalorder %v16398_v56, 0 }
 0x2bc   :  { %2184 = vperm.xlu1 %14288, %v16409_v36  }
 0x2bf   :  { %13092 = vmatmul.mubr.msk.bf16.gmra.mrb[232].mxu0 %vm4140_vm1, %v22045_v44  ;;  %v16414_v44 = vld [vmem:[%s21169_s3 + $0xa0] sm:$0xff] }
 0x2c0   :  { %13095 = vmatprep.mubr.msk.bf16.mxu0 %vm4140_vm1, %v22048_v18  ;;  %2187 = vperm.xlu0 %14289, %v16414_v44   ;;  %v22085_v18 = vld [vmem:[#allocation99_spill] sm:$0xff] }
 0x2c4   :  { %2193 = vperm.xlu0 %14289, %v16426_v35  }
 0x2c7   :  { %13096 = vmatmul.mubr.msk.bf16.gmra.mrb[236].mxu0 %vm4140_vm1, %v22051_v27  ;;  %v16449_v27 = vld [vmem:[%s21169_s3 + $0xc8] sm:$0xff] }
 0x2c8   :  { %13099 = vmatprep.mubr.msk.bf16.mxu0 %vm4140_vm1, %v22054_v42  ;;  %2199 = vperm.xlu0 %14289, %v16442_v15   ;;  %v22087_v42 = vld [vmem:[#allocation101_spill] sm:$0xff]  ;;  %vm3239_vm13 = vcmp.ge.s32.totalorder %v16449_v27, 0 }
 0x2cc   :  { %2205 = vperm.xlu0 %14289, %v16454_v24  }
 0x2cf   :  { %13100 = vmatmul.mubr.msk.bf16.gmra.mrb[240].mxu0 %vm4140_vm1, %v22057_v11  ;;  %v16477_v11 = vld [vmem:[%s21169_s3 + $0xe8] sm:$0xff] }
 0x2d0   :  { %13103 = vmatprep.mubr.msk.bf16.mxu0 %vm4140_vm1, %v22060_v45  ;;  %2211 = vperm.xlu0 %14289, %v16470_v16   ;;  %v22089_v45 = vld [vmem:[#allocation103_spill] sm:$0xff] }
 0x2d4   :  { %2217 = vperm.xlu0 %14289, %v16482_v25  }
 0x2d7   :  { %13104 = vmatmul.mubr.msk.bf16.gmra.mrb[244].mxu0 %vm4140_vm1, %v22063_v60  ;;  %v16505_v60 = vld [vmem:[%s21169_s3 + $0x108] sm:$0xff] }
 0x2d8   :  { %13107 = vmatprep.mubr.msk.bf16.mxu0 %vm4140_vm1, %v22066_v55  ;;  %2223 = vperm.xlu0 %14289, %v16498_v9   ;;  %v22091_v55 = vld [vmem:[#allocation105_spill] sm:$0xff] }
 0x2dc   :  { %2229 = vperm.xlu0 %14289, %v16510_v0  }
 0x2df   :  { %13108 = vmatmul.mubr.msk.bf16.gmra.mrb[248].mxu0 %vm4140_vm1, %v22069_v31  ;;  %v16533_v31 = vld [vmem:[%s21169_s3 + $0x128] sm:$0xff] }
 0x2e0   :  { %13111 = vmatprep.mubr.msk.bf16.mxu0 %vm4140_vm1, %v22072_v6  ;;  %2235 = vperm.xlu0 %14289, %v16526_v43   ;;  %v22093_v6 = vld [vmem:[#allocation107_spill] sm:$0xff] }
 0x2e4   :  { %2241 = vperm.xlu0 %14289, %v16538_v19  }
 0x2e7   :  { %13112 = vmatmul.mubr.msk.bf16.gmra.mrb[252].mxu0 %vm4140_vm1, %v22075_v48  ;;  %v16561_v48 = vld [vmem:[%s21169_s3 + $0x148] sm:$0xff] }
 0x2e8   :  { %13119 = vmatprep.mubr.msk.bf16.mxu0 %vm807_vm5, %v22076_v49  ;;  %2247 = vperm.xlu0 %14289, %v16554_v33   ;;  %v16566_v49 = vld [vmem:[%s21169_s3 + $0x150] sm:$0xff] }
 0x2ec   :  { %2253 = vperm.xlu0 %14289, %v16566_v49  }
 0x2ef   :  { %13120 = vmatmul.mubr.msk.bf16.vlgmr.msra.gmra.mrb[192].mxu0 %vm807_vm5, %v22077_v50  ;;  %v22094_v50 = vld [vmem:[#allocation106_spill] sm:$0xff] }
 0x2f0   :  { %13123 = vmatprep.mubr.msk.bf16.mxu0 %vm807_vm5, %v22078_v61  ;;  %v22095_v61 = vld [vmem:[#allocation109_spill] sm:$0xff] }
 0x2f7   :  { %13124 = vmatmul.mubr.msk.bf16.gmra.mrb[196].mxu0 %vm807_vm5, %v22079_v13  ;;  %v16582_v13 = vld [vmem:[%s21169_s3 + $0x160] sm:$0xff] }
 0x2f8   :  { %13127 = vmatprep.mubr.msk.bf16.mxu0 %vm807_vm5, %v22080_v8  ;;  %2259 = vperm.xlu0 %14289, %v16582_v13   ;;  %v16589_v8 = vld [vmem:[%s21169_s3 + $0x168] sm:$0xff] }
 0x2ff   :  { %13128 = vmatmul.mubr.msk.bf16.gmra.mrb[200].mxu0 %vm807_vm5, %v22081_v1  ;;  %v22097_v1 = vld [vmem:[#allocation111_spill] sm:$0xff] }
 0x300   :  { %13131 = vmatprep.mubr.msk.bf16.mxu0 %vm807_vm5, %v22082_v7  ;;  %v14298_v7 = vld [vmem:[%s21170_s12 + $0x10] sm:$0xff]  }
 0x301   :  { %13187 = vmatprep.subr.bf16.mxu1 %v14298_v7 }
 0x302   :  { %13188 = vmatpush3.bf16.msra.mxu1 %v14298_v7  ;;  %v16667_v7 = vld [vmem:[%s21169_s3 + $0x1b0] sm:$0xff] }
 0x303   :  { %22105 = vst [vmem:[#allocation72_spill] sm:$0xff] %v16667_v7 }
 0x307   :  { %13132 = vmatmul.mubr.msk.bf16.gmra.mrb[204].mxu0 %vm807_vm5, %v22083_v46  ;;  %v16602_v46 = vld [vmem:[%s21169_s3 + $0x178] sm:$0xff] }
 0x308   :  { %13135 = vmatprep.mubr.msk.bf16.mxu0 %vm807_vm5, %v16011_v3  ;;  %v16421_v3 = vld [vmem:[%s21169_s3 + $0xa8] sm:$0xff] }
 0x309   :  { %2190 = vperm.xlu1 %14288, %v16421_v3  }
 0x30d   :  { %2196 = vperm.xlu1 %14288, %v16437_v58  }
 0x30f   :  { %13136 = vmatmul.mubr.msk.bf16.gmra.mrb[208].mxu0 %vm807_vm5, %v22084_v12  ;;  %v16607_v12 = vld [vmem:[%s21169_s3 + $0x170] sm:$0xff] }
 0x310   :  { %13139 = vmatprep.mubr.msk.bf16.mxu0 %vm807_vm5, %v22085_v18  ;;  %22098 = vst [vmem:[#allocation68_spill] sm:$0xff] %v16607_v12  ;;  %v22099_v18 = vld [vmem:[#allocation110_spill] sm:$0xff]  ;;  %2265 = vperm.xlu0 %14289, %v16607_v12  }
 0x311   :  { %2202 = vperm.xlu1 %14288, %v16449_v27  }
 0x315   :  { %2208 = vperm.xlu1 %14288, %v16465_v59  }
 0x317   :  { %13140 = vmatmul.mubr.msk.bf16.gmra.mrb[212].mxu0 %vm807_vm5, %v22086_v38  ;;  %v14299_v38 = vld [vmem:[%s21170_s12 + $0x18] sm:$0xff]  }
 0x318   :  { %13143 = vmatprep.mubr.msk.bf16.mxu0 %vm807_vm5, %v22087_v42  ;;  %v22100_v42 = vld [vmem:[#allocation113_spill] sm:$0xff]  ;;  %13189 = vmatprep.subr.bf16.mxu1 %v14299_v38 }
 0x319   :  { %2214 = vperm.xlu1 %14288, %v16477_v11   ;;  %13190 = vmatpush3.bf16.msra.mxu1 %v14299_v38  ;;  %v22107_v38 = vld [vmem:[#allocation117_spill] sm:$0xff] }
 0x31d   :  { %2220 = vperm.xlu1 %14288, %v16493_v17  }
 0x31f   :  { %13144 = vmatmul.mubr.msk.bf16.gmra.mrb[216].mxu0 %vm807_vm5, %v22088_v40  ;;  %v16621_v40 = vld [vmem:[%s21169_s3 + $0x188] sm:$0xff] }
 0x320   :  { %13147 = vmatprep.mubr.msk.bf16.mxu0 %vm807_vm5, %v22089_v45  ;;  %v16626_v45 = vld [vmem:[%s21169_s3 + $0x180] sm:$0xff] }
 0x321   :  { %2226 = vperm.xlu1 %14288, %v16505_v60   ;;  %2271 = vperm.xlu0 %14289, %v16626_v45  }
 0x325   :  { %2232 = vperm.xlu1 %14288, %v16521_v10  }
 0x327   :  { %13148 = vmatmul.mubr.msk.bf16.gmra.mrb[220].mxu0 %vm807_vm5, %v22090_v47  ;;  %v22101_v47 = vmov 0  }
 0x328   :  { %13151 = vmatprep.mubr.msk.bf16.mxu0 %vm807_vm5, %v22091_v55  ;;  %6064 = vmatprep.subr.bf16.mxu1 %v22101_v47  ;;  %v16634_v55 = vld [vmem:[%s21169_s3 + $0x198] sm:$0xff]  ;;  %v6642_v12 = vsel %vm3214_vm3, 1, %v22101_v47  ;;  %v6658_v28 = vsel %vm3230_vm8, 1, %v22101_v47  ;;  %v6645_v41 = vsel %vm3217_vm9, 1, %v22101_v47  ;;  %v6644_v37 = vsel %vm3216_vm10, 1, %v22101_v47 }
 0x329   :  { %2238 = vperm.xlu1 %14288, %v16533_v31   ;;  %v6653_v34 = vsel %vm3225_vm11, 1, %v22101_v47  ;;  %v6667_v5 = vsel %vm3239_vm13, 1, %v22101_v47  ;;  %v6666_v21 = vsel %vm3238_vm14, 1, %v22101_v47  ;;  %v6661_v30 = vsel %vm3233_vm15, 1, %v22101_v47 }
 0x32a   :  { %v6660_v2 = vsel %vm3232_vm0, 1, %v22101_v47  ;;  %vm3246_vm3 = vcmp.ge.s32.totalorder %v16498_v9, 0  ;;  %vm3226_vm8 = vcmp.ge.s32.totalorder %v16358_v52, 0  ;;  %vm3241_vm9 = vcmp.ge.s32.totalorder %v16465_v59, 0 }
 0x32b   :  { %v6674_v27 = vsel %vm3246_vm3, 1, %v22101_v47  ;;  %vm3240_vm10 = vcmp.ge.s32.totalorder %v16454_v24, 0  ;;  %vm3255_vm11 = vcmp.ge.s32.totalorder %v16561_v48, 0  ;;  %vm3235_vm13 = vcmp.ge.s32.totalorder %v16421_v3, 0  ;;  %v16787_v24 = vpop.permute.xlu0 %2130 }
 0x32c   :  { %v6683_v52 = vsel %vm3255_vm11, 1, %v22101_v47  ;;  %vm3234_vm14 = vcmp.ge.s32.totalorder %v16414_v44, 0  ;;  %22116 = vst [vmem:[#allocation74_spill] sm:$0xff] %v16787_v24  ;;  %vm3249_vm15 = vcmp.ge.s32.totalorder %v16521_v10, 0  ;;  %vm3248_vm0 = vcmp.ge.s32.totalorder %v16510_v0, 0 }
 0x32d   :  { %2244 = vperm.xlu1 %14288, %v16549_v51   ;;  %vm3262_vm3 = vcmp.ge.s32.totalorder %v16626_v45, 0  ;;  %vm3257_vm11 = vcmp.ge.s32.totalorder %v16577_v54, 0 }
 0x32e   :  { %v6690_v10 = vsel %vm3262_vm3, 1, %v22101_v47  ;;  %vm3250_vm3 = vcmp.ge.s32.totalorder %v16526_v43, 0 }
 0x32f   :  { %13152 = vmatmul.mubr.msk.bf16.gmra.mrb[224].mxu0 %vm807_vm5, %v22092_v29  ;;  %v16639_v29 = vld [vmem:[%s21169_s3 + $0x190] sm:$0xff]  ;;  %v16797_v44 = vpop.permute.xlu0 %2139 }
 0x330   :  { %13155 = vmatprep.mubr.msk.bf16.mxu0 %vm807_vm5, %v22093_v6  ;;  %v22102_v6 = vld [vmem:[#allocation112_spill] sm:$0xff]  ;;  %2277 = vperm.xlu0 %14289, %v16639_v29   ;;  %22118 = vst [vmem:[#allocation82_spill] sm:$0xff] %v16797_v44 }
 0x331   :  { %2250 = vperm.xlu1 %14288, %v16561_v48   ;;  %v6662_v48 = vsel %vm3234_vm14, 1, %v22101_v47 }
 0x335   :  { %2256 = vperm.xlu1 %14288, %v16577_v54  }
 0x337   :  { %13156 = vmatmul.mubr.msk.bf16.gmra.mrb[228].mxu0 %vm807_vm5, %v22094_v50  ;;  %v22103_v50 = vld [vmem:[#allocation115_spill] sm:$0xff] }
 0x338   :  { %13159 = vmatprep.mubr.msk.bf16.mxu0 %vm807_vm5, %v22095_v61  ;;  %v16650_v61 = vld [vmem:[%s21169_s3 + $0x1a8] sm:$0xff] }
 0x339   :  { %2262 = vperm.xlu1 %14288, %v16589_v8  }
 0x33d   :  { %2268 = vperm.xlu1 %14288, %v16602_v46  }
 0x33f   :  { %13160 = vmatmul.mubr.msk.bf16.gmra.mrb[232].mxu0 %vm807_vm5, %v22096_v32  ;;  %v16655_v32 = vld [vmem:[%s21169_s3 + $0x1a0] sm:$0xff] }
 0x340   :  { %13163 = vmatprep.mubr.msk.bf16.mxu0 %vm807_vm5, %v22097_v1  ;;  %2283 = vperm.xlu0 %14289, %v16655_v32   ;;  %v16662_v1 = vld [vmem:[%s21169_s3 + $0x1b8] sm:$0xff] }
 0x341   :  { %2274 = vperm.xlu1 %14288, %v16621_v40   ;;  %22104 = vst [vmem:[#allocation67_spill] sm:$0xff] %v16662_v1 }
 0x344   :  { %2289 = vperm.xlu0 %14289, %v16667_v7   ;;  %v16706_v7 = vld [vmem:[%s21169_s3 + $0x1e8] sm:$0xff] }
 0x345   :  { %2280 = vperm.xlu1 %14288, %v16634_v55   ;;  %22109 = vst [vmem:[#allocation70_spill] sm:$0xff] %v16706_v7 }
 0x347   :  { %13164 = vmatmul.mubr.msk.bf16.gmra.mrb[236].mxu0 %vm807_vm5, %v22099_v18  ;;  %v22106_v18 = vld [vmem:[#allocation114_spill] sm:$0xff] }
 0x348   :  { %13167 = vmatprep.mubr.msk.bf16.mxu0 %vm807_vm5, %v22100_v42  ;;  %v16678_v42 = vld [vmem:[%s21169_s3 + $0x1c8] sm:$0xff] }
 0x349   :  { %2286 = vperm.xlu1 %14288, %v16650_v61  }
 0x34d   :  { %2292 = vperm.xlu1 %14288, %v16662_v1   ;;  %v16711_v1 = vld [vmem:[%s21169_s3 + $0x1e0] sm:$0xff] }
 0x34e   :  { %22110 = vst [vmem:[#allocation71_spill] sm:$0xff] %v16711_v1 }
 0x34f   :  { %13168 = vmatmul.mubr.msk.bf16.gmra.mrb[240].mxu0 %vm807_vm5, %v22102_v6  ;;  %v16683_v6 = vld [vmem:[%s21169_s3 + $0x1c0] sm:$0xff] }
 0x350   :  { %13171 = vmatprep.mubr.msk.bf16.mxu0 %vm807_vm5, %v22103_v50  ;;  %2295 = vperm.xlu0 %14289, %v16683_v6   ;;  %v16690_v50 = vld [vmem:[%s21169_s3 + $0x1d8] sm:$0xff]  ;;  %vm3270_vm14 = vcmp.ge.s32.totalorder %v16683_v6, 0 }
 0x351   :  { %2298 = vperm.xlu1 %14288, %v16678_v42  }
 0x355   :  { %2304 = vperm.xlu1 %14288, %v16690_v50  }
 0x357   :  { %13172 = vmatmul.mubr.msk.bf16.gmra.mrb[244].mxu0 %vm807_vm5, %v22106_v18  ;;  %v16695_v18 = vld [vmem:[%s21169_s3 + $0x1d0] sm:$0xff] }
 0x358   :  { %13175 = vmatprep.mubr.msk.bf16.mxu0 %vm807_vm5, %v22107_v38  ;;  %v22108_v38 = vld [vmem:[#allocation116_spill] sm:$0xff]  ;;  %2301 = vperm.xlu0 %14289, %v16695_v18  }
 0x359   :  { %2310 = vperm.xlu1 %14288, %v16706_v7   ;;  %v22112_v7 = vld [vmem:[#allocation18_spill] sm:$0xff] }
 0x35c   :  { %2307 = vperm.xlu0 %14289, %v16711_v1   ;;  %v6643_v1 = vsel %vm3215_vm2, 1, %v22101_v47  ;;  %vm3247_vm2 = vcmp.ge.s32.totalorder %v16505_v60, 0  ;;  %v6654_v60 = vsel %vm3226_vm8, 1, %v22101_v47  ;;  %vm3228_vm8 = vcmp.ge.s32.totalorder %v16370_v57, 0 }
 0x35d   :  { %v6675_v15 = vsel %vm3247_vm2, 1, %v22101_v47  ;;  %vm3263_vm2 = vcmp.ge.s32.totalorder %v16621_v40, 0 }
 0x35e   :  { %v6691_v3 = vsel %vm3263_vm2, 1, %v22101_v47  ;;  %vm3251_vm2 = vcmp.ge.s32.totalorder %v16533_v31, 0 }
 0x35f   :  { %13176 = vmatmul.mubr.msk.bf16.gmra.mrb[248].mxu0 %vm807_vm5, %v22108_v38  ;;  %v16718_v38 = vld [vmem:[%s21169_s3 + $0x1f8] sm:$0xff] }
 0x360   :  { %13179 = vmatprep.mubr.msk.bf16.mxu0 %vm807_vm5, %v16122_v53  ;;  %v16723_v53 = vld [vmem:[%s21169_s3 + $0x1f0] sm:$0xff]  ;;  %2316 = vperm.xlu1 %14288, %v16718_v38  }
 0x361   :  { %22111 = vst [vmem:[#allocation69_spill] sm:$0xff] %v16723_v53  ;;  %2313 = vperm.xlu0 %14289, %v16723_v53   ;;  %v6650_v53 = vsel %vm3222_vm7, 1, %v22101_v47  ;;  %vm3218_vm7 = vcmp.ge.s32.totalorder %v16296_v23, 0  ;;  %v6669_v23 = vsel %vm3241_vm9, 1, %v22101_v47  ;;  %vm3243_vm9 = vcmp.ge.s32.totalorder %v16477_v11, 0 }
 0x362   :  { %v6646_v36 = vsel %vm3218_vm7, 1, %v22101_v47  ;;  %vm3220_vm7 = vcmp.ge.s32.totalorder %v16308_v4, 0 }
 0x363   :  { %v6648_v40 = vsel %vm3220_vm7, 1, %v22101_v47  ;;  %vm3264_vm7 = vcmp.ge.s32.totalorder %v16639_v29, 0 }
 0x364   :  { %6710 = vperm.xlu1 %14288, %v6643_v1   ;;  %v6692_v43 = vsel %vm3264_vm7, 1, %v22101_v47 }
 0x365   :  { %6707 = vperm.xlu0 %14289, %v6642_v12   ;;  %v16767_v12 = vpop.permute.xlu1 %2127 }
 0x366   :  { %22113 = vst [vmem:[#allocation78_spill] sm:$0xff] %v16767_v12 }
 0x367   :  { %13180 = vmatmul.mubr.msk.bf16.gmra.mrb[252].mxu0 %vm807_vm5, %v16120_v20  ;;  %v6651_v20 = vsel %vm3223_vm4, 1, %v22101_v47  ;;  %vm3231_vm5 = vcmp.ge.s32.totalorder %v16393_v62, 0  ;;  %v6652_v62 = vsel %vm3224_vm12, 1, %v22101_v47  ;;  %vm3219_vm4 = vcmp.ge.s32.totalorder %v16303_v63, 0 }
 0x368   :  { %13263 = vmatprep.mubr.msk.bf16.mxu0 %vm3290_vm6, %v22112_v7  ;;  %6734 = vperm.xlu1 %14288, %v6651_v20   ;;  %v6659_v39 = vsel %vm3231_vm5, 1, %v22101_v47  ;;  %v6647_v56 = vsel %vm3219_vm4, 1, %v22101_v47  ;;  %vm3227_vm5 = vcmp.ge.s32.totalorder %v16365_v22, 0  ;;  %v6668_v63 = vsel %vm3240_vm10, 1, %v22101_v47 }
 0x369   :  { %6731 = vperm.xlu0 %14289, %v6650_v53   ;;  %v6655_v9 = vsel %vm3227_vm5, 1, %v22101_v47  ;;  %v16777_v1 = vpop.permute.xlu1 %2133  ;;  %vm3254_vm12 = vcmp.ge.s32.totalorder %v16554_v33, 0  ;;  %v6663_v7 = vsel %vm3235_vm13, 1, %v22101_v47  ;;  %v6677_v33 = vsel %vm3249_vm15, 1, %v22101_v47 }
 0x36a   :  { %22114 = vst [vmem:[#allocation76_spill] sm:$0xff] %v16777_v1  ;;  %v6682_v22 = vsel %vm3254_vm12, 1, %v22101_v47  ;;  %v6676_v53 = vsel %vm3248_vm0, 1, %v22101_v47  ;;  %vm3221_vm4 = vcmp.ge.s32.totalorder %v16319_v26, 0  ;;  %vm3229_vm5 = vcmp.ge.s32.totalorder %v16381_v14, 0 }
 0x36b   :  { %v6657_v45 = vsel %vm3229_vm5, 1, %v22101_v47  ;;  %vm3242_vm10 = vcmp.ge.s32.totalorder %v16470_v16, 0  ;;  %v6671_v26 = vsel %vm3243_vm9, 1, %v22101_v47  ;;  %vm3256_vm12 = vcmp.ge.s32.totalorder %v16566_v49, 0 }
 0x36c   :  { %6758 = vperm.xlu1 %14288, %v6659_v39   ;;  %v16807_v39 = vpop.permute.xlu0 %2145  ;;  %v6670_v14 = vsel %vm3242_vm10, 1, %v22101_v47  ;;  %v6684_v11 = vsel %vm3256_vm12, 1, %v22101_v47  ;;  %vm3271_vm13 = vcmp.ge.s32.totalorder %v16678_v42, 0  ;;  %vm3237_vm15 = vcmp.ge.s32.totalorder %v16437_v58, 0 }
 0x36d   :  { %6755 = vperm.xlu0 %14289, %v6658_v28   ;;  %v16783_v59 = vpop.permute.xlu1 %2136  ;;  %22120 = vst [vmem:[#allocation80_spill] sm:$0xff] %v16807_v39  ;;  %v6649_v28 = vsel %vm3221_vm4, 1, %v22101_v47  ;;  %v6699_v16 = vsel %vm3271_vm13, 1, %v22101_v47  ;;  %vm3236_vm0 = vcmp.ge.s32.totalorder %v16426_v35, 0  ;;  %v6665_v54 = vsel %vm3237_vm15, 1, %v22101_v47 }
 0x36e   :  { %22115 = vst [vmem:[#allocation77_spill] sm:$0xff] %v16783_v59  ;;  %v6664_v42 = vsel %vm3236_vm0, 1, %v22101_v47  ;;  %v6678_v58 = vsel %vm3250_vm3, 1, %v22101_v47  ;;  %v16854_v35 = vld [vmem:[%s21171_s11] ss:$0 sm:$0xff]  ;;  %vm3265_vm4 = vcmp.ge.s32.totalorder %v16634_v55, 0 }
 0x36f   :  { %v6693_v31 = vsel %vm3265_vm4, 1, %v22101_v47  ;;  %vm3245_vm5 = vcmp.ge.s32.totalorder %v16493_v17, 0  ;;  %vm3259_vm9 = vcmp.ge.s32.totalorder %v16589_v8, 0  ;;  %vm3258_vm10 = vcmp.ge.s32.totalorder %v16582_v13, 0 }
 0x370   :  { %6716 = vperm.xlu1 %14288, %v6645_v41   ;;  %v6656_v41 = vsel %vm3228_vm8, 1, %v22101_v47  ;;  %v16817_v4 = vpop.permute.xlu0 %2151  ;;  %vm3244_vm8 = vcmp.ge.s32.totalorder %v16482_v25, 0  ;;  %v6687_v17 = vsel %vm3259_vm9, 1, %v22101_v47  ;;  %vm3272_vm12 = vcmp.ge.s32.totalorder %v16695_v18, 0 }
 0x371   :  { %6713 = vperm.xlu0 %14289, %v6644_v37   ;;  %v16795_v20 = vpop.permute.xlu1 %2142  ;;  %22122 = vst [vmem:[#allocation88_spill] sm:$0xff] %v16817_v4  ;;  %vm3253_vm13 = vcmp.ge.s32.totalorder %v16549_v51, 0  ;;  %vm3267_vm15 = vcmp.ge.s32.totalorder %v16650_v61, 0  ;;  %vm3266_vm0 = vcmp.ge.s32.totalorder %v16655_v32, 0  ;;  %vm3277_vm9 = vcmp.ge.s32.totalorder %v16718_v38, 0 }
 0x372   :  { %22117 = vst [vmem:[#allocation84_spill] sm:$0xff] %v16795_v20  ;;  %v6694_v61 = vsel %vm3266_vm0, 1, %v22101_v47 }
 0x374   :  { %6740 = vperm.xlu1 %14288, %v6653_v34   ;;  %v16827_v34 = vpop.permute.xlu0 %2157 }
 0x375   :  { %6737 = vperm.xlu0 %14289, %v6652_v62   ;;  %v16803_v0 = vpop.permute.xlu1 %2148  ;;  %22124 = vst [vmem:[#allocation86_spill] sm:$0xff] %v16827_v34  ;;  %v6685_v62 = vsel %vm3257_vm11, 1, %v22101_v47  ;;  %vm3273_vm11 = vcmp.ge.s32.totalorder %v16690_v50, 0  ;;  %v6700_v50 = vsel %vm3272_vm12, 1, %v22101_v47 }
 0x376   :  { %22119 = vst [vmem:[#allocation83_spill] sm:$0xff] %v16803_v0 }
 0x378   :  { %6782 = vperm.xlu1 %14288, %v6667_v5   ;;  %v6698_v5 = vsel %vm3270_vm14, 1, %v22101_v47  ;;  %v16837_v49 = vpop.permute.xlu0 %2163  ;;  %vm3252_vm14 = vcmp.ge.s32.totalorder %v16538_v19, 0 }
 0x379   :  { %6779 = vperm.xlu0 %14289, %v6666_v21   ;;  %v16815_v37 = vpop.permute.xlu1 %2154  ;;  %22126 = vst [vmem:[#allocation94_spill] sm:$0xff] %v16837_v49 }
 0x37a   :  { %22121 = vst [vmem:[#allocation90_spill] sm:$0xff] %v16815_v37 }
 0x37c   :  { %6764 = vperm.xlu1 %14288, %v6661_v30   ;;  %v16847_v30 = vpop.permute.xlu0 %2169 }
 0x37d   :  { %6761 = vperm.xlu0 %14289, %v6660_v2   ;;  %v16823_v57 = vpop.permute.xlu1 %2160  ;;  %22128 = vst [vmem:[#allocation92_spill] sm:$0xff] %v16847_v30  ;;  %v6679_v2 = vsel %vm3251_vm2, 1, %v22101_v47  ;;  %vm3261_vm2 = vcmp.ge.s32.totalorder %v16602_v46, 0 }
 0x37e   :  { %22123 = vst [vmem:[#allocation89_spill] sm:$0xff] %v16823_v57 }
 0x380   :  { %6806 = vperm.xlu1 %14288, %v6675_v15  }
 0x381   :  { %6803 = vperm.xlu0 %14289, %v6674_v27   ;;  %v16835_v21 = vpop.permute.xlu1 %2166 }
 0x382   :  { %22125 = vst [vmem:[#allocation96_spill] sm:$0xff] %v16835_v21 }
 0x384   :  { %6722 = vperm.xlu1 %14288, %v6647_v56  }
 0x385   :  { %6719 = vperm.xlu0 %14289, %v6646_v36   ;;  %v16843_v6 = vpop.permute.xlu1 %2172 }
 0x386   :  { %22127 = vst [vmem:[#allocation95_spill] sm:$0xff] %v16843_v6 }
 0x388   :  { %6746 = vperm.xlu1 %14288, %v6655_v9   ;;  %v16863_v9 = vpop.permute.xlu0 %2175 }
 0x389   :  { %6743 = vperm.xlu0 %14289, %v6654_v60   ;;  %v16860_v27 = vpop.permute.xlu1 %2178  ;;  %22130 = vst [vmem:[#allocation73_spill] sm:$0xff] %v16863_v9 }
 0x38a   :  { %22129 = vst [vmem:[#allocation75_spill] sm:$0xff] %v16860_v27 }
 0x38c   :  { %6788 = vperm.xlu1 %14288, %v6669_v23  }
 0x38d   :  { %6785 = vperm.xlu0 %14289, %v6668_v63   ;;  %v6673_v63 = vsel %vm3245_vm5, 1, %v22101_v47 }
 0x390   :  { %6830 = vperm.xlu1 %14288, %v6683_v52   ;;  %v6672_v52 = vsel %vm3244_vm8, 1, %v22101_v47 }
 0x391   :  { %6827 = vperm.xlu0 %14289, %v6682_v22  }
 0x394   :  { %6770 = vperm.xlu1 %14288, %v6663_v7  }
 0x395   :  { %6767 = vperm.xlu0 %14289, %v6662_v48  }
 0x398   :  { %6812 = vperm.xlu1 %14288, %v6677_v33  }
 0x399   :  { %6809 = vperm.xlu0 %14289, %v6676_v53   ;;  %v16875_v53 = vpop.permute.xlu1 %2184 }
 0x39a   :  { %22131 = vst [vmem:[#allocation81_spill] sm:$0xff] %v16875_v53 }
 0x39c   :  { %6854 = vperm.xlu1 %14288, %v6691_v3   ;;  %v6686_v3 = vsel %vm3258_vm10, 1, %v22101_v47 }
 0x39d   :  { %6851 = vperm.xlu0 %14289, %v6690_v10  }
 0x3a0   :  { %6728 = vperm.xlu1 %14288, %v6649_v28   ;;  %v16879_v28 = vpop.permute.xlu0 %2181 }
 0x3a1   :  { %6725 = vperm.xlu0 %14289, %v6648_v40   ;;  %22132 = vst [vmem:[#allocation79_spill] sm:$0xff] %v16879_v28 }
 0x3a4   :  { %6752 = vperm.xlu1 %14288, %v6657_v45  }
 0x3a5   :  { %6749 = vperm.xlu0 %14289, %v6656_v41   ;;  %v6701_v41 = vsel %vm3273_vm11, 1, %v22101_v47 }
 0x3a8   :  { %6794 = vperm.xlu1 %14288, %v6671_v26  }
 0x3a9   :  { %6791 = vperm.xlu0 %14289, %v6670_v14  }
 0x3ac   :  { %6836 = vperm.xlu1 %14288, %v6685_v62  }
 0x3ad   :  { %6833 = vperm.xlu0 %14289, %v6684_v11  }
 0x3b0   :  { %6878 = vperm.xlu1 %14288, %v6699_v16   ;;  %v16892_v16 = vpop.permute.xlu1 %2190 }
 0x3b1   :  { %6875 = vperm.xlu0 %14289, %v6698_v5   ;;  %22133 = vst [vmem:[#allocation87_spill] sm:$0xff] %v16892_v16 }
 0x3b4   :  { %6776 = vperm.xlu1 %14288, %v6665_v54  }
 0x3b5   :  { %6773 = vperm.xlu0 %14289, %v6664_v42   ;;  %v16894_v42 = vpop.permute.xlu0 %2187 }
 0x3b6   :  { %22134 = vst [vmem:[#allocation85_spill] sm:$0xff] %v16894_v42 }
 0x3b8   :  { %6818 = vperm.xlu1 %14288, %v6679_v2   ;;  %v6681_v2 = vsel %vm3253_vm13, 1, %v22101_v47 }
 0x3b9   :  { %6815 = vperm.xlu0 %14289, %v6678_v58  }
 0x3bc   :  { %6860 = vperm.xlu1 %14288, %v6693_v31   ;;  %v6680_v31 = vsel %vm3252_vm14, 1, %v22101_v47 }
 0x3bd   :  { %6857 = vperm.xlu0 %14289, %v6692_v43  }
 0x3c0   :  { %6800 = vperm.xlu1 %14288, %v6673_v63  }
 0x3c1   :  { %6797 = vperm.xlu0 %14289, %v6672_v52   ;;  %v16910_v52 = vpop.permute.xlu0 %2193 }
 0x3c2   :  { %v13121_v15 = vpop.f32.mrb[192].mxu0  ;;  %22136 = vst [vmem:[#allocation91_spill] sm:$0xff] %v16910_v52 }
 0x3c3   :  { %v5386_v56 = vadd.f32 %v13121_v15, %v16854_v35  ;;  %v5059_v36 = vpop.f32.mrb[193].mxu0 }
 0x3c4   :  { %v5384_v60 = vadd.f32 %v16854_v35, %v5059_v36  ;;  %v13122_v23 = vpop.f32.mrb[194].mxu0  ;;  %6842 = vperm.xlu1 %14288, %v6687_v17  }
 0x3c5   :  { %v5387_v55 = vadd.f32 %v13122_v23, %v16854_v35  ;;  %v5062_v29 = vpop.f32.mrb[195].mxu0  ;;  %v5450_v7 = vmax.f32 %v5386_v56, 0.0  ;;  %6839 = vperm.xlu0 %14289, %v6686_v3  }
 0x3c6   :  { %v5385_v22 = vadd.f32 %v16854_v35, %v5062_v29  ;;  %v5448_v25 = vmax.f32 %v5384_v60, 0.0  ;;  %v6695_v60 = vsel %vm3267_vm15, 1, %v22101_v47  ;;  %v16904_v29 = vpop.permute.xlu1 %2196 }
 0x3c7   :  { %v5451_v48 = vmax.f32 %v5387_v55, 0.0  ;;  %22135 = vst [vmem:[#allocation93_spill] sm:$0xff] %v16904_v29 }
 0x3c8   :  { %v5449_v33 = vmax.f32 %v5385_v22, 0.0  ;;  %6884 = vperm.xlu1 %14288, %v6701_v41   ;;  %v22137_v22 = vld [vmem:[#allocation68_spill] sm:$0xff] }
 0x3c9   :  { %v5513_v10 = vpack.c.bf16 %v5451_v48, %v5450_v7  ;;  %6881 = vperm.xlu0 %14289, %v6700_v50   ;;  %vm3260_vm3 = vcmp.ge.s32.totalorder %v22137_v22, 0  ;;  %v16921_v50 = vpop.permute.xlu0 %2199 }
 0x3ca   :  { %v5512_v8 = vpack.c.bf16 %v5449_v33, %v5448_v25  ;;  %v13125_v13 = vpop.f32.mrb[196].mxu0  ;;  %v6689_v25 = vsel %vm3261_vm2, 1, %v22101_v47  ;;  %v6688_v46 = vsel %vm3260_vm3, 1, %v22101_v47  ;;  %v16918_v41 = vpop.permute.xlu1 %2202  ;;  %22141 = vst [vmem:[#allocation99_spill] sm:$0xff] %v16921_v50 }
 0x3cb   :  { %v5390_v40 = vadd.f32 %v13125_v13, %v16854_v35  ;;  %v5075_v45 = vpop.f32.mrb[197].mxu0  ;;  %v22139_v13 = vld [vmem:[#allocation71_spill] sm:$0xff]  ;;  %22140 = vst [vmem:[#allocation97_spill] sm:$0xff] %v16918_v41 }
 0x3cc   :  { %v5388_v26 = vadd.f32 %v16854_v35, %v5075_v45  ;;  %v13126_v14 = vpop.f32.mrb[198].mxu0  ;;  %13191 = vmatprep.mubr.msk.bf16.mxu1 %vm3290_vm6, %v5512_v8  ;;  %6824 = vperm.xlu1 %14288, %v6681_v2   ;;  %vm3274_vm7 = vcmp.ge.s32.totalorder %v22139_v13, 0 }
 0x3cd   :  { %v5391_v18 = vadd.f32 %v13126_v14, %v16854_v35  ;;  %v5078_v62 = vpop.f32.mrb[199].mxu0  ;;  %13192 = vmatmul.mubr.msk.bf16.vlgmr.msra.gmra.mrb[64].mxu1 %vm3290_vm6, %v5513_v10  ;;  %v5454_v5 = vmax.f32 %v5390_v40, 0.0  ;;  %6821 = vperm.xlu0 %14289, %v6680_v31   ;;  %v22138_v10 = vld [vmem:[#allocation70_spill] sm:$0xff] }
 0x3ce   :  { %v5389_v11 = vadd.f32 %v16854_v35, %v5078_v62  ;;  %v5452_v51 = vmax.f32 %v5388_v26, 0.0  ;;  %vm3275_vm4 = vcmp.ge.s32.totalorder %v22138_v10, 0 }
 0x3cf   :  { %v5455_v54 = vmax.f32 %v5391_v18, 0.0  ;;  %v6703_v18 = vsel %vm3275_vm4, 1, %v22101_v47 }
 0x3d0   :  { %v5453_v58 = vmax.f32 %v5389_v11, 0.0  ;;  %6866 = vperm.xlu1 %14288, %v6695_v60   ;;  %v16933_v60 = vpop.permute.xlu1 %2208 }
 0x3d1   :  { %v5515_v43 = vpack.c.bf16 %v5455_v54, %v5454_v5  ;;  %6863 = vperm.xlu0 %14289, %v6694_v61   ;;  %v6702_v5 = vsel %vm3274_vm7, 1, %v22101_v47  ;;  %v22142_v54 = vld [vmem:[#allocation67_spill] sm:$0xff]  ;;  %22144 = vst [vmem:[#allocation98_spill] sm:$0xff] %v16933_v60  ;;  %v16937_v61 = vpop.permute.xlu0 %2205 }
 0x3d2   :  { %v5514_v19 = vpack.c.bf16 %v5453_v58, %v5452_v51  ;;  %v13129_v15 = vpop.f32.mrb[200].mxu0  ;;  %vm3269_vm5 = vcmp.ge.s32.totalorder %v22142_v54, 0  ;;  %v22143_v58 = vld [vmem:[#allocation72_spill] sm:$0xff]  ;;  %22145 = vst [vmem:[#allocation101_spill] sm:$0xff] %v16937_v61 }
 0x3d3   :  { %v5394_v56 = vadd.f32 %v13129_v15, %v16854_v35  ;;  %v5091_v36 = vpop.f32.mrb[201].mxu0  ;;  %vm3268_vm8 = vcmp.ge.s32.totalorder %v22143_v58, 0  ;;  %v6697_v15 = vsel %vm3269_vm5, 1, %v22101_v47 }
 0x3d4   :  { %v5392_v23 = vadd.f32 %v16854_v35, %v5091_v36  ;;  %v13130_v55 = vpop.f32.mrb[202].mxu0  ;;  %13195 = vmatprep.mubr.msk.bf16.mxu1 %vm3290_vm6, %v5514_v19  ;;  %6848 = vperm.xlu1 %14288, %v6689_v25  }
 0x3d5   :  { %v5395_v32 = vadd.f32 %v13130_v55, %v16854_v35  ;;  %v5094_v63 = vpop.f32.mrb[203].mxu0  ;;  %13196 = vmatmul.mubr.msk.bf16.gmra.mrb[68].mxu1 %vm3290_vm6, %v5515_v43  ;;  %v5458_v48 = vmax.f32 %v5394_v56, 0.0  ;;  %6845 = vperm.xlu0 %14289, %v6688_v46  }
 0x3d6   :  { %v5393_v7 = vadd.f32 %v16854_v35, %v5094_v63  ;;  %v5456_v33 = vmax.f32 %v5392_v23, 0.0  ;;  %v6696_v23 = vsel %vm3268_vm8, 1, %v22101_v47 }
 0x3d7   :  { %v5459_v17 = vmax.f32 %v5395_v32, 0.0  ;;  %v22146_v32 = vld [vmem:[#allocation69_spill] sm:$0xff] }
 0x3d8   :  { %v5457_v3 = vmax.f32 %v5393_v7, 0.0  ;;  %6890 = vperm.xlu1 %14288, %v6703_v18   ;;  %vm3276_vm10 = vcmp.ge.s32.totalorder %v22146_v32, 0 }
 0x3d9   :  { %v5517_v8 = vpack.c.bf16 %v5459_v17, %v5458_v48  ;;  %6887 = vperm.xlu0 %14289, %v6702_v5   ;;  %v6705_v17 = vsel %vm3277_vm9, 1, %v22101_v47  ;;  %v6704_v38 = vsel %vm3276_vm10, 1, %v22101_v47 }
 0x3da   :  { %v5516_v40 = vpack.c.bf16 %v5457_v3, %v5456_v33  ;;  %v13133_v45 = vpop.f32.mrb[204].mxu0 }
 0x3db   :  { %v5398_v26 = vadd.f32 %v13133_v45, %v16854_v35  ;;  %v5107_v14 = vpop.f32.mrb[205].mxu0  ;;  %v16950_v45 = vpop.permute.xlu0 %2211 }
 0x3dc   :  { %v5396_v62 = vadd.f32 %v16854_v35, %v5107_v14  ;;  %v13134_v11 = vpop.f32.mrb[206].mxu0  ;;  %13199 = vmatprep.mubr.msk.bf16.mxu1 %vm3290_vm6, %v5516_v40  ;;  %6872 = vperm.xlu1 %14288, %v6697_v15   ;;  %22148 = vst [vmem:[#allocation103_spill] sm:$0xff] %v16950_v45 }
 0x3dd   :  { %v5399_v2 = vadd.f32 %v13134_v11, %v16854_v35  ;;  %v5110_v51 = vpop.f32.mrb[207].mxu0  ;;  %13200 = vmatmul.mubr.msk.bf16.gmra.mrb[72].mxu1 %vm3290_vm6, %v5517_v8  ;;  %v5462_v43 = vmax.f32 %v5398_v26, 0.0  ;;  %6869 = vperm.xlu0 %14289, %v6696_v23   ;;  %v16948_v8 = vpop.permute.xlu1 %2214 }
 0x3de   :  { %v5397_v31 = vadd.f32 %v16854_v35, %v5110_v51  ;;  %v5460_v56 = vmax.f32 %v5396_v62, 0.0  ;;  %22147 = vst [vmem:[#allocation100_spill] sm:$0xff] %v16948_v8 }
 0x3df   :  { %v5463_v19 = vmax.f32 %v5399_v2, 0.0 }
 0x3e0   :  { %v5461_v36 = vmax.f32 %v5397_v31, 0.0  ;;  %6896 = vperm.xlu1 %14288, %v6705_v17  }
 0x3e1   :  { %v5519_v55 = vpack.c.bf16 %v5463_v19, %v5462_v43  ;;  %6893 = vperm.xlu0 %14289, %v6704_v38  }
 0x3e2   :  { %v5518_v63 = vpack.c.bf16 %v5461_v36, %v5460_v56  ;;  %v13137_v22 = vpop.f32.mrb[208].mxu0 }
 0x3e3   :  { %v5402_v7 = vadd.f32 %v13137_v22, %v16854_v35  ;;  %v5123_v48 = vpop.f32.mrb[209].mxu0 }
 0x3e4   :  { %v5400_v25 = vadd.f32 %v16854_v35, %v5123_v48  ;;  %v13138_v33 = vpop.f32.mrb[210].mxu0  ;;  %13203 = vmatprep.mubr.msk.bf16.mxu1 %vm3290_vm6, %v5518_v63 }
 0x3e5   :  { %v5403_v3 = vadd.f32 %v13138_v33, %v16854_v35  ;;  %v5126_v46 = vpop.f32.mrb[211].mxu0  ;;  %13204 = vmatmul.mubr.msk.bf16.gmra.mrb[76].mxu1 %vm3290_vm6, %v5519_v55  ;;  %v5466_v13 = vmax.f32 %v5402_v7, 0.0 }
 0x3e6   :  { %v5401_v10 = vadd.f32 %v16854_v35, %v5126_v46  ;;  %v5464_v26 = vmax.f32 %v5400_v25, 0.0 }
 0x3e7   :  { %v5467_v40 = vmax.f32 %v5403_v3, 0.0 }
 0x3e8   :  { %v5465_v14 = vmax.f32 %v5401_v10, 0.0 }
 0x3e9   :  { %v5521_v18 = vpack.c.bf16 %v5467_v40, %v5466_v13 }
 0x3ea   :  { %v5520_v62 = vpack.c.bf16 %v5465_v14, %v5464_v26  ;;  %v13141_v11 = vpop.f32.mrb[212].mxu0 }
 0x3eb   :  { %v5406_v5 = vadd.f32 %v13141_v11, %v16854_v35  ;;  %v5139_v54 = vpop.f32.mrb[213].mxu0 }
 0x3ec   :  { %v5404_v2 = vadd.f32 %v16854_v35, %v5139_v54  ;;  %v13142_v51 = vpop.f32.mrb[214].mxu0  ;;  %13207 = vmatprep.mubr.msk.bf16.mxu1 %vm3290_vm6, %v5520_v62 }
 0x3ed   :  { %v5407_v58 = vadd.f32 %v13142_v51, %v16854_v35  ;;  %v5142_v31 = vpop.f32.mrb[215].mxu0  ;;  %13208 = vmatmul.mubr.msk.bf16.gmra.mrb[80].mxu1 %vm3290_vm6, %v5521_v18  ;;  %v5470_v19 = vmax.f32 %v5406_v5, 0.0 }
 0x3ee   :  { %v5405_v43 = vadd.f32 %v16854_v35, %v5142_v31  ;;  %v5468_v56 = vmax.f32 %v5404_v2, 0.0 }
 0x3ef   :  { %v5471_v15 = vmax.f32 %v5407_v58, 0.0 }
 0x3f0   :  { %v5469_v36 = vmax.f32 %v5405_v43, 0.0 }
 0x3f1   :  { %v5523_v23 = vpack.c.bf16 %v5471_v15, %v5470_v19 }
 0x3f2   :  { %v5522_v55 = vpack.c.bf16 %v5469_v36, %v5468_v56  ;;  %v13145_v32 = vpop.f32.mrb[216].mxu0 }
 0x3f3   :  { %v5410_v63 = vadd.f32 %v13145_v32, %v16854_v35  ;;  %v5155_v22 = vpop.f32.mrb[217].mxu0 }
 0x3f4   :  { %v5408_v7 = vadd.f32 %v16854_v35, %v5155_v22  ;;  %v13146_v48 = vpop.f32.mrb[218].mxu0  ;;  %13211 = vmatprep.mubr.msk.bf16.mxu1 %vm3290_vm6, %v5522_v55 }
 0x3f5   :  { %v5411_v17 = vadd.f32 %v13146_v48, %v16854_v35  ;;  %v5158_v25 = vpop.f32.mrb[219].mxu0  ;;  %13212 = vmatmul.mubr.msk.bf16.gmra.mrb[84].mxu1 %vm3290_vm6, %v5523_v23  ;;  %v5474_v38 = vmax.f32 %v5410_v63, 0.0 }
 0x3f6   :  { %v5409_v33 = vadd.f32 %v16854_v35, %v5158_v25  ;;  %v5472_v46 = vmax.f32 %v5408_v7, 0.0 }
 0x3f7   :  { %v5475_v3 = vmax.f32 %v5411_v17, 0.0 }
 0x3f8   :  { %v5473_v10 = vmax.f32 %v5409_v33, 0.0 }
 0x3f9   :  { %v5525_v13 = vpack.c.bf16 %v5475_v3, %v5474_v38 }
 0x3fa   :  { %v5524_v40 = vpack.c.bf16 %v5473_v10, %v5472_v46  ;;  %v13149_v26 = vpop.f32.mrb[220].mxu0 }
 0x3fb   :  { %v5414_v14 = vadd.f32 %v13149_v26, %v16854_v35  ;;  %v5171_v18 = vpop.f32.mrb[221].mxu0 }
 0x3fc   :  { %v5412_v62 = vadd.f32 %v16854_v35, %v5171_v18  ;;  %v13150_v11 = vpop.f32.mrb[222].mxu0  ;;  %13215 = vmatprep.mubr.msk.bf16.mxu1 %vm3290_vm6, %v5524_v40 }
 0x3fd   :  { %v5415_v5 = vadd.f32 %v13150_v11, %v16854_v35  ;;  %v5174_v54 = vpop.f32.mrb[223].mxu0  ;;  %13216 = vmatmul.mubr.msk.bf16.gmra.mrb[88].mxu1 %vm3290_vm6, %v5525_v13  ;;  %v5478_v51 = vmax.f32 %v5414_v14, 0.0 }
 0x3fe   :  { %v5413_v2 = vadd.f32 %v16854_v35, %v5174_v54  ;;  %v5476_v31 = vmax.f32 %v5412_v62, 0.0 }
 0x3ff   :  { %v5479_v58 = vmax.f32 %v5415_v5, 0.0 }
 0x400   :  { %v5477_v43 = vmax.f32 %v5413_v2, 0.0 }
 0x401   :  { %v5527_v19 = vpack.c.bf16 %v5479_v58, %v5478_v51 }
 0x402   :  { %v5526_v15 = vpack.c.bf16 %v5477_v43, %v5476_v31  ;;  %v13153_v56 = vpop.f32.mrb[224].mxu0 }
 0x403   :  { %v5418_v36 = vadd.f32 %v13153_v56, %v16854_v35  ;;  %v5187_v23 = vpop.f32.mrb[225].mxu0 }
 0x404   :  { %v5416_v55 = vadd.f32 %v16854_v35, %v5187_v23  ;;  %v13154_v32 = vpop.f32.mrb[226].mxu0  ;;  %13219 = vmatprep.mubr.msk.bf16.mxu1 %vm3290_vm6, %v5526_v15 }
 0x405   :  { %v5419_v63 = vadd.f32 %v13154_v32, %v16854_v35  ;;  %v5190_v22 = vpop.f32.mrb[227].mxu0  ;;  %13220 = vmatmul.mubr.msk.bf16.gmra.mrb[92].mxu1 %vm3290_vm6, %v5527_v19  ;;  %v5482_v48 = vmax.f32 %v5418_v36, 0.0 }
 0x406   :  { %v5417_v7 = vadd.f32 %v16854_v35, %v5190_v22  ;;  %v5480_v25 = vmax.f32 %v5416_v55, 0.0 }
 0x407   :  { %v5483_v17 = vmax.f32 %v5419_v63, 0.0 }
 0x408   :  { %v5481_v33 = vmax.f32 %v5417_v7, 0.0 }
 0x409   :  { %v5529_v38 = vpack.c.bf16 %v5483_v17, %v5482_v48 }
 0x40a   :  { %v5528_v3 = vpack.c.bf16 %v5481_v33, %v5480_v25  ;;  %v13157_v46 = vpop.f32.mrb[228].mxu0 }
 0x40b   :  { %v5422_v10 = vadd.f32 %v13157_v46, %v16854_v35  ;;  %v5203_v13 = vpop.f32.mrb[229].mxu0 }
 0x40c   :  { %v5420_v40 = vadd.f32 %v16854_v35, %v5203_v13  ;;  %v13158_v26 = vpop.f32.mrb[230].mxu0  ;;  %13223 = vmatprep.mubr.msk.bf16.mxu1 %vm3290_vm6, %v5528_v3 }
 0x40d   :  { %v5423_v14 = vadd.f32 %v13158_v26, %v16854_v35  ;;  %v5206_v18 = vpop.f32.mrb[231].mxu0  ;;  %13224 = vmatmul.mubr.msk.bf16.gmra.mrb[96].mxu1 %vm3290_vm6, %v5529_v38  ;;  %v5486_v11 = vmax.f32 %v5422_v10, 0.0 }
 0x40e   :  { %v5421_v62 = vadd.f32 %v16854_v35, %v5206_v18  ;;  %v5484_v54 = vmax.f32 %v5420_v40, 0.0 }
 0x40f   :  { %v5487_v5 = vmax.f32 %v5423_v14, 0.0 }
 0x410   :  { %v5485_v2 = vmax.f32 %v5421_v62, 0.0 }
 0x411   :  { %v5531_v51 = vpack.c.bf16 %v5487_v5, %v5486_v11 }
 0x412   :  { %v5530_v58 = vpack.c.bf16 %v5485_v2, %v5484_v54  ;;  %v13161_v31 = vpop.f32.mrb[232].mxu0 }
 0x413   :  { %v5426_v43 = vadd.f32 %v13161_v31, %v16854_v35  ;;  %v5219_v19 = vpop.f32.mrb[233].mxu0 }
 0x414   :  { %v5424_v15 = vadd.f32 %v16854_v35, %v5219_v19  ;;  %v13162_v56 = vpop.f32.mrb[234].mxu0  ;;  %13227 = vmatprep.mubr.msk.bf16.mxu1 %vm3290_vm6, %v5530_v58 }
 0x415   :  { %v5427_v36 = vadd.f32 %v13162_v56, %v16854_v35  ;;  %v5222_v23 = vpop.f32.mrb[235].mxu0  ;;  %13228 = vmatmul.mubr.msk.bf16.gmra.mrb[100].mxu1 %vm3290_vm6, %v5531_v51  ;;  %v5490_v32 = vmax.f32 %v5426_v43, 0.0 }
 0x416   :  { %v5425_v55 = vadd.f32 %v16854_v35, %v5222_v23  ;;  %v5488_v22 = vmax.f32 %v5424_v15, 0.0 }
 0x417   :  { %v5491_v63 = vmax.f32 %v5427_v36, 0.0 }
 0x418   :  { %v5489_v7 = vmax.f32 %v5425_v55, 0.0 }
 0x419   :  { %v5533_v48 = vpack.c.bf16 %v5491_v63, %v5490_v32 }
 0x41a   :  { %v5532_v17 = vpack.c.bf16 %v5489_v7, %v5488_v22  ;;  %v13165_v25 = vpop.f32.mrb[236].mxu0 }
 0x41b   :  { %v5430_v33 = vadd.f32 %v13165_v25, %v16854_v35  ;;  %v5235_v38 = vpop.f32.mrb[237].mxu0 }
 0x41c   :  { %v5428_v3 = vadd.f32 %v16854_v35, %v5235_v38  ;;  %v13166_v46 = vpop.f32.mrb[238].mxu0  ;;  %13231 = vmatprep.mubr.msk.bf16.mxu1 %vm3290_vm6, %v5532_v17 }
 0x41d   :  { %v5431_v10 = vadd.f32 %v13166_v46, %v16854_v35  ;;  %v5238_v13 = vpop.f32.mrb[239].mxu0  ;;  %13232 = vmatmul.mubr.msk.bf16.gmra.mrb[104].mxu1 %vm3290_vm6, %v5533_v48  ;;  %v5494_v26 = vmax.f32 %v5430_v33, 0.0 }
 0x41e   :  { %v5429_v40 = vadd.f32 %v16854_v35, %v5238_v13  ;;  %v5492_v18 = vmax.f32 %v5428_v3, 0.0 }
 0x41f   :  { %v5495_v14 = vmax.f32 %v5431_v10, 0.0 }
 0x420   :  { %v5493_v62 = vmax.f32 %v5429_v40, 0.0 }
 0x421   :  { %v5535_v11 = vpack.c.bf16 %v5495_v14, %v5494_v26 }
 0x422   :  { %v5534_v5 = vpack.c.bf16 %v5493_v62, %v5492_v18  ;;  %v13169_v54 = vpop.f32.mrb[240].mxu0 }
 0x423   :  { %v5434_v2 = vadd.f32 %v13169_v54, %v16854_v35  ;;  %v5251_v51 = vpop.f32.mrb[241].mxu0 }
 0x424   :  { %v5432_v58 = vadd.f32 %v16854_v35, %v5251_v51  ;;  %v13170_v31 = vpop.f32.mrb[242].mxu0  ;;  %13235 = vmatprep.mubr.msk.bf16.mxu1 %vm3290_vm6, %v5534_v5 }
 0x425   :  { %v5435_v43 = vadd.f32 %v13170_v31, %v16854_v35  ;;  %v5254_v19 = vpop.f32.mrb[243].mxu0  ;;  %13236 = vmatmul.mubr.msk.bf16.gmra.mrb[108].mxu1 %vm3290_vm6, %v5535_v11  ;;  %v5498_v56 = vmax.f32 %v5434_v2, 0.0 }
 0x426   :  { %v5433_v15 = vadd.f32 %v16854_v35, %v5254_v19  ;;  %v5496_v23 = vmax.f32 %v5432_v58, 0.0 }
 0x427   :  { %v5499_v36 = vmax.f32 %v5435_v43, 0.0 }
 0x428   :  { %v5497_v55 = vmax.f32 %v5433_v15, 0.0 }
 0x429   :  { %v5537_v32 = vpack.c.bf16 %v5499_v36, %v5498_v56 }
 0x42a   :  { %v5536_v63 = vpack.c.bf16 %v5497_v55, %v5496_v23  ;;  %v13173_v22 = vpop.f32.mrb[244].mxu0 }
 0x42b   :  { %v5438_v7 = vadd.f32 %v13173_v22, %v16854_v35  ;;  %v5267_v48 = vpop.f32.mrb[245].mxu0 }
 0x42c   :  { %v5436_v17 = vadd.f32 %v16854_v35, %v5267_v48  ;;  %v13174_v25 = vpop.f32.mrb[246].mxu0  ;;  %13239 = vmatprep.mubr.msk.bf16.mxu1 %vm3290_vm6, %v5536_v63 }
 0x42d   :  { %v5439_v33 = vadd.f32 %v13174_v25, %v16854_v35  ;;  %v5270_v38 = vpop.f32.mrb[247].mxu0  ;;  %13240 = vmatmul.mubr.msk.bf16.gmra.mrb[112].mxu1 %vm3290_vm6, %v5537_v32  ;;  %v5502_v46 = vmax.f32 %v5438_v7, 0.0 }
 0x42e   :  { %v5437_v3 = vadd.f32 %v16854_v35, %v5270_v38  ;;  %v5500_v13 = vmax.f32 %v5436_v17, 0.0 }
 0x42f   :  { %v5503_v10 = vmax.f32 %v5439_v33, 0.0 }
 0x430   :  { %v5501_v40 = vmax.f32 %v5437_v3, 0.0 }
 0x431   :  { %v5539_v26 = vpack.c.bf16 %v5503_v10, %v5502_v46 }
 0x432   :  { %v5538_v14 = vpack.c.bf16 %v5501_v40, %v5500_v13  ;;  %v13177_v18 = vpop.f32.mrb[248].mxu0  ;;  %v22149_v13 = vld [vmem:[#allocation16_spill] sm:$0xff] }
 0x433   :  { %v5442_v62 = vadd.f32 %v13177_v18, %v16854_v35  ;;  %v5283_v11 = vpop.f32.mrb[249].mxu0  ;;  %v17021_v40 = vadd.s32 128, %v22149_v13  ;;  %vm2318_vm14 = vcmp.eq.s32.totalorder %v22149_v13, %v16767_v12  ;;  %vm2322_vm15 = vcmp.eq.s32.totalorder %v22149_v13, %v16787_v24 }
 0x434   :  { %v5440_v5 = vadd.f32 %v16854_v35, %v5283_v11  ;;  %v13178_v54 = vpop.f32.mrb[250].mxu0  ;;  %13243 = vmatprep.mubr.msk.bf16.mxu1 %vm3290_vm6, %v5538_v14  ;;  %vm11472_vm0 = vmpackc.low %vm2322_vm15, %vm2318_vm14  ;;  %vm21774_vm7 = vcmp.eq.s32.totalorder %v22149_v13, %v16777_v1  ;;  %vm21334_vm5 = vcmp.eq.s32.totalorder %v22149_v13, %v16783_v59 }
 0x435   :  { %v5443_v2 = vadd.f32 %v13178_v54, %v16854_v35  ;;  %v5286_v51 = vpop.f32.mrb[251].mxu0  ;;  %13244 = vmatmul.mubr.msk.bf16.gmra.mrb[116].mxu1 %vm3290_vm6, %v5539_v26  ;;  %v5506_v31 = vmax.f32 %v5442_v62, 0.0  ;;  %22150 = vst [vmem:[#allocation102_spill] sm:$0xff] %v17021_v40  ;;  %vm2319_vm11 = vcmp.eq.s32.totalorder %v17021_v40, %v16767_v12  ;;  %vm2323_vm12 = vcmp.eq.s32.totalorder %v17021_v40, %v16787_v24  ;;  %v17037_v26 = vld [vmem:[%s21172_s13] ss:$0 sm:$0xff]  ;;  %vm11476_vm10 = vmpackc.low %vm21334_vm5, %vm21774_vm7 }
 0x436   :  { %v5441_v58 = vadd.f32 %v16854_v35, %v5286_v51  ;;  %v5504_v19 = vmax.f32 %v5440_v5, 0.0  ;;  %vm11470_vm13 = vmpackc.low %vm2323_vm12, %vm2319_vm11  ;;  %vm2327_vm2 = vcmp.eq.s32.totalorder %v17021_v40, %v16777_v1  ;;  %vm21335_vm3 = vcmp.eq.s32.totalorder %v17021_v40, %v16783_v59 }
 0x437   :  { %v5507_v43 = vmax.f32 %v5443_v2, 0.0  ;;  %vm11474_vm4 = vmpackc.low %vm21335_vm3, %vm2327_vm2  ;;  %vm21299_vm8 = vcmp.eq.s32.totalorder %v17021_v40, %v16797_v44  ;;  %vm21298_vm9 = vcmp.eq.s32.totalorder %v17021_v40, %v16795_v20  ;;  %vm21343_vm5 = vcmp.eq.s32.totalorder %v22149_v13, %v16879_v28 }
 0x438   :  { %v5505_v15 = vmax.f32 %v5441_v58, 0.0  ;;  %vm21340_vm3 = vcmp.eq.s32.totalorder %v22149_v13, %v16875_v53 }
 0x439   :  { %v5541_v56 = vpack.c.bf16 %v5507_v43, %v5506_v31 }
 0x43a   :  { %v5540_v36 = vpack.c.bf16 %v5505_v15, %v5504_v19  ;;  %v13181_v23 = vpop.f32.mrb[252].mxu0 }
 0x43b   :  { %v5446_v55 = vadd.f32 %v13181_v23, %v16854_v35  ;;  %v5299_v32 = vpop.f32.mrb[253].mxu0 }
 0x43c   :  { %v5444_v63 = vadd.f32 %v16854_v35, %v5299_v32  ;;  %v13182_v22 = vpop.f32.mrb[254].mxu0  ;;  %13247 = vmatprep.mubr.msk.bf16.mxu1 %vm3290_vm6, %v5540_v36 }
 0x43d   :  { %v5447_v7 = vadd.f32 %v13182_v22, %v16854_v35  ;;  %v5302_v48 = vpop.f32.mrb[255].mxu0  ;;  %13248 = vmatmul.mubr.msk.bf16.gmra.mrb[120].mxu1 %vm3290_vm6, %v5541_v56  ;;  %v5510_v25 = vmax.f32 %v5446_v55, 0.0 }
 0x43e   :  { %v5445_v17 = vadd.f32 %v16854_v35, %v5302_v48  ;;  %v5508_v38 = vmax.f32 %v5444_v63, 0.0  ;;  %v21295_v35 = vmov 1.0|1.0  }
 0x43f   :  { %v5511_v33 = vmax.f32 %v5447_v7, 0.0 }
 0x440   :  { %v5509_v3 = vmax.f32 %v5445_v17, 0.0 }
 0x441   :  { %v5543_v46 = vpack.c.bf16 %v5511_v33, %v5510_v25 }
 0x442   :  { %v5542_v10 = vpack.c.bf16 %v5509_v3, %v5508_v38 }
 0x444   :  { %13251 = vmatprep.mubr.msk.bf16.mxu1 %vm3290_vm6, %v5542_v10 }
 0x445   :  { %13252 = vmatmul.mubr.msk.bf16.gmra.mrb[124].mxu1 %vm3290_vm6, %v5543_v46 }
 0x446   :  { %11471 = vmatprep.mubr.msk.bf16.mxu1 %vm11470_vm13, %v21295_v35  ;;  %vm11478_vm13 = vmpackc.low %vm21298_vm9, %vm21299_vm8 }
 0x4a0   :  { %v13193_v14 = vpop.f32.mrb[64].mxu1 }
 0x4a1   :  { %v5722_v18 = vadd.f32 %v13193_v14, %v17037_v26  ;;  %v5713_v62 = vpop.f32.mrb[65].mxu1 }
 0x4a2   :  { %v5714_v11 = vadd.f32 %v17037_v26, %v5713_v62  ;;  %v13194_v5 = vpop.f32.mrb[66].mxu1 }
 0x4a3   :  { %v5725_v54 = vadd.f32 %v13194_v5, %v17037_v26  ;;  %v5716_v2 = vpop.f32.mrb[67].mxu1  ;;  %v5970_v58 = vmax.f32 %v5722_v18, 0.0 }
 0x4a4   :  { %v5717_v51 = vadd.f32 %v17037_v26, %v5716_v2  ;;  %v5968_v43 = vmax.f32 %v5714_v11, 0.0 }
 0x4a5   :  { %v5971_v31 = vmax.f32 %v5725_v54, 0.0 }
 0x4a6   :  { %v5969_v19 = vmax.f32 %v5717_v51, 0.0 }
 0x4a7   :  { %v17043_v15 = vpack.c.bf16 %v5971_v31, %v5970_v58 }
 0x4a8   :  { %v13197_v56 = vpop.f32.mrb[68].mxu1  ;;  %v17045_v36 = vpack.c.bf16 %v5969_v19, %v5968_v43 }
 0x4a9   :  { %22151 = vst [vmem:[#allocation105_spill] sm:$0xff] %v17043_v15  ;;  %v5738_v23 = vadd.f32 %v13197_v56, %v17037_v26  ;;  %v5729_v55 = vpop.f32.mrb[69].mxu1 }
 0x4aa   :  { %22152 = vst [vmem:[#allocation104_spill] sm:$0xff] %v17045_v36  ;;  %v5730_v32 = vadd.f32 %v17037_v26, %v5729_v55  ;;  %v13198_v63 = vpop.f32.mrb[70].mxu1  ;;  %6065 = vmatpush1.bf16.msra.mxu1 %v17045_v36 }
 0x4ab   :  { %v5741_v22 = vadd.f32 %v13198_v63, %v17037_v26  ;;  %v5732_v7 = vpop.f32.mrb[71].mxu1  ;;  %6066 = vmatprep.subr.bf16.mxu1 %v22101_v47  ;;  %v5974_v17 = vmax.f32 %v5738_v23, 0.0 }
 0x4ac   :  { %v5733_v48 = vadd.f32 %v17037_v26, %v5732_v7  ;;  %v5972_v33 = vmax.f32 %v5730_v32, 0.0 }
 0x4ad   :  { %v5975_v25 = vmax.f32 %v5741_v22, 0.0 }
 0x4ae   :  { %v5973_v38 = vmax.f32 %v5733_v48, 0.0  ;;  %6067 = vmatpush1.bf16.msra.mxu1 %v17043_v15 }
 0x4af   :  { %6068 = vmatprep.subr.bf16.mxu1 %v22101_v47  ;;  %v17055_v3 = vpack.c.bf16 %v5975_v25, %v5974_v17 }
 0x4b0   :  { %v13201_v46 = vpop.f32.mrb[72].mxu1  ;;  %v17057_v10 = vpack.c.bf16 %v5973_v38, %v5972_v33 }
 0x4b1   :  { %22153 = vst [vmem:[#allocation107_spill] sm:$0xff] %v17055_v3  ;;  %v5754_v14 = vadd.f32 %v13201_v46, %v17037_v26  ;;  %v5745_v18 = vpop.f32.mrb[73].mxu1 }
 0x4b2   :  { %22154 = vst [vmem:[#allocation106_spill] sm:$0xff] %v17057_v10  ;;  %v5746_v62 = vadd.f32 %v17037_v26, %v5745_v18  ;;  %v13202_v11 = vpop.f32.mrb[74].mxu1  ;;  %6069 = vmatpush1.bf16.msra.mxu1 %v17057_v10 }
 0x4b3   :  { %v5757_v5 = vadd.f32 %v13202_v11, %v17037_v26  ;;  %v5748_v54 = vpop.f32.mrb[75].mxu1  ;;  %6070 = vmatprep.subr.bf16.mxu1 %v22101_v47  ;;  %v5978_v51 = vmax.f32 %v5754_v14, 0.0 }
 0x4b4   :  { %v5749_v2 = vadd.f32 %v17037_v26, %v5748_v54  ;;  %v5976_v31 = vmax.f32 %v5746_v62, 0.0 }
 0x4b5   :  { %v5979_v58 = vmax.f32 %v5757_v5, 0.0 }
 0x4b6   :  { %v5977_v43 = vmax.f32 %v5749_v2, 0.0  ;;  %6071 = vmatpush1.bf16.msra.mxu1 %v17055_v3 }
 0x4b7   :  { %6072 = vmatprep.subr.bf16.mxu1 %v22101_v47  ;;  %v17067_v19 = vpack.c.bf16 %v5979_v58, %v5978_v51 }
 0x4b8   :  { %v13205_v56 = vpop.f32.mrb[76].mxu1  ;;  %v17069_v23 = vpack.c.bf16 %v5977_v43, %v5976_v31 }
 0x4b9   :  { %22155 = vst [vmem:[#allocation109_spill] sm:$0xff] %v17067_v19  ;;  %v5770_v55 = vadd.f32 %v13205_v56, %v17037_v26  ;;  %v5761_v32 = vpop.f32.mrb[77].mxu1 }
 0x4ba   :  { %22156 = vst [vmem:[#allocation108_spill] sm:$0xff] %v17069_v23  ;;  %v5762_v63 = vadd.f32 %v17037_v26, %v5761_v32  ;;  %v13206_v22 = vpop.f32.mrb[78].mxu1  ;;  %6073 = vmatpush1.bf16.msra.mxu1 %v17069_v23 }
 0x4bb   :  { %v5773_v7 = vadd.f32 %v13206_v22, %v17037_v26  ;;  %v5764_v48 = vpop.f32.mrb[79].mxu1  ;;  %6074 = vmatprep.subr.bf16.mxu1 %v22101_v47  ;;  %v5982_v25 = vmax.f32 %v5770_v55, 0.0 }
 0x4bc   :  { %v5765_v17 = vadd.f32 %v17037_v26, %v5764_v48  ;;  %v5980_v38 = vmax.f32 %v5762_v63, 0.0 }
 0x4bd   :  { %v5983_v33 = vmax.f32 %v5773_v7, 0.0 }
 0x4be   :  { %v5981_v46 = vmax.f32 %v5765_v17, 0.0  ;;  %6075 = vmatpush1.bf16.msra.mxu1 %v17067_v19 }
 0x4bf   :  { %6076 = vmatprep.subr.bf16.mxu1 %v22101_v47  ;;  %v17079_v14 = vpack.c.bf16 %v5983_v33, %v5982_v25 }
 0x4c0   :  { %v13209_v18 = vpop.f32.mrb[80].mxu1  ;;  %v17081_v62 = vpack.c.bf16 %v5981_v46, %v5980_v38 }
 0x4c1   :  { %22157 = vst [vmem:[#allocation111_spill] sm:$0xff] %v17079_v14  ;;  %v5786_v11 = vadd.f32 %v13209_v18, %v17037_v26  ;;  %v5777_v5 = vpop.f32.mrb[81].mxu1 }
 0x4c2   :  { %22158 = vst [vmem:[#allocation110_spill] sm:$0xff] %v17081_v62  ;;  %v5778_v54 = vadd.f32 %v17037_v26, %v5777_v5  ;;  %v13210_v2 = vpop.f32.mrb[82].mxu1  ;;  %6077 = vmatpush1.bf16.msra.mxu1 %v17081_v62 }
 0x4c3   :  { %v5789_v51 = vadd.f32 %v13210_v2, %v17037_v26  ;;  %v5780_v58 = vpop.f32.mrb[83].mxu1  ;;  %6078 = vmatprep.subr.bf16.mxu1 %v22101_v47  ;;  %v5986_v43 = vmax.f32 %v5786_v11, 0.0 }
 0x4c4   :  { %v5781_v31 = vadd.f32 %v17037_v26, %v5780_v58  ;;  %v5984_v55 = vmax.f32 %v5778_v54, 0.0 }
 0x4c5   :  { %v5987_v56 = vmax.f32 %v5789_v51, 0.0 }
 0x4c6   :  { %v5985_v32 = vmax.f32 %v5781_v31, 0.0  ;;  %6079 = vmatpush1.bf16.msra.mxu1 %v17079_v14 }
 0x4c7   :  { %6080 = vmatprep.subr.bf16.mxu1 %v22101_v47  ;;  %v17091_v63 = vpack.c.bf16 %v5987_v56, %v5986_v43 }
 0x4c8   :  { %v13213_v22 = vpop.f32.mrb[84].mxu1  ;;  %v17093_v7 = vpack.c.bf16 %v5985_v32, %v5984_v55 }
 0x4c9   :  { %22159 = vst [vmem:[#allocation113_spill] sm:$0xff] %v17091_v63  ;;  %v5802_v48 = vadd.f32 %v13213_v22, %v17037_v26  ;;  %v5793_v17 = vpop.f32.mrb[85].mxu1 }
 0x4ca   :  { %22160 = vst [vmem:[#allocation112_spill] sm:$0xff] %v17093_v7  ;;  %v5794_v25 = vadd.f32 %v17037_v26, %v5793_v17  ;;  %v13214_v33 = vpop.f32.mrb[86].mxu1  ;;  %6081 = vmatpush1.bf16.msra.mxu1 %v17093_v7 }
 0x4cb   :  { %v5805_v38 = vadd.f32 %v13214_v33, %v17037_v26  ;;  %v5796_v46 = vpop.f32.mrb[87].mxu1  ;;  %6082 = vmatprep.subr.bf16.mxu1 %v22101_v47  ;;  %v5990_v11 = vmax.f32 %v5802_v48, 0.0 }
 0x4cc   :  { %v5797_v18 = vadd.f32 %v17037_v26, %v5796_v46  ;;  %v5988_v54 = vmax.f32 %v5794_v25, 0.0 }
 0x4cd   :  { %v5991_v5 = vmax.f32 %v5805_v38, 0.0 }
 0x4ce   :  { %v5989_v2 = vmax.f32 %v5797_v18, 0.0  ;;  %6083 = vmatpush1.bf16.msra.mxu1 %v17091_v63 }
 0x4cf   :  { %6084 = vmatprep.subr.bf16.mxu1 %v22101_v47  ;;  %v17103_v51 = vpack.c.bf16 %v5991_v5, %v5990_v11 }
 0x4d0   :  { %v13217_v58 = vpop.f32.mrb[88].mxu1  ;;  %v17105_v31 = vpack.c.bf16 %v5989_v2, %v5988_v54 }
 0x4d1   :  { %22161 = vst [vmem:[#allocation115_spill] sm:$0xff] %v17103_v51  ;;  %v5818_v43 = vadd.f32 %v13217_v58, %v17037_v26  ;;  %v5809_v56 = vpop.f32.mrb[89].mxu1 }
 0x4d2   :  { %22162 = vst [vmem:[#allocation114_spill] sm:$0xff] %v17105_v31  ;;  %v5810_v55 = vadd.f32 %v17037_v26, %v5809_v56  ;;  %v13218_v32 = vpop.f32.mrb[90].mxu1  ;;  %6085 = vmatpush1.bf16.msra.mxu1 %v17105_v31 }
 0x4d3   :  { %v5821_v22 = vadd.f32 %v13218_v32, %v17037_v26  ;;  %v5812_v48 = vpop.f32.mrb[91].mxu1  ;;  %6086 = vmatprep.subr.bf16.mxu1 %v22101_v47  ;;  %v5994_v25 = vmax.f32 %v5818_v43, 0.0 }
 0x4d4   :  { %v5813_v17 = vadd.f32 %v17037_v26, %v5812_v48  ;;  %v5992_v38 = vmax.f32 %v5810_v55, 0.0 }
 0x4d5   :  { %v5995_v33 = vmax.f32 %v5821_v22, 0.0 }
 0x4d6   :  { %v5993_v46 = vmax.f32 %v5813_v17, 0.0  ;;  %6087 = vmatpush1.bf16.msra.mxu1 %v17103_v51 }
 0x4d7   :  { %6088 = vmatprep.subr.bf16.mxu1 %v22101_v47  ;;  %v17115_v18 = vpack.c.bf16 %v5995_v33, %v5994_v25 }
 0x4d8   :  { %v13221_v11 = vpop.f32.mrb[92].mxu1  ;;  %v17117_v5 = vpack.c.bf16 %v5993_v46, %v5992_v38 }
 0x4d9   :  { %22163 = vst [vmem:[#allocation117_spill] sm:$0xff] %v17115_v18  ;;  %v5834_v54 = vadd.f32 %v13221_v11, %v17037_v26  ;;  %v5825_v2 = vpop.f32.mrb[93].mxu1 }
 0x4da   :  { %22164 = vst [vmem:[#allocation116_spill] sm:$0xff] %v17117_v5  ;;  %v5826_v58 = vadd.f32 %v17037_v26, %v5825_v2  ;;  %v13222_v56 = vpop.f32.mrb[94].mxu1  ;;  %6089 = vmatpush1.bf16.msra.mxu1 %v17117_v5 }
 0x4db   :  { %v5837_v43 = vadd.f32 %v13222_v56, %v17037_v26  ;;  %v5828_v55 = vpop.f32.mrb[95].mxu1  ;;  %6090 = vmatprep.subr.bf16.mxu1 %v22101_v47  ;;  %v5998_v22 = vmax.f32 %v5834_v54, 0.0 }
 0x4dc   :  { %v5829_v32 = vadd.f32 %v17037_v26, %v5828_v55  ;;  %v5996_v17 = vmax.f32 %v5826_v58, 0.0 }
 0x4dd   :  { %v5999_v48 = vmax.f32 %v5837_v43, 0.0 }
 0x4de   :  { %v5997_v25 = vmax.f32 %v5829_v32, 0.0  ;;  %6091 = vmatpush1.bf16.msra.mxu1 %v17115_v18 }
 0x4df   :  { %6092 = vmatprep.subr.bf16.mxu1 %v22101_v47  ;;  %v17127_v33 = vpack.c.bf16 %v5999_v48, %v5998_v22 }
 0x4e0   :  { %v13225_v38 = vpop.f32.mrb[96].mxu1  ;;  %v17129_v46 = vpack.c.bf16 %v5997_v25, %v5996_v17 }
 0x4e1   :  { %22165 = vst [vmem:[#allocation18_spill] sm:$0xff] %v17127_v33  ;;  %v5850_v11 = vadd.f32 %v13225_v38, %v17037_v26  ;;  %v5841_v2 = vpop.f32.mrb[97].mxu1 }
 0x4e2   :  { %22166 = vst [vmem:[#allocation68_spill] sm:$0xff] %v17129_v46  ;;  %v5842_v56 = vadd.f32 %v17037_v26, %v5841_v2  ;;  %v13226_v35 = vpop.f32.mrb[98].mxu1  ;;  %6093 = vmatpush1.bf16.msra.mxu1 %v17129_v46  ;;  %v22169_v2 = vmov 1.0|1.0  }
 0x4e3   :  { %v5853_v54 = vadd.f32 %v13226_v35, %v17037_v26  ;;  %v5844_v58 = vpop.f32.mrb[99].mxu1  ;;  %6094 = vmatprep.subr.bf16.mxu1 %v22101_v47  ;;  %v6002_v55 = vmax.f32 %v5850_v11, 0.0 }
 0x4e4   :  { %v5845_v43 = vadd.f32 %v17037_v26, %v5844_v58  ;;  %v6000_v22 = vmax.f32 %v5842_v56, 0.0 }
 0x4e5   :  { %v6003_v32 = vmax.f32 %v5853_v54, 0.0 }
 0x4e6   :  { %v6001_v48 = vmax.f32 %v5845_v43, 0.0  ;;  %6095 = vmatpush1.bf16.msra.mxu1 %v17127_v33 }
 0x4e7   :  { %6353 = vmatprep.subr.bf16.mxu1 %v22101_v47  ;;  %v17153_v35 = vpack.c.bf16 %v6003_v32, %v6002_v55 }
 0x4e8   :  { %v13229_v17 = vpop.f32.mrb[100].mxu1  ;;  %v17155_v25 = vpack.c.bf16 %v6001_v48, %v6000_v22 }
 0x4e9   :  { %22167 = vst [vmem:[#allocation70_spill] sm:$0xff] %v17153_v35  ;;  %v5866_v38 = vadd.f32 %v13229_v17, %v17037_v26  ;;  %v5857_v11 = vpop.f32.mrb[101].mxu1  ;;  %11473 = vmatmul.mubr.msk.bf16.vlgmr.msra.gmra.mrb[128].mxu1 %vm11472_vm0, %v22169_v2  ;;  %vm21305_vm0 = vcmp.eq.s32.totalorder %v22149_v13, %v16797_v44 }
 0x4ea   :  { %22168 = vst [vmem:[#allocation71_spill] sm:$0xff] %v17155_v25  ;;  %v5858_v56 = vadd.f32 %v17037_v26, %v5857_v11  ;;  %v13230_v54 = vpop.f32.mrb[102].mxu1  ;;  %11475 = vmatprep.mubr.msk.bf16.mxu1 %vm11474_vm4, %v22169_v2  ;;  %6354 = vmatpush1.bf16.msra.mxu1 %v17155_v25  ;;  %vm21304_vm4 = vcmp.eq.s32.totalorder %v22149_v13, %v16795_v20 }
 0x4eb   :  { %v5869_v58 = vadd.f32 %v13230_v54, %v17037_v26  ;;  %v5860_v43 = vpop.f32.mrb[103].mxu1  ;;  %6355 = vmatprep.subr.bf16.mxu1 %v22101_v47  ;;  %v6006_v32 = vmax.f32 %v5866_v38, 0.0  ;;  %vm11480_vm9 = vmpackc.low %vm21304_vm4, %vm21305_vm0 }
 0x4ec   :  { %v5861_v55 = vadd.f32 %v17037_v26, %v5860_v43  ;;  %v6004_v48 = vmax.f32 %v5858_v56, 0.0 }
 0x4ed   :  { %v6007_v22 = vmax.f32 %v5869_v58, 0.0 }
 0x4ee   :  { %v6005_v17 = vmax.f32 %v5861_v55, 0.0  ;;  %6356 = vmatpush1.bf16.msra.mxu1 %v17153_v35 }
 0x4ef   :  { %6357 = vmatprep.subr.bf16.mxu1 %v22101_v47  ;;  %v17181_v38 = vpack.c.bf16 %v6007_v22, %v6006_v32 }
 0x4f0   :  { %v13233_v11 = vpop.f32.mrb[104].mxu1  ;;  %v17189_v56 = vpack.c.bf16 %v6005_v17, %v6004_v48 }
 0x4f1   :  { %22170 = vst [vmem:[#allocation67_spill] sm:$0xff] %v17181_v38  ;;  %v5882_v54 = vadd.f32 %v13233_v11, %v17037_v26  ;;  %v5873_v58 = vpop.f32.mrb[105].mxu1  ;;  %11477 = vmatmul.mubr.msk.bf16.gmra.mrb[132].mxu1 %vm11476_vm10, %v22169_v2  ;;  %vm21303_vm10 = vcmp.eq.s32.totalorder %v17021_v40, %v16807_v39 }
 0x4f2   :  { %22171 = vst [vmem:[#allocation72_spill] sm:$0xff] %v17189_v56  ;;  %v5874_v43 = vadd.f32 %v17037_v26, %v5873_v58  ;;  %v13234_v55 = vpop.f32.mrb[106].mxu1  ;;  %11479 = vmatprep.mubr.msk.bf16.mxu1 %vm11478_vm13, %v22169_v2  ;;  %6358 = vmatpush1.bf16.msra.mxu1 %v17189_v56  ;;  %vm21301_vm13 = vcmp.eq.s32.totalorder %v17021_v40, %v16803_v0 }
 0x4f3   :  { %v5885_v32 = vadd.f32 %v13234_v55, %v17037_v26  ;;  %v5876_v22 = vpop.f32.mrb[107].mxu1  ;;  %6359 = vmatprep.subr.bf16.mxu1 %v22101_v47  ;;  %v6010_v17 = vmax.f32 %v5882_v54, 0.0  ;;  %vm11482_vm8 = vmpackc.low %vm21301_vm13, %vm21303_vm10  ;;  %vm21310_vm13 = vcmp.eq.s32.totalorder %v22149_v13, %v16803_v0  ;;  %vm21307_vm10 = vcmp.eq.s32.totalorder %v17021_v40, %v16815_v37 }
 0x4f4   :  { %v5877_v48 = vadd.f32 %v17037_v26, %v5876_v22  ;;  %v6008_v58 = vmax.f32 %v5874_v43, 0.0 }
 0x4f5   :  { %v6011_v11 = vmax.f32 %v5885_v32, 0.0 }
 0x4f6   :  { %v6009_v35 = vmax.f32 %v5877_v48, 0.0  ;;  %6360 = vmatpush1.bf16.msra.mxu1 %v17181_v38 }
 0x4f7   :  { %6361 = vmatprep.subr.bf16.mxu1 %v22101_v47  ;;  %v17215_v54 = vpack.c.bf16 %v6011_v11, %v6010_v17 }
 0x4f8   :  { %v13237_v55 = vpop.f32.mrb[108].mxu1  ;;  %v17223_v43 = vpack.c.bf16 %v6009_v35, %v6008_v58 }
 0x4f9   :  { %22172 = vst [vmem:[#allocation69_spill] sm:$0xff] %v17215_v54  ;;  %v5898_v32 = vadd.f32 %v13237_v55, %v17037_v26  ;;  %v5889_v22 = vpop.f32.mrb[109].mxu1  ;;  %11481 = vmatmul.mubr.msk.bf16.gmra.mrb[136].mxu1 %vm11480_vm9, %v22169_v2  ;;  %vm21311_vm9 = vcmp.eq.s32.totalorder %v22149_v13, %v16807_v39 }
 0x4fa   :  { %22173 = vst [vmem:[#allocation118_spill] sm:$0xff] %v17223_v43  ;;  %v5890_v48 = vadd.f32 %v17037_v26, %v5889_v22  ;;  %v13238_v17 = vpop.f32.mrb[110].mxu1  ;;  %11483 = vmatprep.mubr.msk.bf16.mxu1 %vm11482_vm8, %v22169_v2  ;;  %6362 = vmatpush1.bf16.msra.mxu1 %v17223_v43  ;;  %vm21309_vm8 = vcmp.eq.s32.totalorder %v17021_v40, %v16817_v4  ;;  %vm11484_vm4 = vmpackc.low %vm21310_vm13, %vm21311_vm9 }
 0x4fb   :  { %v5901_v35 = vadd.f32 %v13238_v17, %v17037_v26  ;;  %v5892_v11 = vpop.f32.mrb[111].mxu1  ;;  %6363 = vmatprep.subr.bf16.mxu1 %v22101_v47  ;;  %v6014_v55 = vmax.f32 %v5898_v32, 0.0  ;;  %vm11486_vm0 = vmpackc.low %vm21307_vm10, %vm21309_vm8  ;;  %vm21316_vm10 = vcmp.eq.s32.totalorder %v22149_v13, %v16815_v37  ;;  %vm21313_vm8 = vcmp.eq.s32.totalorder %v17021_v40, %v16823_v57 }
 0x4fc   :  { %v5893_v58 = vadd.f32 %v17037_v26, %v5892_v11  ;;  %v6012_v22 = vmax.f32 %v5890_v48, 0.0 }
 0x4fd   :  { %v6015_v38 = vmax.f32 %v5901_v35, 0.0 }
 0x4fe   :  { %v6013_v56 = vmax.f32 %v5893_v58, 0.0  ;;  %6364 = vmatpush1.bf16.msra.mxu1 %v17215_v54 }
 0x4ff   :  { %6365 = vmatprep.subr.bf16.mxu1 %v22101_v47  ;;  %v17249_v32 = vpack.c.bf16 %v6015_v38, %v6014_v55 }
 0x500   :  { %v13241_v17 = vpop.f32.mrb[112].mxu1  ;;  %v17257_v48 = vpack.c.bf16 %v6013_v56, %v6012_v22 }
 0x501   :  { %22174 = vst [vmem:[#allocation119_spill] sm:$0xff] %v17249_v32  ;;  %v5914_v35 = vadd.f32 %v13241_v17, %v17037_v26  ;;  %v5905_v11 = vpop.f32.mrb[113].mxu1  ;;  %11485 = vmatmul.mubr.msk.bf16.gmra.mrb[140].mxu1 %vm11484_vm4, %v22169_v2  ;;  %vm21317_vm4 = vcmp.eq.s32.totalorder %v22149_v13, %v16817_v4 }
 0x502   :  { %22175 = vst [vmem:[#allocation120_spill] sm:$0xff] %v17257_v48  ;;  %v5906_v38 = vadd.f32 %v17037_v26, %v5905_v11  ;;  %v13242_v58 = vpop.f32.mrb[114].mxu1  ;;  %11487 = vmatprep.mubr.msk.bf16.mxu1 %vm11486_vm0, %v22169_v2  ;;  %6366 = vmatpush1.bf16.msra.mxu1 %v17257_v48  ;;  %vm21315_vm0 = vcmp.eq.s32.totalorder %v17021_v40, %v16827_v34  ;;  %vm11488_vm13 = vmpackc.low %vm21316_vm10, %vm21317_vm4 }
 0x503   :  { %v5917_v56 = vadd.f32 %v13242_v58, %v17037_v26  ;;  %v5908_v55 = vpop.f32.mrb[115].mxu1  ;;  %6367 = vmatprep.subr.bf16.mxu1 %v22101_v47  ;;  %v6018_v17 = vmax.f32 %v5914_v35, 0.0  ;;  %vm11490_vm9 = vmpackc.low %vm21313_vm8, %vm21315_vm0  ;;  %vm21322_vm8 = vcmp.eq.s32.totalorder %v22149_v13, %v16823_v57  ;;  %vm21319_vm0 = vcmp.eq.s32.totalorder %v17021_v40, %v16835_v21 }
 0x504   :  { %v5909_v22 = vadd.f32 %v17037_v26, %v5908_v55  ;;  %v6016_v11 = vmax.f32 %v5906_v38, 0.0 }
 0x505   :  { %v6019_v54 = vmax.f32 %v5917_v56, 0.0 }
 0x506   :  { %v6017_v43 = vmax.f32 %v5909_v22, 0.0  ;;  %6368 = vmatpush1.bf16.msra.mxu1 %v17249_v32 }
 0x507   :  { %6369 = vmatprep.subr.bf16.mxu1 %v22101_v47  ;;  %v17283_v35 = vpack.c.bf16 %v6019_v54, %v6018_v17 }
 0x508   :  { %v13245_v58 = vpop.f32.mrb[116].mxu1  ;;  %v17291_v38 = vpack.c.bf16 %v6017_v43, %v6016_v11 }
 0x509   :  { %22176 = vst [vmem:[#allocation121_spill] sm:$0xff] %v17283_v35  ;;  %v5930_v56 = vadd.f32 %v13245_v58, %v17037_v26  ;;  %v5921_v55 = vpop.f32.mrb[117].mxu1  ;;  %11489 = vmatmul.mubr.msk.bf16.gmra.mrb[144].mxu1 %vm11488_vm13, %v22169_v2  ;;  %vm21323_vm13 = vcmp.eq.s32.totalorder %v22149_v13, %v16827_v34 }
 0x50a   :  { %22177 = vst [vmem:[#allocation122_spill] sm:$0xff] %v17291_v38  ;;  %v5922_v54 = vadd.f32 %v17037_v26, %v5921_v55  ;;  %v13246_v22 = vpop.f32.mrb[118].mxu1  ;;  %11491 = vmatprep.mubr.msk.bf16.mxu1 %vm11490_vm9, %v22169_v2  ;;  %6370 = vmatpush1.bf16.msra.mxu1 %v17291_v38  ;;  %vm21321_vm9 = vcmp.eq.s32.totalorder %v17021_v40, %v16837_v49  ;;  %vm11492_vm10 = vmpackc.low %vm21322_vm8, %vm21323_vm13 }
 0x50b   :  { %v5933_v43 = vadd.f32 %v13246_v22, %v17037_v26  ;;  %v5924_v17 = vpop.f32.mrb[119].mxu1  ;;  %6371 = vmatprep.subr.bf16.mxu1 %v22101_v47  ;;  %v6022_v58 = vmax.f32 %v5930_v56, 0.0  ;;  %vm11494_vm4 = vmpackc.low %vm21319_vm0, %vm21321_vm9  ;;  %vm21328_vm0 = vcmp.eq.s32.totalorder %v22149_v13, %v16835_v21  ;;  %vm21325_vm9 = vcmp.eq.s32.totalorder %v17021_v40, %v16843_v6 }
 0x50c   :  { %v5925_v11 = vadd.f32 %v17037_v26, %v5924_v17  ;;  %v6020_v55 = vmax.f32 %v5922_v54, 0.0 }
 0x50d   :  { %v6023_v32 = vmax.f32 %v5933_v43, 0.0 }
 0x50e   :  { %v6021_v48 = vmax.f32 %v5925_v11, 0.0  ;;  %6372 = vmatpush1.bf16.msra.mxu1 %v17283_v35 }
 0x50f   :  { %6373 = vmatprep.subr.bf16.mxu1 %v22101_v47  ;;  %v17317_v56 = vpack.c.bf16 %v6023_v32, %v6022_v58 }
 0x510   :  { %v13249_v22 = vpop.f32.mrb[120].mxu1  ;;  %v17325_v54 = vpack.c.bf16 %v6021_v48, %v6020_v55 }
 0x511   :  { %22178 = vst [vmem:[#allocation123_spill] sm:$0xff] %v17317_v56  ;;  %v5946_v43 = vadd.f32 %v13249_v22, %v17037_v26  ;;  %v5937_v17 = vpop.f32.mrb[121].mxu1  ;;  %11493 = vmatmul.mubr.msk.bf16.gmra.mrb[148].mxu1 %vm11492_vm10, %v22169_v2  ;;  %vm21329_vm10 = vcmp.eq.s32.totalorder %v22149_v13, %v16837_v49 }
 0x512   :  { %22179 = vst [vmem:[#allocation124_spill] sm:$0xff] %v17325_v54  ;;  %v5938_v32 = vadd.f32 %v17037_v26, %v5937_v17  ;;  %v13250_v11 = vpop.f32.mrb[122].mxu1  ;;  %11495 = vmatprep.mubr.msk.bf16.mxu1 %vm11494_vm4, %v22169_v2  ;;  %6374 = vmatpush1.bf16.msra.mxu1 %v17325_v54  ;;  %vm21327_vm4 = vcmp.eq.s32.totalorder %v17021_v40, %v16847_v30  ;;  %vm11496_vm8 = vmpackc.low %vm21328_vm0, %vm21329_vm10 }
 0x513   :  { %v5949_v48 = vadd.f32 %v13250_v11, %v17037_v26  ;;  %v5940_v58 = vpop.f32.mrb[123].mxu1  ;;  %6375 = vmatprep.subr.bf16.mxu1 %v22101_v47  ;;  %v6026_v22 = vmax.f32 %v5946_v43, 0.0  ;;  %vm11498_vm13 = vmpackc.low %vm21325_vm9, %vm21327_vm4  ;;  %vm21330_vm9 = vcmp.eq.s32.totalorder %v22149_v13, %v16843_v6  ;;  %vm21332_vm4 = vcmp.eq.s32.totalorder %v17021_v40, %v16860_v27 }
 0x514   :  { %v5941_v55 = vadd.f32 %v17037_v26, %v5940_v58  ;;  %v6024_v17 = vmax.f32 %v5938_v32, 0.0 }
 0x515   :  { %v6027_v35 = vmax.f32 %v5949_v48, 0.0 }
 0x516   :  { %v6025_v38 = vmax.f32 %v5941_v55, 0.0  ;;  %6376 = vmatpush1.bf16.msra.mxu1 %v17317_v56 }
 0x517   :  { %6377 = vmatprep.subr.bf16.mxu1 %v22101_v47  ;;  %v17351_v43 = vpack.c.bf16 %v6027_v35, %v6026_v22 }
 0x518   :  { %v13253_v11 = vpop.f32.mrb[124].mxu1  ;;  %v17359_v32 = vpack.c.bf16 %v6025_v38, %v6024_v17 }
 0x519   :  { %22180 = vst [vmem:[#allocation125_spill] sm:$0xff] %v17351_v43  ;;  %v5962_v48 = vadd.f32 %v13253_v11, %v17037_v26  ;;  %v5953_v58 = vpop.f32.mrb[125].mxu1  ;;  %11497 = vmatmul.mubr.msk.bf16.gmra.mrb[152].mxu1 %vm11496_vm8, %v22169_v2  ;;  %vm21331_vm8 = vcmp.eq.s32.totalorder %v22149_v13, %v16847_v30 }
 0x51a   :  { %22181 = vst [vmem:[#allocation126_spill] sm:$0xff] %v17359_v32  ;;  %v5954_v35 = vadd.f32 %v17037_v26, %v5953_v58  ;;  %v13254_v55 = vpop.f32.mrb[126].mxu1  ;;  %11499 = vmatprep.mubr.msk.bf16.mxu1 %vm11498_vm13, %v22169_v2  ;;  %6378 = vmatpush1.bf16.msra.mxu1 %v17359_v32  ;;  %vm21333_vm13 = vcmp.eq.s32.totalorder %v17021_v40, %v16863_v9  ;;  %vm11500_vm0 = vmpackc.low %vm21330_vm9, %vm21331_vm8 }
 0x51b   :  { %v5965_v38 = vadd.f32 %v13254_v55, %v17037_v26  ;;  %v5956_v22 = vpop.f32.mrb[127].mxu1  ;;  %6379 = vmatprep.subr.bf16.mxu1 %v22101_v47  ;;  %v6030_v11 = vmax.f32 %v5962_v48, 0.0  ;;  %vm11502_vm10 = vmpackc.low %vm21332_vm4, %vm21333_vm13  ;;  %vm21339_vm9 = vcmp.eq.s32.totalorder %v22149_v13, %v16863_v9  ;;  %vm21336_vm8 = vcmp.eq.s32.totalorder %v22149_v13, %v16860_v27 }
 0x51c   :  { %v5957_v17 = vadd.f32 %v17037_v26, %v5956_v22  ;;  %v6028_v58 = vmax.f32 %v5954_v35, 0.0  ;;  %vm21337_vm4 = vcmp.eq.s32.totalorder %v17021_v40, %v16875_v53 }
 0x51d   :  { %v6031_v56 = vmax.f32 %v5965_v38, 0.0 }
 0x51e   :  { %v6029_v54 = vmax.f32 %v5957_v17, 0.0  ;;  %6380 = vmatpush1.bf16.msra.mxu1 %v17351_v43 }
 0x51f   :  { %6381 = vmatprep.subr.bf16.mxu1 %v22101_v47  ;;  %v17385_v26 = vpack.c.bf16 %v6031_v56, %v6030_v11  ;;  %v17540_v56 = vpop.permute.xlu0 %2217 }
 0x520   :  { %v17393_v48 = vpack.c.bf16 %v6029_v54, %v6028_v58  ;;  %22185 = vst [vmem:[#allocation130_spill] sm:$0xff] %v17540_v56 }
 0x521   :  { %22182 = vst [vmem:[#allocation127_spill] sm:$0xff] %v17385_v26  ;;  %11501 = vmatmul.mubr.msk.bf16.gmra.mrb[156].mxu1 %vm11500_vm0, %v22169_v2  ;;  %vm21338_vm0 = vcmp.eq.s32.totalorder %v17021_v40, %v16879_v28 }
 0x522   :  { %22183 = vst [vmem:[#allocation128_spill] sm:$0xff] %v17393_v48  ;;  %11503 = vmatprep.mubr.msk.bf16.mxu1 %vm11502_vm10, %v22169_v2  ;;  %6382 = vmatpush1.bf16.msra.mxu1 %v17393_v48  ;;  %vm11504_vm10 = vmpackc.low %vm21336_vm8, %vm21339_vm9  ;;  %vm21342_vm8 = vcmp.eq.s32.totalorder %v17021_v40, %v16894_v42  ;;  %vm21344_vm9 = vcmp.eq.s32.totalorder %v22149_v13, %v16892_v16 }
 0x523   :  { %6383 = vmatprep.subr.bf16.mxu1 %v22101_v47  ;;  %vm11506_vm13 = vmpackc.low %vm21337_vm4, %vm21338_vm0  ;;  %vm21347_vm0 = vcmp.eq.s32.totalorder %v22149_v13, %v16894_v42  ;;  %v17538_v47 = vpop.permute.xlu1 %2220  ;;  %v17566_v35 = vpop.permute.xlu0 %2223 }
 0x524   :  { %vm11508_vm4 = vmpackc.low %vm21340_vm3, %vm21343_vm5  ;;  %vm21346_vm3 = vcmp.eq.s32.totalorder %v17021_v40, %v16910_v52  ;;  %vm21348_vm5 = vcmp.eq.s32.totalorder %v22149_v13, %v16904_v29  ;;  %22184 = vst [vmem:[#allocation129_spill] sm:$0xff] %v17538_v47 }
 0x525   :  { %22187 = vst [vmem:[#allocation132_spill] sm:$0xff] %v17566_v35 }
 0x526   :  { %6384 = vmatpush1.bf16.msra.mxu1 %v17385_v26 }
 0x527   :  { %v17564_v54 = vpop.permute.xlu1 %2226  ;;  %v17592_v38 = vpop.permute.xlu0 %2229 }
 0x528   :  { %22186 = vst [vmem:[#allocation131_spill] sm:$0xff] %v17564_v54  ;;  %22189 = vst [vmem:[#allocation134_spill] sm:$0xff] %v17592_v38 }
 0x529   :  { %11505 = vmatmul.mubr.msk.bf16.gmra.mrb[160].mxu1 %vm11504_vm10, %v22169_v2  ;;  %vm21341_vm10 = vcmp.eq.s32.totalorder %v17021_v40, %v16892_v16 }
 0x52a   :  { %11507 = vmatprep.mubr.msk.bf16.mxu1 %vm11506_vm13, %v22169_v2  ;;  %vm11510_vm13 = vmpackc.low %vm21341_vm10, %vm21342_vm8  ;;  %vm21351_vm8 = vcmp.eq.s32.totalorder %v22149_v13, %v16910_v52 }
 0x52b   :  { %vm11512_vm10 = vmpackc.low %vm21344_vm9, %vm21347_vm0  ;;  %vm21350_vm9 = vcmp.eq.s32.totalorder %v17021_v40, %v16921_v50  ;;  %vm21352_vm0 = vcmp.eq.s32.totalorder %v22149_v13, %v16918_v41  ;;  %v17590_v55 = vpop.permute.xlu1 %2232  ;;  %v17618_v17 = vpop.permute.xlu0 %2235 }
 0x52c   :  { %22188 = vst [vmem:[#allocation133_spill] sm:$0xff] %v17590_v55  ;;  %22191 = vst [vmem:[#allocation136_spill] sm:$0xff] %v17618_v17 }
 0x52f   :  { %v17616_v22 = vpop.permute.xlu1 %2238  ;;  %v17644_v58 = vpop.permute.xlu0 %2241 }
 0x530   :  { %22190 = vst [vmem:[#allocation135_spill] sm:$0xff] %v17616_v22  ;;  %22193 = vst [vmem:[#allocation138_spill] sm:$0xff] %v17644_v58 }
 0x531   :  { %11509 = vmatmul.mubr.msk.bf16.gmra.mrb[164].mxu1 %vm11508_vm4, %v22169_v2  ;;  %vm21345_vm4 = vcmp.eq.s32.totalorder %v17021_v40, %v16904_v29 }
 0x532   :  { %11511 = vmatprep.mubr.msk.bf16.mxu1 %vm11510_vm13, %v22169_v2  ;;  %vm11514_vm13 = vmpackc.low %vm21345_vm4, %vm21346_vm3  ;;  %vm21462_vm3 = vcmp.eq.s32.totalorder %v22149_v13, %v16921_v50 }
 0x533   :  { %vm11516_vm4 = vmpackc.low %vm21348_vm5, %vm21351_vm8  ;;  %vm21354_vm5 = vcmp.eq.s32.totalorder %v17021_v40, %v16937_v61  ;;  %vm21355_vm8 = vcmp.eq.s32.totalorder %v22149_v13, %v16933_v60  ;;  %v17642_v11 = vpop.permute.xlu1 %2244  ;;  %v17670_v48 = vpop.permute.xlu0 %2247 }
 0x534   :  { %22192 = vst [vmem:[#allocation137_spill] sm:$0xff] %v17642_v11  ;;  %22195 = vst [vmem:[#allocation140_spill] sm:$0xff] %v17670_v48 }
 0x537   :  { %v17668_v26 = vpop.permute.xlu1 %2250  ;;  %v17696_v32 = vpop.permute.xlu0 %2253 }
 0x538   :  { %22194 = vst [vmem:[#allocation139_spill] sm:$0xff] %v17668_v26  ;;  %22197 = vst [vmem:[#allocation142_spill] sm:$0xff] %v17696_v32 }
 0x539   :  { %11513 = vmatmul.mubr.msk.bf16.gmra.mrb[168].mxu1 %vm11512_vm10, %v22169_v2  ;;  %vm21349_vm10 = vcmp.eq.s32.totalorder %v17021_v40, %v16918_v41 }
 0x53a   :  { %11515 = vmatprep.mubr.msk.bf16.mxu1 %vm11514_vm13, %v22169_v2  ;;  %vm11518_vm13 = vmpackc.low %vm21349_vm10, %vm21350_vm9  ;;  %vm21356_vm9 = vcmp.eq.s32.totalorder %v22149_v13, %v16937_v61 }
 0x53b   :  { %vm11520_vm10 = vmpackc.low %vm21352_vm0, %vm21462_vm3  ;;  %vm21358_vm0 = vcmp.eq.s32.totalorder %v17021_v40, %v16950_v45  ;;  %v17694_v43 = vpop.permute.xlu1 %2256  ;;  %v17722_v33 = vpop.permute.xlu0 %2259 }
 0x53c   :  { %22196 = vst [vmem:[#allocation141_spill] sm:$0xff] %v17694_v43  ;;  %22199 = vst [vmem:[#allocation144_spill] sm:$0xff] %v17722_v33 }
 0x53f   :  { %v17720_v25 = vpop.permute.xlu1 %2262  ;;  %v17748_v18 = vpop.permute.xlu0 %2265 }
 0x540   :  { %22198 = vst [vmem:[#allocation143_spill] sm:$0xff] %v17720_v25  ;;  %22201 = vst [vmem:[#allocation146_spill] sm:$0xff] %v17748_v18 }
 0x541   :  { %11517 = vmatmul.mubr.msk.bf16.gmra.mrb[172].mxu1 %vm11516_vm4, %v22169_v2  ;;  %vm21353_vm4 = vcmp.eq.s32.totalorder %v17021_v40, %v16933_v60 }
 0x542   :  { %11519 = vmatprep.mubr.msk.bf16.mxu1 %vm11518_vm13, %v22169_v2  ;;  %vm11522_vm13 = vmpackc.low %vm21353_vm4, %vm21354_vm5  ;;  %vm21360_vm5 = vcmp.eq.s32.totalorder %v22149_v13, %v16950_v45 }
 0x543   :  { %vm11524_vm4 = vmpackc.low %vm21355_vm8, %vm21356_vm9  ;;  %vm21359_vm8 = vcmp.eq.s32.totalorder %v22149_v13, %v16948_v8  ;;  %vm21361_vm9 = vcmp.eq.s32.totalorder %v17021_v40, %v17538_v47  ;;  %v17746_v46 = vpop.permute.xlu1 %2268  ;;  %v17774_v51 = vpop.permute.xlu0 %2271 }
 0x544   :  { %22200 = vst [vmem:[#allocation145_spill] sm:$0xff] %v17746_v46  ;;  %22203 = vst [vmem:[#allocation148_spill] sm:$0xff] %v17774_v51 }
 0x547   :  { %v17772_v5 = vpop.permute.xlu1 %2274  ;;  %v17800_v63 = vpop.permute.xlu0 %2277 }
 0x548   :  { %22202 = vst [vmem:[#allocation147_spill] sm:$0xff] %v17772_v5  ;;  %22205 = vst [vmem:[#allocation150_spill] sm:$0xff] %v17800_v63 }
 0x549   :  { %11521 = vmatmul.mubr.msk.bf16.gmra.mrb[176].mxu1 %vm11520_vm10, %v22169_v2  ;;  %vm21357_vm10 = vcmp.eq.s32.totalorder %v17021_v40, %v16948_v8 }
 0x54a   :  { %11523 = vmatprep.mubr.msk.bf16.mxu1 %vm11522_vm13, %v22169_v2  ;;  %vm11526_vm13 = vmpackc.low %vm21357_vm10, %vm21358_vm0  ;;  %vm21364_vm0 = vcmp.eq.s32.totalorder %v22149_v13, %v17540_v56 }
 0x54b   :  { %v17798_v31 = vpop.permute.xlu1 %2280  ;;  %v17826_v14 = vpop.permute.xlu0 %2283 }
 0x54c   :  { %22204 = vst [vmem:[#allocation149_spill] sm:$0xff] %v17798_v31  ;;  %22207 = vst [vmem:[#allocation152_spill] sm:$0xff] %v17826_v14 }
 0x54f   :  { %v17824_v7 = vpop.permute.xlu1 %2286  ;;  %v17852_v19 = vpop.permute.xlu0 %2289 }
 0x550   :  { %22206 = vst [vmem:[#allocation151_spill] sm:$0xff] %v17824_v7  ;;  %22209 = vst [vmem:[#allocation154_spill] sm:$0xff] %v17852_v19 }
 0x551   :  { %11525 = vmatmul.mubr.msk.bf16.gmra.mrb[180].mxu1 %vm11524_vm4, %v22169_v2  ;;  %vm21362_vm4 = vcmp.eq.s32.totalorder %v17021_v40, %v17540_v56 }
 0x552   :  { %11527 = vmatprep.mubr.msk.bf16.mxu1 %vm11526_vm13, %v22169_v2  ;;  %vm11528_vm13 = vmpackc.low %vm21359_vm8, %vm21360_vm5  ;;  %vm21363_vm8 = vcmp.eq.s32.totalorder %v22149_v13, %v17538_v47  ;;  %vm21365_vm5 = vcmp.eq.s32.totalorder %v17021_v40, %v17564_v54 }
 0x553   :  { %vm11530_vm10 = vmpackc.low %vm21361_vm9, %vm21362_vm4  ;;  %vm21368_vm4 = vcmp.eq.s32.totalorder %v22149_v13, %v17566_v35  ;;  %v17850_v62 = vpop.permute.xlu1 %2292  ;;  %v17878_v3 = vpop.permute.xlu0 %2295 }
 0x554   :  { %22208 = vst [vmem:[#allocation153_spill] sm:$0xff] %v17850_v62  ;;  %22211 = vst [vmem:[#allocation156_spill] sm:$0xff] %v17878_v3 }
 0x557   :  { %v17876_v23 = vpop.permute.xlu1 %2298  ;;  %v17904_v15 = vpop.permute.xlu0 %2301 }
 0x558   :  { %22210 = vst [vmem:[#allocation155_spill] sm:$0xff] %v17876_v23  ;;  %22213 = vst [vmem:[#allocation158_spill] sm:$0xff] %v17904_v15 }
 0x559   :  { %11529 = vmatmul.mubr.msk.bf16.gmra.mrb[184].mxu1 %vm11528_vm13, %v22169_v2  ;;  %vm21366_vm13 = vcmp.eq.s32.totalorder %v17021_v40, %v17566_v35 }
 0x55a   :  { %11531 = vmatprep.mubr.msk.bf16.mxu1 %vm11530_vm10, %v22169_v2  ;;  %vm11532_vm10 = vmpackc.low %vm21363_vm8, %vm21364_vm0  ;;  %vm21367_vm8 = vcmp.eq.s32.totalorder %v22149_v13, %v17564_v54  ;;  %vm21369_vm0 = vcmp.eq.s32.totalorder %v17021_v40, %v17590_v55 }
 0x55b   :  { %vm11534_vm9 = vmpackc.low %vm21365_vm5, %vm21366_vm13  ;;  %vm21372_vm13 = vcmp.eq.s32.totalorder %v22149_v13, %v17592_v38  ;;  %v17902_v10 = vpop.permute.xlu1 %2304 }
 0x55c   :  { %22212 = vst [vmem:[#allocation157_spill] sm:$0xff] %v17902_v10 }
 0x55f   :  { %v17928_v36 = vpop.permute.xlu1 %2310 }
 0x560   :  { %22214 = vst [vmem:[#allocation159_spill] sm:$0xff] %v17928_v36 }
 0x561   :  { %11533 = vmatmul.mubr.msk.bf16.gmra.mrb[188].mxu1 %vm11532_vm10, %v22169_v2  ;;  %vm21370_vm10 = vcmp.eq.s32.totalorder %v17021_v40, %v17592_v38 }
 0x562   :  { %11535 = vmatprep.mubr.msk.bf16.mxu1 %vm11534_vm9, %v22169_v2  ;;  %vm11536_vm9 = vmpackc.low %vm21367_vm8, %vm21368_vm4  ;;  %vm21371_vm8 = vcmp.eq.s32.totalorder %v22149_v13, %v17590_v55  ;;  %vm21373_vm4 = vcmp.eq.s32.totalorder %v17021_v40, %v17616_v22 }
 0x563   :  { %vm11538_vm5 = vmpackc.low %vm21369_vm0, %vm21370_vm10  ;;  %vm21378_vm10 = vcmp.eq.s32.totalorder %v22149_v13, %v17618_v17 }
 0x569   :  { %11537 = vmatmul.mubr.msk.bf16.gmra.mrb[192].mxu1 %vm11536_vm9, %v22169_v2  ;;  %vm21376_vm9 = vcmp.eq.s32.totalorder %v17021_v40, %v17618_v17 }
 0x56a   :  { %11539 = vmatprep.mubr.msk.bf16.mxu1 %vm11538_vm5, %v22169_v2  ;;  %vm11540_vm5 = vmpackc.low %vm21371_vm8, %vm21372_vm13  ;;  %vm21377_vm8 = vcmp.eq.s32.totalorder %v22149_v13, %v17616_v22  ;;  %vm21379_vm13 = vcmp.eq.s32.totalorder %v17021_v40, %v17642_v11 }
 0x56b   :  { %vm11542_vm0 = vmpackc.low %vm21373_vm4, %vm21376_vm9  ;;  %vm21384_vm9 = vcmp.eq.s32.totalorder %v22149_v13, %v17644_v58 }
 0x571   :  { %11541 = vmatmul.mubr.msk.bf16.gmra.mrb[196].mxu1 %vm11540_vm5, %v22169_v2  ;;  %vm21382_vm5 = vcmp.eq.s32.totalorder %v17021_v40, %v17644_v58 }
 0x572   :  { %11543 = vmatprep.mubr.msk.bf16.mxu1 %vm11542_vm0, %v22169_v2  ;;  %vm11544_vm0 = vmpackc.low %vm21377_vm8, %vm21378_vm10  ;;  %vm21383_vm8 = vcmp.eq.s32.totalorder %v22149_v13, %v17642_v11  ;;  %vm21385_vm10 = vcmp.eq.s32.totalorder %v17021_v40, %v17668_v26 }
 0x573   :  { %vm11546_vm4 = vmpackc.low %vm21379_vm13, %vm21382_vm5  ;;  %vm21390_vm5 = vcmp.eq.s32.totalorder %v22149_v13, %v17670_v48 }
 0x579   :  { %11545 = vmatmul.mubr.msk.bf16.gmra.mrb[200].mxu1 %vm11544_vm0, %v22169_v2  ;;  %vm21388_vm0 = vcmp.eq.s32.totalorder %v17021_v40, %v17670_v48 }
 0x57a   :  { %11547 = vmatprep.mubr.msk.bf16.mxu1 %vm11546_vm4, %v22169_v2  ;;  %vm11548_vm4 = vmpackc.low %vm21383_vm8, %vm21384_vm9  ;;  %vm21389_vm8 = vcmp.eq.s32.totalorder %v22149_v13, %v17668_v26  ;;  %vm21391_vm9 = vcmp.eq.s32.totalorder %v17021_v40, %v17694_v43 }
 0x57b   :  { %vm11550_vm13 = vmpackc.low %vm21385_vm10, %vm21388_vm0  ;;  %vm21396_vm0 = vcmp.eq.s32.totalorder %v22149_v13, %v17696_v32 }
 0x581   :  { %11549 = vmatmul.mubr.msk.bf16.gmra.mrb[204].mxu1 %vm11548_vm4, %v22169_v2  ;;  %vm21394_vm4 = vcmp.eq.s32.totalorder %v17021_v40, %v17696_v32 }
 0x582   :  { %11551 = vmatprep.mubr.msk.bf16.mxu1 %vm11550_vm13, %v22169_v2  ;;  %vm11552_vm13 = vmpackc.low %vm21389_vm8, %vm21390_vm5  ;;  %vm21395_vm8 = vcmp.eq.s32.totalorder %v22149_v13, %v17694_v43  ;;  %vm21397_vm5 = vcmp.eq.s32.totalorder %v17021_v40, %v17720_v25 }
 0x583   :  { %vm11554_vm10 = vmpackc.low %vm21391_vm9, %vm21394_vm4  ;;  %vm21402_vm4 = vcmp.eq.s32.totalorder %v22149_v13, %v17722_v33 }
 0x589   :  { %11553 = vmatmul.mubr.msk.bf16.gmra.mrb[208].mxu1 %vm11552_vm13, %v22169_v2  ;;  %vm21400_vm13 = vcmp.eq.s32.totalorder %v17021_v40, %v17722_v33 }
 0x58a   :  { %11555 = vmatprep.mubr.msk.bf16.mxu1 %vm11554_vm10, %v22169_v2  ;;  %vm11556_vm10 = vmpackc.low %vm21395_vm8, %vm21396_vm0  ;;  %vm21401_vm8 = vcmp.eq.s32.totalorder %v22149_v13, %v17720_v25  ;;  %vm21403_vm0 = vcmp.eq.s32.totalorder %v17021_v40, %v17746_v46 }
 0x58b   :  { %vm11558_vm9 = vmpackc.low %vm21397_vm5, %vm21400_vm13  ;;  %vm21408_vm13 = vcmp.eq.s32.totalorder %v22149_v13, %v17748_v18 }
 0x591   :  { %11557 = vmatmul.mubr.msk.bf16.gmra.mrb[212].mxu1 %vm11556_vm10, %v22169_v2  ;;  %vm21406_vm10 = vcmp.eq.s32.totalorder %v17021_v40, %v17748_v18 }
 0x592   :  { %11559 = vmatprep.mubr.msk.bf16.mxu1 %vm11558_vm9, %v22169_v2  ;;  %vm11560_vm9 = vmpackc.low %vm21401_vm8, %vm21402_vm4  ;;  %vm21407_vm8 = vcmp.eq.s32.totalorder %v22149_v13, %v17746_v46  ;;  %vm21409_vm4 = vcmp.eq.s32.totalorder %v17021_v40, %v17772_v5 }
 0x593   :  { %vm11562_vm5 = vmpackc.low %vm21403_vm0, %vm21406_vm10  ;;  %vm21414_vm10 = vcmp.eq.s32.totalorder %v22149_v13, %v17774_v51 }
 0x599   :  { %11561 = vmatmul.mubr.msk.bf16.gmra.mrb[216].mxu1 %vm11560_vm9, %v22169_v2  ;;  %vm21412_vm9 = vcmp.eq.s32.totalorder %v17021_v40, %v17774_v51 }
 0x59a   :  { %11563 = vmatprep.mubr.msk.bf16.mxu1 %vm11562_vm5, %v22169_v2  ;;  %vm11564_vm5 = vmpackc.low %vm21407_vm8, %vm21408_vm13  ;;  %vm21413_vm8 = vcmp.eq.s32.totalorder %v22149_v13, %v17772_v5  ;;  %vm21415_vm13 = vcmp.eq.s32.totalorder %v17021_v40, %v17798_v31 }
 0x59b   :  { %vm11566_vm0 = vmpackc.low %vm21409_vm4, %vm21412_vm9  ;;  %vm21420_vm9 = vcmp.eq.s32.totalorder %v22149_v13, %v17800_v63 }
 0x5a1   :  { %11565 = vmatmul.mubr.msk.bf16.gmra.mrb[220].mxu1 %vm11564_vm5, %v22169_v2  ;;  %vm21418_vm5 = vcmp.eq.s32.totalorder %v17021_v40, %v17800_v63 }
 0x5a2   :  { %11567 = vmatprep.mubr.msk.bf16.mxu1 %vm11566_vm0, %v22169_v2  ;;  %vm11568_vm0 = vmpackc.low %vm21413_vm8, %vm21414_vm10  ;;  %vm21419_vm8 = vcmp.eq.s32.totalorder %v22149_v13, %v17798_v31  ;;  %vm21421_vm10 = vcmp.eq.s32.totalorder %v17021_v40, %v17824_v7 }
 0x5a3   :  { %vm11570_vm4 = vmpackc.low %vm21415_vm13, %vm21418_vm5  ;;  %vm21426_vm5 = vcmp.eq.s32.totalorder %v22149_v13, %v17826_v14 }
 0x5a9   :  { %11569 = vmatmul.mubr.msk.bf16.gmra.mrb[224].mxu1 %vm11568_vm0, %v22169_v2  ;;  %vm21424_vm0 = vcmp.eq.s32.totalorder %v17021_v40, %v17826_v14 }
 0x5aa   :  { %11571 = vmatprep.mubr.msk.bf16.mxu1 %vm11570_vm4, %v22169_v2  ;;  %vm11572_vm4 = vmpackc.low %vm21419_vm8, %vm21420_vm9  ;;  %vm21425_vm8 = vcmp.eq.s32.totalorder %v22149_v13, %v17824_v7  ;;  %vm21427_vm9 = vcmp.eq.s32.totalorder %v17021_v40, %v17850_v62 }
 0x5ab   :  { %vm11574_vm13 = vmpackc.low %vm21421_vm10, %vm21424_vm0  ;;  %vm21432_vm0 = vcmp.eq.s32.totalorder %v22149_v13, %v17852_v19 }
 0x5b1   :  { %11573 = vmatmul.mubr.msk.bf16.gmra.mrb[228].mxu1 %vm11572_vm4, %v22169_v2  ;;  %vm21430_vm4 = vcmp.eq.s32.totalorder %v17021_v40, %v17852_v19 }
 0x5b2   :  { %11575 = vmatprep.mubr.msk.bf16.mxu1 %vm11574_vm13, %v22169_v2  ;;  %vm11576_vm13 = vmpackc.low %vm21425_vm8, %vm21426_vm5  ;;  %vm21431_vm8 = vcmp.eq.s32.totalorder %v22149_v13, %v17850_v62  ;;  %vm21433_vm5 = vcmp.eq.s32.totalorder %v17021_v40, %v17876_v23  ;;  %v17930_v62 = vpop.permute.xlu0 %2307 }
 0x5b3   :  { %vm11578_vm10 = vmpackc.low %vm21427_vm9, %vm21430_vm4  ;;  %vm21439_vm4 = vcmp.eq.s32.totalorder %v22149_v13, %v17878_v3  ;;  %22215 = vst [vmem:[#allocation160_spill] sm:$0xff] %v17930_v62 }
 0x5b9   :  { %11577 = vmatmul.mubr.msk.bf16.gmra.mrb[232].mxu1 %vm11576_vm13, %v22169_v2  ;;  %vm21437_vm13 = vcmp.eq.s32.totalorder %v17021_v40, %v17878_v3  ;;  %v17956_v3 = vpop.permute.xlu0 %2313 }
 0x5ba   :  { %11579 = vmatprep.mubr.msk.bf16.mxu1 %vm11578_vm10, %v22169_v2  ;;  %vm11580_vm10 = vmpackc.low %vm21431_vm8, %vm21432_vm0  ;;  %vm21438_vm8 = vcmp.eq.s32.totalorder %v22149_v13, %v17876_v23  ;;  %vm21440_vm0 = vcmp.eq.s32.totalorder %v17021_v40, %v17902_v10  ;;  %v17954_v23 = vpop.permute.xlu1 %2316  ;;  %22217 = vst [vmem:[#allocation162_spill] sm:$0xff] %v17956_v3 }
 0x5bb   :  { %vm11582_vm9 = vmpackc.low %vm21433_vm5, %vm21437_vm13  ;;  %vm21447_vm13 = vcmp.eq.s32.totalorder %v22149_v13, %v17904_v15  ;;  %22216 = vst [vmem:[#allocation161_spill] sm:$0xff] %v17954_v23 }
 0x5c1   :  { %11581 = vmatmul.mubr.msk.bf16.gmra.mrb[236].mxu1 %vm11580_vm10, %v22169_v2  ;;  %vm21445_vm10 = vcmp.eq.s32.totalorder %v17021_v40, %v17904_v15 }
 0x5c2   :  { %11583 = vmatprep.mubr.msk.bf16.mxu1 %vm11582_vm9, %v22169_v2  ;;  %vm11584_vm9 = vmpackc.low %vm21438_vm8, %vm21439_vm4  ;;  %vm21446_vm8 = vcmp.eq.s32.totalorder %v22149_v13, %v17902_v10  ;;  %vm21448_vm4 = vcmp.eq.s32.totalorder %v17021_v40, %v17928_v36  ;;  %v17981_v10 = vadd.s32 384, %v22149_v13 }
 0x5c3   :  { %vm11586_vm5 = vmpackc.low %vm21440_vm0, %vm21445_vm10  ;;  %vm21453_vm10 = vcmp.eq.s32.totalorder %v22149_v13, %v17930_v62 }
 0x5c4   :  { %22218 = vst [vmem:[#allocation163_spill] sm:$0xff] %v17981_v10 }
 0x5c9   :  { %11585 = vmatmul.mubr.msk.bf16.gmra.mrb[240].mxu1 %vm11584_vm9, %v22169_v2  ;;  %vm21451_vm9 = vcmp.eq.s32.totalorder %v17021_v40, %v17930_v62 }
 0x5ca   :  { %11587 = vmatprep.mubr.msk.bf16.mxu1 %vm11586_vm5, %v22169_v2  ;;  %vm11588_vm5 = vmpackc.low %vm21446_vm8, %vm21447_vm13  ;;  %vm21452_vm8 = vcmp.eq.s32.totalorder %v22149_v13, %v17928_v36  ;;  %vm21456_vm13 = vcmp.eq.s32.totalorder %v17021_v40, %v17954_v23 }
 0x5cb   :  { %vm11590_vm0 = vmpackc.low %vm21448_vm4, %vm21451_vm9  ;;  %vm21459_vm9 = vcmp.eq.s32.totalorder %v22149_v13, %v17956_v3 }
 0x5d1   :  { %11589 = vmatmul.mubr.msk.bf16.gmra.mrb[244].mxu1 %vm11588_vm5, %v22169_v2  ;;  %vm21457_vm5 = vcmp.eq.s32.totalorder %v17021_v40, %v17956_v3  ;;  %v17998_v40 = vadd.s32 256, %v22149_v13 }
 0x5d2   :  { %11591 = vmatprep.mubr.msk.bf16.mxu1 %vm11590_vm0, %v22169_v2  ;;  %vm11592_vm0 = vmpackc.low %vm21452_vm8, %vm21453_vm10  ;;  %vm21458_vm8 = vcmp.eq.s32.totalorder %v22149_v13, %v17954_v23  ;;  %vm21460_vm10 = vcmp.eq.s32.totalorder %v17981_v10, %v16787_v24 }
 0x5d3   :  { %vm11594_vm4 = vmpackc.low %vm21456_vm13, %vm21457_vm5  ;;  %22219 = vst [vmem:[#allocation164_spill] sm:$0xff] %v17998_v40  ;;  %vm21466_vm5 = vcmp.eq.s32.totalorder %v17998_v40, %v16767_v12  ;;  %vm21467_vm3 = vcmp.eq.s32.totalorder %v17998_v40, %v16783_v59 }
 0x5d9   :  { %11593 = vmatmul.mubr.msk.bf16.gmra.mrb[248].mxu1 %vm11592_vm0, %v22169_v2  ;;  %vm21461_vm0 = vcmp.eq.s32.totalorder %v17981_v10, %v16767_v12 }
 0x5da   :  { %11595 = vmatprep.mubr.msk.bf16.mxu1 %vm11594_vm4, %v22169_v2  ;;  %vm11596_vm4 = vmpackc.low %vm21458_vm8, %vm21459_vm9  ;;  %vm21463_vm8 = vcmp.eq.s32.totalorder %v17998_v40, %v16787_v24  ;;  %vm21465_vm9 = vcmp.eq.s32.totalorder %v17981_v10, %v16777_v1 }
 0x5db   :  { %vm11598_vm13 = vmpackc.low %vm21460_vm10, %vm21461_vm0  ;;  %vm21470_vm0 = vcmp.eq.s32.totalorder %v17998_v40, %v16777_v1 }
 0x5dc   :  { %vm11600_vm10 = vmpackc.low %vm21463_vm8, %vm21466_vm5  ;;  %vm21469_vm8 = vcmp.eq.s32.totalorder %v17981_v10, %v16797_v44  ;;  %vm21471_vm5 = vcmp.eq.s32.totalorder %v17998_v40, %v16795_v20 }
 0x5e1   :  { %11597 = vmatmul.mubr.msk.bf16.gmra.mrb[252].mxu1 %vm11596_vm4, %v22169_v2  ;;  %vm21464_vm4 = vcmp.eq.s32.totalorder %v17981_v10, %v16783_v59 }
 0x5e2   :  { %11599 = vmatprep.mubr.msk.bf16.mxu1 %vm11598_vm13, %v22169_v2  ;;  %vm11602_vm13 = vmpackc.low %vm21464_vm4, %vm21465_vm9  ;;  %vm21474_vm9 = vcmp.eq.s32.totalorder %v17998_v40, %v16797_v44 }
 0x5e3   :  { %vm11604_vm4 = vmpackc.low %vm21467_vm3, %vm21470_vm0  ;;  %vm21473_vm3 = vcmp.eq.s32.totalorder %v17981_v10, %v16807_v39  ;;  %vm21475_vm0 = vcmp.eq.s32.totalorder %v17998_v40, %v16803_v0 }
 0x5e9   :  { %11601 = vmatmul.mubr.msk.bf16.vlgmr.msra.gmra.mrb[128].mxu1 %vm11600_vm10, %v22169_v2  ;;  %vm21468_vm10 = vcmp.eq.s32.totalorder %v17981_v10, %v16795_v20 }
 0x5ea   :  { %11603 = vmatprep.mubr.msk.bf16.mxu1 %vm11602_vm13, %v22169_v2  ;;  %vm11606_vm13 = vmpackc.low %vm21468_vm10, %vm21469_vm8  ;;  %vm21478_vm8 = vcmp.eq.s32.totalorder %v17998_v40, %v16807_v39 }
 0x5eb   :  { %vm11608_vm10 = vmpackc.low %vm21471_vm5, %vm21474_vm9  ;;  %vm21477_vm5 = vcmp.eq.s32.totalorder %v17981_v10, %v16817_v4  ;;  %vm21479_vm9 = vcmp.eq.s32.totalorder %v17998_v40, %v16815_v37 }
 0x5f1   :  { %11605 = vmatmul.mubr.msk.bf16.gmra.mrb[132].mxu1 %vm11604_vm4, %v22169_v2  ;;  %vm21472_vm4 = vcmp.eq.s32.totalorder %v17981_v10, %v16803_v0 }
 0x5f2   :  { %11607 = vmatprep.mubr.msk.bf16.mxu1 %vm11606_vm13, %v22169_v2  ;;  %vm11610_vm13 = vmpackc.low %vm21472_vm4, %vm21473_vm3  ;;  %vm21482_vm3 = vcmp.eq.s32.totalorder %v17998_v40, %v16817_v4 }
 0x5f3   :  { %vm11612_vm4 = vmpackc.low %vm21475_vm0, %vm21478_vm8  ;;  %vm21481_vm0 = vcmp.eq.s32.totalorder %v17981_v10, %v16827_v34  ;;  %vm21483_vm8 = vcmp.eq.s32.totalorder %v17998_v40, %v16823_v57 }
 0x5f9   :  { %11609 = vmatmul.mubr.msk.bf16.gmra.mrb[136].mxu1 %vm11608_vm10, %v22169_v2  ;;  %vm21476_vm10 = vcmp.eq.s32.totalorder %v17981_v10, %v16815_v37 }
 0x5fa   :  { %11611 = vmatprep.mubr.msk.bf16.mxu1 %vm11610_vm13, %v22169_v2  ;;  %vm11614_vm13 = vmpackc.low %vm21476_vm10, %vm21477_vm5  ;;  %vm21486_vm5 = vcmp.eq.s32.totalorder %v17998_v40, %v16827_v34 }
 0x5fb   :  { %vm11616_vm10 = vmpackc.low %vm21479_vm9, %vm21482_vm3  ;;  %vm21485_vm9 = vcmp.eq.s32.totalorder %v17981_v10, %v16837_v49  ;;  %vm21487_vm3 = vcmp.eq.s32.totalorder %v17998_v40, %v16835_v21 }
 0x601   :  { %11613 = vmatmul.mubr.msk.bf16.gmra.mrb[140].mxu1 %vm11612_vm4, %v22169_v2  ;;  %vm21480_vm4 = vcmp.eq.s32.totalorder %v17981_v10, %v16823_v57 }
 0x602   :  { %11615 = vmatprep.mubr.msk.bf16.mxu1 %vm11614_vm13, %v22169_v2  ;;  %vm11618_vm13 = vmpackc.low %vm21480_vm4, %vm21481_vm0  ;;  %vm21490_vm0 = vcmp.eq.s32.totalorder %v17998_v40, %v16837_v49 }
 0x603   :  { %vm11620_vm4 = vmpackc.low %vm21483_vm8, %vm21486_vm5  ;;  %vm21489_vm8 = vcmp.eq.s32.totalorder %v17981_v10, %v16847_v30  ;;  %vm21491_vm5 = vcmp.eq.s32.totalorder %v17998_v40, %v16843_v6 }
 0x609   :  { %11617 = vmatmul.mubr.msk.bf16.gmra.mrb[144].mxu1 %vm11616_vm10, %v22169_v2  ;;  %vm21484_vm10 = vcmp.eq.s32.totalorder %v17981_v10, %v16835_v21 }
 0x60a   :  { %11619 = vmatprep.mubr.msk.bf16.mxu1 %vm11618_vm13, %v22169_v2  ;;  %vm11622_vm13 = vmpackc.low %vm21484_vm10, %vm21485_vm9  ;;  %vm21494_vm9 = vcmp.eq.s32.totalorder %v17998_v40, %v16847_v30 }
 0x60b   :  { %vm11624_vm10 = vmpackc.low %vm21487_vm3, %vm21490_vm0  ;;  %vm21493_vm3 = vcmp.eq.s32.totalorder %v17981_v10, %v16863_v9  ;;  %vm21495_vm0 = vcmp.eq.s32.totalorder %v17998_v40, %v16860_v27 }
 0x611   :  { %11621 = vmatmul.mubr.msk.bf16.gmra.mrb[148].mxu1 %vm11620_vm4, %v22169_v2  ;;  %vm21488_vm4 = vcmp.eq.s32.totalorder %v17981_v10, %v16843_v6  ;;  %v14301_v6 = vld [vmem:[%s21174_s14] sm:$0xff]  }
 0x612   :  { %11623 = vmatprep.mubr.msk.bf16.mxu1 %vm11622_vm13, %v22169_v2  ;;  %vm11626_vm13 = vmpackc.low %vm21488_vm4, %vm21489_vm8  ;;  %vm21498_vm8 = vcmp.eq.s32.totalorder %v17998_v40, %v16863_v9 }
 0x613   :  { %vm11628_vm4 = vmpackc.low %vm21491_vm5, %vm21494_vm9  ;;  %vm21497_vm5 = vcmp.eq.s32.totalorder %v17981_v10, %v16879_v28  ;;  %vm21499_vm9 = vcmp.eq.s32.totalorder %v17998_v40, %v16875_v53 }
 0x619   :  { %11625 = vmatmul.mubr.msk.bf16.gmra.mrb[152].mxu1 %vm11624_vm10, %v22169_v2  ;;  %vm21492_vm10 = vcmp.eq.s32.totalorder %v17981_v10, %v16860_v27 }
 0x61a   :  { %11627 = vmatprep.mubr.msk.bf16.mxu1 %vm11626_vm13, %v22169_v2  ;;  %vm11630_vm13 = vmpackc.low %vm21492_vm10, %vm21493_vm3  ;;  %vm21502_vm3 = vcmp.eq.s32.totalorder %v17998_v40, %v16879_v28 }
 0x61b   :  { %vm11632_vm10 = vmpackc.low %vm21495_vm0, %vm21498_vm8  ;;  %vm21501_vm0 = vcmp.eq.s32.totalorder %v17981_v10, %v16894_v42  ;;  %vm21503_vm8 = vcmp.eq.s32.totalorder %v17998_v40, %v16892_v16 }
 0x621   :  { %11629 = vmatmul.mubr.msk.bf16.gmra.mrb[156].mxu1 %vm11628_vm4, %v22169_v2  ;;  %vm21496_vm4 = vcmp.eq.s32.totalorder %v17981_v10, %v16875_v53 }
 0x622   :  { %11631 = vmatprep.mubr.msk.bf16.mxu1 %vm11630_vm13, %v22169_v2  ;;  %vm11634_vm13 = vmpackc.low %vm21496_vm4, %vm21497_vm5  ;;  %vm21506_vm5 = vcmp.eq.s32.totalorder %v17998_v40, %v16894_v42 }
 0x623   :  { %vm11636_vm4 = vmpackc.low %vm21499_vm9, %vm21502_vm3  ;;  %vm21505_vm9 = vcmp.eq.s32.totalorder %v17981_v10, %v16910_v52  ;;  %vm21507_vm3 = vcmp.eq.s32.totalorder %v17998_v40, %v16904_v29 }
 0x629   :  { %11633 = vmatmul.mubr.msk.bf16.gmra.mrb[160].mxu1 %vm11632_vm10, %v22169_v2  ;;  %vm21500_vm10 = vcmp.eq.s32.totalorder %v17981_v10, %v16892_v16 }
 0x62a   :  { %11635 = vmatprep.mubr.msk.bf16.mxu1 %vm11634_vm13, %v22169_v2  ;;  %vm11638_vm13 = vmpackc.low %vm21500_vm10, %vm21501_vm0  ;;  %vm21510_vm0 = vcmp.eq.s32.totalorder %v17998_v40, %v16910_v52 }
 0x62b   :  { %vm11640_vm10 = vmpackc.low %vm21503_vm8, %vm21506_vm5  ;;  %vm21509_vm8 = vcmp.eq.s32.totalorder %v17981_v10, %v16921_v50  ;;  %vm21511_vm5 = vcmp.eq.s32.totalorder %v17998_v40, %v16918_v41 }
 0x631   :  { %11637 = vmatmul.mubr.msk.bf16.gmra.mrb[164].mxu1 %vm11636_vm4, %v22169_v2  ;;  %vm21504_vm4 = vcmp.eq.s32.totalorder %v17981_v10, %v16904_v29 }
 0x632   :  { %11639 = vmatprep.mubr.msk.bf16.mxu1 %vm11638_vm13, %v22169_v2  ;;  %vm11642_vm13 = vmpackc.low %vm21504_vm4, %vm21505_vm9  ;;  %vm21514_vm9 = vcmp.eq.s32.totalorder %v17998_v40, %v16921_v50 }
 0x633   :  { %vm11644_vm4 = vmpackc.low %vm21507_vm3, %vm21510_vm0  ;;  %vm21513_vm3 = vcmp.eq.s32.totalorder %v17981_v10, %v16937_v61  ;;  %vm21515_vm0 = vcmp.eq.s32.totalorder %v17998_v40, %v16933_v60 }
 0x639   :  { %11641 = vmatmul.mubr.msk.bf16.gmra.mrb[168].mxu1 %vm11640_vm10, %v22169_v2  ;;  %vm21508_vm10 = vcmp.eq.s32.totalorder %v17981_v10, %v16918_v41 }
 0x63a   :  { %11643 = vmatprep.mubr.msk.bf16.mxu1 %vm11642_vm13, %v22169_v2  ;;  %vm11646_vm13 = vmpackc.low %vm21508_vm10, %vm21509_vm8  ;;  %vm21518_vm8 = vcmp.eq.s32.totalorder %v17998_v40, %v16937_v61 }
 0x63b   :  { %vm11648_vm10 = vmpackc.low %vm21511_vm5, %vm21514_vm9  ;;  %vm21517_vm5 = vcmp.eq.s32.totalorder %v17981_v10, %v16950_v45  ;;  %vm21519_vm9 = vcmp.eq.s32.totalorder %v17998_v40, %v16948_v8 }
 0x641   :  { %11645 = vmatmul.mubr.msk.bf16.gmra.mrb[172].mxu1 %vm11644_vm4, %v22169_v2  ;;  %vm21512_vm4 = vcmp.eq.s32.totalorder %v17981_v10, %v16933_v60 }
 0x642   :  { %11647 = vmatprep.mubr.msk.bf16.mxu1 %vm11646_vm13, %v22169_v2  ;;  %vm11650_vm13 = vmpackc.low %vm21512_vm4, %vm21513_vm3  ;;  %vm21522_vm3 = vcmp.eq.s32.totalorder %v17998_v40, %v16950_v45 }
 0x643   :  { %vm11652_vm4 = vmpackc.low %vm21515_vm0, %vm21518_vm8  ;;  %vm21521_vm0 = vcmp.eq.s32.totalorder %v17981_v10, %v17540_v56  ;;  %vm21523_vm8 = vcmp.eq.s32.totalorder %v17998_v40, %v17538_v47 }
 0x649   :  { %11649 = vmatmul.mubr.msk.bf16.gmra.mrb[176].mxu1 %vm11648_vm10, %v22169_v2  ;;  %vm21516_vm10 = vcmp.eq.s32.totalorder %v17981_v10, %v16948_v8  ;;  %v22241_v8 = vld [vmem:[#allocation157_spill] sm:$0xff] }
 0x64a   :  { %11651 = vmatprep.mubr.msk.bf16.mxu1 %vm11650_vm13, %v22169_v2  ;;  %vm11654_vm13 = vmpackc.low %vm21516_vm10, %vm21517_vm5  ;;  %vm21526_vm5 = vcmp.eq.s32.totalorder %v17998_v40, %v17540_v56 }
 0x64b   :  { %vm11656_vm10 = vmpackc.low %vm21519_vm9, %vm21522_vm3  ;;  %vm21525_vm9 = vcmp.eq.s32.totalorder %v17981_v10, %v17566_v35  ;;  %vm21527_vm3 = vcmp.eq.s32.totalorder %v17998_v40, %v17564_v54 }
 0x651   :  { %11653 = vmatmul.mubr.msk.bf16.gmra.mrb[180].mxu1 %vm11652_vm4, %v22169_v2  ;;  %vm21520_vm4 = vcmp.eq.s32.totalorder %v17981_v10, %v17538_v47 }
 0x652   :  { %11655 = vmatprep.mubr.msk.bf16.mxu1 %vm11654_vm13, %v22169_v2  ;;  %vm11658_vm13 = vmpackc.low %vm21520_vm4, %vm21521_vm0  ;;  %vm21530_vm0 = vcmp.eq.s32.totalorder %v17998_v40, %v17566_v35 }
 0x653   :  { %vm11660_vm4 = vmpackc.low %vm21523_vm8, %vm21526_vm5  ;;  %vm21529_vm8 = vcmp.eq.s32.totalorder %v17981_v10, %v17592_v38  ;;  %vm21531_vm5 = vcmp.eq.s32.totalorder %v17998_v40, %v17590_v55 }
 0x659   :  { %11657 = vmatmul.mubr.msk.bf16.gmra.mrb[184].mxu1 %vm11656_vm10, %v22169_v2  ;;  %vm21524_vm10 = vcmp.eq.s32.totalorder %v17981_v10, %v17564_v54  ;;  %v22237_v54 = vld [vmem:[#allocation155_spill] sm:$0xff] }
 0x65a   :  { %11659 = vmatprep.mubr.msk.bf16.mxu1 %vm11658_vm13, %v22169_v2  ;;  %vm11662_vm13 = vmpackc.low %vm21524_vm10, %vm21525_vm9  ;;  %vm21534_vm9 = vcmp.eq.s32.totalorder %v17998_v40, %v17592_v38  ;;  %v22236_v38 = vld [vmem:[#allocation156_spill] sm:$0xff] }
 0x65b   :  { %vm11664_vm10 = vmpackc.low %vm21527_vm3, %vm21530_vm0  ;;  %vm21533_vm3 = vcmp.eq.s32.totalorder %v17981_v10, %v17618_v17  ;;  %vm21535_vm0 = vcmp.eq.s32.totalorder %v17998_v40, %v17616_v22 }
 0x661   :  { %11661 = vmatmul.mubr.msk.bf16.gmra.mrb[188].mxu1 %vm11660_vm4, %v22169_v2  ;;  %vm21528_vm4 = vcmp.eq.s32.totalorder %v17981_v10, %v17590_v55 }
 0x662   :  { %11663 = vmatprep.mubr.msk.bf16.mxu1 %vm11662_vm13, %v22169_v2  ;;  %vm11666_vm13 = vmpackc.low %vm21528_vm4, %vm21529_vm8  ;;  %vm21538_vm8 = vcmp.eq.s32.totalorder %v17998_v40, %v17618_v17 }
 0x663   :  { %vm11668_vm4 = vmpackc.low %vm21531_vm5, %vm21534_vm9  ;;  %vm21537_vm5 = vcmp.eq.s32.totalorder %v17981_v10, %v17644_v58  ;;  %vm21539_vm9 = vcmp.eq.s32.totalorder %v17998_v40, %v17642_v11 }
 0x669   :  { %11665 = vmatmul.mubr.msk.bf16.gmra.mrb[192].mxu1 %vm11664_vm10, %v22169_v2  ;;  %vm21532_vm10 = vcmp.eq.s32.totalorder %v17981_v10, %v17616_v22 }
 0x66a   :  { %11667 = vmatprep.mubr.msk.bf16.mxu1 %vm11666_vm13, %v22169_v2  ;;  %vm11670_vm13 = vmpackc.low %vm21532_vm10, %vm21533_vm3  ;;  %vm21542_vm3 = vcmp.eq.s32.totalorder %v17998_v40, %v17644_v58 }
 0x66b   :  { %vm11672_vm10 = vmpackc.low %vm21535_vm0, %vm21538_vm8  ;;  %vm21541_vm0 = vcmp.eq.s32.totalorder %v17981_v10, %v17670_v48  ;;  %vm21543_vm8 = vcmp.eq.s32.totalorder %v17998_v40, %v17668_v26 }
 0x671   :  { %11669 = vmatmul.mubr.msk.bf16.gmra.mrb[196].mxu1 %vm11668_vm4, %v22169_v2  ;;  %vm21536_vm4 = vcmp.eq.s32.totalorder %v17981_v10, %v17642_v11 }
 0x672   :  { %11671 = vmatprep.mubr.msk.bf16.mxu1 %vm11670_vm13, %v22169_v2  ;;  %vm11674_vm13 = vmpackc.low %vm21536_vm4, %vm21537_vm5  ;;  %vm21654_vm5 = vcmp.eq.s32.totalorder %v17998_v40, %v17670_v48  ;;  %v18494_v48 = vpop.permute.xlu1 %6710 }
 0x673   :  { %vm11676_vm4 = vmpackc.low %vm21539_vm9, %vm21542_vm3  ;;  %vm21549_vm9 = vcmp.eq.s32.totalorder %v17981_v10, %v17696_v32  ;;  %vm21550_vm3 = vcmp.eq.s32.totalorder %v17998_v40, %v17694_v43  ;;  %22221 = vst [vmem:[#allocation166_spill] sm:$0xff] %v18494_v48 }
 0x679   :  { %11673 = vmatmul.mubr.msk.bf16.gmra.mrb[200].mxu1 %vm11672_vm10, %v22169_v2  ;;  %vm21540_vm10 = vcmp.eq.s32.totalorder %v17981_v10, %v17668_v26  ;;  %v18492_v26 = vpop.permute.xlu0 %6707 }
 0x67a   :  { %11675 = vmatprep.mubr.msk.bf16.mxu1 %vm11674_vm13, %v22169_v2  ;;  %vm11678_vm13 = vmpackc.low %vm21540_vm10, %vm21541_vm0  ;;  %vm21551_vm0 = vcmp.eq.s32.totalorder %v17998_v40, %v17696_v32  ;;  %22220 = vst [vmem:[#allocation165_spill] sm:$0xff] %v18492_v26  ;;  %v18520_v32 = vpop.permute.xlu1 %6734 }
 0x67b   :  { %vm11680_vm10 = vmpackc.low %vm21543_vm8, %vm21654_vm5  ;;  %vm21557_vm8 = vcmp.eq.s32.totalorder %v17981_v10, %v17722_v33  ;;  %22223 = vst [vmem:[#allocation168_spill] sm:$0xff] %v18520_v32 }
 0x681   :  { %11677 = vmatmul.mubr.msk.bf16.gmra.mrb[204].mxu1 %vm11676_vm4, %v22169_v2  ;;  %vm21544_vm4 = vcmp.eq.s32.totalorder %v17981_v10, %v17694_v43  ;;  %v18510_v43 = vpop.permute.xlu0 %6731 }
 0x682   :  { %11679 = vmatprep.mubr.msk.bf16.mxu1 %vm11678_vm13, %v22169_v2  ;;  %vm11682_vm13 = vmpackc.low %vm21544_vm4, %vm21549_vm9  ;;  %vm21559_vm9 = vcmp.eq.s32.totalorder %v17998_v40, %v17722_v33  ;;  %22222 = vst [vmem:[#allocation167_spill] sm:$0xff] %v18510_v43  ;;  %v18538_v33 = vpop.permute.xlu1 %6758  ;;  %vm21766_vm5 = vcmp.eq.s32.totalorder %v18510_v43, 1 }
 0x683   :  { %vm11684_vm4 = vmpackc.low %vm21550_vm3, %vm21551_vm0  ;;  %vm21558_vm3 = vcmp.eq.s32.totalorder %v17998_v40, %v17720_v25  ;;  %vm21564_vm0 = vcmp.eq.s32.totalorder %v17981_v10, %v17746_v46  ;;  %22225 = vst [vmem:[#allocation170_spill] sm:$0xff] %v18538_v33 }
 0x689   :  { %11681 = vmatmul.mubr.msk.bf16.gmra.mrb[208].mxu1 %vm11680_vm10, %v22169_v2  ;;  %vm21554_vm10 = vcmp.eq.s32.totalorder %v17981_v10, %v17720_v25  ;;  %v18530_v25 = vpop.permute.xlu0 %6755 }
 0x68a   :  { %11683 = vmatprep.mubr.msk.bf16.mxu1 %vm11682_vm13, %v22169_v2  ;;  %vm11686_vm13 = vmpackc.low %vm21554_vm10, %vm21557_vm8  ;;  %vm21569_vm8 = vcmp.eq.s32.totalorder %v17998_v40, %v17748_v18  ;;  %22224 = vst [vmem:[#allocation169_spill] sm:$0xff] %v18530_v25 }
 0x68d   :  { %v18548_v11 = vpop.permute.xlu0 %6713 }
 0x68e   :  { %22226 = vst [vmem:[#allocation171_spill] sm:$0xff] %v18548_v11 }
 0x691   :  { %11685 = vmatmul.mubr.msk.bf16.gmra.mrb[212].mxu1 %vm11684_vm4, %v22169_v2  ;;  %vm21567_vm4 = vcmp.eq.s32.totalorder %v17981_v10, %v17748_v18  ;;  %v18574_v18 = vpop.permute.xlu0 %6737 }
 0x692   :  { %11687 = vmatprep.mubr.msk.bf16.mxu1 %vm11686_vm13, %v22169_v2  ;;  %vm11688_vm13 = vmpackc.low %vm21558_vm3, %vm21559_vm9  ;;  %vm21568_vm3 = vcmp.eq.s32.totalorder %v17998_v40, %v17746_v46  ;;  %vm21572_vm9 = vcmp.eq.s32.totalorder %v17981_v10, %v17772_v5  ;;  %v18558_v46 = vpop.permute.xlu1 %6716  ;;  %22228 = vst [vmem:[#allocation173_spill] sm:$0xff] %v18574_v18 }
 0x693   :  { %vm11690_vm10 = vmpackc.low %vm21564_vm0, %vm21567_vm4  ;;  %vm21579_vm4 = vcmp.eq.s32.totalorder %v17998_v40, %v17774_v51  ;;  %22227 = vst [vmem:[#allocation172_spill] sm:$0xff] %v18558_v46 }
 0x696   :  { %v18576_v58 = vpop.permute.xlu1 %6740 }
 0x697   :  { %22229 = vst [vmem:[#allocation174_spill] sm:$0xff] %v18576_v58 }
 0x699   :  { %11689 = vmatmul.mubr.msk.bf16.gmra.mrb[216].mxu1 %vm11688_vm13, %v22169_v2  ;;  %vm21577_vm13 = vcmp.eq.s32.totalorder %v17981_v10, %v17774_v51 }
 0x69a   :  { %11691 = vmatprep.mubr.msk.bf16.mxu1 %vm11690_vm10, %v22169_v2  ;;  %vm11692_vm10 = vmpackc.low %vm21568_vm3, %vm21569_vm8  ;;  %vm21578_vm3 = vcmp.eq.s32.totalorder %v17998_v40, %v17772_v5  ;;  %vm21582_vm8 = vcmp.eq.s32.totalorder %v17981_v10, %v17798_v31  ;;  %v18592_v5 = vpop.permute.xlu0 %6779  ;;  %v18602_v51 = vpop.permute.xlu1 %6782 }
 0x69b   :  { %vm11694_vm0 = vmpackc.low %vm21572_vm9, %vm21577_vm13  ;;  %vm21589_vm13 = vcmp.eq.s32.totalorder %v17998_v40, %v17800_v63  ;;  %22230 = vst [vmem:[#allocation175_spill] sm:$0xff] %v18592_v5 }
 0x69c   :  { %22231 = vst [vmem:[#allocation176_spill] sm:$0xff] %v18602_v51 }
 0x69e   :  { %v18620_v22 = vpop.permute.xlu1 %6764 }
 0x69f   :  { %22234 = vst [vmem:[#allocation178_spill] sm:$0xff] %v18620_v22 }
 0x6a1   :  { %11693 = vmatmul.mubr.msk.bf16.gmra.mrb[220].mxu1 %vm11692_vm10, %v22169_v2  ;;  %vm21585_vm10 = vcmp.eq.s32.totalorder %v17981_v10, %v17800_v63  ;;  %v18612_v63 = vpop.permute.xlu0 %6761 }
 0x6a2   :  { %11695 = vmatprep.mubr.msk.bf16.mxu1 %vm11694_vm0, %v22169_v2  ;;  %vm11696_vm0 = vmpackc.low %vm21578_vm3, %vm21579_vm4  ;;  %vm21586_vm3 = vcmp.eq.s32.totalorder %v17998_v40, %v17798_v31  ;;  %vm21594_vm4 = vcmp.eq.s32.totalorder %v17981_v10, %v17824_v7  ;;  %v22232_v31 = vld [vmem:[#allocation153_spill] sm:$0xff]  ;;  %22233 = vst [vmem:[#allocation177_spill] sm:$0xff] %v18612_v63  ;;  %v18644_v35 = vpop.permute.xlu1 %6806 }
 0x6a3   :  { %vm11698_vm9 = vmpackc.low %vm21582_vm8, %vm21585_vm10  ;;  %vm21606_vm10 = vcmp.eq.s32.totalorder %v17998_v40, %v17826_v14  ;;  %22238 = vst [vmem:[#allocation180_spill] sm:$0xff] %v18644_v35 }
 0x6a9   :  { %11697 = vmatmul.mubr.msk.bf16.gmra.mrb[224].mxu1 %vm11696_vm0, %v22169_v2  ;;  %vm21653_vm0 = vcmp.eq.s32.totalorder %v17981_v10, %v17826_v14  ;;  %v18632_v14 = vpop.permute.xlu0 %6803 }
 0x6aa   :  { %11699 = vmatprep.mubr.msk.bf16.mxu1 %vm11698_vm9, %v22169_v2  ;;  %vm11700_vm9 = vmpackc.low %vm21586_vm3, %vm21589_vm13  ;;  %vm21601_vm3 = vcmp.eq.s32.totalorder %v17998_v40, %v17824_v7  ;;  %vm21609_vm13 = vcmp.eq.s32.totalorder %v17981_v10, %v22232_v31  ;;  %22235 = vst [vmem:[#allocation179_spill] sm:$0xff] %v18632_v14 }
 0x6ab   :  { %vm11702_vm8 = vmpackc.low %vm21594_vm4, %vm21653_vm0  ;;  %vm21767_vm0 = vcmp.eq.s32.totalorder %v18492_v26, 1 }
 0x6b1   :  { %11701 = vmatmul.mubr.msk.bf16.gmra.mrb[228].mxu1 %vm11700_vm9, %v22169_v2  ;;  %vm21614_vm9 = vcmp.eq.s32.totalorder %v17981_v10, %v17852_v19 }
 0x6b2   :  { %11703 = vmatprep.mubr.msk.bf16.mxu1 %vm11702_vm8, %v22169_v2  ;;  %vm11704_vm8 = vmpackc.low %vm21601_vm3, %vm21606_vm10  ;;  %vm21627_vm3 = vcmp.eq.s32.totalorder %v17998_v40, %v17852_v19  ;;  %vm21626_vm10 = vcmp.eq.s32.totalorder %v17981_v10, %v22236_v38  ;;  %v18664_v19 = vpop.permute.xlu1 %6722 }
 0x6b3   :  { %vm11706_vm4 = vmpackc.low %vm21609_vm13, %vm21614_vm9  ;;  %vm21621_vm13 = vcmp.eq.s32.totalorder %v17981_v10, %v22237_v54  ;;  %22240 = vst [vmem:[#allocation182_spill] sm:$0xff] %v18664_v19 }
 0x6b4   :  { %vm11710_vm9 = vmpackc.low %vm21621_vm13, %vm21626_vm10  ;;  %vm21639_vm13 = vcmp.eq.s32.totalorder %v17981_v10, %v17904_v15 }
 0x6b9   :  { %11705 = vmatmul.mubr.msk.bf16.gmra.mrb[232].mxu1 %vm11704_vm8, %v22169_v2  ;;  %vm21619_vm8 = vcmp.eq.s32.totalorder %v17998_v40, %v22232_v31 }
 0x6ba   :  { %11707 = vmatprep.mubr.msk.bf16.mxu1 %vm11706_vm4, %v22169_v2  ;;  %vm11708_vm4 = vmpackc.low %vm21619_vm8, %vm21627_vm3  ;;  %vm21633_vm8 = vcmp.eq.s32.totalorder %v17998_v40, %v22236_v38 }
 0x6bc   :  { %v18630_v17 = vpop.f32.mrb[128].mxu1 }
 0x6bd   :  { %v6389_v55 = vpop.f32.mrb[129].mxu1 }
 0x6be   :  { %v18638_v7 = vpop.f32.mrb[130].mxu1  ;;  %v18660_v55 = vpop.permute.xlu0 %6719 }
 0x6bf   :  { %v6392_v47 = vpop.f32.mrb[131].mxu1  ;;  %22239 = vst [vmem:[#allocation181_spill] sm:$0xff] %v18660_v55 }
 0x6c1   :  { %11709 = vmatmul.mubr.msk.bf16.gmra.mrb[236].mxu1 %vm11708_vm4, %v22169_v2  ;;  %vm21631_vm4 = vcmp.eq.s32.totalorder %v17998_v40, %v22237_v54 }
 0x6c2   :  { %11711 = vmatprep.mubr.msk.bf16.mxu1 %vm11710_vm9, %v22169_v2  ;;  %vm21634_vm9 = vcmp.eq.s32.totalorder %v17981_v10, %v22241_v8  ;;  %vm11712_vm10 = vmpackc.low %vm21631_vm4, %vm21633_vm8  ;;  %vm21646_vm4 = vcmp.eq.s32.totalorder %v17998_v40, %v17904_v15  ;;  %vm21652_vm8 = vcmp.eq.s32.totalorder %v17981_v10, %v17930_v62 }
 0x6c3   :  { %vm11714_vm3 = vmpackc.low %vm21634_vm9, %vm21639_vm13  ;;  %vm21647_vm9 = vcmp.eq.s32.totalorder %v17981_v10, %v17928_v36 }
 0x6c4   :  { %v18662_v47 = vpop.f32.mrb[132].mxu1  ;;  %vm11718_vm13 = vmpackc.low %vm21647_vm9, %vm21652_vm8  ;;  %vm21663_vm9 = vcmp.eq.s32.totalorder %v17981_v10, %v17954_v23 }
 0x6c5   :  { %v6397_v56 = vpop.f32.mrb[133].mxu1 }
 0x6c6   :  { %v18670_v31 = vpop.f32.mrb[134].mxu1  ;;  %v18682_v56 = vpop.permute.xlu0 %6743 }
 0x6c7   :  { %v6400_v45 = vpop.f32.mrb[135].mxu1  ;;  %22242 = vst [vmem:[#allocation183_spill] sm:$0xff] %v18682_v56 }
 0x6c8   :  { %v18692_v45 = vpop.permute.xlu1 %6746 }
 0x6c9   :  { %11713 = vmatmul.mubr.msk.bf16.gmra.mrb[240].mxu1 %vm11712_vm10, %v22169_v2  ;;  %22243 = vst [vmem:[#allocation184_spill] sm:$0xff] %v18692_v45  ;;  %vm21644_vm10 = vcmp.eq.s32.totalorder %v17998_v40, %v22241_v8 }
 0x6ca   :  { %11715 = vmatprep.mubr.msk.bf16.mxu1 %vm11714_vm3, %v22169_v2  ;;  %v18706_v61 = vpop.permute.xlu0 %6785  ;;  %vm11716_vm3 = vmpackc.low %vm21644_vm10, %vm21646_vm4  ;;  %vm21771_vm10 = vcmp.eq.s32.totalorder %v17998_v40, %v17930_v62  ;;  %vm21664_vm4 = vcmp.eq.s32.totalorder %v17981_v10, %v17956_v3  ;;  %v18763_v62 = vsel %vm21767_vm0, %v18630_v17, -3.4e+38 }
 0x6cb   :  { %22244 = vst [vmem:[#allocation185_spill] sm:$0xff] %v18706_v61  ;;  %vm11722_vm8 = vmpackc.low %vm21663_vm9, %vm21664_vm4  ;;  %vm21671_vm9 = vcmp.eq.s32.totalorder %v18494_v48, 1  ;;  %vm21670_vm4 = vcmp.eq.s32.totalorder %v18520_v32, 1 }
 0x6cc   :  { %v18694_v38 = vpop.f32.mrb[136].mxu1 }
 0x6cd   :  { %v6405_v60 = vpop.f32.mrb[137].mxu1 }
 0x6ce   :  { %v18700_v54 = vpop.f32.mrb[138].mxu1  ;;  %v18714_v60 = vpop.permute.xlu1 %6788 }
 0x6cf   :  { %v6408_v41 = vpop.f32.mrb[139].mxu1  ;;  %22245 = vst [vmem:[#allocation186_spill] sm:$0xff] %v18714_v60  ;;  %v18726_v15 = vpop.permute.xlu0 %6827 }
 0x6d0   :  { %22246 = vst [vmem:[#allocation187_spill] sm:$0xff] %v18726_v15 }
 0x6d1   :  { %11717 = vmatmul.mubr.msk.bf16.gmra.mrb[244].mxu1 %vm11716_vm3, %v22169_v2  ;;  %vm21669_vm3 = vcmp.eq.s32.totalorder %v17998_v40, %v17928_v36 }
 0x6d2   :  { %11719 = vmatprep.mubr.msk.bf16.mxu1 %vm11718_vm13, %v22169_v2  ;;  %v18738_v29 = vpop.permute.xlu1 %6830  ;;  %vm11720_vm13 = vmpackc.low %vm21669_vm3, %vm21771_vm10 }
 0x6d3   :  { %22247 = vst [vmem:[#allocation188_spill] sm:$0xff] %v18738_v29 }
 0x6d4   :  { %v18724_v41 = vpop.f32.mrb[140].mxu1 }
 0x6d5   :  { %v6413_v50 = vpop.f32.mrb[141].mxu1 }
 0x6d6   :  { %v18732_v8 = vpop.f32.mrb[142].mxu1  ;;  %v18754_v50 = vpop.permute.xlu0 %6767 }
 0x6d7   :  { %v6416_v52 = vpop.f32.mrb[143].mxu1  ;;  %22248 = vst [vmem:[#allocation189_spill] sm:$0xff] %v18754_v50  ;;  %v18758_v36 = vpop.permute.xlu1 %6770 }
 0x6d8   :  { %22249 = vst [vmem:[#allocation190_spill] sm:$0xff] %v18758_v36 }
 0x6d9   :  { %11721 = vmatmul.mubr.msk.bf16.gmra.mrb[248].mxu1 %vm11720_vm13, %v22169_v2  ;;  %vm21672_vm13 = vcmp.eq.s32.totalorder %v17998_v40, %v17954_v23 }
 0x6da   :  { %11723 = vmatprep.mubr.msk.bf16.mxu1 %vm11722_vm8, %v22169_v2  ;;  %vm21765_vm8 = vcmp.eq.s32.totalorder %v17998_v40, %v17956_v3  ;;  %v18794_v26 = vpop.permute.xlu0 %6809 }
 0x6db   :  { %vm11724_vm3 = vmpackc.low %vm21672_vm13, %vm21765_vm8  ;;  %22250 = vst [vmem:[#allocation191_spill] sm:$0xff] %v18794_v26  ;;  %vm21683_vm13 = vcmp.eq.s32.totalorder %v18558_v46, 1 }
 0x6dc   :  { %v6419_v52 = vpop.f32.mrb[144].mxu1 }
 0x6dd   :  { %v18767_v10 = vsel %vm21766_vm5, %v6419_v52, -3.4e+38  ;;  %v6421_v16 = vpop.f32.mrb[145].mxu1  ;;  %v18780_v52 = vsel %vm21671_vm9, %v18638_v7, -3.4e+38  ;;  %v18797_v7 = vpop.permute.xlu1 %6812  ;;  %vm21677_vm9 = vcmp.eq.s32.totalorder %v18574_v18, 1 }
 0x6de   :  { %v6422_v17 = vpop.f32.mrb[146].mxu1  ;;  %22251 = vst [vmem:[#allocation192_spill] sm:$0xff] %v18797_v7  ;;  %v18814_v48 = vpop.permute.xlu0 %6851 }
 0x6df   :  { %v18784_v16 = vsel %vm21670_vm4, %v6422_v17, -3.4e+38  ;;  %v6424_v43 = vpop.f32.mrb[147].mxu1  ;;  %vm21678_vm4 = vcmp.eq.s32.totalorder %v18548_v11, 1  ;;  %22252 = vst [vmem:[#allocation193_spill] sm:$0xff] %v18814_v48 }
 0x6e0   :  { %v7027_v42 = vmax.f32 %v18780_v52, %v18784_v16  ;;  %v18804_v17 = vsel %vm21678_vm4, %v18662_v47, -3.4e+38  ;;  %v6965_v47 = vsel %vm21683_vm13, %v18670_v31, -3.4e+38  ;;  %vm21687_vm4 = vcmp.eq.s32.totalorder %v18682_v56, 1 }
 0x6e1   :  { %11725 = vmatmul.mubr.msk.bf16.gmra.mrb[252].mxu1 %vm11724_vm3, %v22169_v2  ;;  %vm21682_vm3 = vcmp.eq.s32.totalorder %v18576_v58, 1  ;;  %vm21689_vm13 = vcmp.eq.s32.totalorder %v18692_v45, 1 }
 0x6e4   :  { %v6427_v43 = vpop.f32.mrb[148].mxu1 }
 0x6e5   :  { %v18808_v52 = vsel %vm21677_vm9, %v6427_v43, -3.4e+38  ;;  %v6429_v16 = vpop.f32.mrb[149].mxu1  ;;  %vm21688_vm9 = vcmp.eq.s32.totalorder %v18660_v55, 1 }
 0x6e6   :  { %v7028_v2 = vmax.f32 %v18804_v17, %v18808_v52  ;;  %v6430_v32 = vpop.f32.mrb[150].mxu1  ;;  %v18821_v16 = vpop.permute.xlu1 %6854  ;;  %v6966_v52 = vsel %vm21688_vm9, %v18694_v38, -3.4e+38 }
 0x6e7   :  { %v6973_v18 = vsel %vm21682_vm3, %v6430_v32, -3.4e+38  ;;  %v6432_v43 = vpop.f32.mrb[151].mxu1  ;;  %22253 = vst [vmem:[#allocation194_spill] sm:$0xff] %v18821_v16  ;;  %v18825_v17 = vpop.permute.xlu0 %6725  ;;  %vm21690_vm3 = vcmp.eq.s32.totalorder %v18664_v19, 1 }
 0x6e8   :  { %v7029_v11 = vmax.f32 %v6965_v47, %v6973_v18  ;;  %22254 = vst [vmem:[#allocation195_spill] sm:$0xff] %v18825_v17  ;;  %v6967_v43 = vsel %vm21690_vm3, %v18700_v54, -3.4e+38 }
 0x6ea   :  { %v18834_v47 = vpop.permute.xlu1 %6728 }
 0x6eb   :  { %22255 = vst [vmem:[#allocation196_spill] sm:$0xff] %v18834_v47  ;;  %v18841_v56 = vpop.permute.xlu0 %6749 }
 0x6ec   :  { %v6435_v40 = vpop.f32.mrb[152].mxu1  ;;  %22256 = vst [vmem:[#allocation197_spill] sm:$0xff] %v18841_v56  ;;  %vm21694_vm9 = vcmp.eq.s32.totalorder %v18841_v56, 1 }
 0x6ed   :  { %v6974_v31 = vsel %vm21687_vm4, %v6435_v40, -3.4e+38  ;;  %v6437_v58 = vpop.f32.mrb[153].mxu1  ;;  %vm21693_vm4 = vcmp.eq.s32.totalorder %v18825_v17, 1 }
 0x6ee   :  { %v7030_v18 = vmax.f32 %v6966_v52, %v6974_v31  ;;  %v6438_v32 = vpop.f32.mrb[154].mxu1  ;;  %v18845_v58 = vpop.permute.xlu1 %6752  ;;  %v6968_v52 = vsel %vm21693_vm4, %v18724_v41, -3.4e+38  ;;  %vm21696_vm4 = vcmp.eq.s32.totalorder %v18530_v25, 1 }
 0x6ef   :  { %v6975_v55 = vsel %vm21689_vm13, %v6438_v32, -3.4e+38  ;;  %v6440_v38 = vpop.f32.mrb[155].mxu1  ;;  %22257 = vst [vmem:[#allocation198_spill] sm:$0xff] %v18845_v58  ;;  %vm21753_vm13 = vcmp.eq.s32.totalorder %v18834_v47, 1  ;;  %vm21698_vm3 = vcmp.eq.s32.totalorder %v18845_v58, 1 }
 0x6f0   :  { %v7031_v46 = vmax.f32 %v6967_v43, %v6975_v55  ;;  %v6969_v43 = vsel %vm21753_vm13, %v18732_v8, -3.4e+38 }
 0x6f4   :  { %v6443_v40 = vpop.f32.mrb[156].mxu1 }
 0x6f5   :  { %v6976_v54 = vsel %vm21694_vm9, %v6443_v40, -3.4e+38  ;;  %v6445_v31 = vpop.f32.mrb[157].mxu1  ;;  %vm21699_vm9 = vcmp.eq.s32.totalorder %v18538_v33, 1 }
 0x6f6   :  { %v7032_v55 = vmax.f32 %v6968_v52, %v6976_v54  ;;  %v6446_v32 = vpop.f32.mrb[158].mxu1  ;;  %v22258_v54 = vmax.f32 %v18763_v62, %v18767_v10 }
 0x6f7   :  { %v6977_v38 = vsel %vm21698_vm3, %v6446_v32, -3.4e+38  ;;  %v6448_v45 = vpop.f32.mrb[159].mxu1  ;;  %vm21703_vm3 = vcmp.eq.s32.totalorder %v18620_v22, 1 }
 0x6f8   :  { %v7033_v17 = vmax.f32 %v6969_v43, %v6977_v38  ;;  %v18872_v43 = vpop.permute.xlu0 %6791  ;;  %v18874_v38 = vpop.permute.xlu1 %6794 }
 0x6f9   :  { %22259 = vst [vmem:[#allocation199_spill] sm:$0xff] %v18872_v43  ;;  %22260 = vst [vmem:[#allocation200_spill] sm:$0xff] %v18874_v38 }
 0x6fc   :  { %v6451_v41 = vpop.f32.mrb[160].mxu1 }
 0x6fd   :  { %v6978_v40 = vsel %vm21696_vm4, %v6451_v41, -3.4e+38  ;;  %v6453_v31 = vpop.f32.mrb[161].mxu1  ;;  %vm21700_vm4 = vcmp.eq.s32.totalorder %v18612_v63, 1 }
 0x6fe   :  { %v6454_v52 = vpop.f32.mrb[162].mxu1  ;;  %v18866_v47 = vmax.f32 %v22258_v54, %v6978_v40  ;;  %v18882_v40 = vpop.permute.xlu0 %6833 }
 0x6ff   :  { %v6979_v8 = vsel %vm21699_vm9, %v6454_v52, -3.4e+38  ;;  %v6456_v45 = vpop.f32.mrb[163].mxu1  ;;  %22261 = vst [vmem:[#allocation201_spill] sm:$0xff] %v18882_v40  ;;  %vm21705_vm9 = vcmp.eq.s32.totalorder %v18754_v50, 1 }
 0x700   :  { %v18870_v32 = vmax.f32 %v7027_v42, %v6979_v8  ;;  %v18888_v8 = vpop.permute.xlu1 %6836 }
 0x701   :  { %22262 = vst [vmem:[#allocation202_spill] sm:$0xff] %v18888_v8 }
 0x704   :  { %v6459_v41 = vpop.f32.mrb[164].mxu1 }
 0x705   :  { %v6980_v31 = vsel %vm21700_vm4, %v6459_v41, -3.4e+38  ;;  %v6461_v25 = vpop.f32.mrb[165].mxu1  ;;  %v18891_v41 = vpop.permute.xlu0 %6875  ;;  %vm21707_vm4 = vcmp.eq.s32.totalorder %v18758_v36, 1 }
 0x706   :  { %v6462_v10 = vpop.f32.mrb[166].mxu1  ;;  %v18880_v62 = vmax.f32 %v7028_v2, %v6980_v31  ;;  %22263 = vst [vmem:[#allocation203_spill] sm:$0xff] %v18891_v41 }
 0x707   :  { %v6981_v42 = vsel %vm21703_vm3, %v6462_v10, -3.4e+38  ;;  %v6464_v52 = vpop.f32.mrb[167].mxu1  ;;  %v18898_v10 = vpop.permute.xlu1 %6878 }
 0x708   :  { %v18886_v54 = vmax.f32 %v7029_v11, %v6981_v42  ;;  %22264 = vst [vmem:[#allocation204_spill] sm:$0xff] %v18898_v10 }
 0x709   :  { %v18904_v22 = vpop.permute.xlu0 %6773 }
 0x70a   :  { %22265 = vst [vmem:[#allocation205_spill] sm:$0xff] %v18904_v22  ;;  %vm21710_vm3 = vcmp.eq.s32.totalorder %v18904_v22, 1 }
 0x70c   :  { %v6467_v45 = vpop.f32.mrb[168].mxu1 }
 0x70d   :  { %v6982_v25 = vsel %vm21705_vm9, %v6467_v45, -3.4e+38  ;;  %v6469_v2 = vpop.f32.mrb[169].mxu1  ;;  %v18907_v45 = vpop.permute.xlu1 %6776 }
 0x70e   :  { %v6470_v31 = vpop.f32.mrb[170].mxu1  ;;  %v18896_v63 = vmax.f32 %v7030_v18, %v6982_v25  ;;  %22266 = vst [vmem:[#allocation206_spill] sm:$0xff] %v18907_v45  ;;  %vm21711_vm9 = vcmp.eq.s32.totalorder %v18907_v45, 1 }
 0x70f   :  { %v6983_v11 = vsel %vm21707_vm4, %v6470_v31, -3.4e+38  ;;  %v6472_v42 = vpop.f32.mrb[171].mxu1  ;;  %vm21712_vm4 = vcmp.eq.s32.totalorder %v18592_v5, 1  ;;  %v18931_v5 = vpop.permute.xlu0 %6815 }
 0x710   :  { %v18902_v52 = vmax.f32 %v7031_v46, %v6983_v11  ;;  %22267 = vst [vmem:[#allocation207_spill] sm:$0xff] %v18931_v5 }
 0x714   :  { %v6475_v50 = vpop.f32.mrb[172].mxu1 }
 0x715   :  { %v6984_v2 = vsel %vm21710_vm3, %v6475_v50, -3.4e+38  ;;  %v6477_v18 = vpop.f32.mrb[173].mxu1  ;;  %vm21714_vm3 = vcmp.eq.s32.totalorder %v18602_v51, 1 }
 0x716   :  { %v6478_v25 = vpop.f32.mrb[174].mxu1  ;;  %v18912_v33 = vmax.f32 %v7032_v55, %v6984_v2 }
 0x717   :  { %v6985_v46 = vsel %vm21711_vm9, %v6478_v25, -3.4e+38  ;;  %v6480_v31 = vpop.f32.mrb[175].mxu1  ;;  %vm21715_vm9 = vcmp.eq.s32.totalorder %v18706_v61, 1 }
 0x718   :  { %v18916_v11 = vmax.f32 %v7033_v17, %v6985_v46 }
 0x71c   :  { %v6483_v42 = vpop.f32.mrb[176].mxu1 }
 0x71d   :  { %v6485_v36 = vpop.f32.mrb[177].mxu1  ;;  %v6986_v22 = vsel %vm21712_vm4, %v6483_v42, -3.4e+38  ;;  %vm21717_vm4 = vcmp.eq.s32.totalorder %v18714_v60, 1 }
 0x71e   :  { %v6486_v50 = vpop.f32.mrb[178].mxu1  ;;  %v7042_v18 = vmax.f32 %v18866_v47, %v6986_v22 }
 0x71f   :  { %v6488_v55 = vpop.f32.mrb[179].mxu1  ;;  %v6987_v2 = vsel %vm21714_vm3, %v6486_v50, -3.4e+38  ;;  %v18936_v50 = vpop.permute.xlu1 %6818  ;;  %vm21720_vm3 = vcmp.eq.s32.totalorder %v18872_v43, 1 }
 0x720   :  { %v7043_v25 = vmax.f32 %v18870_v32, %v6987_v2  ;;  %22268 = vst [vmem:[#allocation208_spill] sm:$0xff] %v18936_v50  ;;  %v18939_v2 = vpop.permute.xlu0 %6857 }
 0x721   :  { %22269 = vst [vmem:[#allocation209_spill] sm:$0xff] %v18939_v2 }
 0x724   :  { %v6491_v17 = vpop.f32.mrb[180].mxu1  ;;  %v18950_v60 = vpop.permute.xlu0 %6797 }
 0x725   :  { %v6493_v46 = vpop.f32.mrb[181].mxu1  ;;  %v6988_v36 = vsel %vm21715_vm9, %v6491_v17, -3.4e+38  ;;  %vm21721_vm9 = vcmp.eq.s32.totalorder %v18874_v38, 1  ;;  %22271 = vst [vmem:[#allocation211_spill] sm:$0xff] %v18950_v60 }
 0x726   :  { %v6494_v31 = vpop.f32.mrb[182].mxu1  ;;  %v7044_v42 = vmax.f32 %v18880_v62, %v6988_v36 }
 0x727   :  { %v6496_v22 = vpop.f32.mrb[183].mxu1  ;;  %v6989_v47 = vsel %vm21717_vm4, %v6494_v31, -3.4e+38  ;;  %vm21723_vm4 = vcmp.eq.s32.totalorder %v18950_v60, 1 }
 0x728   :  { %v7045_v32 = vmax.f32 %v18886_v54, %v6989_v47  ;;  %v18945_v22 = vpop.permute.xlu1 %6860 }
 0x729   :  { %22270 = vst [vmem:[#allocation210_spill] sm:$0xff] %v18945_v22  ;;  %vm21756_vm13 = vcmp.eq.s32.totalorder %v18945_v22, 1 }
 0x72c   :  { %v6499_v55 = vpop.f32.mrb[184].mxu1  ;;  %v18953_v43 = vpop.permute.xlu1 %6800 }
 0x72d   :  { %v6501_v17 = vpop.f32.mrb[185].mxu1  ;;  %v6990_v46 = vsel %vm21720_vm3, %v6499_v55, -3.4e+38  ;;  %22272 = vst [vmem:[#allocation212_spill] sm:$0xff] %v18953_v43  ;;  %vm21725_vm3 = vcmp.eq.s32.totalorder %v18953_v43, 1 }
 0x72e   :  { %v6502_v62 = vpop.f32.mrb[186].mxu1  ;;  %v7046_v36 = vmax.f32 %v18896_v63, %v6990_v46 }
 0x72f   :  { %v6504_v31 = vpop.f32.mrb[187].mxu1  ;;  %v6991_v54 = vsel %vm21721_vm9, %v6502_v62, -3.4e+38  ;;  %vm21726_vm9 = vcmp.eq.s32.totalorder %v18632_v14, 1 }
 0x730   :  { %v7047_v47 = vmax.f32 %v18902_v52, %v6991_v54 }
 0x734   :  { %v6507_v17 = vpop.f32.mrb[188].mxu1 }
 0x735   :  { %v6509_v55 = vpop.f32.mrb[189].mxu1  ;;  %v6992_v61 = vsel %vm21723_vm4, %v6507_v17, -3.4e+38  ;;  %vm21727_vm4 = vcmp.eq.s32.totalorder %v18644_v35, 1 }
 0x736   :  { %v6510_v63 = vpop.f32.mrb[190].mxu1  ;;  %v7048_v46 = vmax.f32 %v18912_v33, %v6992_v61 }
 0x737   :  { %v6512_v31 = vpop.f32.mrb[191].mxu1  ;;  %v6993_v52 = vsel %vm21725_vm3, %v6510_v63, -3.4e+38  ;;  %vm21728_vm3 = vcmp.eq.s32.totalorder %v18794_v26, 1 }
 0x738   :  { %v7049_v62 = vmax.f32 %v18916_v11, %v6993_v52 }
 0x73c   :  { %v6515_v54 = vpop.f32.mrb[192].mxu1 }
 0x73d   :  { %v6994_v55 = vsel %vm21726_vm9, %v6515_v54, -3.4e+38  ;;  %v6517_v38 = vpop.f32.mrb[193].mxu1  ;;  %vm21731_vm9 = vcmp.eq.s32.totalorder %v18797_v7, 1  ;;  %v18978_v54 = vpop.permute.xlu0 %6839 }
 0x73e   :  { %v18966_v17 = vmax.f32 %v7042_v18, %v6994_v55  ;;  %v6518_v60 = vpop.f32.mrb[194].mxu1  ;;  %22273 = vst [vmem:[#allocation213_spill] sm:$0xff] %v18978_v54 }
 0x73f   :  { %v6995_v61 = vsel %vm21727_vm4, %v6518_v60, -3.4e+38  ;;  %v6520_v33 = vpop.f32.mrb[195].mxu1  ;;  %vm21733_vm4 = vcmp.eq.s32.totalorder %v18931_v5, 1 }
 0x740   :  { %v18970_v31 = vmax.f32 %v7043_v25, %v6995_v61  ;;  %v18984_v61 = vpop.permute.xlu1 %6842 }
 0x741   :  { %22274 = vst [vmem:[#allocation214_spill] sm:$0xff] %v18984_v61 }
 0x744   :  { %v6523_v11 = vpop.f32.mrb[196].mxu1 }
 0x745   :  { %v6996_v63 = vsel %vm21728_vm3, %v6523_v11, -3.4e+38  ;;  %v6525_v52 = vpop.f32.mrb[197].mxu1  ;;  %v18987_v11 = vpop.permute.xlu0 %6881  ;;  %vm21735_vm3 = vcmp.eq.s32.totalorder %v18936_v50, 1 }
 0x746   :  { %v18976_v38 = vmax.f32 %v7044_v42, %v6996_v63  ;;  %v6526_v18 = vpop.f32.mrb[198].mxu1  ;;  %22275 = vst [vmem:[#allocation215_spill] sm:$0xff] %v18987_v11  ;;  %vm21769_vm0 = vcmp.eq.s32.totalorder %v18987_v11, 1 }
 0x747   :  { %v6997_v60 = vsel %vm21731_vm9, %v6526_v18, -3.4e+38  ;;  %v6528_v55 = vpop.f32.mrb[199].mxu1  ;;  %v18994_v18 = vpop.permute.xlu1 %6884 }
 0x748   :  { %v18982_v25 = vmax.f32 %v7045_v32, %v6997_v60  ;;  %22276 = vst [vmem:[#allocation216_spill] sm:$0xff] %v18994_v18 }
 0x749   :  { %v19000_v26 = vpop.permute.xlu0 %6821 }
 0x74a   :  { %22277 = vst [vmem:[#allocation217_spill] sm:$0xff] %v19000_v26  ;;  %vm21738_vm9 = vcmp.eq.s32.totalorder %v19000_v26, 1 }
 0x74c   :  { %v6531_v33 = vpop.f32.mrb[200].mxu1 }
 0x74d   :  { %v6998_v42 = vsel %vm21733_vm4, %v6531_v33, -3.4e+38  ;;  %v6533_v63 = vpop.f32.mrb[201].mxu1  ;;  %v19003_v33 = vpop.permute.xlu1 %6824 }
 0x74e   :  { %v18992_v52 = vmax.f32 %v7046_v36, %v6998_v42  ;;  %v6534_v7 = vpop.f32.mrb[202].mxu1  ;;  %22278 = vst [vmem:[#allocation218_spill] sm:$0xff] %v19003_v33  ;;  %vm21739_vm4 = vcmp.eq.s32.totalorder %v19003_v33, 1 }
 0x74f   :  { %v6999_v32 = vsel %vm21735_vm3, %v6534_v7, -3.4e+38  ;;  %v6536_v60 = vpop.f32.mrb[203].mxu1  ;;  %vm21740_vm3 = vcmp.eq.s32.totalorder %v18726_v15, 1 }
 0x750   :  { %v18998_v55 = vmax.f32 %v7047_v47, %v6999_v32 }
 0x754   :  { %v6539_v5 = vpop.f32.mrb[204].mxu1 }
 0x755   :  { %v7000_v36 = vsel %vm21738_vm9, %v6539_v5, -3.4e+38  ;;  %v6541_v42 = vpop.f32.mrb[205].mxu1  ;;  %vm21741_vm9 = vcmp.eq.s32.totalorder %v18738_v29, 1 }
 0x756   :  { %v19008_v63 = vmax.f32 %v7048_v46, %v7000_v36  ;;  %v6542_v50 = vpop.f32.mrb[206].mxu1 }
 0x757   :  { %v7001_v7 = vsel %vm21739_vm4, %v6542_v50, -3.4e+38  ;;  %v6544_v47 = vpop.f32.mrb[207].mxu1  ;;  %vm21742_vm4 = vcmp.eq.s32.totalorder %v18882_v40, 1 }
 0x758   :  { %v19012_v32 = vmax.f32 %v7049_v62, %v7001_v7 }
 0x75c   :  { %v6547_v60 = vpop.f32.mrb[208].mxu1 }
 0x75d   :  { %v7002_v35 = vsel %vm21740_vm3, %v6547_v60, -3.4e+38  ;;  %v6549_v26 = vpop.f32.mrb[209].mxu1  ;;  %vm21743_vm3 = vcmp.eq.s32.totalorder %v18888_v8, 1 }
 0x75e   :  { %v7058_v5 = vmax.f32 %v18966_v17, %v7002_v35  ;;  %v6550_v46 = vpop.f32.mrb[210].mxu1 }
 0x75f   :  { %v7003_v36 = vsel %vm21741_vm9, %v6550_v46, -3.4e+38  ;;  %v6552_v42 = vpop.f32.mrb[211].mxu1  ;;  %vm21745_vm9 = vcmp.eq.s32.totalorder %v18978_v54, 1 }
 0x760   :  { %v7059_v50 = vmax.f32 %v18970_v31, %v7003_v36  ;;  %v19031_v36 = vpop.permute.xlu0 %6863 }
 0x761   :  { %22279 = vst [vmem:[#allocation219_spill] sm:$0xff] %v19031_v36 }
 0x764   :  { %v6555_v62 = vpop.f32.mrb[212].mxu1 }
 0x765   :  { %v7004_v7 = vsel %vm21742_vm4, %v6555_v62, -3.4e+38  ;;  %v6557_v47 = vpop.f32.mrb[213].mxu1  ;;  %vm21747_vm4 = vcmp.eq.s32.totalorder %v18984_v61, 1 }
 0x766   :  { %v7060_v26 = vmax.f32 %v18976_v38, %v7004_v7  ;;  %v6558_v60 = vpop.f32.mrb[214].mxu1  ;;  %v19037_v47 = vpop.permute.xlu1 %6866 }
 0x767   :  { %v7005_v35 = vsel %vm21743_vm3, %v6558_v60, -3.4e+38  ;;  %v6560_v17 = vpop.f32.mrb[215].mxu1  ;;  %22280 = vst [vmem:[#allocation220_spill] sm:$0xff] %v19037_v47 }
 0x768   :  { %v7061_v46 = vmax.f32 %v18982_v25, %v7005_v35  ;;  %v19042_v17 = vpop.permute.xlu0 %6845 }
 0x769   :  { %22281 = vst [vmem:[#allocation221_spill] sm:$0xff] %v19042_v17  ;;  %vm21750_vm3 = vcmp.eq.s32.totalorder %v19042_v17, 1 }
 0x76c   :  { %v6563_v31 = vpop.f32.mrb[216].mxu1 }
 0x76d   :  { %v7006_v42 = vsel %vm21745_vm9, %v6563_v31, -3.4e+38  ;;  %v6565_v62 = vpop.f32.mrb[217].mxu1  ;;  %v19045_v31 = vpop.permute.xlu1 %6848 }
 0x76e   :  { %v7062_v38 = vmax.f32 %v18992_v52, %v7006_v42  ;;  %v6566_v7 = vpop.f32.mrb[218].mxu1  ;;  %22282 = vst [vmem:[#allocation222_spill] sm:$0xff] %v19045_v31  ;;  %vm21752_vm9 = vcmp.eq.s32.totalorder %v19045_v31, 1 }
 0x76f   :  { %v7007_v60 = vsel %vm21747_vm4, %v6566_v7, -3.4e+38  ;;  %v6568_v25 = vpop.f32.mrb[219].mxu1  ;;  %vm21763_vm4 = vcmp.eq.s32.totalorder %v18814_v48, 1 }
 0x770   :  { %v7063_v35 = vmax.f32 %v18998_v55, %v7007_v60 }
 0x774   :  { %v6571_v54 = vpop.f32.mrb[220].mxu1 }
 0x775   :  { %v7008_v62 = vsel %vm21750_vm3, %v6571_v54, -3.4e+38  ;;  %v6573_v52 = vpop.f32.mrb[221].mxu1  ;;  %vm21754_vm3 = vcmp.eq.s32.totalorder %v18821_v16, 1 }
 0x776   :  { %v7064_v42 = vmax.f32 %v19008_v63, %v7008_v62  ;;  %v6574_v61 = vpop.f32.mrb[222].mxu1 }
 0x777   :  { %v7009_v7 = vsel %vm21752_vm9, %v6574_v61, -3.4e+38  ;;  %v6576_v55 = vpop.f32.mrb[223].mxu1  ;;  %vm21755_vm9 = vcmp.eq.s32.totalorder %v18939_v2, 1 }
 0x778   :  { %v7065_v60 = vmax.f32 %v19012_v32, %v7009_v7 }
 0x77c   :  { %v6579_v25 = vpop.f32.mrb[224].mxu1 }
 0x77d   :  { %v7010_v8 = vsel %vm21763_vm4, %v6579_v25, -3.4e+38  ;;  %v6581_v17 = vpop.f32.mrb[225].mxu1 }
 0x77e   :  { %v7066_v54 = vmax.f32 %v7058_v5, %v7010_v8  ;;  %v6582_v52 = vpop.f32.mrb[226].mxu1 }
 0x77f   :  { %v7011_v63 = vsel %vm21754_vm3, %v6582_v52, -3.4e+38  ;;  %v6584_v62 = vpop.f32.mrb[227].mxu1  ;;  %vm21758_vm3 = vcmp.eq.s32.totalorder %v19031_v36, 1 }
 0x780   :  { %v7067_v31 = vmax.f32 %v7059_v50, %v7011_v63  ;;  %v19067_v50 = vpop.permute.xlu0 %6887 }
 0x781   :  { %22283 = vst [vmem:[#allocation223_spill] sm:$0xff] %v19067_v50 }
 0x784   :  { %v6587_v61 = vpop.f32.mrb[228].mxu1 }
 0x785   :  { %v7012_v32 = vsel %vm21755_vm9, %v6587_v61, -3.4e+38  ;;  %v6589_v7 = vpop.f32.mrb[229].mxu1  ;;  %vm21759_vm9 = vcmp.eq.s32.totalorder %v19037_v47, 1 }
 0x786   :  { %v7068_v55 = vmax.f32 %v7060_v26, %v7012_v32  ;;  %v6590_v17 = vpop.f32.mrb[230].mxu1  ;;  %v19072_v26 = vpop.permute.xlu1 %6890 }
 0x787   :  { %v7013_v8 = vsel %vm21756_vm13, %v6590_v17, -3.4e+38  ;;  %v6592_v5 = vpop.f32.mrb[231].mxu1  ;;  %22284 = vst [vmem:[#allocation224_spill] sm:$0xff] %v19072_v26 }
 0x788   :  { %v7069_v25 = vmax.f32 %v7061_v46, %v7013_v8  ;;  %v19076_v8 = vpop.permute.xlu0 %6869 }
 0x789   :  { %22285 = vst [vmem:[#allocation225_spill] sm:$0xff] %v19076_v8  ;;  %vm21762_vm13 = vcmp.eq.s32.totalorder %v19076_v8, 1 }
 0x78a   :  { %v19079_v22 = vpop.permute.xlu1 %6872 }
 0x78b   :  { %22286 = vst [vmem:[#allocation226_spill] sm:$0xff] %v19079_v22 }
 0x78c   :  { %v6595_v52 = vpop.f32.mrb[232].mxu1 }
 0x78d   :  { %v7014_v63 = vsel %vm21758_vm3, %v6595_v52, -3.4e+38  ;;  %v6597_v62 = vpop.f32.mrb[233].mxu1  ;;  %vm21764_vm3 = vcmp.eq.s32.totalorder %v19079_v22, 1 }
 0x78e   :  { %v7070_v61 = vmax.f32 %v7062_v38, %v7014_v63  ;;  %v6598_v7 = vpop.f32.mrb[234].mxu1 }
 0x78f   :  { %v7015_v32 = vsel %vm21759_vm9, %v6598_v7, -3.4e+38  ;;  %v6600_v17 = vpop.f32.mrb[235].mxu1  ;;  %vm21768_vm9 = vcmp.eq.s32.totalorder %v18891_v41, 1  ;;  %v22357_v41 = vld [vmem:[#allocation66_spill] sm:$0xff] }
 0x790   :  { %v7071_v46 = vmax.f32 %v7063_v35, %v7015_v32 }
 0x794   :  { %v6603_v5 = vpop.f32.mrb[236].mxu1 }
 0x795   :  { %v7016_v52 = vsel %vm21762_vm13, %v6603_v5, -3.4e+38  ;;  %v6605_v62 = vpop.f32.mrb[237].mxu1  ;;  %vm21770_vm13 = vcmp.eq.s32.totalorder %v18898_v10, 1 }
 0x796   :  { %v19084_v38 = vmax.f32 %v7064_v42, %v7016_v52  ;;  %v6606_v63 = vpop.f32.mrb[238].mxu1 }
 0x797   :  { %v7017_v7 = vsel %vm21764_vm3, %v6606_v63, -3.4e+38  ;;  %v6608_v35 = vpop.f32.mrb[239].mxu1 }
 0x798   :  { %v19088_v32 = vmax.f32 %v7065_v60, %v7017_v7 }
 0x79c   :  { %v6611_v17 = vpop.f32.mrb[240].mxu1 }
 0x79d   :  { %v7018_v47 = vsel %vm21768_vm9, %v6611_v17, -3.4e+38  ;;  %v6613_v8 = vpop.f32.mrb[241].mxu1 }
 0x79e   :  { %v7074_v5 = vmax.f32 %v7066_v54, %v7018_v47  ;;  %v6614_v62 = vpop.f32.mrb[242].mxu1  ;;  %v22300_v8 = vld [vmem:[#allocation23_spill] sm:$0xff] }
 0x79f   :  { %v7019_v42 = vsel %vm21770_vm13, %v6614_v62, -3.4e+38  ;;  %v6616_v52 = vpop.f32.mrb[243].mxu1  ;;  %vm21773_vm13 = vcmp.eq.s32.totalorder %v19067_v50, 1  ;;  %v22355_v50 = vld [vmem:[#allocation64_spill] sm:$0xff] }
 0x7a0   :  { %vm7082_vm4 = vcmp.le.f32.partialorder %v7074_v5, -1e+38  ;;  %v7075_v63 = vmax.f32 %v7067_v31, %v7019_v42 }
 0x7a1   :  { %vm11727_vm3 = vmneg %vm7082_vm4  ;;  %vm21772_vm4 = vcmp.eq.s32.totalorder %v18994_v18, 1 }
 0x7a2   :  { %vm7083_vm8 = vcmp.le.f32.partialorder %v7075_v63, -1e+38  ;;  %v19096_v60 = vpack.c.bf16 %v7075_v63, %v7074_v5 }
 0x7a3   :  { %vm11726_vm5 = vmneg %vm7083_vm8 }
 0x7a4   :  { %v6619_v7 = vpop.f32.mrb[244].mxu1  ;;  %vm19099_vm9 = vmpackc.low %vm11726_vm5, %vm11727_vm3 }
 0x7a5   :  { %v7020_v47 = vsel %vm21769_vm0, %v6619_v7, -3.4e+38  ;;  %v6621_v54 = vpop.f32.mrb[245].mxu1  ;;  %13255 = vmatprep.subr.msk.bf16.mxu0 %vm19099_vm9, %v19096_v60 }
 0x7a6   :  { %v7076_v31 = vmax.f32 %v7068_v55, %v7020_v47  ;;  %v6622_v35 = vpop.f32.mrb[246].mxu1  ;;  %13256 = vmatpush3.bf16.msk.msra.mxu0 %vm19099_vm9, %v19096_v60  ;;  %v22302_v55 = vld [vmem:[#allocation25_spill] sm:$0xff] }
 0x7a7   :  { %v7021_v17 = vsel %vm21772_vm4, %v6622_v35, -3.4e+38  ;;  %v6624_v5 = vpop.f32.mrb[247].mxu1  ;;  %vm21776_vm4 = vcmp.eq.s32.totalorder %v19072_v26, 1 }
 0x7a8   :  { %vm7084_vm5 = vcmp.le.f32.partialorder %v7076_v31, -1e+38  ;;  %v7077_v62 = vmax.f32 %v7069_v25, %v7021_v17  ;;  %v19128_v17 = vpop.permute.xlu0 %6893 }
 0x7a9   :  { %vm11732_vm8 = vmneg %vm7084_vm5  ;;  %22291 = vst [vmem:[#allocation227_spill] sm:$0xff] %v19128_v17 }
 0x7aa   :  { %vm7085_vm3 = vcmp.le.f32.partialorder %v7077_v62, -1e+38  ;;  %v11734_v42 = vpack.c.bf16 %v7077_v62, %v7076_v31  ;;  %v19130_v62 = vpop.permute.xlu1 %6896 }
 0x7ab   :  { %vm11731_vm0 = vmneg %vm7085_vm3  ;;  %22292 = vst [vmem:[#allocation228_spill] sm:$0xff] %v19130_v62 }
 0x7ac   :  { %v6627_v52 = vpop.f32.mrb[248].mxu1  ;;  %vm19115_vm10 = vmpackc.low %vm11731_vm0, %vm11732_vm8 }
 0x7ad   :  { %v7022_v63 = vsel %vm21773_vm13, %v6627_v52, -3.4e+38  ;;  %v6629_v7 = vpop.f32.mrb[249].mxu1  ;;  %13257 = vmatprep.subr.msk.bf16.mxu0 %vm19115_vm10, %v11734_v42  ;;  %vm21775_vm13 = vcmp.eq.s32.totalorder %v19128_v17, 1  ;;  %v22306_v52 = vld [vmem:[#allocation29_spill] sm:$0xff] }
 0x7ae   :  { %v7078_v25 = vmax.f32 %v7070_v61, %v7022_v63  ;;  %v6630_v47 = vpop.f32.mrb[250].mxu1  ;;  %13258 = vmatpush3.bf16.msk.msra.mxu0 %vm19115_vm10, %v11734_v42 }
 0x7af   :  { %v7023_v54 = vsel %vm21776_vm4, %v6630_v47, -3.4e+38  ;;  %v6632_v31 = vpop.f32.mrb[251].mxu1 }
 0x7b0   :  { %vm7086_vm0 = vcmp.le.f32.partialorder %v7078_v25, -1e+38  ;;  %v7079_v35 = vmax.f32 %v7071_v46, %v7023_v54 }
 0x7b1   :  { %vm11737_vm5 = vmneg %vm7086_vm0  ;;  %vm6961_vm0 = vcmp.eq.s32.totalorder %v19130_v62, 1 }
 0x7b2   :  { %vm7087_vm8 = vcmp.le.f32.partialorder %v7079_v35, -1e+38  ;;  %v11739_v5 = vpack.c.bf16 %v7079_v35, %v7078_v25 }
 0x7b3   :  { %vm11736_vm3 = vmneg %vm7087_vm8 }
 0x7b4   :  { %v6635_v61 = vpop.f32.mrb[252].mxu1  ;;  %vm19133_vm7 = vmpackc.low %vm11736_vm3, %vm11737_vm5 }
 0x7b5   :  { %v7024_v63 = vsel %vm21775_vm13, %v6635_v61, -3.4e+38  ;;  %v6637_v7 = vpop.f32.mrb[253].mxu1  ;;  %13259 = vmatprep.subr.msk.bf16.mxu0 %vm19133_vm7, %v11739_v5  ;;  %v22296_v61 = vld [vmem:[#allocation19_spill] sm:$0xff] }
 0x7b6   :  { %v7080_v46 = vmax.f32 %v19084_v38, %v7024_v63  ;;  %v6638_v25 = vpop.f32.mrb[254].mxu1  ;;  %13260 = vmatpush3.bf16.msk.msra.mxu0 %vm19133_vm7, %v11739_v5  ;;  %v22295_v38 = vld [vmem:[#allocation17_spill] sm:$0xff]  ;;  %v22303_v7 = vld [vmem:[#allocation26_spill] sm:$0xff] }
 0x7b7   :  { %v7025_v47 = vsel %vm6961_vm0, %v6638_v25, -3.4e+38  ;;  %v6640_v54 = vpop.f32.mrb[255].mxu1  ;;  %v22298_v63 = vld [vmem:[#allocation21_spill] sm:$0xff]  ;;  %v22307_v25 = vld [vmem:[#allocation30_spill] sm:$0xff] }
 0x7b8   :  { %vm7088_vm5 = vcmp.le.f32.partialorder %v7080_v46, -1e+38  ;;  %v7081_v31 = vmax.f32 %v19088_v32, %v7025_v47  ;;  %v22297_v32 = vld [vmem:[#allocation20_spill] sm:$0xff]  ;;  %v22308_v47 = vld [vmem:[#allocation31_spill] sm:$0xff] }
 0x7b9   :  { %vm11742_vm8 = vmneg %vm7088_vm5  ;;  %v22309_v54 = vld [vmem:[#allocation32_spill] sm:$0xff] }
 0x7ba   :  { %vm7089_vm3 = vcmp.le.f32.partialorder %v7081_v31, -1e+38  ;;  %v11744_v35 = vpack.c.bf16 %v7081_v31, %v7080_v46  ;;  %v22304_v46 = vld [vmem:[#allocation27_spill] sm:$0xff]  ;;  %v22310_v31 = vld [vmem:[#allocation33_spill] sm:$0xff] }
 0x7bb   :  { %vm11741_vm13 = vmneg %vm7089_vm3 }
 0x7bc   :  { %vm11743_vm4 = vmpackc.low %vm11741_vm13, %vm11742_vm8 }
 0x7bd   :  { %13261 = vmatprep.subr.msk.bf16.mxu0 %vm11743_vm4, %v11744_v35 }
 0x7be   :  { %13262 = vmatpush3.bf16.msk.msra.mxu0 %vm11743_vm4, %v11744_v35 }
 0x7bf   :  { %13327 = vmatprep.subr.msk.bf16.mxu0 %vm19099_vm9, %v19096_v60 }
 0x7c1   :  { %13264 = vmatmul.mubr.msk.bf16.vlgmr.msra.gmra.mrb[0].mxu0 %vm3290_vm6, %v22295_v38  ;;  %v22312_v38 = vld [vmem:[#allocation35_spill] sm:$0xff] }
 0x7c2   :  { %13267 = vmatprep.mubr.msk.bf16.mxu0 %vm3290_vm6, %v22296_v61  ;;  %13328 = vmatpush3.bf16.msk.msra.mxu0 %vm19099_vm9, %v19096_v60  ;;  %v22299_v60 = vld [vmem:[#allocation22_spill] sm:$0xff]  ;;  %v22313_v61 = vld [vmem:[#allocation36_spill] sm:$0xff] }
 0x7c3   :  { %13329 = vmatprep.subr.msk.bf16.mxu0 %vm19115_vm10, %v11734_v42 }
 0x7c6   :  { %13330 = vmatpush3.bf16.msk.msra.mxu0 %vm19115_vm10, %v11734_v42  ;;  %v22301_v42 = vld [vmem:[#allocation24_spill] sm:$0xff] }
 0x7c7   :  { %13331 = vmatprep.subr.msk.bf16.mxu0 %vm19133_vm7, %v11739_v5 }
 0x7c9   :  { %13268 = vmatmul.mubr.msk.bf16.gmra.mrb[4].mxu0 %vm3290_vm6, %v22297_v32  ;;  %v22314_v32 = vld [vmem:[#allocation37_spill] sm:$0xff] }
 0x7ca   :  { %13271 = vmatprep.mubr.msk.bf16.mxu0 %vm3290_vm6, %v22298_v63  ;;  %13332 = vmatpush3.bf16.msk.msra.mxu0 %vm19133_vm7, %v11739_v5  ;;  %v22305_v5 = vld [vmem:[#allocation28_spill] sm:$0xff]  ;;  %v22315_v63 = vld [vmem:[#allocation38_spill] sm:$0xff] }
 0x7cb   :  { %13333 = vmatprep.subr.msk.bf16.mxu0 %vm11743_vm4, %v11744_v35 }
 0x7ce   :  { %13334 = vmatpush3.bf16.msk.msra.mxu0 %vm11743_vm4, %v11744_v35  ;;  %v22311_v35 = vld [vmem:[#allocation34_spill] sm:$0xff] }
 0x7d1   :  { %13272 = vmatmul.mubr.msk.bf16.gmra.mrb[8].mxu0 %vm3290_vm6, %v22299_v60  ;;  %v22316_v60 = vld [vmem:[#allocation39_spill] sm:$0xff] }
 0x7d2   :  { %13275 = vmatprep.mubr.msk.bf16.mxu0 %vm3290_vm6, %v22300_v8  ;;  %v22317_v8 = vld [vmem:[#allocation40_spill] sm:$0xff] }
 0x7d9   :  { %13276 = vmatmul.mubr.msk.bf16.gmra.mrb[12].mxu0 %vm3290_vm6, %v22301_v42  ;;  %v22318_v42 = vld [vmem:[#allocation41_spill] sm:$0xff] }
 0x7da   :  { %13279 = vmatprep.mubr.msk.bf16.mxu0 %vm3290_vm6, %v22302_v55  ;;  %v22319_v55 = vld [vmem:[#allocation3_spill] sm:$0xff] }
 0x7e1   :  { %13280 = vmatmul.mubr.msk.bf16.gmra.mrb[16].mxu0 %vm3290_vm6, %v22303_v7  ;;  %v22320_v7 = vld [vmem:[#allocation2_spill] sm:$0xff] }
 0x7e2   :  { %13283 = vmatprep.mubr.msk.bf16.mxu0 %vm3290_vm6, %v22304_v46  ;;  %v22321_v46 = vld [vmem:[#allocation5_spill] sm:$0xff] }
 0x7e9   :  { %13284 = vmatmul.mubr.msk.bf16.gmra.mrb[20].mxu0 %vm3290_vm6, %v22305_v5  ;;  %v22322_v5 = vld [vmem:[#allocation4_spill] sm:$0xff] }
 0x7ea   :  { %13287 = vmatprep.mubr.msk.bf16.mxu0 %vm3290_vm6, %v22306_v52  ;;  %v22323_v52 = vld [vmem:[#allocation7_spill] sm:$0xff] }
 0x7f1   :  { %13288 = vmatmul.mubr.msk.bf16.gmra.mrb[24].mxu0 %vm3290_vm6, %v22307_v25  ;;  %v22324_v25 = vld [vmem:[#allocation6_spill] sm:$0xff] }
 0x7f2   :  { %13291 = vmatprep.mubr.msk.bf16.mxu0 %vm3290_vm6, %v22308_v47  ;;  %v22325_v47 = vld [vmem:[#allocation9_spill] sm:$0xff] }
 0x7f9   :  { %13292 = vmatmul.mubr.msk.bf16.gmra.mrb[28].mxu0 %vm3290_vm6, %v22309_v54  ;;  %v22326_v54 = vld [vmem:[#allocation8_spill] sm:$0xff] }
 0x7fa   :  { %13295 = vmatprep.mubr.msk.bf16.mxu0 %vm3290_vm6, %v22310_v31  ;;  %v22327_v31 = vld [vmem:[#allocation11_spill] sm:$0xff] }
 0x801   :  { %13296 = vmatmul.mubr.msk.bf16.gmra.mrb[32].mxu0 %vm3290_vm6, %v22311_v35  ;;  %v22328_v35 = vld [vmem:[#allocation10_spill] sm:$0xff] }
 0x802   :  { %13299 = vmatprep.mubr.msk.bf16.mxu0 %vm3290_vm6, %v22312_v38  ;;  %v22329_v38 = vld [vmem:[#allocation13_spill] sm:$0xff] }
 0x809   :  { %13300 = vmatmul.mubr.msk.bf16.gmra.mrb[36].mxu0 %vm3290_vm6, %v22313_v61  ;;  %v22330_v61 = vld [vmem:[#allocation12_spill] sm:$0xff] }
 0x80a   :  { %13303 = vmatprep.mubr.msk.bf16.mxu0 %vm3290_vm6, %v22314_v32  ;;  %v22331_v32 = vld [vmem:[#allocation15_spill] sm:$0xff] }
 0x811   :  { %13304 = vmatmul.mubr.msk.bf16.gmra.mrb[40].mxu0 %vm3290_vm6, %v22315_v63  ;;  %v22332_v63 = vld [vmem:[#allocation14_spill] sm:$0xff] }
 0x812   :  { %13307 = vmatprep.mubr.msk.bf16.mxu0 %vm3290_vm6, %v22316_v60  ;;  %v22333_v60 = vld [vmem:[#allocation42_spill] sm:$0xff] }
 0x819   :  { %13308 = vmatmul.mubr.msk.bf16.gmra.mrb[44].mxu0 %vm3290_vm6, %v22317_v8  ;;  %v22334_v8 = vld [vmem:[#allocation43_spill] sm:$0xff] }
 0x81a   :  { %13311 = vmatprep.mubr.msk.bf16.mxu0 %vm3290_vm6, %v22318_v42  ;;  %v22335_v42 = vld [vmem:[#allocation44_spill] sm:$0xff] }
 0x821   :  { %13312 = vmatmul.mubr.msk.bf16.gmra.mrb[48].mxu0 %vm3290_vm6, %v22319_v55  ;;  %v22336_v55 = vld [vmem:[#allocation45_spill] sm:$0xff] }
 0x822   :  { %13315 = vmatprep.mubr.msk.bf16.mxu0 %vm3290_vm6, %v22320_v7  ;;  %v22337_v7 = vld [vmem:[#allocation46_spill] sm:$0xff] }
 0x829   :  { %13316 = vmatmul.mubr.msk.bf16.gmra.mrb[52].mxu0 %vm3290_vm6, %v22321_v46  ;;  %v22338_v46 = vld [vmem:[#allocation47_spill] sm:$0xff] }
 0x82a   :  { %13319 = vmatprep.mubr.msk.bf16.mxu0 %vm3290_vm6, %v22322_v5  ;;  %v22339_v5 = vld [vmem:[#allocation48_spill] sm:$0xff] }
 0x831   :  { %13320 = vmatmul.mubr.msk.bf16.gmra.mrb[56].mxu0 %vm3290_vm6, %v22323_v52  ;;  %v22340_v52 = vld [vmem:[#allocation49_spill] sm:$0xff] }
 0x832   :  { %13323 = vmatprep.mubr.msk.bf16.mxu0 %vm3290_vm6, %v22324_v25  ;;  %v22341_v25 = vld [vmem:[#allocation50_spill] sm:$0xff] }
 0x839   :  { %13324 = vmatmul.mubr.msk.bf16.gmra.mrb[60].mxu0 %vm3290_vm6, %v22325_v47  ;;  %v22342_v47 = vld [vmem:[#allocation51_spill] sm:$0xff] }
 0x83a   :  { %13335 = vmatprep.mubr.msk.bf16.mxu0 %vm3290_vm6, %v22326_v54  ;;  %v22343_v54 = vld [vmem:[#allocation52_spill] sm:$0xff] }
 0x841   :  { %13336 = vmatmul.mubr.msk.bf16.vlgmr.msra.gmra.mrb[64].mxu0 %vm3290_vm6, %v22327_v31  ;;  %v14300_v31 = vld [vmem:[%s21173_s15] sm:$0xff]  }
 0x842   :  { %13339 = vmatprep.mubr.msk.bf16.mxu0 %vm3290_vm6, %v22328_v35  ;;  %v22344_v35 = vld [vmem:[#allocation53_spill] sm:$0xff]  ;;  %13399 = vmatprep.subr.bf16.mxu0 %v14300_v31 }
 0x843   :  { %13400 = vmatpush3.bf16.msra.mxu0 %v14300_v31 }
 0x844   :  { %13465 = vmatprep.subr.bf16.mxu0 %v14301_v6 }
 0x849   :  { %13340 = vmatmul.mubr.msk.bf16.gmra.mrb[68].mxu0 %vm3290_vm6, %v22329_v38  ;;  %v22345_v38 = vld [vmem:[#allocation54_spill] sm:$0xff] }
 0x84a   :  { %13343 = vmatprep.mubr.msk.bf16.mxu0 %vm3290_vm6, %v22330_v61  ;;  %v22346_v61 = vld [vmem:[#allocation55_spill] sm:$0xff] }
 0x851   :  { %13344 = vmatmul.mubr.msk.bf16.gmra.mrb[72].mxu0 %vm3290_vm6, %v22331_v32  ;;  %v22347_v32 = vld [vmem:[#allocation56_spill] sm:$0xff] }
 0x852   :  { %13347 = vmatprep.mubr.msk.bf16.mxu0 %vm3290_vm6, %v22332_v63  ;;  %v22348_v63 = vld [vmem:[#allocation57_spill] sm:$0xff] }
 0x859   :  { %13348 = vmatmul.mubr.msk.bf16.gmra.mrb[76].mxu0 %vm3290_vm6, %v22333_v60 }
 0x85a   :  { %13351 = vmatprep.mubr.msk.bf16.mxu0 %vm3290_vm6, %v22334_v8 }
 0x861   :  { %13352 = vmatmul.mubr.msk.bf16.gmra.mrb[80].mxu0 %vm3290_vm6, %v22335_v42 }
 0x862   :  { %13355 = vmatprep.mubr.msk.bf16.mxu0 %vm3290_vm6, %v22336_v55 }
 0x869   :  { %13356 = vmatmul.mubr.msk.bf16.gmra.mrb[84].mxu0 %vm3290_vm6, %v22337_v7 }
 0x86a   :  { %13359 = vmatprep.mubr.msk.bf16.mxu0 %vm3290_vm6, %v22338_v46  ;;  %v22353_v46 = vld [vmem:[#allocation62_spill] sm:$0xff] }
 0x871   :  { %13360 = vmatmul.mubr.msk.bf16.gmra.mrb[88].mxu0 %vm3290_vm6, %v22339_v5  ;;  %v22349_v5 = vld [vmem:[#allocation58_spill] sm:$0xff] }
 0x872   :  { %13363 = vmatprep.mubr.msk.bf16.mxu0 %vm3290_vm6, %v22340_v52  ;;  %v22350_v52 = vld [vmem:[#allocation59_spill] sm:$0xff] }
 0x879   :  { %13364 = vmatmul.mubr.msk.bf16.gmra.mrb[92].mxu0 %vm3290_vm6, %v22341_v25 }
 0x87a   :  { %13367 = vmatprep.mubr.msk.bf16.mxu0 %vm3290_vm6, %v22342_v47 }
 0x881   :  { %13368 = vmatmul.mubr.msk.bf16.gmra.mrb[96].mxu0 %vm3290_vm6, %v22343_v54 }
 0x882   :  { %13371 = vmatprep.mubr.msk.bf16.mxu0 %vm3290_vm6, %v22344_v35 }
 0x889   :  { %13372 = vmatmul.mubr.msk.bf16.gmra.mrb[100].mxu0 %vm3290_vm6, %v22345_v38 }
 0x88a   :  { %13375 = vmatprep.mubr.msk.bf16.mxu0 %vm3290_vm6, %v22346_v61  ;;  %v22351_v61 = vld [vmem:[#allocation60_spill] sm:$0xff] }
 0x891   :  { %13376 = vmatmul.mubr.msk.bf16.gmra.mrb[104].mxu0 %vm3290_vm6, %v22347_v32  ;;  %v22352_v32 = vld [vmem:[#allocation61_spill] sm:$0xff] }
 0x892   :  { %13379 = vmatprep.mubr.msk.bf16.mxu0 %vm3290_vm6, %v22348_v63 }
 0x894   :  { %v19273_v60 = vpop.f32.mrb[0].mxu0 }
 0x895   :  { %v19275_v8 = vpop.f32.mrb[1].mxu0 }
 0x896   :  { %v19277_v42 = vpop.f32.mrb[2].mxu0 }
 0x897   :  { %v19281_v7 = vpop.f32.mrb[3].mxu0 }
 0x899   :  { %13380 = vmatmul.mubr.msk.bf16.gmra.mrb[108].mxu0 %vm3290_vm6, %v22349_v5 }
 0x89a   :  { %13383 = vmatprep.mubr.msk.bf16.mxu0 %vm3290_vm6, %v22350_v52 }
 0x89c   :  { %v19289_v25 = vpop.f32.mrb[4].mxu0 }
 0x89d   :  { %v19291_v47 = vpop.f32.mrb[5].mxu0 }
 0x89e   :  { %v19293_v54 = vpop.f32.mrb[6].mxu0 }
 0x89f   :  { %v19297_v35 = vpop.f32.mrb[7].mxu0 }
 0x8a1   :  { %13384 = vmatmul.mubr.msk.bf16.gmra.mrb[112].mxu0 %vm3290_vm6, %v22351_v61  ;;  %v22354_v61 = vld [vmem:[#allocation63_spill] sm:$0xff] }
 0x8a2   :  { %13387 = vmatprep.mubr.msk.bf16.mxu0 %vm3290_vm6, %v22352_v32 }
 0x8a4   :  { %v19305_v63 = vpop.f32.mrb[8].mxu0 }
 0x8a5   :  { %v19307_v5 = vpop.f32.mrb[9].mxu0 }
 0x8a6   :  { %v19309_v52 = vpop.f32.mrb[10].mxu0 }
 0x8a7   :  { %v19313_v55 = vpop.f32.mrb[11].mxu0 }
 0x8a9   :  { %13388 = vmatmul.mubr.msk.bf16.gmra.mrb[116].mxu0 %vm3290_vm6, %v22353_v46  ;;  %v22356_v46 = vld [vmem:[#allocation65_spill] sm:$0xff] }
 0x8aa   :  { %13391 = vmatprep.mubr.msk.bf16.mxu0 %vm3290_vm6, %v22354_v61 }
 0x8ac   :  { %v19321_v32 = vpop.f32.mrb[12].mxu0 }
 0x8ad   :  { %v19323_v62 = vpop.f32.mrb[13].mxu0 }
 0x8ae   :  { %v19325_v17 = vpop.f32.mrb[14].mxu0 }
 0x8af   :  { %v19329_v26 = vpop.f32.mrb[15].mxu0 }
 0x8b1   :  { %13392 = vmatmul.mubr.msk.bf16.gmra.mrb[120].mxu0 %vm3290_vm6, %v22355_v50 }
 0x8b2   :  { %13395 = vmatprep.mubr.msk.bf16.mxu0 %vm3290_vm6, %v22356_v46 }
 0x8b4   :  { %v19337_v61 = vpop.f32.mrb[16].mxu0 }
 0x8b5   :  { %v19339_v18 = vpop.f32.mrb[17].mxu0 }
 0x8b6   :  { %v19341_v11 = vpop.f32.mrb[18].mxu0 }
 0x8b7   :  { %v19345_v10 = vpop.f32.mrb[19].mxu0 }
 0x8b9   :  { %13396 = vmatmul.mubr.msk.bf16.gmra.mrb[124].mxu0 %vm3290_vm6, %v22357_v41 }
 0x8bc   :  { %v19351_v50 = vpop.f32.mrb[20].mxu0 }
 0x8bd   :  { %v19353_v46 = vpop.f32.mrb[21].mxu0 }
 0x8be   :  { %v19355_v22 = vpop.f32.mrb[22].mxu0 }
 0x8bf   :  { %v19359_v2 = vpop.f32.mrb[23].mxu0 }
 0x8c4   :  { %v19363_v16 = vpop.f32.mrb[24].mxu0 }
 0x8c5   :  { %v19365_v38 = vpop.f32.mrb[25].mxu0 }
 0x8c6   :  { %v19367_v48 = vpop.f32.mrb[26].mxu0 }
 0x8c7   :  { %v19371_v40 = vpop.f32.mrb[27].mxu0 }
 0x8cc   :  { %v19375_v36 = vpop.f32.mrb[28].mxu0 }
 0x8cd   :  { %v19377_v15 = vpop.f32.mrb[29].mxu0 }
 0x8ce   :  { %v19379_v33 = vpop.f32.mrb[30].mxu0 }
 0x8cf   :  { %v19383_v14 = vpop.f32.mrb[31].mxu0 }
 0x8d4   :  { %v19387_v41 = vpop.f32.mrb[32].mxu0 }
 0x8d5   :  { %v19389_v51 = vpop.f32.mrb[33].mxu0 }
 0x8d6   :  { %v19391_v45 = vpop.f32.mrb[34].mxu0 }
 0x8d7   :  { %v19395_v58 = vpop.f32.mrb[35].mxu0 }
 0x8dc   :  { %v19399_v31 = vpop.f32.mrb[36].mxu0 }
 0x8dd   :  { %v19401_v19 = vpop.f32.mrb[37].mxu0 }
 0x8de   :  { %v19403_v23 = vpop.f32.mrb[38].mxu0 }
 0x8df   :  { %v19407_v3 = vpop.f32.mrb[39].mxu0 }
 0x8e4   :  { %v19411_v29 = vpop.f32.mrb[40].mxu0 }
 0x8e5   :  { %v19413_v28 = vpop.f32.mrb[41].mxu0 }
 0x8e6   :  { %v19415_v27 = vpop.f32.mrb[42].mxu0 }
 0x8e7   :  { %v19419_v9 = vpop.f32.mrb[43].mxu0 }
 0x8ec   :  { %v19423_v43 = vpop.f32.mrb[44].mxu0 }
 0x8ed   :  { %v19425_v30 = vpop.f32.mrb[45].mxu0 }
 0x8ee   :  { %v19427_v21 = vpop.f32.mrb[46].mxu0 }
 0x8ef   :  { %v19431_v49 = vpop.f32.mrb[47].mxu0 }
 0x8f4   :  { %v19435_v56 = vpop.f32.mrb[48].mxu0 }
 0x8f5   :  { %22358 = vst [vmem:[#allocation17_spill] sm:$0xff] %v19435_v56  ;;  %v19437_v34 = vpop.f32.mrb[49].mxu0 }
 0x8f6   :  { %22359 = vst [vmem:[#allocation19_spill] sm:$0xff] %v19437_v34  ;;  %v19439_v37 = vpop.f32.mrb[50].mxu0 }
 0x8f7   :  { %22360 = vst [vmem:[#allocation20_spill] sm:$0xff] %v19439_v37  ;;  %v19443_v4 = vpop.f32.mrb[51].mxu0 }
 0x8f8   :  { %22361 = vst [vmem:[#allocation21_spill] sm:$0xff] %v19443_v4 }
 0x8fc   :  { %v19447_v53 = vpop.f32.mrb[52].mxu0 }
 0x8fd   :  { %22362 = vst [vmem:[#allocation22_spill] sm:$0xff] %v19447_v53  ;;  %v19449_v39 = vpop.f32.mrb[53].mxu0 }
 0x8fe   :  { %22363 = vst [vmem:[#allocation23_spill] sm:$0xff] %v19449_v39  ;;  %v19451_v20 = vpop.f32.mrb[54].mxu0 }
 0x8ff   :  { %22364 = vst [vmem:[#allocation24_spill] sm:$0xff] %v19451_v20  ;;  %v19455_v44 = vpop.f32.mrb[55].mxu0 }
 0x900   :  { %22365 = vst [vmem:[#allocation25_spill] sm:$0xff] %v19455_v44 }
 0x904   :  { %v19462_v0 = vpop.f32.mrb[56].mxu0 }
 0x905   :  { %22366 = vst [vmem:[#allocation26_spill] sm:$0xff] %v19462_v0  ;;  %v19464_v1 = vpop.f32.mrb[57].mxu0 }
 0x906   :  { %22367 = vst [vmem:[#allocation27_spill] sm:$0xff] %v19464_v1  ;;  %v19466_v24 = vpop.f32.mrb[58].mxu0 }
 0x907   :  { %22368 = vst [vmem:[#allocation28_spill] sm:$0xff] %v19466_v24  ;;  %v19470_v57 = vpop.f32.mrb[59].mxu0 }
 0x908   :  { %22369 = vst [vmem:[#allocation29_spill] sm:$0xff] %v19470_v57 }
 0x90c   :  { %v19474_v59 = vpop.f32.mrb[60].mxu0 }
 0x90d   :  { %22370 = vst [vmem:[#allocation30_spill] sm:$0xff] %v19474_v59  ;;  %v19476_v53 = vpop.f32.mrb[61].mxu0 }
 0x90e   :  { %22371 = vst [vmem:[#allocation31_spill] sm:$0xff] %v19476_v53  ;;  %v19478_v20 = vpop.f32.mrb[62].mxu0 }
 0x90f   :  { %22372 = vst [vmem:[#allocation32_spill] sm:$0xff] %v19478_v20  ;;  %v19482_v44 = vpop.f32.mrb[63].mxu0 }
 0x910   :  { %22373 = vst [vmem:[#allocation33_spill] sm:$0xff] %v19482_v44 }
 0x914   :  { %v13337_v13 = vpop.f32.mrb[64].mxu0 }
 0x915   :  { %v7425_v0 = vpop.f32.mrb[65].mxu0 }
 0x916   :  { %v13338_v24 = vpop.f32.mrb[66].mxu0 }
 0x917   :  { %v7720_v37 = vpack.c.bf16 %v13338_v24, %v13337_v13  ;;  %v7428_v34 = vpop.f32.mrb[67].mxu0 }
 0x918   :  { %v7719_v12 = vpack.c.bf16 %v7428_v34, %v7425_v0 }
 0x91a   :  { %13401 = vmatprep.mubr.msk.bf16.mxu0 %vm4140_vm1, %v7719_v12 }
 0x91b   :  { %13402 = vmatmul.mubr.msk.bf16.vlgmr.msra.gmra.mrb[128].mxu0 %vm4140_vm1, %v7720_v37 }
 0x91c   :  { %v13341_v1 = vpop.f32.mrb[68].mxu0  ;;  %13466 = vmatpush3.bf16.msra.mxu0 %v14301_v6 }
 0x91d   :  { %v7441_v57 = vpop.f32.mrb[69].mxu0 }
 0x91e   :  { %v13342_v4 = vpop.f32.mrb[70].mxu0 }
 0x91f   :  { %v7722_v39 = vpack.c.bf16 %v13342_v4, %v13341_v1  ;;  %v7444_v59 = vpop.f32.mrb[71].mxu0 }
 0x920   :  { %v7721_v20 = vpack.c.bf16 %v7444_v59, %v7441_v57 }
 0x922   :  { %13405 = vmatprep.mubr.msk.bf16.mxu0 %vm4140_vm1, %v7721_v20 }
 0x923   :  { %13406 = vmatmul.mubr.msk.bf16.gmra.mrb[132].mxu0 %vm4140_vm1, %v7722_v39 }
 0x924   :  { %v13345_v56 = vpop.f32.mrb[72].mxu0 }
 0x925   :  { %v7457_v53 = vpop.f32.mrb[73].mxu0 }
 0x926   :  { %v13346_v24 = vpop.f32.mrb[74].mxu0 }
 0x927   :  { %v7724_v13 = vpack.c.bf16 %v13346_v24, %v13345_v56  ;;  %v7460_v0 = vpop.f32.mrb[75].mxu0 }
 0x928   :  { %v7723_v34 = vpack.c.bf16 %v7460_v0, %v7457_v53 }
 0x92a   :  { %13409 = vmatprep.mubr.msk.bf16.mxu0 %vm4140_vm1, %v7723_v34 }
 0x92b   :  { %13410 = vmatmul.mubr.msk.bf16.gmra.mrb[136].mxu0 %vm4140_vm1, %v7724_v13 }
 0x92c   :  { %v13349_v12 = vpop.f32.mrb[76].mxu0 }
 0x92d   :  { %v7473_v37 = vpop.f32.mrb[77].mxu0 }
 0x92e   :  { %v13350_v6 = vpop.f32.mrb[78].mxu0 }
 0x92f   :  { %v7726_v1 = vpack.c.bf16 %v13350_v6, %v13349_v12  ;;  %v7476_v4 = vpop.f32.mrb[79].mxu0 }
 0x930   :  { %v7725_v59 = vpack.c.bf16 %v7476_v4, %v7473_v37 }
 0x932   :  { %13413 = vmatprep.mubr.msk.bf16.mxu0 %vm4140_vm1, %v7725_v59 }
 0x933   :  { %13414 = vmatmul.mubr.msk.bf16.gmra.mrb[140].mxu0 %vm4140_vm1, %v7726_v1 }
 0x934   :  { %v13353_v20 = vpop.f32.mrb[80].mxu0 }
 0x935   :  { %v7489_v39 = vpop.f32.mrb[81].mxu0 }
 0x936   :  { %v13354_v57 = vpop.f32.mrb[82].mxu0 }
 0x937   :  { %v7728_v56 = vpack.c.bf16 %v13354_v57, %v13353_v20  ;;  %v7492_v24 = vpop.f32.mrb[83].mxu0 }
 0x938   :  { %v7727_v53 = vpack.c.bf16 %v7492_v24, %v7489_v39 }
 0x93a   :  { %13417 = vmatprep.mubr.msk.bf16.mxu0 %vm4140_vm1, %v7727_v53 }
 0x93b   :  { %13418 = vmatmul.mubr.msk.bf16.gmra.mrb[144].mxu0 %vm4140_vm1, %v7728_v56 }
 0x93c   :  { %v13357_v13 = vpop.f32.mrb[84].mxu0 }
 0x93d   :  { %v7505_v0 = vpop.f32.mrb[85].mxu0 }
 0x93e   :  { %v13358_v34 = vpop.f32.mrb[86].mxu0 }
 0x93f   :  { %v7730_v12 = vpack.c.bf16 %v13358_v34, %v13357_v13  ;;  %v7508_v6 = vpop.f32.mrb[87].mxu0 }
 0x940   :  { %v7729_v37 = vpack.c.bf16 %v7508_v6, %v7505_v0 }
 0x942   :  { %13421 = vmatprep.mubr.msk.bf16.mxu0 %vm4140_vm1, %v7729_v37 }
 0x943   :  { %13422 = vmatmul.mubr.msk.bf16.gmra.mrb[148].mxu0 %vm4140_vm1, %v7730_v12 }
 0x944   :  { %v13361_v1 = vpop.f32.mrb[88].mxu0 }
 0x945   :  { %v7521_v4 = vpop.f32.mrb[89].mxu0 }
 0x946   :  { %v13362_v59 = vpop.f32.mrb[90].mxu0 }
 0x947   :  { %v7732_v20 = vpack.c.bf16 %v13362_v59, %v13361_v1  ;;  %v7524_v57 = vpop.f32.mrb[91].mxu0 }
 0x948   :  { %v7731_v39 = vpack.c.bf16 %v7524_v57, %v7521_v4 }
 0x94a   :  { %13425 = vmatprep.mubr.msk.bf16.mxu0 %vm4140_vm1, %v7731_v39 }
 0x94b   :  { %13426 = vmatmul.mubr.msk.bf16.gmra.mrb[152].mxu0 %vm4140_vm1, %v7732_v20 }
 0x94c   :  { %v13365_v56 = vpop.f32.mrb[92].mxu0 }
 0x94d   :  { %v7537_v24 = vpop.f32.mrb[93].mxu0 }
 0x94e   :  { %v13366_v53 = vpop.f32.mrb[94].mxu0 }
 0x94f   :  { %v7734_v13 = vpack.c.bf16 %v13366_v53, %v13365_v56  ;;  %v7540_v34 = vpop.f32.mrb[95].mxu0 }
 0x950   :  { %v7733_v0 = vpack.c.bf16 %v7540_v34, %v7537_v24 }
 0x952   :  { %13429 = vmatprep.mubr.msk.bf16.mxu0 %vm4140_vm1, %v7733_v0 }
 0x953   :  { %13430 = vmatmul.mubr.msk.bf16.gmra.mrb[156].mxu0 %vm4140_vm1, %v7734_v13 }
 0x954   :  { %v13369_v12 = vpop.f32.mrb[96].mxu0 }
 0x955   :  { %v7553_v6 = vpop.f32.mrb[97].mxu0 }
 0x956   :  { %v13370_v37 = vpop.f32.mrb[98].mxu0 }
 0x957   :  { %v7736_v1 = vpack.c.bf16 %v13370_v37, %v13369_v12  ;;  %v7556_v59 = vpop.f32.mrb[99].mxu0 }
 0x958   :  { %v7735_v4 = vpack.c.bf16 %v7556_v59, %v7553_v6 }
 0x95a   :  { %13433 = vmatprep.mubr.msk.bf16.mxu0 %vm4140_vm1, %v7735_v4 }
 0x95b   :  { %13434 = vmatmul.mubr.msk.bf16.gmra.mrb[160].mxu0 %vm4140_vm1, %v7736_v1 }
 0x95c   :  { %v13373_v20 = vpop.f32.mrb[100].mxu0 }
 0x95d   :  { %v7569_v57 = vpop.f32.mrb[101].mxu0 }
 0x95e   :  { %v13374_v39 = vpop.f32.mrb[102].mxu0 }
 0x95f   :  { %v7738_v56 = vpack.c.bf16 %v13374_v39, %v13373_v20  ;;  %v7572_v53 = vpop.f32.mrb[103].mxu0 }
 0x960   :  { %v7737_v24 = vpack.c.bf16 %v7572_v53, %v7569_v57 }
 0x962   :  { %13437 = vmatprep.mubr.msk.bf16.mxu0 %vm4140_vm1, %v7737_v24 }
 0x963   :  { %13438 = vmatmul.mubr.msk.bf16.gmra.mrb[164].mxu0 %vm4140_vm1, %v7738_v56 }
 0x964   :  { %v13377_v13 = vpop.f32.mrb[104].mxu0 }
 0x965   :  { %v7585_v34 = vpop.f32.mrb[105].mxu0 }
 0x966   :  { %v13378_v0 = vpop.f32.mrb[106].mxu0 }
 0x967   :  { %v7740_v12 = vpack.c.bf16 %v13378_v0, %v13377_v13  ;;  %v7588_v37 = vpop.f32.mrb[107].mxu0 }
 0x968   :  { %v7739_v6 = vpack.c.bf16 %v7588_v37, %v7585_v34 }
 0x96a   :  { %13441 = vmatprep.mubr.msk.bf16.mxu0 %vm4140_vm1, %v7739_v6  ;;  %v14302_v6 = vld [vmem:[%s21175_s16] sm:$0xff]  }
 0x96b   :  { %13442 = vmatmul.mubr.msk.bf16.gmra.mrb[168].mxu0 %vm4140_vm1, %v7740_v12  ;;  %13531 = vmatprep.subr.bf16.mxu0 %v14302_v6 }
 0x96c   :  { %v13381_v1 = vpop.f32.mrb[108].mxu0 }
 0x96d   :  { %v7601_v59 = vpop.f32.mrb[109].mxu0 }
 0x96e   :  { %v13382_v4 = vpop.f32.mrb[110].mxu0 }
 0x96f   :  { %v7742_v20 = vpack.c.bf16 %v13382_v4, %v13381_v1  ;;  %v7604_v39 = vpop.f32.mrb[111].mxu0 }
 0x970   :  { %v7741_v57 = vpack.c.bf16 %v7604_v39, %v7601_v59 }
 0x972   :  { %13445 = vmatprep.mubr.msk.bf16.mxu0 %vm4140_vm1, %v7741_v57 }
 0x973   :  { %13446 = vmatmul.mubr.msk.bf16.gmra.mrb[172].mxu0 %vm4140_vm1, %v7742_v20 }
 0x974   :  { %v13385_v56 = vpop.f32.mrb[112].mxu0 }
 0x975   :  { %v7617_v53 = vpop.f32.mrb[113].mxu0 }
 0x976   :  { %v13386_v24 = vpop.f32.mrb[114].mxu0 }
 0x977   :  { %v7744_v13 = vpack.c.bf16 %v13386_v24, %v13385_v56  ;;  %v7620_v0 = vpop.f32.mrb[115].mxu0 }
 0x978   :  { %v7743_v34 = vpack.c.bf16 %v7620_v0, %v7617_v53 }
 0x97a   :  { %13449 = vmatprep.mubr.msk.bf16.mxu0 %vm4140_vm1, %v7743_v34 }
 0x97b   :  { %13450 = vmatmul.mubr.msk.bf16.gmra.mrb[176].mxu0 %vm4140_vm1, %v7744_v13 }
 0x97c   :  { %v13389_v12 = vpop.f32.mrb[116].mxu0 }
 0x97d   :  { %v7633_v37 = vpop.f32.mrb[117].mxu0 }
 0x97e   :  { %v13390_v1 = vpop.f32.mrb[118].mxu0 }
 0x97f   :  { %v7746_v59 = vpack.c.bf16 %v13390_v1, %v13389_v12  ;;  %v7636_v4 = vpop.f32.mrb[119].mxu0 }
 0x980   :  { %v7745_v20 = vpack.c.bf16 %v7636_v4, %v7633_v37  ;;  %v22375_v4 = vpack.c.bf16 %v19277_v42, %v19273_v60  ;;  %v22379_v60 = vpack.c.bf16 %v19309_v52, %v19305_v63  ;;  %v22380_v42 = vpack.c.bf16 %v19329_v26, %v19323_v62  ;;  %v22411_v62 = vld [vmem:[#allocation27_spill] sm:$0xff]  ;;  %v22419_v52 = vld [vmem:[#allocation32_spill] sm:$0xff] }
 0x981   :  { %v22384_v26 = vpack.c.bf16 %v19359_v2, %v19353_v46  ;;  %v22388_v2 = vpack.c.bf16 %v19383_v14, %v19377_v15  ;;  %v22392_v15 = vpack.c.bf16 %v19407_v3, %v19401_v19  ;;  %v14303_v14 = vld [vmem:[%s21176_s18] sm:$0xff]   ;;  %v22395_v3 = vpack.c.bf16 %v19415_v27, %v19411_v29  ;;  %v22404_v29 = vld [vmem:[#allocation25_spill] sm:$0xff]  ;;  %v22417_v63 = vld [vmem:[#allocation31_spill] sm:$0xff] }
 0x982   :  { %13453 = vmatprep.mubr.msk.bf16.mxu0 %vm4140_vm1, %v7745_v20  ;;  %v22376_v20 = vpack.c.bf16 %v19297_v35, %v19291_v47  ;;  %13597 = vmatprep.subr.bf16.mxu1 %v14303_v14  ;;  %v22396_v19 = vpack.c.bf16 %v19431_v49, %v19425_v30  ;;  %v22407_v30 = vld [vmem:[#allocation24_spill] sm:$0xff] }
 0x983   :  { %13454 = vmatmul.mubr.msk.bf16.gmra.mrb[180].mxu0 %vm4140_vm1, %v7746_v59  ;;  %v22374_v59 = vpack.c.bf16 %v19281_v7, %v19275_v8  ;;  %v22378_v8 = vpack.c.bf16 %v19313_v55, %v19307_v5  ;;  %v22381_v7 = vpack.c.bf16 %v19325_v17, %v19321_v32  ;;  %v22382_v55 = vpack.c.bf16 %v19345_v10, %v19339_v18  ;;  %v22402_v18 = vld [vmem:[#allocation17_spill] sm:$0xff]  ;;  %v22420_v32 = vld [vmem:[#allocation30_spill] sm:$0xff]  ;;  %v14305_v46 = vld [vmem:[%s21176_s18 + $0x10] sm:$0xff]  }
 0x984   :  { %v13393_v39 = vpop.f32.mrb[120].mxu0  ;;  %v22385_v17 = vpack.c.bf16 %v19355_v22, %v19351_v50  ;;  %v22386_v10 = vpack.c.bf16 %v19371_v40, %v19365_v38  ;;  %v22389_v22 = vpack.c.bf16 %v19379_v33, %v19375_v36  ;;  %v22390_v40 = vpack.c.bf16 %v19395_v58, %v19389_v51  ;;  %13598 = vmatpush3.bf16.msra.mxu1 %v14303_v14  ;;  %v22398_v58 = vld [vmem:[#allocation21_spill] sm:$0xff]  ;;  %v22405_v33 = vld [vmem:[#allocation23_spill] sm:$0xff]  ;;  %v22408_v36 = vld [vmem:[#allocation22_spill] sm:$0xff] }
 0x985   :  { %v7649_v57 = vpop.f32.mrb[121].mxu0  ;;  %v22393_v51 = vpack.c.bf16 %v19403_v23, %v19399_v31  ;;  %v22397_v23 = vpack.c.bf16 %v19427_v21, %v19423_v43  ;;  %v22406_v49 = vpack.c.bf16 %v22404_v29, %v22405_v33  ;;  %v22409_v21 = vpack.c.bf16 %v22407_v30, %v22408_v36  ;;  %v22410_v43 = vld [vmem:[#allocation29_spill] sm:$0xff]  ;;  %v22414_v31 = vld [vmem:[#allocation26_spill] sm:$0xff]  ;;  %v14304_v50 = vld [vmem:[%s21176_s18 + $0x8] sm:$0xff]  }
 0x986   :  { %v13394_v56 = vpop.f32.mrb[122].mxu0  ;;  %v22412_v47 = vpack.c.bf16 %v22410_v43, %v22411_v62  ;;  %v22416_v38 = vld [vmem:[#allocation33_spill] sm:$0xff]  ;;  %13599 = vmatprep.subr.bf16.mxu1 %v14304_v50  ;;  %v22453_v14 = vld [vmem:[#allocation127_spill] sm:$0xff] }
 0x987   :  { %v7748_v53 = vpack.c.bf16 %v13394_v56, %v13393_v39  ;;  %v7652_v24 = vpop.f32.mrb[123].mxu0  ;;  %v22418_v5 = vpack.c.bf16 %v22416_v38, %v22417_v63  ;;  %v22424_v39 = vld [vmem:[#allocation106_spill] sm:$0xff]  ;;  %v22426_v56 = vld [vmem:[#allocation108_spill] sm:$0xff] }
 0x988   :  { %v7747_v13 = vpack.c.bf16 %v7652_v24, %v7649_v57  ;;  %13600 = vmatpush3.bf16.msra.mxu1 %v14304_v50  ;;  %v22425_v57 = vld [vmem:[#allocation107_spill] sm:$0xff]  ;;  %v22428_v24 = vld [vmem:[#allocation110_spill] sm:$0xff] }
 0x989   :  { %13601 = vmatprep.subr.bf16.mxu1 %v14305_v46 }
 0x98a   :  { %13457 = vmatprep.mubr.msk.bf16.mxu0 %vm4140_vm1, %v7747_v13  ;;  %v22429_v13 = vld [vmem:[#allocation111_spill] sm:$0xff] }
 0x98b   :  { %13458 = vmatmul.mubr.msk.bf16.gmra.mrb[184].mxu0 %vm4140_vm1, %v7748_v53  ;;  %v22427_v53 = vld [vmem:[#allocation109_spill] sm:$0xff] }
 0x98c   :  { %v13397_v0 = vpop.f32.mrb[124].mxu0  ;;  %13602 = vmatpush3.bf16.msra.mxu1 %v14305_v46 }
 0x98d   :  { %v7665_v34 = vpop.f32.mrb[125].mxu0 }
 0x98e   :  { %v13398_v12 = vpop.f32.mrb[126].mxu0 }
 0x98f   :  { %v7750_v1 = vpack.c.bf16 %v13398_v12, %v13397_v0  ;;  %v7668_v44 = vpop.f32.mrb[127].mxu0  ;;  %v22430_v0 = vld [vmem:[#allocation112_spill] sm:$0xff]  ;;  %v22432_v12 = vld [vmem:[#allocation114_spill] sm:$0xff] }
 0x990   :  { %v7749_v37 = vpack.c.bf16 %v7668_v44, %v7665_v34  ;;  %v22377_v44 = vpack.c.bf16 %v19293_v54, %v19289_v25  ;;  %v22383_v25 = vpack.c.bf16 %v19341_v11, %v19337_v61  ;;  %v22387_v11 = vpack.c.bf16 %v19367_v48, %v19363_v16  ;;  %v22413_v54 = vld [vmem:[#allocation28_spill] sm:$0xff]  ;;  %v22431_v34 = vld [vmem:[#allocation113_spill] sm:$0xff] }
 0x991   :  { %v22391_v48 = vpack.c.bf16 %v19391_v45, %v19387_v41  ;;  %v22394_v16 = vpack.c.bf16 %v19419_v9, %v19413_v28  ;;  %v22399_v45 = vld [vmem:[#allocation19_spill] sm:$0xff]  ;;  %v22401_v28 = vld [vmem:[#allocation20_spill] sm:$0xff]  ;;  %v22415_v35 = vpack.c.bf16 %v22413_v54, %v22414_v31  ;;  %v22421_v61 = vpack.c.bf16 %v22419_v52, %v22420_v32 }
 0x992   :  { %13461 = vmatprep.mubr.msk.bf16.mxu0 %vm4140_vm1, %v7749_v37  ;;  %v22400_v9 = vpack.c.bf16 %v22398_v58, %v22399_v45  ;;  %v22403_v27 = vpack.c.bf16 %v22401_v28, %v22402_v18  ;;  %v22422_v41 = vld [vmem:[#allocation104_spill] sm:$0xff] }
 0x993   :  { %13462 = vmatmul.mubr.msk.bf16.gmra.mrb[188].mxu0 %vm4140_vm1, %v7750_v1  ;;  %v22433_v1 = vld [vmem:[#allocation115_spill] sm:$0xff]  ;;  %v22434_v37 = vld [vmem:[#allocation116_spill] sm:$0xff] }
 0x994   :  { %13467 = vmatprep.mubr.msk.bf16.mxu0 %vm4140_vm1, %v22374_v59  ;;  %v22435_v59 = vld [vmem:[#allocation117_spill] sm:$0xff] }
 0x99b   :  { %13468 = vmatmul.mubr.msk.bf16.vlgmr.msra.gmra.mrb[128].mxu0 %vm4140_vm1, %v22375_v4  ;;  %v22436_v4 = vld [vmem:[#allocation68_spill] sm:$0xff] }
 0x99c   :  { %13471 = vmatprep.mubr.msk.bf16.mxu0 %vm4140_vm1, %v22376_v20  ;;  %13532 = vmatpush3.bf16.msra.mxu0 %v14302_v6  ;;  %v22423_v6 = vld [vmem:[#allocation105_spill] sm:$0xff]  ;;  %v22437_v20 = vld [vmem:[#allocation18_spill] sm:$0xff] }
 0x9a3   :  { %13472 = vmatmul.mubr.msk.bf16.gmra.mrb[132].mxu0 %vm4140_vm1, %v22377_v44  ;;  %v22438_v44 = vld [vmem:[#allocation71_spill] sm:$0xff] }
 0x9a4   :  { %13475 = vmatprep.mubr.msk.bf16.mxu0 %vm4140_vm1, %v22378_v8  ;;  %v22439_v8 = vld [vmem:[#allocation70_spill] sm:$0xff] }
 0x9ab   :  { %13476 = vmatmul.mubr.msk.bf16.gmra.mrb[136].mxu0 %vm4140_vm1, %v22379_v60  ;;  %v22440_v60 = vld [vmem:[#allocation72_spill] sm:$0xff] }
 0x9ac   :  { %13479 = vmatprep.mubr.msk.bf16.mxu0 %vm4140_vm1, %v22380_v42  ;;  %v22441_v42 = vld [vmem:[#allocation67_spill] sm:$0xff] }
 0x9b3   :  { %13480 = vmatmul.mubr.msk.bf16.gmra.mrb[140].mxu0 %vm4140_vm1, %v22381_v7  ;;  %v22442_v7 = vld [vmem:[#allocation118_spill] sm:$0xff] }
 0x9b4   :  { %13483 = vmatprep.mubr.msk.bf16.mxu0 %vm4140_vm1, %v22382_v55  ;;  %v22443_v55 = vld [vmem:[#allocation69_spill] sm:$0xff] }
 0x9bb   :  { %13484 = vmatmul.mubr.msk.bf16.gmra.mrb[144].mxu0 %vm4140_vm1, %v22383_v25  ;;  %v22444_v25 = vld [vmem:[#allocation120_spill] sm:$0xff] }
 0x9bc   :  { %13487 = vmatprep.mubr.msk.bf16.mxu0 %vm4140_vm1, %v22384_v26  ;;  %v22445_v26 = vld [vmem:[#allocation119_spill] sm:$0xff] }
 0x9c3   :  { %13488 = vmatmul.mubr.msk.bf16.gmra.mrb[148].mxu0 %vm4140_vm1, %v22385_v17  ;;  %v14306_v17 = vld [vmem:[%s21176_s18 + $0x18] sm:$0xff]  }
 0x9c4   :  { %13491 = vmatprep.mubr.msk.bf16.mxu0 %vm4140_vm1, %v22386_v10  ;;  %v22446_v10 = vld [vmem:[#allocation122_spill] sm:$0xff]  ;;  %13603 = vmatprep.subr.bf16.mxu1 %v14306_v17 }
 0x9c5   :  { %13604 = vmatpush3.bf16.msra.mxu1 %v14306_v17 }
 0x9cb   :  { %13492 = vmatmul.mubr.msk.bf16.gmra.mrb[152].mxu0 %vm4140_vm1, %v22387_v11  ;;  %v22447_v11 = vld [vmem:[#allocation121_spill] sm:$0xff] }
 0x9cc   :  { %13495 = vmatprep.mubr.msk.bf16.mxu0 %vm4140_vm1, %v22388_v2  ;;  %v22448_v2 = vld [vmem:[#allocation124_spill] sm:$0xff] }
 0x9d3   :  { %13496 = vmatmul.mubr.msk.bf16.gmra.mrb[156].mxu0 %vm4140_vm1, %v22389_v22  ;;  %v22449_v22 = vld [vmem:[#allocation123_spill] sm:$0xff] }
 0x9d4   :  { %13499 = vmatprep.mubr.msk.bf16.mxu0 %vm4140_vm1, %v22390_v40  ;;  %v22450_v40 = vld [vmem:[#allocation126_spill] sm:$0xff] }
 0x9db   :  { %13500 = vmatmul.mubr.msk.bf16.gmra.mrb[160].mxu0 %vm4140_vm1, %v22391_v48  ;;  %v22451_v48 = vld [vmem:[#allocation125_spill] sm:$0xff] }
 0x9dc   :  { %13503 = vmatprep.mubr.msk.bf16.mxu0 %vm4140_vm1, %v22392_v15  ;;  %v22452_v15 = vld [vmem:[#allocation128_spill] sm:$0xff] }
 0x9e3   :  { %13504 = vmatmul.mubr.msk.bf16.gmra.mrb[164].mxu0 %vm4140_vm1, %v22393_v51  ;;  %v19728_v51 = vld [vmem:[%s21177_s17] ss:$0 sm:$0xff] }
 0x9e4   :  { %13507 = vmatprep.mubr.msk.bf16.mxu0 %vm4140_vm1, %v22394_v16 }
 0x9eb   :  { %13508 = vmatmul.mubr.msk.bf16.gmra.mrb[168].mxu0 %vm4140_vm1, %v22395_v3 }
 0x9ec   :  { %13511 = vmatprep.mubr.msk.bf16.mxu0 %vm4140_vm1, %v22396_v19 }
 0x9f3   :  { %13512 = vmatmul.mubr.msk.bf16.gmra.mrb[172].mxu0 %vm4140_vm1, %v22397_v23 }
 0x9f4   :  { %13515 = vmatprep.mubr.msk.bf16.mxu0 %vm4140_vm1, %v22400_v9 }
 0x9fb   :  { %13516 = vmatmul.mubr.msk.bf16.gmra.mrb[176].mxu0 %vm4140_vm1, %v22403_v27 }
 0x9fc   :  { %13519 = vmatprep.mubr.msk.bf16.mxu0 %vm4140_vm1, %v22406_v49 }
 0xa03   :  { %13520 = vmatmul.mubr.msk.bf16.gmra.mrb[180].mxu0 %vm4140_vm1, %v22409_v21 }
 0xa04   :  { %13523 = vmatprep.mubr.msk.bf16.mxu0 %vm4140_vm1, %v22412_v47 }
 0xa0b   :  { %13524 = vmatmul.mubr.msk.bf16.gmra.mrb[184].mxu0 %vm4140_vm1, %v22415_v35 }
 0xa0c   :  { %13527 = vmatprep.mubr.msk.bf16.mxu0 %vm4140_vm1, %v22418_v5 }
 0xa13   :  { %13528 = vmatmul.mubr.msk.bf16.gmra.mrb[188].mxu0 %vm4140_vm1, %v22421_v61 }
 0xa14   :  { %13533 = vmatprep.mubr.msk.bf16.mxu0 %vm4140_vm1, %v22422_v41 }
 0xa1b   :  { %13534 = vmatmul.mubr.msk.bf16.vlgmr.msra.gmra.mrb[128].mxu0 %vm4140_vm1, %v22423_v6 }
 0xa1c   :  { %13537 = vmatprep.mubr.msk.bf16.mxu0 %vm4140_vm1, %v22424_v39 }
 0xa23   :  { %13538 = vmatmul.mubr.msk.bf16.gmra.mrb[132].mxu0 %vm4140_vm1, %v22425_v57 }
 0xa24   :  { %13541 = vmatprep.mubr.msk.bf16.mxu0 %vm4140_vm1, %v22426_v56 }
 0xa2b   :  { %13542 = vmatmul.mubr.msk.bf16.gmra.mrb[136].mxu0 %vm4140_vm1, %v22427_v53 }
 0xa2c   :  { %13545 = vmatprep.mubr.msk.bf16.mxu0 %vm4140_vm1, %v22428_v24 }
 0xa33   :  { %13546 = vmatmul.mubr.msk.bf16.gmra.mrb[140].mxu0 %vm4140_vm1, %v22429_v13 }
 0xa34   :  { %13549 = vmatprep.mubr.msk.bf16.mxu0 %vm4140_vm1, %v22430_v0 }
 0xa3b   :  { %13550 = vmatmul.mubr.msk.bf16.gmra.mrb[144].mxu0 %vm4140_vm1, %v22431_v34 }
 0xa3c   :  { %13553 = vmatprep.mubr.msk.bf16.mxu0 %vm4140_vm1, %v22432_v12 }
 0xa43   :  { %13554 = vmatmul.mubr.msk.bf16.gmra.mrb[148].mxu0 %vm4140_vm1, %v22433_v1 }
 0xa44   :  { %13557 = vmatprep.mubr.msk.bf16.mxu0 %vm4140_vm1, %v22434_v37 }
 0xa4b   :  { %13558 = vmatmul.mubr.msk.bf16.gmra.mrb[152].mxu0 %vm4140_vm1, %v22435_v59 }
 0xa4c   :  { %13561 = vmatprep.mubr.msk.bf16.mxu0 %vm4140_vm1, %v22436_v4 }
 0xa53   :  { %13562 = vmatmul.mubr.msk.bf16.gmra.mrb[156].mxu0 %vm4140_vm1, %v22437_v20 }
 0xa54   :  { %13565 = vmatprep.mubr.msk.bf16.mxu0 %vm4140_vm1, %v22438_v44 }
 0xa5b   :  { %13566 = vmatmul.mubr.msk.bf16.gmra.mrb[160].mxu0 %vm4140_vm1, %v22439_v8 }
 0xa5c   :  { %13569 = vmatprep.mubr.msk.bf16.mxu0 %vm4140_vm1, %v22440_v60 }
 0xa63   :  { %13570 = vmatmul.mubr.msk.bf16.gmra.mrb[164].mxu0 %vm4140_vm1, %v22441_v42 }
 0xa64   :  { %13573 = vmatprep.mubr.msk.bf16.mxu0 %vm4140_vm1, %v22442_v7 }
 0xa6b   :  { %13574 = vmatmul.mubr.msk.bf16.gmra.mrb[168].mxu0 %vm4140_vm1, %v22443_v55 }
 0xa6c   :  { %13577 = vmatprep.mubr.msk.bf16.mxu0 %vm4140_vm1, %v22444_v25 }
 0xa73   :  { %13578 = vmatmul.mubr.msk.bf16.gmra.mrb[172].mxu0 %vm4140_vm1, %v22445_v26 }
 0xa74   :  { %13581 = vmatprep.mubr.msk.bf16.mxu0 %vm4140_vm1, %v22446_v10 }
 0xa7b   :  { %13582 = vmatmul.mubr.msk.bf16.gmra.mrb[176].mxu0 %vm4140_vm1, %v22447_v11 }
 0xa7c   :  { %13585 = vmatprep.mubr.msk.bf16.mxu0 %vm4140_vm1, %v22448_v2 }
 0xa83   :  { %13586 = vmatmul.mubr.msk.bf16.gmra.mrb[180].mxu0 %vm4140_vm1, %v22449_v22 }
 0xa84   :  { %13589 = vmatprep.mubr.msk.bf16.mxu0 %vm4140_vm1, %v22450_v40 }
 0xa8b   :  { %13590 = vmatmul.mubr.msk.bf16.gmra.mrb[184].mxu0 %vm4140_vm1, %v22451_v48 }
 0xa8c   :  { %13593 = vmatprep.mubr.msk.bf16.mxu0 %vm4140_vm1, %v22452_v15 }
 0xa93   :  { %13594 = vmatmul.mubr.msk.bf16.gmra.mrb[188].mxu0 %vm4140_vm1, %v22453_v14 }
 0xaee   :  { %v13535_v16 = vpop.f32.mrb[128].mxu0 }
 0xaef   :  { %v8996_v3 = vadd.f32 %v13535_v16, %v19728_v51  ;;  %v8669_v19 = vpop.f32.mrb[129].mxu0 }
 0xaf0   :  { %v8994_v23 = vadd.f32 %v19728_v51, %v8669_v19  ;;  %v13536_v58 = vpop.f32.mrb[130].mxu0 }
 0xaf1   :  { %v8997_v45 = vadd.f32 %v13536_v58, %v19728_v51  ;;  %v8672_v9 = vpop.f32.mrb[131].mxu0  ;;  %v9060_v18 = vmax.f32 %v8996_v3, 0.0 }
 0xaf2   :  { %v8995_v28 = vadd.f32 %v19728_v51, %v8672_v9  ;;  %v9058_v29 = vmax.f32 %v8994_v23, 0.0 }
 0xaf3   :  { %v9061_v27 = vmax.f32 %v8997_v45, 0.0 }
 0xaf4   :  { %v9059_v33 = vmax.f32 %v8995_v28, 0.0 }
 0xaf5   :  { %v9123_v49 = vpack.c.bf16 %v9061_v27, %v9060_v18 }
 0xaf6   :  { %v9122_v30 = vpack.c.bf16 %v9059_v33, %v9058_v29  ;;  %v13539_v36 = vpop.f32.mrb[132].mxu0 }
 0xaf7   :  { %v9000_v21 = vadd.f32 %v13539_v36, %v19728_v51  ;;  %v8685_v43 = vpop.f32.mrb[133].mxu0 }
 0xaf8   :  { %v8998_v62 = vadd.f32 %v19728_v51, %v8685_v43  ;;  %v13540_v47 = vpop.f32.mrb[134].mxu0  ;;  %13605 = vmatprep.mubr.msk.bf16.mxu1 %vm3290_vm6, %v9122_v30 }
 0xaf9   :  { %v9001_v54 = vadd.f32 %v13540_v47, %v19728_v51  ;;  %v8688_v31 = vpop.f32.mrb[135].mxu0  ;;  %13606 = vmatmul.mubr.msk.bf16.vlgmr.msra.gmra.mrb[0].mxu1 %vm3290_vm6, %v9123_v49  ;;  %v9064_v38 = vmax.f32 %v9000_v21, 0.0 }
 0xafa   :  { %v8999_v35 = vadd.f32 %v19728_v51, %v8688_v31  ;;  %v9062_v5 = vmax.f32 %v8998_v62, 0.0 }
 0xafb   :  { %v9065_v63 = vmax.f32 %v9001_v54, 0.0 }
 0xafc   :  { %v9063_v52 = vmax.f32 %v8999_v35, 0.0 }
 0xafd   :  { %v9125_v32 = vpack.c.bf16 %v9065_v63, %v9064_v38 }
 0xafe   :  { %v9124_v61 = vpack.c.bf16 %v9063_v52, %v9062_v5  ;;  %v13543_v50 = vpop.f32.mrb[136].mxu0 }
 0xaff   :  { %v9004_v46 = vadd.f32 %v13543_v50, %v19728_v51  ;;  %v8701_v41 = vpop.f32.mrb[137].mxu0 }
 0xb00   :  { %v9002_v6 = vadd.f32 %v19728_v51, %v8701_v41  ;;  %v13544_v39 = vpop.f32.mrb[138].mxu0  ;;  %13609 = vmatprep.mubr.msk.bf16.mxu1 %vm3290_vm6, %v9124_v61 }
 0xb01   :  { %v9005_v57 = vadd.f32 %v13544_v39, %v19728_v51  ;;  %v8704_v56 = vpop.f32.mrb[139].mxu0  ;;  %13610 = vmatmul.mubr.msk.bf16.gmra.mrb[4].mxu1 %vm3290_vm6, %v9125_v32  ;;  %v9068_v24 = vmax.f32 %v9004_v46, 0.0 }
 0xb02   :  { %v9003_v53 = vadd.f32 %v19728_v51, %v8704_v56  ;;  %v9066_v0 = vmax.f32 %v9002_v6, 0.0 }
 0xb03   :  { %v9069_v13 = vmax.f32 %v9005_v57, 0.0 }
 0xb04   :  { %v9067_v34 = vmax.f32 %v9003_v53, 0.0 }
 0xb05   :  { %v9127_v12 = vpack.c.bf16 %v9069_v13, %v9068_v24 }
 0xb06   :  { %v9126_v1 = vpack.c.bf16 %v9067_v34, %v9066_v0  ;;  %v13547_v37 = vpop.f32.mrb[140].mxu0 }
 0xb07   :  { %v9008_v59 = vadd.f32 %v13547_v37, %v19728_v51  ;;  %v8717_v4 = vpop.f32.mrb[141].mxu0 }
 0xb08   :  { %v9006_v20 = vadd.f32 %v19728_v51, %v8717_v4  ;;  %v13548_v44 = vpop.f32.mrb[142].mxu0  ;;  %13613 = vmatprep.mubr.msk.bf16.mxu1 %vm3290_vm6, %v9126_v1 }
 0xb09   :  { %v9009_v8 = vadd.f32 %v13548_v44, %v19728_v51  ;;  %v8720_v60 = vpop.f32.mrb[143].mxu0  ;;  %13614 = vmatmul.mubr.msk.bf16.gmra.mrb[8].mxu1 %vm3290_vm6, %v9127_v12  ;;  %v9072_v7 = vmax.f32 %v9008_v59, 0.0 }
 0xb0a   :  { %v9007_v42 = vadd.f32 %v19728_v51, %v8720_v60  ;;  %v9070_v25 = vmax.f32 %v9006_v20, 0.0 }
 0xb0b   :  { %v9073_v55 = vmax.f32 %v9009_v8, 0.0 }
 0xb0c   :  { %v9071_v26 = vmax.f32 %v9007_v42, 0.0 }
 0xb0d   :  { %v9129_v17 = vpack.c.bf16 %v9073_v55, %v9072_v7 }
 0xb0e   :  { %v9128_v10 = vpack.c.bf16 %v9071_v26, %v9070_v25  ;;  %v13551_v11 = vpop.f32.mrb[144].mxu0 }
 0xb0f   :  { %v9012_v2 = vadd.f32 %v13551_v11, %v19728_v51  ;;  %v8733_v22 = vpop.f32.mrb[145].mxu0 }
 0xb10   :  { %v9010_v40 = vadd.f32 %v19728_v51, %v8733_v22  ;;  %v13552_v48 = vpop.f32.mrb[146].mxu0  ;;  %13617 = vmatprep.mubr.msk.bf16.mxu1 %vm3290_vm6, %v9128_v10 }
 0xb11   :  { %v9013_v15 = vadd.f32 %v13552_v48, %v19728_v51  ;;  %v8736_v14 = vpop.f32.mrb[147].mxu0  ;;  %13618 = vmatmul.mubr.msk.bf16.gmra.mrb[12].mxu1 %vm3290_vm6, %v9129_v17  ;;  %v9076_v3 = vmax.f32 %v9012_v2, 0.0 }
 0xb12   :  { %v9011_v16 = vadd.f32 %v19728_v51, %v8736_v14  ;;  %v9074_v23 = vmax.f32 %v9010_v40, 0.0 }
 0xb13   :  { %v9077_v19 = vmax.f32 %v9013_v15, 0.0 }
 0xb14   :  { %v9075_v58 = vmax.f32 %v9011_v16, 0.0 }
 0xb15   :  { %v9131_v45 = vpack.c.bf16 %v9077_v19, %v9076_v3 }
 0xb16   :  { %v9130_v9 = vpack.c.bf16 %v9075_v58, %v9074_v23  ;;  %v13555_v28 = vpop.f32.mrb[148].mxu0 }
 0xb17   :  { %v9016_v18 = vadd.f32 %v13555_v28, %v19728_v51  ;;  %v8749_v27 = vpop.f32.mrb[149].mxu0 }
 0xb18   :  { %v9014_v29 = vadd.f32 %v19728_v51, %v8749_v27  ;;  %v13556_v33 = vpop.f32.mrb[150].mxu0  ;;  %13621 = vmatprep.mubr.msk.bf16.mxu1 %vm3290_vm6, %v9130_v9 }
 0xb19   :  { %v9017_v49 = vadd.f32 %v13556_v33, %v19728_v51  ;;  %v8752_v30 = vpop.f32.mrb[151].mxu0  ;;  %13622 = vmatmul.mubr.msk.bf16.gmra.mrb[16].mxu1 %vm3290_vm6, %v9131_v45  ;;  %v9080_v21 = vmax.f32 %v9016_v18, 0.0 }
 0xb1a   :  { %v9015_v36 = vadd.f32 %v19728_v51, %v8752_v30  ;;  %v9078_v62 = vmax.f32 %v9014_v29, 0.0 }
 0xb1b   :  { %v9081_v43 = vmax.f32 %v9017_v49, 0.0 }
 0xb1c   :  { %v9079_v47 = vmax.f32 %v9015_v36, 0.0 }
 0xb1d   :  { %v9133_v54 = vpack.c.bf16 %v9081_v43, %v9080_v21 }
 0xb1e   :  { %v9132_v31 = vpack.c.bf16 %v9079_v47, %v9078_v62  ;;  %v13559_v35 = vpop.f32.mrb[152].mxu0 }
 0xb1f   :  { %v9020_v38 = vadd.f32 %v13559_v35, %v19728_v51  ;;  %v8765_v63 = vpop.f32.mrb[153].mxu0 }
 0xb20   :  { %v9018_v5 = vadd.f32 %v19728_v51, %v8765_v63  ;;  %v13560_v52 = vpop.f32.mrb[154].mxu0  ;;  %13625 = vmatprep.mubr.msk.bf16.mxu1 %vm3290_vm6, %v9132_v31 }
 0xb21   :  { %v9021_v32 = vadd.f32 %v13560_v52, %v19728_v51  ;;  %v8768_v61 = vpop.f32.mrb[155].mxu0  ;;  %13626 = vmatmul.mubr.msk.bf16.gmra.mrb[20].mxu1 %vm3290_vm6, %v9133_v54  ;;  %v9084_v46 = vmax.f32 %v9020_v38, 0.0 }
 0xb22   :  { %v9019_v50 = vadd.f32 %v19728_v51, %v8768_v61  ;;  %v9082_v6 = vmax.f32 %v9018_v5, 0.0 }
 0xb23   :  { %v9085_v41 = vmax.f32 %v9021_v32, 0.0 }
 0xb24   :  { %v9083_v39 = vmax.f32 %v9019_v50, 0.0 }
 0xb25   :  { %v9135_v57 = vpack.c.bf16 %v9085_v41, %v9084_v46 }
 0xb26   :  { %v9134_v56 = vpack.c.bf16 %v9083_v39, %v9082_v6  ;;  %v13563_v53 = vpop.f32.mrb[156].mxu0 }
 0xb27   :  { %v9024_v24 = vadd.f32 %v13563_v53, %v19728_v51  ;;  %v8781_v13 = vpop.f32.mrb[157].mxu0 }
 0xb28   :  { %v9022_v0 = vadd.f32 %v19728_v51, %v8781_v13  ;;  %v13564_v34 = vpop.f32.mrb[158].mxu0  ;;  %13629 = vmatprep.mubr.msk.bf16.mxu1 %vm3290_vm6, %v9134_v56 }
 0xb29   :  { %v9025_v12 = vadd.f32 %v13564_v34, %v19728_v51  ;;  %v8784_v1 = vpop.f32.mrb[159].mxu0  ;;  %13630 = vmatmul.mubr.msk.bf16.gmra.mrb[24].mxu1 %vm3290_vm6, %v9135_v57  ;;  %v9088_v59 = vmax.f32 %v9024_v24, 0.0 }
 0xb2a   :  { %v9023_v37 = vadd.f32 %v19728_v51, %v8784_v1  ;;  %v9086_v20 = vmax.f32 %v9022_v0, 0.0 }
 0xb2b   :  { %v9089_v4 = vmax.f32 %v9025_v12, 0.0 }
 0xb2c   :  { %v9087_v44 = vmax.f32 %v9023_v37, 0.0 }
 0xb2d   :  { %v9137_v8 = vpack.c.bf16 %v9089_v4, %v9088_v59 }
 0xb2e   :  { %v9136_v60 = vpack.c.bf16 %v9087_v44, %v9086_v20  ;;  %v13567_v42 = vpop.f32.mrb[160].mxu0 }
 0xb2f   :  { %v9028_v7 = vadd.f32 %v13567_v42, %v19728_v51  ;;  %v8797_v55 = vpop.f32.mrb[161].mxu0 }
 0xb30   :  { %v9026_v25 = vadd.f32 %v19728_v51, %v8797_v55  ;;  %v13568_v26 = vpop.f32.mrb[162].mxu0  ;;  %13633 = vmatprep.mubr.msk.bf16.mxu1 %vm3290_vm6, %v9136_v60 }
 0xb31   :  { %v9029_v17 = vadd.f32 %v13568_v26, %v19728_v51  ;;  %v8800_v10 = vpop.f32.mrb[163].mxu0  ;;  %13634 = vmatmul.mubr.msk.bf16.gmra.mrb[28].mxu1 %vm3290_vm6, %v9137_v8  ;;  %v9092_v2 = vmax.f32 %v9028_v7, 0.0 }
 0xb32   :  { %v9027_v11 = vadd.f32 %v19728_v51, %v8800_v10  ;;  %v9090_v40 = vmax.f32 %v9026_v25, 0.0  ;;  %v14312_v10 = vmov 0.0|0.0  }
 0xb33   :  { %v9093_v22 = vmax.f32 %v9029_v17, 0.0  ;;  %13669 = vmatprep.subr.bf16.mxu1 %v14312_v10 }
 0xb34   :  { %v9091_v48 = vmax.f32 %v9027_v11, 0.0 }
 0xb35   :  { %v9139_v15 = vpack.c.bf16 %v9093_v22, %v9092_v2 }
 0xb36   :  { %v9138_v14 = vpack.c.bf16 %v9091_v48, %v9090_v40  ;;  %v13571_v16 = vpop.f32.mrb[164].mxu0 }
 0xb37   :  { %v9032_v3 = vadd.f32 %v13571_v16, %v19728_v51  ;;  %v8813_v19 = vpop.f32.mrb[165].mxu0 }
 0xb38   :  { %v9030_v23 = vadd.f32 %v19728_v51, %v8813_v19  ;;  %v13572_v58 = vpop.f32.mrb[166].mxu0  ;;  %13637 = vmatprep.mubr.msk.bf16.mxu1 %vm3290_vm6, %v9138_v14 }
 0xb39   :  { %v9033_v45 = vadd.f32 %v13572_v58, %v19728_v51  ;;  %v8816_v9 = vpop.f32.mrb[167].mxu0  ;;  %13638 = vmatmul.mubr.msk.bf16.gmra.mrb[32].mxu1 %vm3290_vm6, %v9139_v15  ;;  %v9096_v18 = vmax.f32 %v9032_v3, 0.0 }
 0xb3a   :  { %v9031_v28 = vadd.f32 %v19728_v51, %v8816_v9  ;;  %v9094_v29 = vmax.f32 %v9030_v23, 0.0 }
 0xb3b   :  { %v9097_v27 = vmax.f32 %v9033_v45, 0.0 }
 0xb3c   :  { %v9095_v33 = vmax.f32 %v9031_v28, 0.0 }
 0xb3d   :  { %v9141_v49 = vpack.c.bf16 %v9097_v27, %v9096_v18 }
 0xb3e   :  { %v9140_v30 = vpack.c.bf16 %v9095_v33, %v9094_v29  ;;  %v13575_v36 = vpop.f32.mrb[168].mxu0 }
 0xb3f   :  { %v9036_v21 = vadd.f32 %v13575_v36, %v19728_v51  ;;  %v8829_v43 = vpop.f32.mrb[169].mxu0 }
 0xb40   :  { %v9034_v62 = vadd.f32 %v19728_v51, %v8829_v43  ;;  %v13576_v47 = vpop.f32.mrb[170].mxu0  ;;  %13641 = vmatprep.mubr.msk.bf16.mxu1 %vm3290_vm6, %v9140_v30 }
 0xb41   :  { %v9037_v54 = vadd.f32 %v13576_v47, %v19728_v51  ;;  %v8832_v31 = vpop.f32.mrb[171].mxu0  ;;  %13642 = vmatmul.mubr.msk.bf16.gmra.mrb[36].mxu1 %vm3290_vm6, %v9141_v49  ;;  %v9100_v38 = vmax.f32 %v9036_v21, 0.0 }
 0xb42   :  { %v9035_v35 = vadd.f32 %v19728_v51, %v8832_v31  ;;  %v9098_v5 = vmax.f32 %v9034_v62, 0.0 }
 0xb43   :  { %v9101_v63 = vmax.f32 %v9037_v54, 0.0 }
 0xb44   :  { %v9099_v52 = vmax.f32 %v9035_v35, 0.0 }
 0xb45   :  { %v9143_v32 = vpack.c.bf16 %v9101_v63, %v9100_v38 }
 0xb46   :  { %v9142_v61 = vpack.c.bf16 %v9099_v52, %v9098_v5  ;;  %v13579_v50 = vpop.f32.mrb[172].mxu0 }
 0xb47   :  { %v9040_v46 = vadd.f32 %v13579_v50, %v19728_v51  ;;  %v8845_v41 = vpop.f32.mrb[173].mxu0 }
 0xb48   :  { %v9038_v6 = vadd.f32 %v19728_v51, %v8845_v41  ;;  %v13580_v39 = vpop.f32.mrb[174].mxu0  ;;  %13645 = vmatprep.mubr.msk.bf16.mxu1 %vm3290_vm6, %v9142_v61 }
 0xb49   :  { %v9041_v57 = vadd.f32 %v13580_v39, %v19728_v51  ;;  %v8848_v56 = vpop.f32.mrb[175].mxu0  ;;  %13646 = vmatmul.mubr.msk.bf16.gmra.mrb[40].mxu1 %vm3290_vm6, %v9143_v32  ;;  %v9104_v24 = vmax.f32 %v9040_v46, 0.0 }
 0xb4a   :  { %v9039_v53 = vadd.f32 %v19728_v51, %v8848_v56  ;;  %v9102_v0 = vmax.f32 %v9038_v6, 0.0 }
 0xb4b   :  { %v9105_v13 = vmax.f32 %v9041_v57, 0.0 }
 0xb4c   :  { %v9103_v34 = vmax.f32 %v9039_v53, 0.0 }
 0xb4d   :  { %v9145_v12 = vpack.c.bf16 %v9105_v13, %v9104_v24  ;;  %v14313_v24 = vmov 1.0   ;;  %v22454_v13 = vld [vmem:[#allocation102_spill] sm:$0xff] }
 0xb4e   :  { %v9144_v1 = vpack.c.bf16 %v9103_v34, %v9102_v0  ;;  %v13583_v37 = vpop.f32.mrb[176].mxu0  ;;  %v22455_v0 = vld [vmem:[#allocation78_spill] sm:$0xff] }
 0xb4f   :  { %v9044_v59 = vadd.f32 %v13583_v37, %v19728_v51  ;;  %v8861_v4 = vpop.f32.mrb[177].mxu0 }
 0xb50   :  { %v9042_v20 = vadd.f32 %v19728_v51, %v8861_v4  ;;  %v13584_v44 = vpop.f32.mrb[178].mxu0  ;;  %13649 = vmatprep.mubr.msk.bf16.mxu1 %vm3290_vm6, %v9144_v1 }
 0xb51   :  { %v9045_v8 = vadd.f32 %v13584_v44, %v19728_v51  ;;  %v8864_v60 = vpop.f32.mrb[179].mxu0  ;;  %13650 = vmatmul.mubr.msk.bf16.gmra.mrb[44].mxu1 %vm3290_vm6, %v9145_v12  ;;  %v9108_v7 = vmax.f32 %v9044_v59, 0.0 }
 0xb52   :  { %v9043_v42 = vadd.f32 %v19728_v51, %v8864_v60  ;;  %v9106_v25 = vmax.f32 %v9042_v20, 0.0 }
 0xb53   :  { %v9109_v55 = vmax.f32 %v9045_v8, 0.0 }
 0xb54   :  { %v9107_v26 = vmax.f32 %v9043_v42, 0.0 }
 0xb55   :  { %v9147_v17 = vpack.c.bf16 %v9109_v55, %v9108_v7 }
 0xb56   :  { %v9146_v11 = vpack.c.bf16 %v9107_v26, %v9106_v25  ;;  %v13587_v2 = vpop.f32.mrb[180].mxu0 }
 0xb57   :  { %v9048_v22 = vadd.f32 %v13587_v2, %v19728_v51  ;;  %v8877_v40 = vpop.f32.mrb[181].mxu0 }
 0xb58   :  { %v9046_v48 = vadd.f32 %v19728_v51, %v8877_v40  ;;  %v13588_v15 = vpop.f32.mrb[182].mxu0  ;;  %13653 = vmatprep.mubr.msk.bf16.mxu1 %vm3290_vm6, %v9146_v11 }
 0xb59   :  { %v9049_v14 = vadd.f32 %v13588_v15, %v19728_v51  ;;  %v8880_v16 = vpop.f32.mrb[183].mxu0  ;;  %13654 = vmatmul.mubr.msk.bf16.gmra.mrb[48].mxu1 %vm3290_vm6, %v9147_v17  ;;  %v9112_v19 = vmax.f32 %v9048_v22, 0.0 }
 0xb5a   :  { %v9047_v3 = vadd.f32 %v19728_v51, %v8880_v16  ;;  %v9110_v58 = vmax.f32 %v9046_v48, 0.0 }
 0xb5b   :  { %v9113_v23 = vmax.f32 %v9049_v14, 0.0 }
 0xb5c   :  { %v9111_v45 = vmax.f32 %v9047_v3, 0.0 }
 0xb5d   :  { %v9149_v9 = vpack.c.bf16 %v9113_v23, %v9112_v19 }
 0xb5e   :  { %v9148_v28 = vpack.c.bf16 %v9111_v45, %v9110_v58  ;;  %v13591_v18 = vpop.f32.mrb[184].mxu0 }
 0xb5f   :  { %v9052_v27 = vadd.f32 %v13591_v18, %v19728_v51  ;;  %v8893_v29 = vpop.f32.mrb[185].mxu0 }
 0xb60   :  { %v9050_v33 = vadd.f32 %v19728_v51, %v8893_v29  ;;  %v13592_v49 = vpop.f32.mrb[186].mxu0  ;;  %13657 = vmatprep.mubr.msk.bf16.mxu1 %vm3290_vm6, %v9148_v28 }
 0xb61   :  { %v9053_v30 = vadd.f32 %v13592_v49, %v19728_v51  ;;  %v8896_v36 = vpop.f32.mrb[187].mxu0  ;;  %13658 = vmatmul.mubr.msk.bf16.gmra.mrb[52].mxu1 %vm3290_vm6, %v9149_v9  ;;  %v9116_v43 = vmax.f32 %v9052_v27, 0.0 }
 0xb62   :  { %v9051_v21 = vadd.f32 %v19728_v51, %v8896_v36  ;;  %v9114_v47 = vmax.f32 %v9050_v33, 0.0 }
 0xb63   :  { %v9117_v62 = vmax.f32 %v9053_v30, 0.0 }
 0xb64   :  { %v9115_v54 = vmax.f32 %v9051_v21, 0.0 }
 0xb65   :  { %v9151_v31 = vpack.c.bf16 %v9117_v62, %v9116_v43 }
 0xb66   :  { %v9150_v35 = vpack.c.bf16 %v9115_v54, %v9114_v47  ;;  %v13595_v38 = vpop.f32.mrb[188].mxu0 }
 0xb67   :  { %v9056_v63 = vadd.f32 %v13595_v38, %v19728_v51  ;;  %v8909_v5 = vpop.f32.mrb[189].mxu0 }
 0xb68   :  { %v9054_v52 = vadd.f32 %v19728_v51, %v8909_v5  ;;  %v13596_v32 = vpop.f32.mrb[190].mxu0  ;;  %13661 = vmatprep.mubr.msk.bf16.mxu1 %vm3290_vm6, %v9150_v35 }
 0xb69   :  { %v9057_v61 = vadd.f32 %v13596_v32, %v19728_v51  ;;  %v8912_v50 = vpop.f32.mrb[191].mxu0  ;;  %13662 = vmatmul.mubr.msk.bf16.gmra.mrb[56].mxu1 %vm3290_vm6, %v9151_v31  ;;  %v9120_v41 = vmax.f32 %v9056_v63, 0.0 }
 0xb6a   :  { %v9055_v46 = vadd.f32 %v19728_v51, %v8912_v50  ;;  %v9118_v39 = vmax.f32 %v9054_v52, 0.0  ;;  %v19834_v51 = vld [vmem:[%s21178_s19] ss:$0 sm:$0xff] }
 0xb6b   :  { %v9121_v6 = vmax.f32 %v9057_v61, 0.0 }
 0xb6c   :  { %v9119_v57 = vmax.f32 %v9055_v46, 0.0 }
 0xb6d   :  { %v9153_v56 = vpack.c.bf16 %v9121_v6, %v9120_v41 }
 0xb6e   :  { %v9152_v53 = vpack.c.bf16 %v9119_v57, %v9118_v39 }
 0xb70   :  { %13665 = vmatprep.mubr.msk.bf16.mxu1 %vm3290_vm6, %v9152_v53 }
 0xb71   :  { %13666 = vmatmul.mubr.msk.bf16.gmra.mrb[60].mxu1 %vm3290_vm6, %v9153_v56 }
 0xb72   :  { %11967 = vmatprep.mubr.msk.f32.mxu1 %vm2319_vm11, %v14313_v24 }
 0xbcc   :  { %v13607_v34 = vpop.f32.mrb[0].mxu1 }
 0xbcd   :  { %v9332_v12 = vadd.f32 %v13607_v34, %v19834_v51  ;;  %v9323_v1 = vpop.f32.mrb[1].mxu1 }
 0xbce   :  { %v9324_v37 = vadd.f32 %v19834_v51, %v9323_v1  ;;  %v13608_v59 = vpop.f32.mrb[2].mxu1 }
 0xbcf   :  { %v9335_v4 = vadd.f32 %v13608_v59, %v19834_v51  ;;  %v9326_v20 = vpop.f32.mrb[3].mxu1  ;;  %v9580_v8 = vmax.f32 %v9332_v12, 0.0 }
 0xbd0   :  { %v9327_v44 = vadd.f32 %v19834_v51, %v9326_v20  ;;  %v9578_v42 = vmax.f32 %v9324_v37, 0.0 }
 0xbd1   :  { %v9581_v60 = vmax.f32 %v9335_v4, 0.0 }
 0xbd2   :  { %v9579_v7 = vmax.f32 %v9327_v44, 0.0 }
 0xbd3   :  { %v13673_v55 = vpack.c.bf16 %v9581_v60, %v9580_v8 }
 0xbd4   :  { %v13670_v25 = vpack.c.bf16 %v9579_v7, %v9578_v42  ;;  %v13611_v26 = vpop.f32.mrb[4].mxu1 }
 0xbd5   :  { %v9348_v17 = vadd.f32 %v13611_v26, %v19834_v51  ;;  %v9339_v11 = vpop.f32.mrb[5].mxu1 }
 0xbd6   :  { %v9340_v2 = vadd.f32 %v19834_v51, %v9339_v11  ;;  %v13612_v22 = vpop.f32.mrb[6].mxu1  ;;  %13671 = vmatpush1.bf16.msra.mxu1 %v13670_v25 }
 0xbd7   :  { %v9351_v40 = vadd.f32 %v13612_v22, %v19834_v51  ;;  %v9342_v48 = vpop.f32.mrb[7].mxu1  ;;  %13672 = vmatprep.subr.bf16.mxu1 %v14312_v10  ;;  %v9584_v14 = vmax.f32 %v9348_v17, 0.0 }
 0xbd8   :  { %v9343_v15 = vadd.f32 %v19834_v51, %v9342_v48  ;;  %v9582_v3 = vmax.f32 %v9340_v2, 0.0 }
 0xbd9   :  { %v9585_v16 = vmax.f32 %v9351_v40, 0.0 }
 0xbda   :  { %v9583_v19 = vmax.f32 %v9343_v15, 0.0  ;;  %13674 = vmatpush1.bf16.msra.mxu1 %v13673_v55 }
 0xbdb   :  { %v13679_v23 = vpack.c.bf16 %v9585_v16, %v9584_v14  ;;  %13675 = vmatprep.subr.bf16.mxu1 %v14312_v10 }
 0xbdc   :  { %v13676_v58 = vpack.c.bf16 %v9583_v19, %v9582_v3  ;;  %v13615_v45 = vpop.f32.mrb[8].mxu1 }
 0xbdd   :  { %v9364_v9 = vadd.f32 %v13615_v45, %v19834_v51  ;;  %v9355_v28 = vpop.f32.mrb[9].mxu1 }
 0xbde   :  { %v9356_v18 = vadd.f32 %v19834_v51, %v9355_v28  ;;  %v13616_v27 = vpop.f32.mrb[10].mxu1  ;;  %13677 = vmatpush1.bf16.msra.mxu1 %v13676_v58 }
 0xbdf   :  { %v9367_v29 = vadd.f32 %v13616_v27, %v19834_v51  ;;  %v9358_v33 = vpop.f32.mrb[11].mxu1  ;;  %13678 = vmatprep.subr.bf16.mxu1 %v14312_v10  ;;  %v9588_v30 = vmax.f32 %v9364_v9, 0.0 }
 0xbe0   :  { %v9359_v49 = vadd.f32 %v19834_v51, %v9358_v33  ;;  %v9586_v21 = vmax.f32 %v9356_v18, 0.0 }
 0xbe1   :  { %v9589_v36 = vmax.f32 %v9367_v29, 0.0 }
 0xbe2   :  { %v9587_v43 = vmax.f32 %v9359_v49, 0.0  ;;  %13680 = vmatpush1.bf16.msra.mxu1 %v13679_v23 }
 0xbe3   :  { %v13685_v62 = vpack.c.bf16 %v9589_v36, %v9588_v30  ;;  %13681 = vmatprep.subr.bf16.mxu1 %v14312_v10 }
 0xbe4   :  { %v13682_v47 = vpack.c.bf16 %v9587_v43, %v9586_v21  ;;  %v13619_v54 = vpop.f32.mrb[12].mxu1 }
 0xbe5   :  { %v9380_v31 = vadd.f32 %v13619_v54, %v19834_v51  ;;  %v9371_v35 = vpop.f32.mrb[13].mxu1 }
 0xbe6   :  { %v9372_v38 = vadd.f32 %v19834_v51, %v9371_v35  ;;  %v13620_v63 = vpop.f32.mrb[14].mxu1  ;;  %13683 = vmatpush1.bf16.msra.mxu1 %v13682_v47 }
 0xbe7   :  { %v9383_v5 = vadd.f32 %v13620_v63, %v19834_v51  ;;  %v9374_v52 = vpop.f32.mrb[15].mxu1  ;;  %13684 = vmatprep.subr.bf16.mxu1 %v14312_v10  ;;  %v9592_v61 = vmax.f32 %v9380_v31, 0.0 }
 0xbe8   :  { %v9375_v32 = vadd.f32 %v19834_v51, %v9374_v52  ;;  %v9590_v46 = vmax.f32 %v9372_v38, 0.0 }
 0xbe9   :  { %v9593_v50 = vmax.f32 %v9383_v5, 0.0 }
 0xbea   :  { %v9591_v41 = vmax.f32 %v9375_v32, 0.0  ;;  %13686 = vmatpush1.bf16.msra.mxu1 %v13685_v62 }
 0xbeb   :  { %v13691_v6 = vpack.c.bf16 %v9593_v50, %v9592_v61  ;;  %13687 = vmatprep.subr.bf16.mxu1 %v14312_v10 }
 0xbec   :  { %v13688_v39 = vpack.c.bf16 %v9591_v41, %v9590_v46  ;;  %v13623_v57 = vpop.f32.mrb[16].mxu1 }
 0xbed   :  { %v9396_v56 = vadd.f32 %v13623_v57, %v19834_v51  ;;  %v9387_v53 = vpop.f32.mrb[17].mxu1 }
 0xbee   :  { %v9388_v34 = vadd.f32 %v19834_v51, %v9387_v53  ;;  %v13624_v12 = vpop.f32.mrb[18].mxu1  ;;  %13689 = vmatpush1.bf16.msra.mxu1 %v13688_v39 }
 0xbef   :  { %v9399_v1 = vadd.f32 %v13624_v12, %v19834_v51  ;;  %v9390_v37 = vpop.f32.mrb[19].mxu1  ;;  %13690 = vmatprep.subr.bf16.mxu1 %v14312_v10  ;;  %v9596_v4 = vmax.f32 %v9396_v56, 0.0 }
 0xbf0   :  { %v9391_v59 = vadd.f32 %v19834_v51, %v9390_v37  ;;  %v9594_v44 = vmax.f32 %v9388_v34, 0.0 }
 0xbf1   :  { %v9597_v20 = vmax.f32 %v9399_v1, 0.0 }
 0xbf2   :  { %v9595_v8 = vmax.f32 %v9391_v59, 0.0  ;;  %13692 = vmatpush1.bf16.msra.mxu1 %v13691_v6 }
 0xbf3   :  { %v13697_v60 = vpack.c.bf16 %v9597_v20, %v9596_v4  ;;  %13693 = vmatprep.subr.bf16.mxu1 %v14312_v10 }
 0xbf4   :  { %v13694_v42 = vpack.c.bf16 %v9595_v8, %v9594_v44  ;;  %v13627_v7 = vpop.f32.mrb[20].mxu1 }
 0xbf5   :  { %v9412_v55 = vadd.f32 %v13627_v7, %v19834_v51  ;;  %v9403_v25 = vpop.f32.mrb[21].mxu1  ;;  %v22456_v7 = vld [vmem:[#allocation16_spill] sm:$0xff] }
 0xbf6   :  { %v9404_v26 = vadd.f32 %v19834_v51, %v9403_v25  ;;  %v13628_v17 = vpop.f32.mrb[22].mxu1  ;;  %13695 = vmatpush1.bf16.msra.mxu1 %v13694_v42 }
 0xbf7   :  { %v9415_v11 = vadd.f32 %v13628_v17, %v19834_v51  ;;  %v9406_v2 = vpop.f32.mrb[23].mxu1  ;;  %13696 = vmatprep.subr.bf16.mxu1 %v14312_v10  ;;  %v9600_v40 = vmax.f32 %v9412_v55, 0.0 }
 0xbf8   :  { %v9407_v22 = vadd.f32 %v19834_v51, %v9406_v2  ;;  %v9598_v15 = vmax.f32 %v9404_v26, 0.0  ;;  %v22457_v26 = vld [vmem:[#allocation74_spill] sm:$0xff] }
 0xbf9   :  { %v9601_v48 = vmax.f32 %v9415_v11, 0.0 }
 0xbfa   :  { %v9599_v14 = vmax.f32 %v9407_v22, 0.0  ;;  %13698 = vmatpush1.bf16.msra.mxu1 %v13697_v60 }
 0xbfb   :  { %v13703_v16 = vpack.c.bf16 %v9601_v48, %v9600_v40  ;;  %13699 = vmatprep.subr.bf16.mxu1 %v14312_v10 }
 0xbfc   :  { %v13700_v3 = vpack.c.bf16 %v9599_v14, %v9598_v15  ;;  %v13631_v19 = vpop.f32.mrb[24].mxu1  ;;  %v22458_v14 = vld [vmem:[#allocation76_spill] sm:$0xff] }
 0xbfd   :  { %v9428_v23 = vadd.f32 %v13631_v19, %v19834_v51  ;;  %v9419_v58 = vpop.f32.mrb[25].mxu1  ;;  %vm22459_vm6 = vcmp.eq.s32.totalorder %v22456_v7, %v22458_v14 }
 0xbfe   :  { %v9420_v45 = vadd.f32 %v19834_v51, %v9419_v58  ;;  %v13632_v9 = vpop.f32.mrb[26].mxu1  ;;  %13701 = vmatpush1.bf16.msra.mxu1 %v13700_v3 }
 0xbff   :  { %v9431_v28 = vadd.f32 %v13632_v9, %v19834_v51  ;;  %v9422_v18 = vpop.f32.mrb[27].mxu1  ;;  %13702 = vmatprep.subr.bf16.mxu1 %v14312_v10  ;;  %v9604_v29 = vmax.f32 %v9428_v23, 0.0 }
 0xc00   :  { %v9423_v27 = vadd.f32 %v19834_v51, %v9422_v18  ;;  %v9602_v49 = vmax.f32 %v9420_v45, 0.0 }
 0xc01   :  { %v9605_v33 = vmax.f32 %v9431_v28, 0.0  ;;  %v22460_v28 = vld [vmem:[#allocation77_spill] sm:$0xff] }
 0xc02   :  { %v9603_v30 = vmax.f32 %v9423_v27, 0.0  ;;  %13704 = vmatpush1.bf16.msra.mxu1 %v13703_v16  ;;  %vm22461_vm11 = vcmp.eq.s32.totalorder %v22454_v13, %v22460_v28 }
 0xc03   :  { %v13709_v36 = vpack.c.bf16 %v9605_v33, %v9604_v29  ;;  %13705 = vmatprep.subr.bf16.mxu1 %v14312_v10 }
 0xc04   :  { %v13706_v21 = vpack.c.bf16 %v9603_v30, %v9602_v49  ;;  %v13635_v43 = vpop.f32.mrb[28].mxu1 }
 0xc05   :  { %v9444_v62 = vadd.f32 %v13635_v43, %v19834_v51  ;;  %v9435_v47 = vpop.f32.mrb[29].mxu1 }
 0xc06   :  { %v9436_v54 = vadd.f32 %v19834_v51, %v9435_v47  ;;  %v13636_v31 = vpop.f32.mrb[30].mxu1  ;;  %13707 = vmatpush1.bf16.msra.mxu1 %v13706_v21  ;;  %v22463_v21 = vld [vmem:[#allocation82_spill] sm:$0xff] }
 0xc07   :  { %v9447_v35 = vadd.f32 %v13636_v31, %v19834_v51  ;;  %v9438_v38 = vpop.f32.mrb[31].mxu1  ;;  %13708 = vmatprep.subr.bf16.mxu1 %v14312_v10  ;;  %v9608_v5 = vmax.f32 %v9444_v62, 0.0 }
 0xc08   :  { %v9439_v63 = vadd.f32 %v19834_v51, %v9438_v38  ;;  %v9606_v32 = vmax.f32 %v9436_v54, 0.0 }
 0xc09   :  { %v9609_v52 = vmax.f32 %v9447_v35, 0.0 }
 0xc0a   :  { %v9607_v61 = vmax.f32 %v9439_v63, 0.0  ;;  %13710 = vmatpush1.bf16.msra.mxu1 %v13709_v36  ;;  %v22466_v63 = vld [vmem:[#allocation84_spill] sm:$0xff] }
 0xc0b   :  { %v13715_v50 = vpack.c.bf16 %v9609_v52, %v9608_v5  ;;  %13711 = vmatprep.subr.bf16.mxu1 %v14312_v10  ;;  %vm22468_vm7 = vcmp.eq.s32.totalorder %v22456_v7, %v22466_v63 }
 0xc0c   :  { %v13712_v46 = vpack.c.bf16 %v9607_v61, %v9606_v32  ;;  %v13639_v41 = vpop.f32.mrb[32].mxu1 }
 0xc0d   :  { %v9460_v6 = vadd.f32 %v13639_v41, %v19834_v51  ;;  %v9451_v39 = vpop.f32.mrb[33].mxu1 }
 0xc0e   :  { %v9452_v57 = vadd.f32 %v19834_v51, %v9451_v39  ;;  %v13640_v56 = vpop.f32.mrb[34].mxu1  ;;  %13713 = vmatpush1.bf16.msra.mxu1 %v13712_v46 }
 0xc0f   :  { %v9463_v53 = vadd.f32 %v13640_v56, %v19834_v51  ;;  %v9454_v34 = vpop.f32.mrb[35].mxu1  ;;  %13714 = vmatprep.subr.bf16.mxu1 %v14312_v10  ;;  %v9612_v1 = vmax.f32 %v9460_v6, 0.0  ;;  %v22469_v6 = vld [vmem:[#allocation80_spill] sm:$0xff] }
 0xc10   :  { %v9455_v12 = vadd.f32 %v19834_v51, %v9454_v34  ;;  %v9610_v59 = vmax.f32 %v9452_v57, 0.0  ;;  %vm22470_vm9 = vcmp.eq.s32.totalorder %v22454_v13, %v22469_v6  ;;  %vm22471_vm10 = vcmp.eq.s32.totalorder %v22456_v7, %v22469_v6 }
 0xc11   :  { %v9613_v37 = vmax.f32 %v9463_v53, 0.0 }
 0xc12   :  { %v9611_v4 = vmax.f32 %v9455_v12, 0.0  ;;  %13716 = vmatpush1.bf16.msra.mxu1 %v13715_v50 }
 0xc13   :  { %v13721_v20 = vpack.c.bf16 %v9613_v37, %v9612_v1  ;;  %13717 = vmatprep.subr.bf16.mxu1 %v14312_v10  ;;  %v22472_v37 = vld [vmem:[#allocation83_spill] sm:$0xff] }
 0xc14   :  { %v13718_v44 = vpack.c.bf16 %v9611_v4, %v9610_v59  ;;  %v13643_v8 = vpop.f32.mrb[36].mxu1  ;;  %vm22473_vm13 = vcmp.eq.s32.totalorder %v22454_v13, %v22472_v37  ;;  %vm22474_vm4 = vcmp.eq.s32.totalorder %v22456_v7, %v22472_v37 }
 0xc15   :  { %v9476_v60 = vadd.f32 %v13643_v8, %v19834_v51  ;;  %v9467_v42 = vpop.f32.mrb[37].mxu1  ;;  %11968 = vmatmul.mubr.msk.f32.vlgmr.msra.gmra.mrb[64].mxu1 %vm2318_vm14, %v14313_v24  ;;  %vm22464_vm14 = vcmp.eq.s32.totalorder %v22454_v13, %v22463_v21 }
 0xc16   :  { %v9468_v55 = vadd.f32 %v19834_v51, %v9467_v42  ;;  %v13644_v25 = vpop.f32.mrb[38].mxu1  ;;  %11969 = vmatprep.mubr.msk.f32.mxu1 %vm2323_vm12, %v14313_v24  ;;  %13719 = vmatpush1.bf16.msra.mxu1 %v13718_v44  ;;  %vm22462_vm12 = vcmp.eq.s32.totalorder %v22456_v7, %v22460_v28 }
 0xc17   :  { %v9479_v17 = vadd.f32 %v13644_v25, %v19834_v51  ;;  %v9470_v11 = vpop.f32.mrb[39].mxu1  ;;  %13720 = vmatprep.subr.bf16.mxu1 %v14312_v10  ;;  %v9616_v22 = vmax.f32 %v9476_v60, 0.0 }
 0xc18   :  { %v9471_v2 = vadd.f32 %v19834_v51, %v9470_v11  ;;  %v9614_v48 = vmax.f32 %v9468_v55, 0.0  ;;  %v22475_v55 = vld [vmem:[#allocation88_spill] sm:$0xff] }
 0xc19   :  { %v9617_v40 = vmax.f32 %v9479_v17, 0.0  ;;  %11970 = vmatmul.mubr.msk.f32.gmra.mrb[66].mxu1 %vm2322_vm15, %v14313_v24  ;;  %vm22465_vm15 = vcmp.eq.s32.totalorder %v22456_v7, %v22463_v21  ;;  %vm22476_vm5 = vcmp.eq.s32.totalorder %v22454_v13, %v22475_v55  ;;  %vm22477_vm8 = vcmp.eq.s32.totalorder %v22456_v7, %v22475_v55 }
 0xc1a   :  { %v9615_v15 = vmax.f32 %v9471_v2, 0.0  ;;  %11971 = vmatprep.mubr.msk.f32.mxu1 %vm2327_vm2, %v14313_v24  ;;  %13722 = vmatpush1.bf16.msra.mxu1 %v13721_v20  ;;  %vm22467_vm2 = vcmp.eq.s32.totalorder %v22454_v13, %v22466_v63 }
 0xc1b   :  { %v13727_v16 = vpack.c.bf16 %v9617_v40, %v9616_v22  ;;  %13723 = vmatprep.subr.bf16.mxu1 %v14312_v10 }
 0xc1c   :  { %v13724_v3 = vpack.c.bf16 %v9615_v15, %v9614_v48  ;;  %v13647_v19 = vpop.f32.mrb[40].mxu1  ;;  %v22478_v15 = vld [vmem:[#allocation90_spill] sm:$0xff] }
 0xc1d   :  { %v9492_v23 = vadd.f32 %v13647_v19, %v19834_v51  ;;  %v9483_v58 = vpop.f32.mrb[41].mxu1  ;;  %11972 = vmatmul.mubr.msk.f32.gmra.mrb[68].mxu1 %vm22459_vm6, %v14313_v24  ;;  %vm22479_vm3 = vcmp.eq.s32.totalorder %v22454_v13, %v22478_v15  ;;  %vm22480_vm6 = vcmp.eq.s32.totalorder %v22456_v7, %v22478_v15 }
 0xc1e   :  { %v9484_v45 = vadd.f32 %v19834_v51, %v9483_v58  ;;  %v13648_v9 = vpop.f32.mrb[42].mxu1  ;;  %11973 = vmatprep.mubr.msk.f32.mxu1 %vm22461_vm11, %v14313_v24  ;;  %13725 = vmatpush1.bf16.msra.mxu1 %v13724_v3 }
 0xc1f   :  { %v9495_v18 = vadd.f32 %v13648_v9, %v19834_v51  ;;  %v9486_v27 = vpop.f32.mrb[43].mxu1  ;;  %13726 = vmatprep.subr.bf16.mxu1 %v14312_v10  ;;  %v9620_v33 = vmax.f32 %v9492_v23, 0.0 }
 0xc20   :  { %v9487_v29 = vadd.f32 %v19834_v51, %v9486_v27  ;;  %v9618_v30 = vmax.f32 %v9484_v45, 0.0 }
 0xc21   :  { %v9621_v49 = vmax.f32 %v9495_v18, 0.0  ;;  %11974 = vmatmul.mubr.msk.f32.gmra.mrb[70].mxu1 %vm22462_vm12, %v14313_v24  ;;  %v22481_v18 = vld [vmem:[#allocation86_spill] sm:$0xff] }
 0xc22   :  { %v9619_v36 = vmax.f32 %v9487_v29, 0.0  ;;  %11975 = vmatprep.mubr.msk.f32.mxu1 %vm22464_vm14, %v14313_v24  ;;  %13728 = vmatpush1.bf16.msra.mxu1 %v13727_v16  ;;  %vm22482_vm11 = vcmp.eq.s32.totalorder %v22454_v13, %v22481_v18  ;;  %vm22483_vm12 = vcmp.eq.s32.totalorder %v22456_v7, %v22481_v18 }
 0xc23   :  { %v13733_v43 = vpack.c.bf16 %v9621_v49, %v9620_v33  ;;  %13729 = vmatprep.subr.bf16.mxu1 %v14312_v10 }
 0xc24   :  { %v13730_v62 = vpack.c.bf16 %v9619_v36, %v9618_v30  ;;  %v13651_v47 = vpop.f32.mrb[44].mxu1 }
 0xc25   :  { %v9508_v54 = vadd.f32 %v13651_v47, %v19834_v51  ;;  %v9499_v31 = vpop.f32.mrb[45].mxu1  ;;  %11976 = vmatmul.mubr.msk.f32.gmra.mrb[72].mxu1 %vm22465_vm15, %v14313_v24 }
 0xc26   :  { %v9500_v35 = vadd.f32 %v19834_v51, %v9499_v31  ;;  %v13652_v38 = vpop.f32.mrb[46].mxu1  ;;  %11977 = vmatprep.mubr.msk.f32.mxu1 %vm22467_vm2, %v14313_v24  ;;  %13731 = vmatpush1.bf16.msra.mxu1 %v13730_v62  ;;  %v22484_v62 = vld [vmem:[#allocation89_spill] sm:$0xff] }
 0xc27   :  { %v9511_v5 = vadd.f32 %v13652_v38, %v19834_v51  ;;  %v9502_v52 = vpop.f32.mrb[47].mxu1  ;;  %13732 = vmatprep.subr.bf16.mxu1 %v14312_v10  ;;  %v9624_v61 = vmax.f32 %v9508_v54, 0.0  ;;  %vm22485_vm14 = vcmp.eq.s32.totalorder %v22454_v13, %v22484_v62  ;;  %vm22486_vm15 = vcmp.eq.s32.totalorder %v22456_v7, %v22484_v62 }
 0xc28   :  { %v9503_v32 = vadd.f32 %v19834_v51, %v9502_v52  ;;  %v9622_v46 = vmax.f32 %v9500_v35, 0.0 }
 0xc29   :  { %v9625_v50 = vmax.f32 %v9511_v5, 0.0  ;;  %11978 = vmatmul.mubr.msk.f32.gmra.mrb[74].mxu1 %vm22468_vm7, %v14313_v24 }
 0xc2a   :  { %v9623_v41 = vmax.f32 %v9503_v32, 0.0  ;;  %11979 = vmatprep.mubr.msk.f32.mxu1 %vm22470_vm9, %v14313_v24  ;;  %13734 = vmatpush1.bf16.msra.mxu1 %v13733_v43  ;;  %v22487_v32 = vld [vmem:[#allocation94_spill] sm:$0xff] }
 0xc2b   :  { %v13739_v39 = vpack.c.bf16 %v9625_v50, %v9624_v61  ;;  %13735 = vmatprep.subr.bf16.mxu1 %v14312_v10  ;;  %vm22488_vm2 = vcmp.eq.s32.totalorder %v22454_v13, %v22487_v32  ;;  %vm22489_vm7 = vcmp.eq.s32.totalorder %v22456_v7, %v22487_v32 }
 0xc2c   :  { %v13736_v57 = vpack.c.bf16 %v9623_v41, %v9622_v46  ;;  %v13655_v56 = vpop.f32.mrb[48].mxu1 }
 0xc2d   :  { %v9524_v53 = vadd.f32 %v13655_v56, %v19834_v51  ;;  %v9515_v34 = vpop.f32.mrb[49].mxu1  ;;  %11980 = vmatmul.mubr.msk.f32.gmra.mrb[76].mxu1 %vm22471_vm10, %v14313_v24 }
 0xc2e   :  { %v9516_v12 = vadd.f32 %v19834_v51, %v9515_v34  ;;  %v13656_v1 = vpop.f32.mrb[50].mxu1  ;;  %11981 = vmatprep.mubr.msk.f32.mxu1 %vm22473_vm13, %v14313_v24  ;;  %13737 = vmatpush1.bf16.msra.mxu1 %v13736_v57 }
 0xc2f   :  { %v9527_v59 = vadd.f32 %v13656_v1, %v19834_v51  ;;  %v9518_v4 = vpop.f32.mrb[51].mxu1  ;;  %13738 = vmatprep.subr.bf16.mxu1 %v14312_v10  ;;  %v9628_v44 = vmax.f32 %v9524_v53, 0.0  ;;  %v22490_v53 = vld [vmem:[#allocation96_spill] sm:$0xff] }
 0xc30   :  { %v9519_v20 = vadd.f32 %v19834_v51, %v9518_v4  ;;  %v9626_v60 = vmax.f32 %v9516_v12, 0.0  ;;  %vm22491_vm9 = vcmp.eq.s32.totalorder %v22454_v13, %v22490_v53  ;;  %vm22492_vm10 = vcmp.eq.s32.totalorder %v22456_v7, %v22490_v53 }
 0xc31   :  { %v9629_v8 = vmax.f32 %v9527_v59, 0.0  ;;  %11982 = vmatmul.mubr.msk.f32.gmra.mrb[78].mxu1 %vm22474_vm4, %v14313_v24 }
 0xc32   :  { %v9627_v42 = vmax.f32 %v9519_v20, 0.0  ;;  %11983 = vmatprep.mubr.msk.f32.mxu1 %vm22476_vm5, %v14313_v24  ;;  %13740 = vmatpush1.bf16.msra.mxu1 %v13739_v39 }
 0xc33   :  { %v13745_v25 = vpack.c.bf16 %v9629_v8, %v9628_v44  ;;  %13741 = vmatprep.subr.bf16.mxu1 %v14312_v10  ;;  %v22493_v8 = vld [vmem:[#allocation92_spill] sm:$0xff] }
 0xc34   :  { %v13742_v17 = vpack.c.bf16 %v9627_v42, %v9626_v60  ;;  %v13659_v11 = vpop.f32.mrb[52].mxu1  ;;  %vm22494_vm13 = vcmp.eq.s32.totalorder %v22454_v13, %v22493_v8  ;;  %vm22495_vm4 = vcmp.eq.s32.totalorder %v22456_v7, %v22493_v8 }
 0xc35   :  { %v9540_v2 = vadd.f32 %v13659_v11, %v19834_v51  ;;  %v9531_v22 = vpop.f32.mrb[53].mxu1  ;;  %11984 = vmatmul.mubr.msk.f32.gmra.mrb[80].mxu1 %vm22477_vm8, %v14313_v24  ;;  %v22508_v11 = vld [vmem:[#allocation81_spill] sm:$0xff] }
 0xc36   :  { %v9532_v40 = vadd.f32 %v19834_v51, %v9531_v22  ;;  %v13660_v48 = vpop.f32.mrb[54].mxu1  ;;  %11985 = vmatprep.mubr.msk.f32.mxu1 %vm22479_vm3, %v14313_v24  ;;  %13743 = vmatpush1.bf16.msra.mxu1 %v13742_v17  ;;  %v22502_v17 = vld [vmem:[#allocation75_spill] sm:$0xff] }
 0xc37   :  { %v9543_v16 = vadd.f32 %v13660_v48, %v19834_v51  ;;  %v9534_v3 = vpop.f32.mrb[55].mxu1  ;;  %13744 = vmatprep.subr.bf16.mxu1 %v14312_v10  ;;  %v9632_v23 = vmax.f32 %v9540_v2, 0.0  ;;  %v22511_v2 = vld [vmem:[#allocation85_spill] sm:$0xff]  ;;  %v22514_v22 = vld [vmem:[#allocation87_spill] sm:$0xff] }
 0xc38   :  { %v9535_v19 = vadd.f32 %v19834_v51, %v9534_v3  ;;  %v9630_v45 = vmax.f32 %v9532_v40, 0.0  ;;  %v22517_v40 = vld [vmem:[#allocation91_spill] sm:$0xff]  ;;  %v22520_v48 = vld [vmem:[#allocation93_spill] sm:$0xff] }
 0xc39   :  { %v9633_v58 = vmax.f32 %v9543_v16, 0.0  ;;  %11986 = vmatmul.mubr.msk.f32.gmra.mrb[82].mxu1 %vm22480_vm6, %v14313_v24  ;;  %v22523_v16 = vld [vmem:[#allocation99_spill] sm:$0xff]  ;;  %v22526_v3 = vld [vmem:[#allocation97_spill] sm:$0xff] }
 0xc3a   :  { %v9631_v9 = vmax.f32 %v9535_v19, 0.0  ;;  %11987 = vmatprep.mubr.msk.f32.mxu1 %vm22482_vm11, %v14313_v24  ;;  %13746 = vmatpush1.bf16.msra.mxu1 %v13745_v25  ;;  %v22499_v25 = vld [vmem:[#allocation73_spill] sm:$0xff]  ;;  %vm22503_vm11 = vcmp.eq.s32.totalorder %v22454_v13, %v22502_v17 }
 0xc3b   :  { %v13751_v27 = vpack.c.bf16 %v9633_v58, %v9632_v23  ;;  %13747 = vmatprep.subr.bf16.mxu1 %v14312_v10  ;;  %vm22500_vm3 = vcmp.eq.s32.totalorder %v22454_v13, %v22499_v25  ;;  %vm22501_vm6 = vcmp.eq.s32.totalorder %v22456_v7, %v22499_v25  ;;  %v22529_v19 = vld [vmem:[#allocation101_spill] sm:$0xff]  ;;  %v22532_v23 = vld [vmem:[#allocation98_spill] sm:$0xff]  ;;  %v22535_v58 = vld [vmem:[#allocation103_spill] sm:$0xff] }
 0xc3c   :  { %v13748_v29 = vpack.c.bf16 %v9631_v9, %v9630_v45  ;;  %v13663_v33 = vpop.f32.mrb[56].mxu1  ;;  %v22538_v45 = vld [vmem:[#allocation100_spill] sm:$0xff]  ;;  %v22541_v9 = vld [vmem:[#allocation130_spill] sm:$0xff] }
 0xc3d   :  { %v9556_v49 = vadd.f32 %v13663_v33, %v19834_v51  ;;  %v9547_v30 = vpop.f32.mrb[57].mxu1  ;;  %11988 = vmatmul.mubr.msk.f32.gmra.mrb[84].mxu1 %vm22483_vm12, %v14313_v24  ;;  %vm22504_vm12 = vcmp.eq.s32.totalorder %v22456_v7, %v22502_v17  ;;  %v22550_v33 = vld [vmem:[#allocation131_spill] sm:$0xff] }
 0xc3e   :  { %v9548_v36 = vadd.f32 %v19834_v51, %v9547_v30  ;;  %v13664_v43 = vpop.f32.mrb[58].mxu1  ;;  %11989 = vmatprep.mubr.msk.f32.mxu1 %vm22485_vm14, %v14313_v24  ;;  %13749 = vmatpush1.bf16.msra.mxu1 %v13748_v29  ;;  %v22547_v29 = vld [vmem:[#allocation132_spill] sm:$0xff]  ;;  %v22556_v30 = vld [vmem:[#allocation133_spill] sm:$0xff] }
 0xc3f   :  { %v9559_v47 = vadd.f32 %v13664_v43, %v19834_v51  ;;  %v9550_v54 = vpop.f32.mrb[59].mxu1  ;;  %13750 = vmatprep.subr.bf16.mxu1 %v14312_v10  ;;  %v9636_v35 = vmax.f32 %v9556_v49, 0.0  ;;  %v22553_v49 = vld [vmem:[#allocation134_spill] sm:$0xff]  ;;  %v22562_v43 = vld [vmem:[#allocation135_spill] sm:$0xff] }
 0xc40   :  { %v9551_v31 = vadd.f32 %v19834_v51, %v9550_v54  ;;  %v9634_v5 = vmax.f32 %v9548_v36, 0.0  ;;  %v22559_v36 = vld [vmem:[#allocation136_spill] sm:$0xff]  ;;  %v22568_v54 = vld [vmem:[#allocation137_spill] sm:$0xff] }
 0xc41   :  { %v9637_v38 = vmax.f32 %v9559_v47, 0.0  ;;  %11990 = vmatmul.mubr.msk.f32.gmra.mrb[86].mxu1 %vm22486_vm15, %v14313_v24  ;;  %v22565_v47 = vld [vmem:[#allocation138_spill] sm:$0xff] }
 0xc42   :  { %v9635_v52 = vmax.f32 %v9551_v31, 0.0  ;;  %11991 = vmatprep.mubr.msk.f32.mxu1 %vm22488_vm2, %v14313_v24  ;;  %13752 = vmatpush1.bf16.msra.mxu1 %v13751_v27  ;;  %vm22509_vm2 = vcmp.eq.s32.totalorder %v22454_v13, %v22508_v11  ;;  %v22544_v27 = vld [vmem:[#allocation129_spill] sm:$0xff]  ;;  %v22571_v31 = vld [vmem:[#allocation140_spill] sm:$0xff] }
 0xc43   :  { %v13757_v61 = vpack.c.bf16 %v9637_v38, %v9636_v35  ;;  %13753 = vmatprep.subr.bf16.mxu1 %v14312_v10  ;;  %v22574_v35 = vld [vmem:[#allocation139_spill] sm:$0xff]  ;;  %v22577_v38 = vld [vmem:[#allocation142_spill] sm:$0xff] }
 0xc44   :  { %v13754_v50 = vpack.c.bf16 %v9635_v52, %v9634_v5  ;;  %v13667_v46 = vpop.f32.mrb[60].mxu1  ;;  %v22580_v5 = vld [vmem:[#allocation141_spill] sm:$0xff]  ;;  %v22583_v52 = vld [vmem:[#allocation144_spill] sm:$0xff] }
 0xc45   :  { %v9572_v41 = vadd.f32 %v13667_v46, %v19834_v51  ;;  %v9563_v39 = vpop.f32.mrb[61].mxu1  ;;  %11992 = vmatmul.mubr.msk.f32.gmra.mrb[88].mxu1 %vm22489_vm7, %v14313_v24  ;;  %vm22510_vm7 = vcmp.eq.s32.totalorder %v22456_v7, %v22508_v11  ;;  %v22592_v46 = vld [vmem:[#allocation145_spill] sm:$0xff] }
 0xc46   :  { %v9564_v57 = vadd.f32 %v19834_v51, %v9563_v39  ;;  %v13668_v56 = vpop.f32.mrb[62].mxu1  ;;  %11993 = vmatprep.mubr.msk.f32.mxu1 %vm22491_vm9, %v14313_v24  ;;  %13755 = vmatpush1.bf16.msra.mxu1 %v13754_v50  ;;  %vm22512_vm9 = vcmp.eq.s32.totalorder %v22454_v13, %v22511_v2  ;;  %v22589_v50 = vld [vmem:[#allocation146_spill] sm:$0xff]  ;;  %v22598_v39 = vld [vmem:[#allocation147_spill] sm:$0xff] }
 0xc47   :  { %v9575_v34 = vadd.f32 %v13668_v56, %v19834_v51  ;;  %v9566_v12 = vpop.f32.mrb[63].mxu1  ;;  %13756 = vmatprep.subr.bf16.mxu1 %v14312_v10  ;;  %v9640_v59 = vmax.f32 %v9572_v41, 0.0  ;;  %v22595_v41 = vld [vmem:[#allocation148_spill] sm:$0xff]  ;;  %v22604_v56 = vld [vmem:[#allocation149_spill] sm:$0xff] }
 0xc48   :  { %v9567_v1 = vadd.f32 %v19834_v51, %v9566_v12  ;;  %v9638_v20 = vmax.f32 %v9564_v57, 0.0  ;;  %v22496_v51 = vld [vmem:[#allocation95_spill] sm:$0xff]  ;;  %v22601_v57 = vld [vmem:[#allocation150_spill] sm:$0xff] }
 0xc49   :  { %v9641_v4 = vmax.f32 %v9575_v34, 0.0  ;;  %11994 = vmatmul.mubr.msk.f32.gmra.mrb[90].mxu1 %vm22492_vm10, %v14313_v24  ;;  %vm22497_vm5 = vcmp.eq.s32.totalorder %v22454_v13, %v22496_v51  ;;  %vm22498_vm8 = vcmp.eq.s32.totalorder %v22456_v7, %v22496_v51  ;;  %vm22513_vm10 = vcmp.eq.s32.totalorder %v22456_v7, %v22511_v2  ;;  %v22607_v34 = vld [vmem:[#allocation152_spill] sm:$0xff]  ;;  %v22610_v12 = vld [vmem:[#allocation151_spill] sm:$0xff] }
 0xc4a   :  { %v9639_v44 = vmax.f32 %v9567_v1, 0.0  ;;  %11995 = vmatprep.mubr.msk.f32.mxu1 %vm22494_vm13, %v14313_v24  ;;  %13758 = vmatpush1.bf16.msra.mxu1 %v13757_v61  ;;  %vm22515_vm13 = vcmp.eq.s32.totalorder %v22454_v13, %v22514_v22  ;;  %v22586_v61 = vld [vmem:[#allocation143_spill] sm:$0xff]  ;;  %v22613_v1 = vld [vmem:[#allocation154_spill] sm:$0xff] }
 0xc4b   :  { %v13763_v60 = vpack.c.bf16 %v9641_v4, %v9640_v59  ;;  %13759 = vmatprep.subr.bf16.mxu1 %v14312_v10  ;;  %v22616_v59 = vld [vmem:[#allocation153_spill] sm:$0xff]  ;;  %v22619_v4 = vld [vmem:[#allocation156_spill] sm:$0xff] }
 0xc4c   :  { %v13760_v42 = vpack.c.bf16 %v9639_v44, %v9638_v20  ;;  %v22622_v20 = vld [vmem:[#allocation155_spill] sm:$0xff]  ;;  %v22625_v44 = vld [vmem:[#allocation158_spill] sm:$0xff] }
 0xc4d   :  { %11996 = vmatmul.mubr.msk.f32.gmra.mrb[92].mxu1 %vm22495_vm4, %v14313_v24  ;;  %vm22516_vm4 = vcmp.eq.s32.totalorder %v22456_v7, %v22514_v22 }
 0xc4e   :  { %11997 = vmatprep.mubr.msk.f32.mxu1 %vm22497_vm5, %v14313_v24  ;;  %13761 = vmatpush1.bf16.msra.mxu1 %v13760_v42  ;;  %vm22518_vm5 = vcmp.eq.s32.totalorder %v22454_v13, %v22517_v40  ;;  %v22631_v42 = vld [vmem:[#allocation160_spill] sm:$0xff] }
 0xc4f   :  { %13762 = vmatprep.subr.bf16.mxu1 %v14312_v10  ;;  %v22505_v10 = vld [vmem:[#allocation79_spill] sm:$0xff] }
 0xc50   :  { %vm22506_vm14 = vcmp.eq.s32.totalorder %v22454_v13, %v22505_v10  ;;  %vm22507_vm15 = vcmp.eq.s32.totalorder %v22456_v7, %v22505_v10 }
 0xc51   :  { %11998 = vmatmul.mubr.msk.f32.gmra.mrb[94].mxu1 %vm22498_vm8, %v14313_v24  ;;  %vm22519_vm8 = vcmp.eq.s32.totalorder %v22456_v7, %v22517_v40 }
 0xc52   :  { %11999 = vmatprep.mubr.msk.f32.mxu1 %vm22500_vm3, %v14313_v24  ;;  %13764 = vmatpush1.bf16.msra.mxu1 %v13763_v60  ;;  %vm22521_vm3 = vcmp.eq.s32.totalorder %v22454_v13, %v22520_v48  ;;  %v22628_v60 = vld [vmem:[#allocation157_spill] sm:$0xff] }
 0xc55   :  { %12000 = vmatmul.mubr.msk.f32.gmra.mrb[96].mxu1 %vm22501_vm6, %v14313_v24  ;;  %vm22522_vm6 = vcmp.eq.s32.totalorder %v22456_v7, %v22520_v48 }
 0xc56   :  { %12001 = vmatprep.mubr.msk.f32.mxu1 %vm22503_vm11, %v14313_v24  ;;  %vm22524_vm11 = vcmp.eq.s32.totalorder %v22454_v13, %v22523_v16 }
 0xc59   :  { %12002 = vmatmul.mubr.msk.f32.gmra.mrb[98].mxu1 %vm22504_vm12, %v14313_v24  ;;  %vm22525_vm12 = vcmp.eq.s32.totalorder %v22456_v7, %v22523_v16 }
 0xc5a   :  { %12003 = vmatprep.mubr.msk.f32.mxu1 %vm22506_vm14, %v14313_v24  ;;  %vm22527_vm14 = vcmp.eq.s32.totalorder %v22454_v13, %v22526_v3 }
 0xc5d   :  { %12004 = vmatmul.mubr.msk.f32.gmra.mrb[100].mxu1 %vm22507_vm15, %v14313_v24  ;;  %vm22528_vm15 = vcmp.eq.s32.totalorder %v22456_v7, %v22526_v3 }
 0xc5e   :  { %12005 = vmatprep.mubr.msk.f32.mxu1 %vm22509_vm2, %v14313_v24  ;;  %vm22530_vm2 = vcmp.eq.s32.totalorder %v22454_v13, %v22529_v19 }
 0xc61   :  { %12006 = vmatmul.mubr.msk.f32.gmra.mrb[102].mxu1 %vm22510_vm7, %v14313_v24  ;;  %vm22531_vm7 = vcmp.eq.s32.totalorder %v22456_v7, %v22529_v19 }
 0xc62   :  { %12007 = vmatprep.mubr.msk.f32.mxu1 %vm22512_vm9, %v14313_v24  ;;  %vm22533_vm9 = vcmp.eq.s32.totalorder %v22454_v13, %v22532_v23 }
 0xc65   :  { %12008 = vmatmul.mubr.msk.f32.gmra.mrb[104].mxu1 %vm22513_vm10, %v14313_v24  ;;  %vm22534_vm10 = vcmp.eq.s32.totalorder %v22456_v7, %v22532_v23 }
 0xc66   :  { %12009 = vmatprep.mubr.msk.f32.mxu1 %vm22515_vm13, %v14313_v24  ;;  %vm22536_vm13 = vcmp.eq.s32.totalorder %v22454_v13, %v22535_v58 }
 0xc69   :  { %12010 = vmatmul.mubr.msk.f32.gmra.mrb[106].mxu1 %vm22516_vm4, %v14313_v24  ;;  %vm22537_vm4 = vcmp.eq.s32.totalorder %v22456_v7, %v22535_v58 }
 0xc6a   :  { %12011 = vmatprep.mubr.msk.f32.mxu1 %vm22518_vm5, %v14313_v24  ;;  %vm22539_vm5 = vcmp.eq.s32.totalorder %v22454_v13, %v22538_v45 }
 0xc6d   :  { %12012 = vmatmul.mubr.msk.f32.gmra.mrb[108].mxu1 %vm22519_vm8, %v14313_v24  ;;  %vm22540_vm8 = vcmp.eq.s32.totalorder %v22456_v7, %v22538_v45 }
 0xc6e   :  { %12013 = vmatprep.mubr.msk.f32.mxu1 %vm22521_vm3, %v14313_v24  ;;  %vm22542_vm3 = vcmp.eq.s32.totalorder %v22454_v13, %v22541_v9 }
 0xc71   :  { %12014 = vmatmul.mubr.msk.f32.gmra.mrb[110].mxu1 %vm22522_vm6, %v14313_v24  ;;  %vm22543_vm6 = vcmp.eq.s32.totalorder %v22456_v7, %v22541_v9 }
 0xc72   :  { %12015 = vmatprep.mubr.msk.f32.mxu1 %vm22524_vm11, %v14313_v24  ;;  %vm22545_vm11 = vcmp.eq.s32.totalorder %v22454_v13, %v22544_v27 }
 0xc75   :  { %12016 = vmatmul.mubr.msk.f32.gmra.mrb[112].mxu1 %vm22525_vm12, %v14313_v24  ;;  %vm22546_vm12 = vcmp.eq.s32.totalorder %v22456_v7, %v22544_v27 }
 0xc76   :  { %12017 = vmatprep.mubr.msk.f32.mxu1 %vm22527_vm14, %v14313_v24  ;;  %vm22548_vm14 = vcmp.eq.s32.totalorder %v22454_v13, %v22547_v29 }
 0xc79   :  { %12018 = vmatmul.mubr.msk.f32.gmra.mrb[114].mxu1 %vm22528_vm15, %v14313_v24  ;;  %vm22549_vm15 = vcmp.eq.s32.totalorder %v22456_v7, %v22547_v29 }
 0xc7a   :  { %12019 = vmatprep.mubr.msk.f32.mxu1 %vm22530_vm2, %v14313_v24  ;;  %vm22551_vm2 = vcmp.eq.s32.totalorder %v22454_v13, %v22550_v33 }
 0xc7d   :  { %12020 = vmatmul.mubr.msk.f32.gmra.mrb[116].mxu1 %vm22531_vm7, %v14313_v24  ;;  %vm22552_vm7 = vcmp.eq.s32.totalorder %v22456_v7, %v22550_v33 }
 0xc7e   :  { %12021 = vmatprep.mubr.msk.f32.mxu1 %vm22533_vm9, %v14313_v24  ;;  %vm22554_vm9 = vcmp.eq.s32.totalorder %v22454_v13, %v22553_v49 }
 0xc81   :  { %12022 = vmatmul.mubr.msk.f32.gmra.mrb[118].mxu1 %vm22534_vm10, %v14313_v24  ;;  %vm22555_vm10 = vcmp.eq.s32.totalorder %v22456_v7, %v22553_v49 }
 0xc82   :  { %12023 = vmatprep.mubr.msk.f32.mxu1 %vm22536_vm13, %v14313_v24  ;;  %vm22557_vm13 = vcmp.eq.s32.totalorder %v22454_v13, %v22556_v30 }
 0xc85   :  { %12024 = vmatmul.mubr.msk.f32.gmra.mrb[120].mxu1 %vm22537_vm4, %v14313_v24  ;;  %vm22558_vm4 = vcmp.eq.s32.totalorder %v22456_v7, %v22556_v30 }
 0xc86   :  { %12025 = vmatprep.mubr.msk.f32.mxu1 %vm22539_vm5, %v14313_v24  ;;  %vm22560_vm5 = vcmp.eq.s32.totalorder %v22454_v13, %v22559_v36 }
 0xc89   :  { %12026 = vmatmul.mubr.msk.f32.gmra.mrb[122].mxu1 %vm22540_vm8, %v14313_v24  ;;  %vm22561_vm8 = vcmp.eq.s32.totalorder %v22456_v7, %v22559_v36 }
 0xc8a   :  { %12027 = vmatprep.mubr.msk.f32.mxu1 %vm22542_vm3, %v14313_v24  ;;  %vm22563_vm3 = vcmp.eq.s32.totalorder %v22454_v13, %v22562_v43 }
 0xc8d   :  { %12028 = vmatmul.mubr.msk.f32.gmra.mrb[124].mxu1 %vm22543_vm6, %v14313_v24  ;;  %vm22564_vm6 = vcmp.eq.s32.totalorder %v22456_v7, %v22562_v43 }
 0xc8e   :  { %12029 = vmatprep.mubr.msk.f32.mxu1 %vm22545_vm11, %v14313_v24  ;;  %vm22566_vm11 = vcmp.eq.s32.totalorder %v22454_v13, %v22565_v47 }
 0xc91   :  { %12030 = vmatmul.mubr.msk.f32.gmra.mrb[126].mxu1 %vm22546_vm12, %v14313_v24  ;;  %vm22567_vm12 = vcmp.eq.s32.totalorder %v22456_v7, %v22565_v47 }
 0xc92   :  { %12031 = vmatprep.mubr.msk.f32.mxu1 %vm22548_vm14, %v14313_v24  ;;  %vm22569_vm14 = vcmp.eq.s32.totalorder %v22454_v13, %v22568_v54 }
 0xc95   :  { %12032 = vmatmul.mubr.msk.f32.gmra.mrb[128].mxu1 %vm22549_vm15, %v14313_v24  ;;  %vm22570_vm15 = vcmp.eq.s32.totalorder %v22456_v7, %v22568_v54 }
 0xc96   :  { %12033 = vmatprep.mubr.msk.f32.mxu1 %vm22551_vm2, %v14313_v24  ;;  %vm22572_vm2 = vcmp.eq.s32.totalorder %v22454_v13, %v22571_v31 }
 0xc99   :  { %12034 = vmatmul.mubr.msk.f32.gmra.mrb[130].mxu1 %vm22552_vm7, %v14313_v24  ;;  %vm22573_vm7 = vcmp.eq.s32.totalorder %v22456_v7, %v22571_v31 }
 0xc9a   :  { %12035 = vmatprep.mubr.msk.f32.mxu1 %vm22554_vm9, %v14313_v24  ;;  %vm22575_vm9 = vcmp.eq.s32.totalorder %v22454_v13, %v22574_v35 }
 0xc9d   :  { %12036 = vmatmul.mubr.msk.f32.gmra.mrb[132].mxu1 %vm22555_vm10, %v14313_v24  ;;  %vm22576_vm10 = vcmp.eq.s32.totalorder %v22456_v7, %v22574_v35 }
 0xc9e   :  { %12037 = vmatprep.mubr.msk.f32.mxu1 %vm22557_vm13, %v14313_v24  ;;  %vm22578_vm13 = vcmp.eq.s32.totalorder %v22454_v13, %v22577_v38 }
 0xca1   :  { %12038 = vmatmul.mubr.msk.f32.gmra.mrb[134].mxu1 %vm22558_vm4, %v14313_v24  ;;  %vm22579_vm4 = vcmp.eq.s32.totalorder %v22456_v7, %v22577_v38 }
 0xca2   :  { %12039 = vmatprep.mubr.msk.f32.mxu1 %vm22560_vm5, %v14313_v24  ;;  %vm22581_vm5 = vcmp.eq.s32.totalorder %v22454_v13, %v22580_v5 }
 0xca5   :  { %12040 = vmatmul.mubr.msk.f32.gmra.mrb[136].mxu1 %vm22561_vm8, %v14313_v24  ;;  %vm22582_vm8 = vcmp.eq.s32.totalorder %v22456_v7, %v22580_v5 }
 0xca6   :  { %12041 = vmatprep.mubr.msk.f32.mxu1 %vm22563_vm3, %v14313_v24  ;;  %vm22584_vm3 = vcmp.eq.s32.totalorder %v22454_v13, %v22583_v52 }
 0xca9   :  { %12042 = vmatmul.mubr.msk.f32.gmra.mrb[138].mxu1 %vm22564_vm6, %v14313_v24  ;;  %vm22585_vm6 = vcmp.eq.s32.totalorder %v22456_v7, %v22583_v52 }
 0xcaa   :  { %12043 = vmatprep.mubr.msk.f32.mxu1 %vm22566_vm11, %v14313_v24  ;;  %vm22587_vm11 = vcmp.eq.s32.totalorder %v22454_v13, %v22586_v61 }
 0xcad   :  { %12044 = vmatmul.mubr.msk.f32.gmra.mrb[140].mxu1 %vm22567_vm12, %v14313_v24  ;;  %vm22588_vm12 = vcmp.eq.s32.totalorder %v22456_v7, %v22586_v61 }
 0xcae   :  { %12045 = vmatprep.mubr.msk.f32.mxu1 %vm22569_vm14, %v14313_v24  ;;  %vm22590_vm14 = vcmp.eq.s32.totalorder %v22454_v13, %v22589_v50 }
 0xcb1   :  { %12046 = vmatmul.mubr.msk.f32.gmra.mrb[142].mxu1 %vm22570_vm15, %v14313_v24  ;;  %vm22591_vm15 = vcmp.eq.s32.totalorder %v22456_v7, %v22589_v50 }
 0xcb2   :  { %12047 = vmatprep.mubr.msk.f32.mxu1 %vm22572_vm2, %v14313_v24  ;;  %vm22593_vm2 = vcmp.eq.s32.totalorder %v22454_v13, %v22592_v46 }
 0xcb5   :  { %12048 = vmatmul.mubr.msk.f32.gmra.mrb[144].mxu1 %vm22573_vm7, %v14313_v24  ;;  %vm22594_vm7 = vcmp.eq.s32.totalorder %v22456_v7, %v22592_v46 }
 0xcb6   :  { %12049 = vmatprep.mubr.msk.f32.mxu1 %vm22575_vm9, %v14313_v24  ;;  %vm22596_vm9 = vcmp.eq.s32.totalorder %v22454_v13, %v22595_v41 }
 0xcb9   :  { %12050 = vmatmul.mubr.msk.f32.gmra.mrb[146].mxu1 %vm22576_vm10, %v14313_v24  ;;  %vm22597_vm10 = vcmp.eq.s32.totalorder %v22456_v7, %v22595_v41 }
 0xcba   :  { %12051 = vmatprep.mubr.msk.f32.mxu1 %vm22578_vm13, %v14313_v24  ;;  %vm22599_vm13 = vcmp.eq.s32.totalorder %v22454_v13, %v22598_v39 }
 0xcbd   :  { %12052 = vmatmul.mubr.msk.f32.gmra.mrb[148].mxu1 %vm22579_vm4, %v14313_v24  ;;  %vm22600_vm4 = vcmp.eq.s32.totalorder %v22456_v7, %v22598_v39 }
 0xcbe   :  { %12053 = vmatprep.mubr.msk.f32.mxu1 %vm22581_vm5, %v14313_v24  ;;  %vm22602_vm5 = vcmp.eq.s32.totalorder %v22454_v13, %v22601_v57 }
 0xcc1   :  { %12054 = vmatmul.mubr.msk.f32.gmra.mrb[150].mxu1 %vm22582_vm8, %v14313_v24  ;;  %vm22603_vm8 = vcmp.eq.s32.totalorder %v22456_v7, %v22601_v57 }
 0xcc2   :  { %12055 = vmatprep.mubr.msk.f32.mxu1 %vm22584_vm3, %v14313_v24  ;;  %vm22605_vm3 = vcmp.eq.s32.totalorder %v22454_v13, %v22604_v56 }
 0xcc5   :  { %12056 = vmatmul.mubr.msk.f32.gmra.mrb[152].mxu1 %vm22585_vm6, %v14313_v24  ;;  %vm22606_vm6 = vcmp.eq.s32.totalorder %v22456_v7, %v22604_v56 }
 0xcc6   :  { %12057 = vmatprep.mubr.msk.f32.mxu1 %vm22587_vm11, %v14313_v24  ;;  %vm22608_vm11 = vcmp.eq.s32.totalorder %v22454_v13, %v22607_v34 }
 0xcc9   :  { %12058 = vmatmul.mubr.msk.f32.gmra.mrb[154].mxu1 %vm22588_vm12, %v14313_v24  ;;  %vm22609_vm12 = vcmp.eq.s32.totalorder %v22456_v7, %v22607_v34 }
 0xcca   :  { %12059 = vmatprep.mubr.msk.f32.mxu1 %vm22590_vm14, %v14313_v24  ;;  %vm22611_vm14 = vcmp.eq.s32.totalorder %v22454_v13, %v22610_v12 }
 0xccd   :  { %12060 = vmatmul.mubr.msk.f32.gmra.mrb[156].mxu1 %vm22591_vm15, %v14313_v24  ;;  %vm22612_vm15 = vcmp.eq.s32.totalorder %v22456_v7, %v22610_v12 }
 0xcce   :  { %12061 = vmatprep.mubr.msk.f32.mxu1 %vm22593_vm2, %v14313_v24  ;;  %vm22614_vm2 = vcmp.eq.s32.totalorder %v22454_v13, %v22613_v1 }
 0xcd1   :  { %12062 = vmatmul.mubr.msk.f32.gmra.mrb[158].mxu1 %vm22594_vm7, %v14313_v24  ;;  %vm22615_vm7 = vcmp.eq.s32.totalorder %v22456_v7, %v22613_v1 }
 0xcd2   :  { %12063 = vmatprep.mubr.msk.f32.mxu1 %vm22596_vm9, %v14313_v24  ;;  %vm22617_vm9 = vcmp.eq.s32.totalorder %v22454_v13, %v22616_v59 }
 0xcd5   :  { %12064 = vmatmul.mubr.msk.f32.gmra.mrb[160].mxu1 %vm22597_vm10, %v14313_v24  ;;  %vm22618_vm10 = vcmp.eq.s32.totalorder %v22456_v7, %v22616_v59 }
 0xcd6   :  { %12065 = vmatprep.mubr.msk.f32.mxu1 %vm22599_vm13, %v14313_v24  ;;  %vm22620_vm13 = vcmp.eq.s32.totalorder %v22454_v13, %v22619_v4 }
 0xcd9   :  { %12066 = vmatmul.mubr.msk.f32.gmra.mrb[162].mxu1 %vm22600_vm4, %v14313_v24  ;;  %vm22621_vm4 = vcmp.eq.s32.totalorder %v22456_v7, %v22619_v4 }
 0xcda   :  { %12067 = vmatprep.mubr.msk.f32.mxu1 %vm22602_vm5, %v14313_v24  ;;  %vm22623_vm5 = vcmp.eq.s32.totalorder %v22454_v13, %v22622_v20 }
 0xcdd   :  { %12068 = vmatmul.mubr.msk.f32.gmra.mrb[164].mxu1 %vm22603_vm8, %v14313_v24  ;;  %vm22624_vm8 = vcmp.eq.s32.totalorder %v22456_v7, %v22622_v20  ;;  %v22645_v20 = vld [vmem:[#allocation164_spill] sm:$0xff] }
 0xcde   :  { %12069 = vmatprep.mubr.msk.f32.mxu1 %vm22605_vm3, %v14313_v24  ;;  %vm22626_vm3 = vcmp.eq.s32.totalorder %v22454_v13, %v22625_v44 }
 0xce1   :  { %12070 = vmatmul.mubr.msk.f32.gmra.mrb[166].mxu1 %vm22606_vm6, %v14313_v24  ;;  %vm22627_vm6 = vcmp.eq.s32.totalorder %v22456_v7, %v22625_v44  ;;  %v22634_v44 = vld [vmem:[#allocation159_spill] sm:$0xff] }
 0xce2   :  { %12071 = vmatprep.mubr.msk.f32.mxu1 %vm22608_vm11, %v14313_v24  ;;  %vm22629_vm11 = vcmp.eq.s32.totalorder %v22454_v13, %v22628_v60 }
 0xce5   :  { %12072 = vmatmul.mubr.msk.f32.gmra.mrb[168].mxu1 %vm22609_vm12, %v14313_v24  ;;  %vm22630_vm12 = vcmp.eq.s32.totalorder %v22456_v7, %v22628_v60  ;;  %v22637_v60 = vld [vmem:[#allocation162_spill] sm:$0xff] }
 0xce6   :  { %12073 = vmatprep.mubr.msk.f32.mxu1 %vm22611_vm14, %v14313_v24  ;;  %vm22632_vm14 = vcmp.eq.s32.totalorder %v22454_v13, %v22631_v42 }
 0xce9   :  { %12074 = vmatmul.mubr.msk.f32.gmra.mrb[170].mxu1 %vm22612_vm15, %v14313_v24  ;;  %vm22633_vm15 = vcmp.eq.s32.totalorder %v22456_v7, %v22631_v42  ;;  %v22640_v42 = vld [vmem:[#allocation161_spill] sm:$0xff] }
 0xcea   :  { %12075 = vmatprep.mubr.msk.f32.mxu1 %vm22614_vm2, %v14313_v24  ;;  %vm22635_vm2 = vcmp.eq.s32.totalorder %v22454_v13, %v22634_v44 }
 0xced   :  { %12076 = vmatmul.mubr.msk.f32.gmra.mrb[172].mxu1 %vm22615_vm7, %v14313_v24  ;;  %vm22636_vm7 = vcmp.eq.s32.totalorder %v22456_v7, %v22634_v44  ;;  %v22643_v44 = vld [vmem:[#allocation163_spill] sm:$0xff] }
 0xcee   :  { %12077 = vmatprep.mubr.msk.f32.mxu1 %vm22617_vm9, %v14313_v24  ;;  %vm22638_vm9 = vcmp.eq.s32.totalorder %v22454_v13, %v22637_v60 }
 0xcf1   :  { %12078 = vmatmul.mubr.msk.f32.gmra.mrb[174].mxu1 %vm22618_vm10, %v14313_v24  ;;  %vm22639_vm10 = vcmp.eq.s32.totalorder %v22456_v7, %v22637_v60 }
 0xcf2   :  { %12079 = vmatprep.mubr.msk.f32.mxu1 %vm22620_vm13, %v14313_v24  ;;  %vm22641_vm13 = vcmp.eq.s32.totalorder %v22454_v13, %v22640_v42 }
 0xcf5   :  { %12080 = vmatmul.mubr.msk.f32.gmra.mrb[176].mxu1 %vm22621_vm4, %v14313_v24  ;;  %vm22642_vm4 = vcmp.eq.s32.totalorder %v22456_v7, %v22640_v42 }
 0xcf6   :  { %12081 = vmatprep.mubr.msk.f32.mxu1 %vm22623_vm5, %v14313_v24  ;;  %vm22644_vm5 = vcmp.eq.s32.totalorder %v22643_v44, %v22455_v0 }
 0xcf9   :  { %12082 = vmatmul.mubr.msk.f32.gmra.mrb[178].mxu1 %vm22624_vm8, %v14313_v24  ;;  %vm22646_vm8 = vcmp.eq.s32.totalorder %v22645_v20, %v22455_v0 }
 0xcfa   :  { %12083 = vmatprep.mubr.msk.f32.mxu1 %vm22626_vm3, %v14313_v24  ;;  %vm22647_vm3 = vcmp.eq.s32.totalorder %v22643_v44, %v22457_v26 }
 0xcfd   :  { %12084 = vmatmul.mubr.msk.f32.gmra.mrb[180].mxu1 %vm22627_vm6, %v14313_v24  ;;  %vm22648_vm6 = vcmp.eq.s32.totalorder %v22645_v20, %v22457_v26 }
 0xcfe   :  { %12085 = vmatprep.mubr.msk.f32.mxu1 %vm22629_vm11, %v14313_v24  ;;  %vm22649_vm11 = vcmp.eq.s32.totalorder %v22643_v44, %v22458_v14 }
 0xd01   :  { %12086 = vmatmul.mubr.msk.f32.gmra.mrb[182].mxu1 %vm22630_vm12, %v14313_v24  ;;  %vm22650_vm12 = vcmp.eq.s32.totalorder %v22645_v20, %v22458_v14 }
 0xd02   :  { %12087 = vmatprep.mubr.msk.f32.mxu1 %vm22632_vm14, %v14313_v24  ;;  %vm22651_vm14 = vcmp.eq.s32.totalorder %v22643_v44, %v22460_v28 }
 0xd05   :  { %12088 = vmatmul.mubr.msk.f32.gmra.mrb[184].mxu1 %vm22633_vm15, %v14313_v24  ;;  %vm22652_vm15 = vcmp.eq.s32.totalorder %v22645_v20, %v22460_v28 }
 0xd06   :  { %12089 = vmatprep.mubr.msk.f32.mxu1 %vm22635_vm2, %v14313_v24  ;;  %vm22653_vm2 = vcmp.eq.s32.totalorder %v22643_v44, %v22463_v21 }
 0xd09   :  { %12090 = vmatmul.mubr.msk.f32.gmra.mrb[186].mxu1 %vm22636_vm7, %v14313_v24  ;;  %vm22654_vm7 = vcmp.eq.s32.totalorder %v22645_v20, %v22463_v21 }
 0xd0a   :  { %12091 = vmatprep.mubr.msk.f32.mxu1 %vm22638_vm9, %v14313_v24  ;;  %vm22655_vm9 = vcmp.eq.s32.totalorder %v22643_v44, %v22466_v63 }
 0xd0d   :  { %12092 = vmatmul.mubr.msk.f32.gmra.mrb[188].mxu1 %vm22639_vm10, %v14313_v24  ;;  %vm22656_vm10 = vcmp.eq.s32.totalorder %v22645_v20, %v22466_v63 }
 0xd0e   :  { %12093 = vmatprep.mubr.msk.f32.mxu1 %vm22641_vm13, %v14313_v24  ;;  %vm22657_vm13 = vcmp.eq.s32.totalorder %v22643_v44, %v22469_v6 }
 0xd11   :  { %12094 = vmatmul.mubr.msk.f32.gmra.mrb[190].mxu1 %vm22642_vm4, %v14313_v24  ;;  %vm22658_vm4 = vcmp.eq.s32.totalorder %v22645_v20, %v22469_v6  ;;  %v22759_v6 = vld [vmem:[#allocation155_spill] sm:$0xff] }
 0xd12   :  { %12095 = vmatprep.mubr.msk.f32.mxu1 %vm22644_vm5, %v14313_v24  ;;  %vm22659_vm5 = vcmp.eq.s32.totalorder %v22643_v44, %v22472_v37 }
 0xd15   :  { %12096 = vmatmul.mubr.msk.f32.vlgmr.msra.gmra.mrb[64].mxu1 %vm22646_vm8, %v14313_v24  ;;  %vm22660_vm8 = vcmp.eq.s32.totalorder %v22645_v20, %v22472_v37 }
 0xd16   :  { %12097 = vmatprep.mubr.msk.f32.mxu1 %vm22647_vm3, %v14313_v24  ;;  %vm22661_vm3 = vcmp.eq.s32.totalorder %v22643_v44, %v22475_v55 }
 0xd19   :  { %12098 = vmatmul.mubr.msk.f32.gmra.mrb[66].mxu1 %vm22648_vm6, %v14313_v24  ;;  %vm22662_vm6 = vcmp.eq.s32.totalorder %v22645_v20, %v22475_v55 }
 0xd1a   :  { %12099 = vmatprep.mubr.msk.f32.mxu1 %vm22649_vm11, %v14313_v24  ;;  %vm22663_vm11 = vcmp.eq.s32.totalorder %v22643_v44, %v22478_v15 }
 0xd1d   :  { %12100 = vmatmul.mubr.msk.f32.gmra.mrb[68].mxu1 %vm22650_vm12, %v14313_v24  ;;  %vm22664_vm12 = vcmp.eq.s32.totalorder %v22645_v20, %v22478_v15  ;;  %v22762_v15 = vld [vmem:[#allocation158_spill] sm:$0xff] }
 0xd1e   :  { %12101 = vmatprep.mubr.msk.f32.mxu1 %vm22651_vm14, %v14313_v24  ;;  %vm22665_vm14 = vcmp.eq.s32.totalorder %v22643_v44, %v22481_v18 }
 0xd21   :  { %12102 = vmatmul.mubr.msk.f32.gmra.mrb[70].mxu1 %vm22652_vm15, %v14313_v24  ;;  %vm22666_vm15 = vcmp.eq.s32.totalorder %v22645_v20, %v22481_v18 }
 0xd22   :  { %12103 = vmatprep.mubr.msk.f32.mxu1 %vm22653_vm2, %v14313_v24  ;;  %vm22667_vm2 = vcmp.eq.s32.totalorder %v22643_v44, %v22484_v62 }
 0xd25   :  { %12104 = vmatmul.mubr.msk.f32.gmra.mrb[72].mxu1 %vm22654_vm7, %v14313_v24  ;;  %vm22668_vm7 = vcmp.eq.s32.totalorder %v22645_v20, %v22484_v62 }
 0xd26   :  { %12105 = vmatprep.mubr.msk.f32.mxu1 %vm22655_vm9, %v14313_v24  ;;  %vm22669_vm9 = vcmp.eq.s32.totalorder %v22643_v44, %v22487_v32 }
 0xd29   :  { %12106 = vmatmul.mubr.msk.f32.gmra.mrb[74].mxu1 %vm22656_vm10, %v14313_v24  ;;  %vm22670_vm10 = vcmp.eq.s32.totalorder %v22645_v20, %v22487_v32  ;;  %v22765_v32 = vld [vmem:[#allocation157_spill] sm:$0xff] }
 0xd2a   :  { %12107 = vmatprep.mubr.msk.f32.mxu1 %vm22657_vm13, %v14313_v24  ;;  %vm22671_vm13 = vcmp.eq.s32.totalorder %v22643_v44, %v22490_v53 }
 0xd2d   :  { %12108 = vmatmul.mubr.msk.f32.gmra.mrb[76].mxu1 %vm22658_vm4, %v14313_v24  ;;  %vm22672_vm4 = vcmp.eq.s32.totalorder %v22645_v20, %v22490_v53 }
 0xd2e   :  { %12109 = vmatprep.mubr.msk.f32.mxu1 %vm22659_vm5, %v14313_v24  ;;  %vm22673_vm5 = vcmp.eq.s32.totalorder %v22643_v44, %v22493_v8 }
 0xd31   :  { %12110 = vmatmul.mubr.msk.f32.gmra.mrb[78].mxu1 %vm22660_vm8, %v14313_v24  ;;  %vm22674_vm8 = vcmp.eq.s32.totalorder %v22645_v20, %v22493_v8 }
 0xd32   :  { %12111 = vmatprep.mubr.msk.f32.mxu1 %vm22661_vm3, %v14313_v24  ;;  %vm22675_vm3 = vcmp.eq.s32.totalorder %v22643_v44, %v22496_v51 }
 0xd35   :  { %12112 = vmatmul.mubr.msk.f32.gmra.mrb[80].mxu1 %vm22662_vm6, %v14313_v24  ;;  %vm22676_vm6 = vcmp.eq.s32.totalorder %v22645_v20, %v22496_v51  ;;  %v22768_v51 = vld [vmem:[#allocation160_spill] sm:$0xff] }
 0xd36   :  { %12113 = vmatprep.mubr.msk.f32.mxu1 %vm22663_vm11, %v14313_v24  ;;  %vm22677_vm11 = vcmp.eq.s32.totalorder %v22643_v44, %v22499_v25 }
 0xd39   :  { %12114 = vmatmul.mubr.msk.f32.gmra.mrb[82].mxu1 %vm22664_vm12, %v14313_v24  ;;  %vm22678_vm12 = vcmp.eq.s32.totalorder %v22645_v20, %v22499_v25 }
 0xd3a   :  { %12115 = vmatprep.mubr.msk.f32.mxu1 %vm22665_vm14, %v14313_v24  ;;  %vm22679_vm14 = vcmp.eq.s32.totalorder %v22643_v44, %v22502_v17 }
 0xd3d   :  { %12116 = vmatmul.mubr.msk.f32.gmra.mrb[84].mxu1 %vm22666_vm15, %v14313_v24  ;;  %vm22680_vm15 = vcmp.eq.s32.totalorder %v22645_v20, %v22502_v17 }
 0xd3e   :  { %12117 = vmatprep.mubr.msk.f32.mxu1 %vm22667_vm2, %v14313_v24  ;;  %vm22681_vm2 = vcmp.eq.s32.totalorder %v22643_v44, %v22505_v10 }
 0xd41   :  { %12118 = vmatmul.mubr.msk.f32.gmra.mrb[86].mxu1 %vm22668_vm7, %v14313_v24  ;;  %vm22682_vm7 = vcmp.eq.s32.totalorder %v22645_v20, %v22505_v10  ;;  %v22771_v10 = vld [vmem:[#allocation159_spill] sm:$0xff] }
 0xd42   :  { %12119 = vmatprep.mubr.msk.f32.mxu1 %vm22669_vm9, %v14313_v24  ;;  %vm22683_vm9 = vcmp.eq.s32.totalorder %v22643_v44, %v22508_v11 }
 0xd45   :  { %12120 = vmatmul.mubr.msk.f32.gmra.mrb[88].mxu1 %vm22670_vm10, %v14313_v24  ;;  %vm22684_vm10 = vcmp.eq.s32.totalorder %v22645_v20, %v22508_v11 }
 0xd46   :  { %12121 = vmatprep.mubr.msk.f32.mxu1 %vm22671_vm13, %v14313_v24  ;;  %vm22685_vm13 = vcmp.eq.s32.totalorder %v22643_v44, %v22511_v2 }
 0xd49   :  { %12122 = vmatmul.mubr.msk.f32.gmra.mrb[90].mxu1 %vm22672_vm4, %v14313_v24  ;;  %vm22686_vm4 = vcmp.eq.s32.totalorder %v22645_v20, %v22511_v2  ;;  %v22773_v2 = vld [vmem:[#allocation165_spill] sm:$0xff] }
 0xd4a   :  { %12123 = vmatprep.mubr.msk.f32.mxu1 %vm22673_vm5, %v14313_v24  ;;  %vm22687_vm5 = vcmp.eq.s32.totalorder %v22643_v44, %v22514_v22 }
 0xd4d   :  { %12124 = vmatmul.mubr.msk.f32.gmra.mrb[92].mxu1 %vm22674_vm8, %v14313_v24  ;;  %vm22688_vm8 = vcmp.eq.s32.totalorder %v22645_v20, %v22514_v22 }
 0xd4e   :  { %12125 = vmatprep.mubr.msk.f32.mxu1 %vm22675_vm3, %v14313_v24  ;;  %vm22689_vm3 = vcmp.eq.s32.totalorder %v22643_v44, %v22517_v40 }
 0xd51   :  { %12126 = vmatmul.mubr.msk.f32.gmra.mrb[94].mxu1 %vm22676_vm6, %v14313_v24  ;;  %vm22690_vm6 = vcmp.eq.s32.totalorder %v22645_v20, %v22517_v40  ;;  %v22775_v40 = vld [vmem:[#allocation167_spill] sm:$0xff] }
 0xd52   :  { %12127 = vmatprep.mubr.msk.f32.mxu1 %vm22677_vm11, %v14313_v24  ;;  %vm22691_vm11 = vcmp.eq.s32.totalorder %v22643_v44, %v22520_v48 }
 0xd55   :  { %12128 = vmatmul.mubr.msk.f32.gmra.mrb[96].mxu1 %vm22678_vm12, %v14313_v24  ;;  %vm22692_vm12 = vcmp.eq.s32.totalorder %v22645_v20, %v22520_v48 }
 0xd56   :  { %12129 = vmatprep.mubr.msk.f32.mxu1 %vm22679_vm14, %v14313_v24  ;;  %vm22693_vm14 = vcmp.eq.s32.totalorder %v22643_v44, %v22523_v16 }
 0xd59   :  { %12130 = vmatmul.mubr.msk.f32.gmra.mrb[98].mxu1 %vm22680_vm15, %v14313_v24  ;;  %vm22694_vm15 = vcmp.eq.s32.totalorder %v22645_v20, %v22523_v16 }
 0xd5a   :  { %12131 = vmatprep.mubr.msk.f32.mxu1 %vm22681_vm2, %v14313_v24  ;;  %vm22695_vm2 = vcmp.eq.s32.totalorder %v22643_v44, %v22526_v3 }
 0xd5d   :  { %12132 = vmatmul.mubr.msk.f32.gmra.mrb[100].mxu1 %vm22682_vm7, %v14313_v24  ;;  %vm22696_vm7 = vcmp.eq.s32.totalorder %v22645_v20, %v22526_v3 }
 0xd5e   :  { %12133 = vmatprep.mubr.msk.f32.mxu1 %vm22683_vm9, %v14313_v24  ;;  %vm22697_vm9 = vcmp.eq.s32.totalorder %v22643_v44, %v22529_v19 }
 0xd61   :  { %12134 = vmatmul.mubr.msk.f32.gmra.mrb[102].mxu1 %vm22684_vm10, %v14313_v24  ;;  %vm22698_vm10 = vcmp.eq.s32.totalorder %v22645_v20, %v22529_v19 }
 0xd62   :  { %12135 = vmatprep.mubr.msk.f32.mxu1 %vm22685_vm13, %v14313_v24  ;;  %vm22699_vm13 = vcmp.eq.s32.totalorder %v22643_v44, %v22532_v23 }
 0xd65   :  { %12136 = vmatmul.mubr.msk.f32.gmra.mrb[104].mxu1 %vm22686_vm4, %v14313_v24  ;;  %vm22700_vm4 = vcmp.eq.s32.totalorder %v22645_v20, %v22532_v23  ;;  %v22779_v23 = vld [vmem:[#allocation166_spill] sm:$0xff] }
 0xd66   :  { %12137 = vmatprep.mubr.msk.f32.mxu1 %vm22687_vm5, %v14313_v24  ;;  %vm22701_vm5 = vcmp.eq.s32.totalorder %v22643_v44, %v22535_v58 }
 0xd69   :  { %12138 = vmatmul.mubr.msk.f32.gmra.mrb[106].mxu1 %vm22688_vm8, %v14313_v24  ;;  %vm22702_vm8 = vcmp.eq.s32.totalorder %v22645_v20, %v22535_v58 }
 0xd6a   :  { %12139 = vmatprep.mubr.msk.f32.mxu1 %vm22689_vm3, %v14313_v24  ;;  %vm22703_vm3 = vcmp.eq.s32.totalorder %v22643_v44, %v22538_v45 }
 0xd6d   :  { %12140 = vmatmul.mubr.msk.f32.gmra.mrb[108].mxu1 %vm22690_vm6, %v14313_v24  ;;  %vm22704_vm6 = vcmp.eq.s32.totalorder %v22645_v20, %v22538_v45  ;;  %v22781_v45 = vld [vmem:[#allocation168_spill] sm:$0xff] }
 0xd6e   :  { %12141 = vmatprep.mubr.msk.f32.mxu1 %vm22691_vm11, %v14313_v24  ;;  %vm22705_vm11 = vcmp.eq.s32.totalorder %v22643_v44, %v22541_v9 }
 0xd71   :  { %12142 = vmatmul.mubr.msk.f32.gmra.mrb[110].mxu1 %vm22692_vm12, %v14313_v24  ;;  %vm22706_vm12 = vcmp.eq.s32.totalorder %v22645_v20, %v22541_v9 }
 0xd72   :  { %12143 = vmatprep.mubr.msk.f32.mxu1 %vm22693_vm14, %v14313_v24  ;;  %vm22707_vm14 = vcmp.eq.s32.totalorder %v22643_v44, %v22544_v27 }
 0xd75   :  { %12144 = vmatmul.mubr.msk.f32.gmra.mrb[112].mxu1 %vm22694_vm15, %v14313_v24  ;;  %vm22708_vm15 = vcmp.eq.s32.totalorder %v22645_v20, %v22544_v27 }
 0xd76   :  { %12145 = vmatprep.mubr.msk.f32.mxu1 %vm22695_vm2, %v14313_v24  ;;  %vm22709_vm2 = vcmp.eq.s32.totalorder %v22643_v44, %v22547_v29 }
 0xd79   :  { %12146 = vmatmul.mubr.msk.f32.gmra.mrb[114].mxu1 %vm22696_vm7, %v14313_v24  ;;  %vm22710_vm7 = vcmp.eq.s32.totalorder %v22645_v20, %v22547_v29 }
 0xd7a   :  { %12147 = vmatprep.mubr.msk.f32.mxu1 %vm22697_vm9, %v14313_v24  ;;  %vm22711_vm9 = vcmp.eq.s32.totalorder %v22643_v44, %v22550_v33 }
 0xd7d   :  { %12148 = vmatmul.mubr.msk.f32.gmra.mrb[116].mxu1 %vm22698_vm10, %v14313_v24  ;;  %vm22712_vm10 = vcmp.eq.s32.totalorder %v22645_v20, %v22550_v33 }
 0xd7e   :  { %12149 = vmatprep.mubr.msk.f32.mxu1 %vm22699_vm13, %v14313_v24  ;;  %vm22713_vm13 = vcmp.eq.s32.totalorder %v22643_v44, %v22553_v49 }
 0xd81   :  { %12150 = vmatmul.mubr.msk.f32.gmra.mrb[118].mxu1 %vm22700_vm4, %v14313_v24  ;;  %vm22714_vm4 = vcmp.eq.s32.totalorder %v22645_v20, %v22553_v49  ;;  %v22785_v49 = vld [vmem:[#allocation171_spill] sm:$0xff] }
 0xd82   :  { %12151 = vmatprep.mubr.msk.f32.mxu1 %vm22701_vm5, %v14313_v24  ;;  %vm22715_vm5 = vcmp.eq.s32.totalorder %v22643_v44, %v22556_v30 }
 0xd85   :  { %12152 = vmatmul.mubr.msk.f32.gmra.mrb[120].mxu1 %vm22702_vm8, %v14313_v24  ;;  %vm22716_vm8 = vcmp.eq.s32.totalorder %v22645_v20, %v22556_v30 }
 0xd86   :  { %12153 = vmatprep.mubr.msk.f32.mxu1 %vm22703_vm3, %v14313_v24  ;;  %vm22717_vm3 = vcmp.eq.s32.totalorder %v22643_v44, %v22559_v36 }
 0xd89   :  { %12154 = vmatmul.mubr.msk.f32.gmra.mrb[122].mxu1 %vm22704_vm6, %v14313_v24  ;;  %vm22718_vm6 = vcmp.eq.s32.totalorder %v22645_v20, %v22559_v36  ;;  %v22787_v36 = vld [vmem:[#allocation173_spill] sm:$0xff] }
 0xd8a   :  { %12155 = vmatprep.mubr.msk.f32.mxu1 %vm22705_vm11, %v14313_v24  ;;  %vm22719_vm11 = vcmp.eq.s32.totalorder %v22643_v44, %v22562_v43 }
 0xd8d   :  { %12156 = vmatmul.mubr.msk.f32.gmra.mrb[124].mxu1 %vm22706_vm12, %v14313_v24  ;;  %vm22720_vm12 = vcmp.eq.s32.totalorder %v22645_v20, %v22562_v43 }
 0xd8e   :  { %12157 = vmatprep.mubr.msk.f32.mxu1 %vm22707_vm14, %v14313_v24  ;;  %vm22721_vm14 = vcmp.eq.s32.totalorder %v22643_v44, %v22565_v47 }
 0xd91   :  { %12158 = vmatmul.mubr.msk.f32.gmra.mrb[126].mxu1 %vm22708_vm15, %v14313_v24  ;;  %vm22722_vm15 = vcmp.eq.s32.totalorder %v22645_v20, %v22565_v47 }
 0xd92   :  { %12159 = vmatprep.mubr.msk.f32.mxu1 %vm22709_vm2, %v14313_v24  ;;  %vm22723_vm2 = vcmp.eq.s32.totalorder %v22643_v44, %v22568_v54 }
 0xd95   :  { %12160 = vmatmul.mubr.msk.f32.gmra.mrb[128].mxu1 %vm22710_vm7, %v14313_v24  ;;  %vm22724_vm7 = vcmp.eq.s32.totalorder %v22645_v20, %v22568_v54 }
 0xd96   :  { %12161 = vmatprep.mubr.msk.f32.mxu1 %vm22711_vm9, %v14313_v24  ;;  %vm22725_vm9 = vcmp.eq.s32.totalorder %v22643_v44, %v22571_v31 }
 0xd99   :  { %12162 = vmatmul.mubr.msk.f32.gmra.mrb[130].mxu1 %vm22712_vm10, %v14313_v24  ;;  %vm22726_vm10 = vcmp.eq.s32.totalorder %v22645_v20, %v22571_v31 }
 0xd9a   :  { %12163 = vmatprep.mubr.msk.f32.mxu1 %vm22713_vm13, %v14313_v24  ;;  %vm22727_vm13 = vcmp.eq.s32.totalorder %v22643_v44, %v22574_v35 }
 0xd9d   :  { %12164 = vmatmul.mubr.msk.f32.gmra.mrb[132].mxu1 %vm22714_vm4, %v14313_v24  ;;  %vm22728_vm4 = vcmp.eq.s32.totalorder %v22645_v20, %v22574_v35  ;;  %v22790_v35 = vld [vmem:[#allocation172_spill] sm:$0xff] }
 0xd9e   :  { %12165 = vmatprep.mubr.msk.f32.mxu1 %vm22715_vm5, %v14313_v24  ;;  %vm22729_vm5 = vcmp.eq.s32.totalorder %v22643_v44, %v22577_v38 }
 0xda1   :  { %12166 = vmatmul.mubr.msk.f32.gmra.mrb[134].mxu1 %vm22716_vm8, %v14313_v24  ;;  %vm22730_vm8 = vcmp.eq.s32.totalorder %v22645_v20, %v22577_v38 }
 0xda2   :  { %12167 = vmatprep.mubr.msk.f32.mxu1 %vm22717_vm3, %v14313_v24  ;;  %vm22731_vm3 = vcmp.eq.s32.totalorder %v22643_v44, %v22580_v5 }
 0xda5   :  { %12168 = vmatmul.mubr.msk.f32.gmra.mrb[136].mxu1 %vm22718_vm6, %v14313_v24  ;;  %vm22732_vm6 = vcmp.eq.s32.totalorder %v22645_v20, %v22580_v5  ;;  %v22792_v5 = vld [vmem:[#allocation174_spill] sm:$0xff] }
 0xda6   :  { %12169 = vmatprep.mubr.msk.f32.mxu1 %vm22719_vm11, %v14313_v24  ;;  %vm22733_vm11 = vcmp.eq.s32.totalorder %v22643_v44, %v22583_v52 }
 0xda9   :  { %12170 = vmatmul.mubr.msk.f32.gmra.mrb[138].mxu1 %vm22720_vm12, %v14313_v24  ;;  %vm22734_vm12 = vcmp.eq.s32.totalorder %v22645_v20, %v22583_v52 }
 0xdaa   :  { %12171 = vmatprep.mubr.msk.f32.mxu1 %vm22721_vm14, %v14313_v24  ;;  %vm22735_vm14 = vcmp.eq.s32.totalorder %v22643_v44, %v22586_v61 }
 0xdad   :  { %12172 = vmatmul.mubr.msk.f32.gmra.mrb[140].mxu1 %vm22722_vm15, %v14313_v24  ;;  %vm22736_vm15 = vcmp.eq.s32.totalorder %v22645_v20, %v22586_v61 }
 0xdae   :  { %12173 = vmatprep.mubr.msk.f32.mxu1 %vm22723_vm2, %v14313_v24  ;;  %vm22737_vm2 = vcmp.eq.s32.totalorder %v22643_v44, %v22589_v50 }
 0xdb1   :  { %12174 = vmatmul.mubr.msk.f32.gmra.mrb[142].mxu1 %vm22724_vm7, %v14313_v24  ;;  %vm22738_vm7 = vcmp.eq.s32.totalorder %v22645_v20, %v22589_v50 }
 0xdb2   :  { %12175 = vmatprep.mubr.msk.f32.mxu1 %vm22725_vm9, %v14313_v24  ;;  %vm22739_vm9 = vcmp.eq.s32.totalorder %v22643_v44, %v22592_v46 }
 0xdb5   :  { %12176 = vmatmul.mubr.msk.f32.gmra.mrb[144].mxu1 %vm22726_vm10, %v14313_v24  ;;  %vm22740_vm10 = vcmp.eq.s32.totalorder %v22645_v20, %v22592_v46 }
 0xdb6   :  { %12177 = vmatprep.mubr.msk.f32.mxu1 %vm22727_vm13, %v14313_v24  ;;  %vm22741_vm13 = vcmp.eq.s32.totalorder %v22643_v44, %v22595_v41 }
 0xdb9   :  { %12178 = vmatmul.mubr.msk.f32.gmra.mrb[146].mxu1 %vm22728_vm4, %v14313_v24  ;;  %vm22742_vm4 = vcmp.eq.s32.totalorder %v22645_v20, %v22595_v41  ;;  %v22794_v41 = vld [vmem:[#allocation181_spill] sm:$0xff] }
 0xdba   :  { %12179 = vmatprep.mubr.msk.f32.mxu1 %vm22729_vm5, %v14313_v24  ;;  %vm22743_vm5 = vcmp.eq.s32.totalorder %v22643_v44, %v22598_v39 }
 0xdbd   :  { %12180 = vmatmul.mubr.msk.f32.gmra.mrb[148].mxu1 %vm22730_vm8, %v14313_v24  ;;  %vm22744_vm8 = vcmp.eq.s32.totalorder %v22645_v20, %v22598_v39 }
 0xdbe   :  { %12181 = vmatprep.mubr.msk.f32.mxu1 %vm22731_vm3, %v14313_v24  ;;  %vm22745_vm3 = vcmp.eq.s32.totalorder %v22643_v44, %v22601_v57 }
 0xdc1   :  { %12182 = vmatmul.mubr.msk.f32.gmra.mrb[150].mxu1 %vm22732_vm6, %v14313_v24  ;;  %vm22746_vm6 = vcmp.eq.s32.totalorder %v22645_v20, %v22601_v57  ;;  %v22796_v57 = vld [vmem:[#allocation183_spill] sm:$0xff] }
 0xdc2   :  { %12183 = vmatprep.mubr.msk.f32.mxu1 %vm22733_vm11, %v14313_v24  ;;  %vm22747_vm11 = vcmp.eq.s32.totalorder %v22643_v44, %v22604_v56 }
 0xdc5   :  { %12184 = vmatmul.mubr.msk.f32.gmra.mrb[152].mxu1 %vm22734_vm12, %v14313_v24  ;;  %vm22748_vm12 = vcmp.eq.s32.totalorder %v22645_v20, %v22604_v56 }
 0xdc6   :  { %12185 = vmatprep.mubr.msk.f32.mxu1 %vm22735_vm14, %v14313_v24  ;;  %vm22749_vm14 = vcmp.eq.s32.totalorder %v22643_v44, %v22607_v34 }
 0xdc9   :  { %12186 = vmatmul.mubr.msk.f32.gmra.mrb[154].mxu1 %vm22736_vm15, %v14313_v24  ;;  %vm22750_vm15 = vcmp.eq.s32.totalorder %v22645_v20, %v22607_v34 }
 0xdca   :  { %12187 = vmatprep.mubr.msk.f32.mxu1 %vm22737_vm2, %v14313_v24  ;;  %vm22751_vm2 = vcmp.eq.s32.totalorder %v22643_v44, %v22610_v12 }
 0xdcd   :  { %12188 = vmatmul.mubr.msk.f32.gmra.mrb[156].mxu1 %vm22738_vm7, %v14313_v24  ;;  %vm22752_vm7 = vcmp.eq.s32.totalorder %v22645_v20, %v22610_v12 }
 0xdce   :  { %12189 = vmatprep.mubr.msk.f32.mxu1 %vm22739_vm9, %v14313_v24  ;;  %vm22753_vm9 = vcmp.eq.s32.totalorder %v22643_v44, %v22613_v1 }
 0xdd1   :  { %12190 = vmatmul.mubr.msk.f32.gmra.mrb[158].mxu1 %vm22740_vm10, %v14313_v24  ;;  %vm22754_vm10 = vcmp.eq.s32.totalorder %v22645_v20, %v22613_v1  ;;  %v22798_v1 = vld [vmem:[#allocation182_spill] sm:$0xff] }
 0xdd2   :  { %12191 = vmatprep.mubr.msk.f32.mxu1 %vm22741_vm13, %v14313_v24  ;;  %vm22755_vm13 = vcmp.eq.s32.totalorder %v22643_v44, %v22616_v59 }
 0xdd5   :  { %12192 = vmatmul.mubr.msk.f32.gmra.mrb[160].mxu1 %vm22742_vm4, %v14313_v24  ;;  %vm22756_vm4 = vcmp.eq.s32.totalorder %v22645_v20, %v22616_v59 }
 0xdd6   :  { %12193 = vmatprep.mubr.msk.f32.mxu1 %vm22743_vm5, %v14313_v24  ;;  %vm22757_vm5 = vcmp.eq.s32.totalorder %v22643_v44, %v22619_v4 }
 0xdd9   :  { %12194 = vmatmul.mubr.msk.f32.gmra.mrb[162].mxu1 %vm22744_vm8, %v14313_v24  ;;  %vm22758_vm8 = vcmp.eq.s32.totalorder %v22645_v20, %v22619_v4  ;;  %v22800_v4 = vld [vmem:[#allocation184_spill] sm:$0xff] }
 0xdda   :  { %12195 = vmatprep.mubr.msk.f32.mxu1 %vm22745_vm3, %v14313_v24  ;;  %vm22760_vm3 = vcmp.eq.s32.totalorder %v22643_v44, %v22759_v6 }
 0xddd   :  { %12196 = vmatmul.mubr.msk.f32.gmra.mrb[164].mxu1 %vm22746_vm6, %v14313_v24  ;;  %vm22761_vm6 = vcmp.eq.s32.totalorder %v22645_v20, %v22759_v6 }
 0xdde   :  { %12197 = vmatprep.mubr.msk.f32.mxu1 %vm22747_vm11, %v14313_v24  ;;  %vm22763_vm11 = vcmp.eq.s32.totalorder %v22643_v44, %v22762_v15 }
 0xde1   :  { %12198 = vmatmul.mubr.msk.f32.gmra.mrb[166].mxu1 %vm22748_vm12, %v14313_v24  ;;  %vm22764_vm12 = vcmp.eq.s32.totalorder %v22645_v20, %v22762_v15 }
 0xde2   :  { %12199 = vmatprep.mubr.msk.f32.mxu1 %vm22749_vm14, %v14313_v24  ;;  %vm22766_vm14 = vcmp.eq.s32.totalorder %v22643_v44, %v22765_v32 }
 0xde5   :  { %12200 = vmatmul.mubr.msk.f32.gmra.mrb[168].mxu1 %vm22750_vm15, %v14313_v24  ;;  %vm22767_vm15 = vcmp.eq.s32.totalorder %v22645_v20, %v22765_v32  ;;  %v22810_v32 = vld [vmem:[#allocation169_spill] sm:$0xff] }
 0xde6   :  { %12201 = vmatprep.mubr.msk.f32.mxu1 %vm22751_vm2, %v14313_v24  ;;  %vm22769_vm2 = vcmp.eq.s32.totalorder %v22643_v44, %v22768_v51 }
 0xde8   :  { %v10349_v13 = vpop.f32.mrb[64].mxu1 }
 0xde9   :  { %v10351_v0 = vpop.f32.mrb[65].mxu1  ;;  %12202 = vmatmul.mubr.msk.f32.gmra.mrb[170].mxu1 %vm22752_vm7, %v14313_v24  ;;  %vm22770_vm7 = vcmp.eq.s32.totalorder %v22645_v20, %v22768_v51 }
 0xdea   :  { %12203 = vmatprep.mubr.msk.f32.mxu1 %vm22753_vm9, %v14313_v24  ;;  %vm22772_vm9 = vcmp.eq.s32.totalorder %v22643_v44, %v22771_v10 }
 0xdec   :  { %v10354_v7 = vpop.f32.mrb[66].mxu1 }
 0xded   :  { %v10356_v26 = vpop.f32.mrb[67].mxu1  ;;  %12204 = vmatmul.mubr.msk.f32.gmra.mrb[172].mxu1 %vm22754_vm10, %v14313_v24  ;;  %vm22774_vm10 = vcmp.eq.s32.totalorder %v22773_v2, 1 }
 0xdee   :  { %12205 = vmatprep.mubr.msk.f32.mxu1 %vm22755_vm13, %v14313_v24  ;;  %v10668_v22 = vsel %vm22774_vm10, %v10349_v13, -3.4e+38  ;;  %vm22776_vm13 = vcmp.eq.s32.totalorder %v22775_v40, 1  ;;  %vm22797_vm10 = vcmp.eq.s32.totalorder %v22796_v57, 1  ;;  %v22802_v13 = vld [vmem:[#allocation195_spill] sm:$0xff]  ;;  %v22814_v40 = vld [vmem:[#allocation177_spill] sm:$0xff] }
 0xdf0   :  { %v10359_v14 = vpop.f32.mrb[68].mxu1 }
 0xdf1   :  { %v10361_v28 = vpop.f32.mrb[69].mxu1  ;;  %12206 = vmatmul.mubr.msk.f32.gmra.mrb[174].mxu1 %vm22756_vm4, %v14313_v24  ;;  %vm22777_vm4 = vcmp.eq.s32.totalorder %v22645_v20, %v22771_v10  ;;  %v22812_v10 = vld [vmem:[#allocation170_spill] sm:$0xff] }
 0xdf2   :  { %12207 = vmatprep.mubr.msk.f32.mxu1 %vm22757_vm5, %v14313_v24  ;;  %vm22778_vm5 = vcmp.eq.s32.totalorder %v22643_v44, %v22637_v60 }
 0xdf4   :  { %v10364_v21 = vpop.f32.mrb[70].mxu1 }
 0xdf5   :  { %v10366_v63 = vpop.f32.mrb[71].mxu1  ;;  %12208 = vmatmul.mubr.msk.f32.gmra.mrb[176].mxu1 %vm22758_vm8, %v14313_v24  ;;  %vm22780_vm8 = vcmp.eq.s32.totalorder %v22779_v23, 1 }
 0xdf6   :  { %12209 = vmatprep.mubr.msk.f32.mxu1 %vm22760_vm3, %v14313_v24  ;;  %v10669_v58 = vsel %vm22780_vm8, %v10354_v7, -3.4e+38  ;;  %vm22782_vm3 = vcmp.eq.s32.totalorder %v22781_v45, 1  ;;  %v22804_v7 = vld [vmem:[#allocation197_spill] sm:$0xff]  ;;  %v22806_v63 = vld [vmem:[#allocation196_spill] sm:$0xff] }
 0xdf7   :  { %vm22805_vm8 = vcmp.eq.s32.totalorder %v22804_v7, 1 }
 0xdf8   :  { %v10369_v37 = vpop.f32.mrb[72].mxu1 }
 0xdf9   :  { %v10371_v55 = vpop.f32.mrb[73].mxu1  ;;  %12210 = vmatmul.mubr.msk.f32.gmra.mrb[178].mxu1 %vm22761_vm6, %v14313_v24  ;;  %vm22783_vm6 = vcmp.eq.s32.totalorder %v22645_v20, %v22637_v60 }
 0xdfa   :  { %12211 = vmatprep.mubr.msk.f32.mxu1 %vm22763_vm11, %v14313_v24  ;;  %vm22784_vm11 = vcmp.eq.s32.totalorder %v22643_v44, %v22640_v42 }
 0xdfc   :  { %v10374_v18 = vpop.f32.mrb[74].mxu1 }
 0xdfd   :  { %v10376_v62 = vpop.f32.mrb[75].mxu1  ;;  %12212 = vmatmul.mubr.msk.f32.gmra.mrb[180].mxu1 %vm22764_vm12, %v14313_v24  ;;  %vm22786_vm12 = vcmp.eq.s32.totalorder %v22785_v49, 1 }
 0xdfe   :  { %12213 = vmatprep.mubr.msk.f32.mxu1 %vm22766_vm14, %v14313_v24  ;;  %v10670_v30 = vsel %vm22786_vm12, %v10359_v14, -3.4e+38  ;;  %vm22788_vm14 = vcmp.eq.s32.totalorder %v22787_v36, 1  ;;  %vm22813_vm12 = vcmp.eq.s32.totalorder %v22812_v10, 1 }
 0xe00   :  { %v10379_v53 = vpop.f32.mrb[76].mxu1 }
 0xe01   :  { %v10381_v8 = vpop.f32.mrb[77].mxu1  ;;  %12214 = vmatmul.mubr.msk.f32.gmra.mrb[182].mxu1 %vm22767_vm15, %v14313_v24  ;;  %vm22789_vm15 = vcmp.eq.s32.totalorder %v22645_v20, %v22640_v42 }
 0xe02   :  { %12215 = vmatprep.mubr.msk.f32.mxu1 %vm22769_vm2, %v14313_v24  ;;  %vm22791_vm2 = vcmp.eq.s32.totalorder %v22790_v35, 1 }
 0xe03   :  { %v10671_v38 = vsel %vm22791_vm2, %v10364_v21, -3.4e+38 }
 0xe04   :  { %v10384_v25 = vpop.f32.mrb[78].mxu1 }
 0xe05   :  { %v10386_v17 = vpop.f32.mrb[79].mxu1  ;;  %12216 = vmatmul.mubr.msk.f32.gmra.mrb[184].mxu1 %vm22770_vm7, %v14313_v24  ;;  %vm22793_vm7 = vcmp.eq.s32.totalorder %v22792_v5, 1 }
 0xe06   :  { %12217 = vmatprep.mubr.msk.f32.mxu1 %vm22772_vm9, %v14313_v24  ;;  %vm22795_vm9 = vcmp.eq.s32.totalorder %v22794_v41, 1 }
 0xe07   :  { %v10672_v39 = vsel %vm22795_vm9, %v10369_v37, -3.4e+38  ;;  %v22808_v37 = vld [vmem:[#allocation198_spill] sm:$0xff] }
 0xe08   :  { %v10389_v11 = vpop.f32.mrb[80].mxu1 }
 0xe09   :  { %v10676_v48 = vsel %vm22776_vm13, %v10389_v11, -3.4e+38  ;;  %v10391_v16 = vpop.f32.mrb[81].mxu1  ;;  %12218 = vmatmul.mubr.msk.f32.gmra.mrb[186].mxu1 %vm22777_vm4, %v14313_v24  ;;  %vm22799_vm13 = vcmp.eq.s32.totalorder %v22798_v1, 1  ;;  %vm22801_vm4 = vcmp.eq.s32.totalorder %v22800_v4, 1  ;;  %v22828_v4 = vld [vmem:[#allocation176_spill] sm:$0xff] }
 0xe0a   :  { %v10732_v3 = vmax.f32 %v10668_v22, %v10676_v48  ;;  %12219 = vmatprep.mubr.msk.f32.mxu1 %vm22778_vm5, %v14313_v24  ;;  %v10673_v59 = vsel %vm22799_vm13, %v10374_v18, -3.4e+38  ;;  %vm22803_vm5 = vcmp.eq.s32.totalorder %v22802_v13, 1  ;;  %v22830_v13 = vld [vmem:[#allocation185_spill] sm:$0xff] }
 0xe0b   :  { %v10674_v0 = vsel %vm22803_vm5, %v10379_v53, -3.4e+38  ;;  %vm22831_vm5 = vcmp.eq.s32.totalorder %v22830_v13, 1 }
 0xe0c   :  { %v10394_v19 = vpop.f32.mrb[82].mxu1 }
 0xe0d   :  { %v10677_v9 = vsel %vm22782_vm3, %v10394_v19, -3.4e+38  ;;  %v10396_v27 = vpop.f32.mrb[83].mxu1  ;;  %12220 = vmatmul.mubr.msk.f32.gmra.mrb[188].mxu1 %vm22783_vm6, %v14313_v24  ;;  %vm22807_vm3 = vcmp.eq.s32.totalorder %v22806_v63, 1  ;;  %vm22809_vm6 = vcmp.eq.s32.totalorder %v22808_v37, 1 }
 0xe0e   :  { %v10733_v29 = vmax.f32 %v10669_v58, %v10677_v9  ;;  %12221 = vmatprep.mubr.msk.f32.mxu1 %vm22784_vm11, %v14313_v24  ;;  %v10675_v6 = vsel %vm22807_vm3, %v10384_v25, -3.4e+38  ;;  %vm22811_vm11 = vcmp.eq.s32.totalorder %v22810_v32, 1  ;;  %v22816_v58 = vld [vmem:[#allocation178_spill] sm:$0xff] }
 0xe10   :  { %v10399_v33 = vpop.f32.mrb[84].mxu1 }
 0xe11   :  { %v10678_v43 = vsel %vm22788_vm14, %v10399_v33, -3.4e+38  ;;  %v10401_v47 = vpop.f32.mrb[85].mxu1  ;;  %12222 = vmatmul.mubr.msk.f32.gmra.mrb[190].mxu1 %vm22789_vm15, %v14313_v24  ;;  %vm22815_vm14 = vcmp.eq.s32.totalorder %v22814_v40, 1  ;;  %vm22817_vm15 = vcmp.eq.s32.totalorder %v22816_v58, 1  ;;  %v22818_v33 = vld [vmem:[#allocation189_spill] sm:$0xff] }
 0xe12   :  { %v10734_v54 = vmax.f32 %v10670_v30, %v10678_v43  ;;  %vm22819_vm2 = vcmp.eq.s32.totalorder %v22818_v33, 1  ;;  %v22820_v43 = vld [vmem:[#allocation190_spill] sm:$0xff] }
 0xe14   :  { %v10404_v31 = vpop.f32.mrb[86].mxu1 }
 0xe15   :  { %v10679_v52 = vsel %vm22793_vm7, %v10404_v31, -3.4e+38  ;;  %v10406_v61 = vpop.f32.mrb[87].mxu1  ;;  %vm22821_vm7 = vcmp.eq.s32.totalorder %v22820_v43, 1 }
 0xe16   :  { %v10735_v50 = vmax.f32 %v10671_v38, %v10679_v52  ;;  %v22822_v38 = vld [vmem:[#allocation205_spill] sm:$0xff] }
 0xe17   :  { %vm22823_vm9 = vcmp.eq.s32.totalorder %v22822_v38, 1 }
 0xe18   :  { %v10409_v46 = vpop.f32.mrb[88].mxu1 }
 0xe19   :  { %v10680_v56 = vsel %vm22797_vm10, %v10409_v46, -3.4e+38  ;;  %v10411_v34 = vpop.f32.mrb[89].mxu1  ;;  %v22824_v46 = vld [vmem:[#allocation206_spill] sm:$0xff] }
 0xe1a   :  { %v10736_v12 = vmax.f32 %v10672_v39, %v10680_v56  ;;  %vm22825_vm10 = vcmp.eq.s32.totalorder %v22824_v46, 1  ;;  %v22826_v34 = vld [vmem:[#allocation175_spill] sm:$0xff] }
 0xe1b   :  { %vm22827_vm13 = vcmp.eq.s32.totalorder %v22826_v34, 1 }
 0xe1c   :  { %v10414_v24 = vpop.f32.mrb[90].mxu1 }
 0xe1d   :  { %v10681_v20 = vsel %vm22801_vm4, %v10414_v24, -3.4e+38  ;;  %v10416_v44 = vpop.f32.mrb[91].mxu1  ;;  %vm22829_vm4 = vcmp.eq.s32.totalorder %v22828_v4, 1 }
 0xe1e   :  { %v10737_v60 = vmax.f32 %v10673_v59, %v10681_v20 }
 0xe20   :  { %v10419_v42 = vpop.f32.mrb[92].mxu1 }
 0xe21   :  { %v10682_v26 = vsel %vm22805_vm8, %v10419_v42, -3.4e+38  ;;  %v10421_v14 = vpop.f32.mrb[93].mxu1 }
 0xe22   :  { %v10738_v28 = vmax.f32 %v10674_v0, %v10682_v26 }
 0xe24   :  { %v10424_v21 = vpop.f32.mrb[94].mxu1 }
 0xe25   :  { %v10683_v55 = vsel %vm22809_vm6, %v10424_v21, -3.4e+38  ;;  %v10426_v15 = vpop.f32.mrb[95].mxu1 }
 0xe26   :  { %v10739_v18 = vmax.f32 %v10675_v6, %v10683_v55  ;;  %v22834_v55 = vld [vmem:[#allocation199_spill] sm:$0xff] }
 0xe27   :  { %vm22835_vm3 = vcmp.eq.s32.totalorder %v22834_v55, 1 }
 0xe28   :  { %v10429_v62 = vpop.f32.mrb[96].mxu1 }
 0xe29   :  { %v10684_v8 = vsel %vm22811_vm11, %v10429_v62, -3.4e+38  ;;  %v10431_v51 = vpop.f32.mrb[97].mxu1 }
 0xe2a   :  { %v20985_v53 = vmax.f32 %v10732_v3, %v10684_v8  ;;  %v22836_v8 = vld [vmem:[#allocation200_spill] sm:$0xff] }
 0xe2b   :  { %vm22837_vm6 = vcmp.eq.s32.totalorder %v22836_v8, 1 }
 0xe2c   :  { %v10434_v17 = vpop.f32.mrb[98].mxu1 }
 0xe2d   :  { %v10685_v11 = vsel %vm22813_vm12, %v10434_v17, -3.4e+38  ;;  %v10436_v2 = vpop.f32.mrb[99].mxu1 }
 0xe2e   :  { %v20989_v22 = vmax.f32 %v10733_v29, %v10685_v11  ;;  %v22838_v11 = vld [vmem:[#allocation211_spill] sm:$0xff] }
 0xe2f   :  { %vm22839_vm11 = vcmp.eq.s32.totalorder %v22838_v11, 1 }
 0xe30   :  { %v10439_v25 = vpop.f32.mrb[100].mxu1 }
 0xe31   :  { %v10686_v48 = vsel %vm22815_vm14, %v10439_v25, -3.4e+38  ;;  %v10441_v16 = vpop.f32.mrb[101].mxu1 }
 0xe32   :  { %v20993_v19 = vmax.f32 %v10734_v54, %v10686_v48  ;;  %v22840_v48 = vld [vmem:[#allocation212_spill] sm:$0xff] }
 0xe33   :  { %vm22841_vm12 = vcmp.eq.s32.totalorder %v22840_v48, 1 }
 0xe34   :  { %v10444_v23 = vpop.f32.mrb[102].mxu1 }
 0xe35   :  { %v10687_v45 = vsel %vm22817_vm15, %v10444_v23, -3.4e+38  ;;  %v10446_v3 = vpop.f32.mrb[103].mxu1 }
 0xe36   :  { %v20997_v9 = vmax.f32 %v10735_v50, %v10687_v45  ;;  %v22842_v45 = vld [vmem:[#allocation179_spill] sm:$0xff] }
 0xe37   :  { %vm22843_vm14 = vcmp.eq.s32.totalorder %v22842_v45, 1 }
 0xe38   :  { %v10449_v27 = vpop.f32.mrb[104].mxu1 }
 0xe39   :  { %v10688_v49 = vsel %vm22819_vm2, %v10449_v27, -3.4e+38  ;;  %v10451_v29 = vpop.f32.mrb[105].mxu1 }
 0xe3a   :  { %v21001_v30 = vmax.f32 %v10736_v12, %v10688_v49  ;;  %v22844_v49 = vld [vmem:[#allocation180_spill] sm:$0xff] }
 0xe3b   :  { %vm22845_vm15 = vcmp.eq.s32.totalorder %v22844_v49, 1 }
 0xe3c   :  { %v10454_v36 = vpop.f32.mrb[106].mxu1 }
 0xe3d   :  { %v10689_v47 = vsel %vm22821_vm7, %v10454_v36, -3.4e+38  ;;  %v10456_v54 = vpop.f32.mrb[107].mxu1 }
 0xe3e   :  { %v21005_v31 = vmax.f32 %v10737_v60, %v10689_v47  ;;  %v22846_v47 = vld [vmem:[#allocation191_spill] sm:$0xff] }
 0xe3f   :  { %vm22847_vm2 = vcmp.eq.s32.totalorder %v22846_v47, 1 }
 0xe40   :  { %v10459_v35 = vpop.f32.mrb[108].mxu1 }
 0xe41   :  { %v10690_v5 = vsel %vm22823_vm9, %v10459_v35, -3.4e+38  ;;  %v10461_v52 = vpop.f32.mrb[109].mxu1 }
 0xe42   :  { %v21009_v61 = vmax.f32 %v10738_v28, %v10690_v5  ;;  %v22832_v28 = vld [vmem:[#allocation186_spill] sm:$0xff]  ;;  %v22848_v5 = vld [vmem:[#allocation192_spill] sm:$0xff] }
 0xe43   :  { %vm22833_vm8 = vcmp.eq.s32.totalorder %v22832_v28, 1  ;;  %vm22849_vm7 = vcmp.eq.s32.totalorder %v22848_v5, 1 }
 0xe44   :  { %v10464_v50 = vpop.f32.mrb[110].mxu1 }
 0xe45   :  { %v10691_v41 = vsel %vm22825_vm10, %v10464_v50, -3.4e+38  ;;  %v10466_v39 = vpop.f32.mrb[111].mxu1 }
 0xe46   :  { %v21013_v57 = vmax.f32 %v10739_v18, %v10691_v41  ;;  %v22850_v41 = vld [vmem:[#allocation207_spill] sm:$0xff] }
 0xe47   :  { %vm22851_vm9 = vcmp.eq.s32.totalorder %v22850_v41, 1 }
 0xe48   :  { %v10469_v56 = vpop.f32.mrb[112].mxu1 }
 0xe49   :  { %v10692_v12 = vsel %vm22827_vm13, %v10469_v56, -3.4e+38  ;;  %v10471_v24 = vpop.f32.mrb[113].mxu1 }
 0xe4a   :  { %v10748_v1 = vmax.f32 %v20985_v53, %v10692_v12  ;;  %v22852_v12 = vld [vmem:[#allocation208_spill] sm:$0xff] }
 0xe4b   :  { %vm22853_vm10 = vcmp.eq.s32.totalorder %v22852_v12, 1 }
 0xe4c   :  { %v10474_v59 = vpop.f32.mrb[114].mxu1 }
 0xe4d   :  { %v10693_v20 = vsel %vm22829_vm4, %v10474_v59, -3.4e+38  ;;  %v10476_v44 = vpop.f32.mrb[115].mxu1 }
 0xe4e   :  { %v10749_v60 = vmax.f32 %v20989_v22, %v10693_v20  ;;  %v22854_v20 = vld [vmem:[#allocation217_spill] sm:$0xff] }
 0xe4f   :  { %vm22855_vm13 = vcmp.eq.s32.totalorder %v22854_v20, 1 }
 0xe50   :  { %v10479_v42 = vpop.f32.mrb[116].mxu1 }
 0xe51   :  { %v10694_v0 = vsel %vm22831_vm5, %v10479_v42, -3.4e+38  ;;  %v10481_v7 = vpop.f32.mrb[117].mxu1 }
 0xe52   :  { %v10750_v26 = vmax.f32 %v20993_v19, %v10694_v0  ;;  %v22856_v0 = vld [vmem:[#allocation218_spill] sm:$0xff] }
 0xe53   :  { %vm22857_vm4 = vcmp.eq.s32.totalorder %v22856_v0, 1 }
 0xe54   :  { %v10484_v14 = vpop.f32.mrb[118].mxu1 }
 0xe55   :  { %v10695_v21 = vsel %vm22833_vm8, %v10484_v14, -3.4e+38  ;;  %v10486_v63 = vpop.f32.mrb[119].mxu1 }
 0xe56   :  { %v10751_v6 = vmax.f32 %v20997_v9, %v10695_v21  ;;  %v22858_v21 = vld [vmem:[#allocation187_spill] sm:$0xff] }
 0xe57   :  { %vm22859_vm5 = vcmp.eq.s32.totalorder %v22858_v21, 1 }
 0xe58   :  { %v10489_v37 = vpop.f32.mrb[120].mxu1 }
 0xe59   :  { %v10696_v15 = vsel %vm22835_vm3, %v10489_v37, -3.4e+38  ;;  %v10491_v18 = vpop.f32.mrb[121].mxu1 }
 0xe5a   :  { %v10752_v62 = vmax.f32 %v21001_v30, %v10696_v15  ;;  %v22860_v15 = vld [vmem:[#allocation188_spill] sm:$0xff] }
 0xe5b   :  { %vm22861_vm8 = vcmp.eq.s32.totalorder %v22860_v15, 1 }
 0xe5c   :  { %v10494_v32 = vpop.f32.mrb[122].mxu1 }
 0xe5d   :  { %v10697_v51 = vsel %vm22837_vm6, %v10494_v32, -3.4e+38  ;;  %v10496_v53 = vpop.f32.mrb[123].mxu1 }
 0xe5e   :  { %v10753_v17 = vmax.f32 %v21005_v31, %v10697_v51  ;;  %v22862_v51 = vld [vmem:[#allocation201_spill] sm:$0xff] }
 0xe5f   :  { %vm22863_vm3 = vcmp.eq.s32.totalorder %v22862_v51, 1 }
 0xe60   :  { %v10499_v10 = vpop.f32.mrb[124].mxu1 }
 0xe61   :  { %v10698_v2 = vsel %vm22839_vm11, %v10499_v10, -3.4e+38  ;;  %v10501_v22 = vpop.f32.mrb[125].mxu1 }
 0xe62   :  { %v10754_v25 = vmax.f32 %v21009_v61, %v10698_v2  ;;  %v22864_v2 = vld [vmem:[#allocation202_spill] sm:$0xff] }
 0xe63   :  { %vm22865_vm6 = vcmp.eq.s32.totalorder %v22864_v2, 1 }
 0xe64   :  { %v10504_v40 = vpop.f32.mrb[126].mxu1 }
 0xe65   :  { %v10699_v16 = vsel %vm22841_vm12, %v10504_v40, -3.4e+38  ;;  %v10506_v19 = vpop.f32.mrb[127].mxu1 }
 0xe66   :  { %v10755_v23 = vmax.f32 %v21013_v57, %v10699_v16  ;;  %v22866_v16 = vld [vmem:[#allocation213_spill] sm:$0xff] }
 0xe67   :  { %vm22867_vm11 = vcmp.eq.s32.totalorder %v22866_v16, 1 }
 0xe68   :  { %v10509_v58 = vpop.f32.mrb[128].mxu1 }
 0xe69   :  { %v10700_v3 = vsel %vm22843_vm14, %v10509_v58, -3.4e+38  ;;  %v10511_v9 = vpop.f32.mrb[129].mxu1 }
 0xe6a   :  { %v21041_v27 = vmax.f32 %v10748_v1, %v10700_v3  ;;  %v22868_v3 = vld [vmem:[#allocation214_spill] sm:$0xff] }
 0xe6b   :  { %vm22869_vm12 = vcmp.eq.s32.totalorder %v22868_v3, 1 }
 0xe6c   :  { %v10514_v33 = vpop.f32.mrb[130].mxu1 }
 0xe6d   :  { %v10701_v29 = vsel %vm22845_vm15, %v10514_v33, -3.4e+38  ;;  %v10516_v30 = vpop.f32.mrb[131].mxu1 }
 0xe6e   :  { %v21045_v36 = vmax.f32 %v10749_v60, %v10701_v29  ;;  %v22870_v29 = vld [vmem:[#allocation221_spill] sm:$0xff] }
 0xe6f   :  { %vm22871_vm14 = vcmp.eq.s32.totalorder %v22870_v29, 1 }
 0xe70   :  { %v10519_v43 = vpop.f32.mrb[132].mxu1 }
 0xe71   :  { %v10702_v54 = vsel %vm22847_vm2, %v10519_v43, -3.4e+38  ;;  %v10521_v31 = vpop.f32.mrb[133].mxu1 }
 0xe72   :  { %v21049_v35 = vmax.f32 %v10750_v26, %v10702_v54  ;;  %v22872_v54 = vld [vmem:[#allocation222_spill] sm:$0xff] }
 0xe73   :  { %vm22873_vm15 = vcmp.eq.s32.totalorder %v22872_v54, 1 }
 0xe74   :  { %v10524_v38 = vpop.f32.mrb[134].mxu1 }
 0xe75   :  { %v10703_v52 = vsel %vm22849_vm7, %v10524_v38, -3.4e+38  ;;  %v10526_v61 = vpop.f32.mrb[135].mxu1 }
 0xe76   :  { %v21053_v50 = vmax.f32 %v10751_v6, %v10703_v52  ;;  %v22874_v52 = vld [vmem:[#allocation193_spill] sm:$0xff] }
 0xe77   :  { %vm22875_vm2 = vcmp.eq.s32.totalorder %v22874_v52, 1  ;;  %v22898_v52 = vld [vmem:[#allocation223_spill] sm:$0xff] }
 0xe78   :  { %v10529_v46 = vpop.f32.mrb[136].mxu1 }
 0xe79   :  { %v10704_v39 = vsel %vm22851_vm9, %v10529_v46, -3.4e+38  ;;  %v10531_v57 = vpop.f32.mrb[137].mxu1 }
 0xe7a   :  { %v21057_v56 = vmax.f32 %v10752_v62, %v10704_v39  ;;  %v22876_v39 = vld [vmem:[#allocation194_spill] sm:$0xff] }
 0xe7b   :  { %vm22877_vm7 = vcmp.eq.s32.totalorder %v22876_v39, 1 }
 0xe7c   :  { %v10534_v34 = vpop.f32.mrb[138].mxu1 }
 0xe7d   :  { %v10705_v24 = vsel %vm22853_vm10, %v10534_v34, -3.4e+38  ;;  %v10536_v1 = vpop.f32.mrb[139].mxu1 }
 0xe7e   :  { %v21061_v59 = vmax.f32 %v10753_v17, %v10705_v24  ;;  %v22878_v24 = vld [vmem:[#allocation209_spill] sm:$0xff] }
 0xe7f   :  { %vm22879_vm9 = vcmp.eq.s32.totalorder %v22878_v24, 1 }
 0xe80   :  { %v10539_v4 = vpop.f32.mrb[140].mxu1 }
 0xe81   :  { %v10706_v44 = vsel %vm22855_vm13, %v10539_v4, -3.4e+38  ;;  %v10541_v60 = vpop.f32.mrb[141].mxu1 }
 0xe82   :  { %v21065_v42 = vmax.f32 %v10754_v25, %v10706_v44  ;;  %v22880_v44 = vld [vmem:[#allocation210_spill] sm:$0xff] }
 0xe83   :  { %vm22881_vm10 = vcmp.eq.s32.totalorder %v22880_v44, 1 }
 0xe84   :  { %v10544_v13 = vpop.f32.mrb[142].mxu1 }
 0xe85   :  { %v10707_v7 = vsel %vm22857_vm4, %v10544_v13, -3.4e+38  ;;  %v10546_v26 = vpop.f32.mrb[143].mxu1 }
 0xe86   :  { %v21069_v14 = vmax.f32 %v10755_v23, %v10707_v7  ;;  %v22882_v7 = vld [vmem:[#allocation219_spill] sm:$0xff] }
 0xe87   :  { %vm22883_vm13 = vcmp.eq.s32.totalorder %v22882_v7, 1 }
 0xe88   :  { %v10549_v28 = vpop.f32.mrb[144].mxu1 }
 0xe89   :  { %v10708_v63 = vsel %vm22859_vm5, %v10549_v28, -3.4e+38  ;;  %v10551_v6 = vpop.f32.mrb[145].mxu1 }
 0xe8a   :  { %v10764_v37 = vmax.f32 %v21041_v27, %v10708_v63  ;;  %v22884_v63 = vld [vmem:[#allocation220_spill] sm:$0xff] }
 0xe8b   :  { %vm22885_vm4 = vcmp.eq.s32.totalorder %v22884_v63, 1 }
 0xe8c   :  { %v10554_v55 = vpop.f32.mrb[146].mxu1 }
 0xe8d   :  { %v10709_v18 = vsel %vm22861_vm8, %v10554_v55, -3.4e+38  ;;  %v10556_v62 = vpop.f32.mrb[147].mxu1 }
 0xe8e   :  { %v10765_v32 = vmax.f32 %v21045_v36, %v10709_v18  ;;  %v22886_v18 = vld [vmem:[#allocation225_spill] sm:$0xff] }
 0xe8f   :  { %vm22887_vm5 = vcmp.eq.s32.totalorder %v22886_v18, 1 }
 0xe90   :  { %v10559_v8 = vpop.f32.mrb[148].mxu1 }
 0xe91   :  { %v10710_v53 = vsel %vm22863_vm3, %v10559_v8, -3.4e+38  ;;  %v10561_v17 = vpop.f32.mrb[149].mxu1 }
 0xe92   :  { %v10766_v10 = vmax.f32 %v21049_v35, %v10710_v53  ;;  %v22888_v53 = vld [vmem:[#allocation226_spill] sm:$0xff] }
 0xe93   :  { %vm22889_vm8 = vcmp.eq.s32.totalorder %v22888_v53, 1 }
 0xe94   :  { %v10564_v11 = vpop.f32.mrb[150].mxu1 }
 0xe95   :  { %v10711_v22 = vsel %vm22865_vm6, %v10564_v11, -3.4e+38  ;;  %v10566_v25 = vpop.f32.mrb[151].mxu1 }
 0xe96   :  { %v10767_v40 = vmax.f32 %v21053_v50, %v10711_v22  ;;  %v22890_v22 = vld [vmem:[#allocation203_spill] sm:$0xff] }
 0xe97   :  { %vm22891_vm3 = vcmp.eq.s32.totalorder %v22890_v22, 1 }
 0xe98   :  { %v10569_v48 = vpop.f32.mrb[152].mxu1 }
 0xe99   :  { %v10712_v19 = vsel %vm22867_vm11, %v10569_v48, -3.4e+38  ;;  %v10571_v23 = vpop.f32.mrb[153].mxu1 }
 0xe9a   :  { %v10768_v58 = vmax.f32 %v21057_v56, %v10712_v19  ;;  %v22892_v23 = vld [vmem:[#allocation204_spill] sm:$0xff] }
 0xe9b   :  { %vm22893_vm11 = vcmp.eq.s32.totalorder %v22892_v23, 1 }
 0xe9c   :  { %v10574_v45 = vpop.f32.mrb[154].mxu1 }
 0xe9d   :  { %v10713_v9 = vsel %vm22869_vm12, %v10574_v45, -3.4e+38  ;;  %v10576_v27 = vpop.f32.mrb[155].mxu1 }
 0xe9e   :  { %v10769_v33 = vmax.f32 %v21061_v59, %v10713_v9 }
 0xea0   :  { %v10579_v49 = vpop.f32.mrb[156].mxu1 }
 0xea1   :  { %v10714_v30 = vsel %vm22871_vm14, %v10579_v49, -3.4e+38  ;;  %v10581_v36 = vpop.f32.mrb[157].mxu1 }
 0xea2   :  { %v10770_v43 = vmax.f32 %v21065_v42, %v10714_v30 }
 0xea4   :  { %v10584_v47 = vpop.f32.mrb[158].mxu1 }
 0xea5   :  { %v10715_v31 = vsel %vm22873_vm15, %v10584_v47, -3.4e+38  ;;  %v10586_v35 = vpop.f32.mrb[159].mxu1  ;;  %v22896_v47 = vld [vmem:[#allocation216_spill] sm:$0xff] }
 0xea6   :  { %v10771_v38 = vmax.f32 %v21069_v14, %v10715_v31 }
 0xea8   :  { %v10589_v5 = vpop.f32.mrb[160].mxu1 }
 0xea9   :  { %v10716_v61 = vsel %vm22875_vm2, %v10589_v5, -3.4e+38  ;;  %v10591_v50 = vpop.f32.mrb[161].mxu1  ;;  %vm22897_vm2 = vcmp.eq.s32.totalorder %v22896_v47, 1 }
 0xeaa   :  { %v10772_v46 = vmax.f32 %v10764_v37, %v10716_v61 }
 0xeac   :  { %v10594_v41 = vpop.f32.mrb[162].mxu1 }
 0xead   :  { %v10717_v57 = vsel %vm22877_vm7, %v10594_v41, -3.4e+38  ;;  %v10596_v56 = vpop.f32.mrb[163].mxu1 }
 0xeae   :  { %v10773_v34 = vmax.f32 %v10765_v32, %v10717_v57  ;;  %v22900_v57 = vld [vmem:[#allocation224_spill] sm:$0xff] }
 0xeb0   :  { %v10599_v12 = vpop.f32.mrb[164].mxu1 }
 0xeb1   :  { %v10718_v1 = vsel %vm22879_vm9, %v10599_v12, -3.4e+38  ;;  %v10601_v59 = vpop.f32.mrb[165].mxu1  ;;  %vm22899_vm9 = vcmp.eq.s32.totalorder %v22898_v52, 1 }
 0xeb2   :  { %v10774_v4 = vmax.f32 %v10766_v10, %v10718_v1  ;;  %v22902_v59 = vld [vmem:[#allocation227_spill] sm:$0xff] }
 0xeb4   :  { %v10604_v20 = vpop.f32.mrb[166].mxu1 }
 0xeb5   :  { %v10719_v60 = vsel %vm22881_vm10, %v10604_v20, -3.4e+38  ;;  %v10606_v42 = vpop.f32.mrb[167].mxu1 }
 0xeb6   :  { %v10775_v13 = vmax.f32 %v10767_v40, %v10719_v60 }
 0xeb8   :  { %v10609_v0 = vpop.f32.mrb[168].mxu1 }
 0xeb9   :  { %v10720_v26 = vsel %vm22883_vm13, %v10609_v0, -3.4e+38  ;;  %v10611_v14 = vpop.f32.mrb[169].mxu1  ;;  %vm22901_vm13 = vcmp.eq.s32.totalorder %v22900_v57, 1 }
 0xeba   :  { %v10776_v28 = vmax.f32 %v10768_v58, %v10720_v26 }
 0xebc   :  { %v10614_v21 = vpop.f32.mrb[170].mxu1 }
 0xebd   :  { %v10721_v6 = vsel %vm22885_vm4, %v10614_v21, -3.4e+38  ;;  %v10616_v37 = vpop.f32.mrb[171].mxu1 }
 0xebe   :  { %v10777_v55 = vmax.f32 %v10769_v33, %v10721_v6  ;;  %v22894_v33 = vld [vmem:[#allocation215_spill] sm:$0xff] }
 0xebf   :  { %vm22895_vm14 = vcmp.eq.s32.totalorder %v22894_v33, 1 }
 0xec0   :  { %v10619_v15 = vpop.f32.mrb[172].mxu1 }
 0xec1   :  { %v10722_v62 = vsel %vm22887_vm5, %v10619_v15, -3.4e+38  ;;  %v10621_v32 = vpop.f32.mrb[173].mxu1  ;;  %vm22903_vm5 = vcmp.eq.s32.totalorder %v22902_v59, 1 }
 0xec2   :  { %v10778_v8 = vmax.f32 %v10770_v43, %v10722_v62 }
 0xec4   :  { %v10624_v51 = vpop.f32.mrb[174].mxu1 }
 0xec5   :  { %v10723_v17 = vsel %vm22889_vm8, %v10624_v51, -3.4e+38  ;;  %v10626_v10 = vpop.f32.mrb[175].mxu1 }
 0xec6   :  { %v10779_v11 = vmax.f32 %v10771_v38, %v10723_v17 }
 0xec8   :  { %v10629_v2 = vpop.f32.mrb[176].mxu1 }
 0xec9   :  { %v10724_v25 = vsel %vm22891_vm3, %v10629_v2, -3.4e+38  ;;  %v10631_v40 = vpop.f32.mrb[177].mxu1 }
 0xeca   :  { %v10780_v48 = vmax.f32 %v10772_v46, %v10724_v25 }
 0xecc   :  { %vm10788_vm6 = vcmp.le.f32.partialorder %v10780_v48, -1e+38  ;;  %v10634_v16 = vpop.f32.mrb[178].mxu1 }
 0xecd   :  { %v10796_v19 = vsel %vm10788_vm6, 0.0, %v10780_v48  ;;  %v10725_v58 = vsel %vm22893_vm11, %v10634_v16, -3.4e+38  ;;  %v10636_v45 = vpop.f32.mrb[179].mxu1 }
 0xece   :  { %10804 = vst.msk [vmem:[%s21179_s20] sm:$0xff] %vm4140_vm1, %v10796_v19  ;;  %v10781_v3 = vmax.f32 %v10773_v34, %v10725_v58 }
 0xed0   :  { %vm10789_vm12 = vcmp.le.f32.partialorder %v10781_v3, -1e+38  ;;  %v10639_v9 = vpop.f32.mrb[180].mxu1 }
 0xed1   :  { %v10797_v27 = vsel %vm10789_vm12, 0.0, %v10781_v3  ;;  %v10726_v49 = vsel %vm22895_vm14, %v10639_v9, -3.4e+38  ;;  %v10641_v29 = vpop.f32.mrb[181].mxu1 }
 0xed2   :  { %10805 = vst.msk [vmem:[%s21179_s20 + $0x8] sm:$0xff] %vm4140_vm1, %v10797_v27  ;;  %v10782_v30 = vmax.f32 %v10774_v4, %v10726_v49 }
 0xed4   :  { %vm10790_vm15 = vcmp.le.f32.partialorder %v10782_v30, -1e+38  ;;  %v10644_v36 = vpop.f32.mrb[182].mxu1 }
 0xed5   :  { %v10798_v43 = vsel %vm10790_vm15, 0.0, %v10782_v30  ;;  %v10727_v54 = vsel %vm22897_vm2, %v10644_v36, -3.4e+38  ;;  %v10646_v31 = vpop.f32.mrb[183].mxu1 }
 0xed6   :  { %10806 = vst.msk [vmem:[%s21179_s20 + $0x10] sm:$0xff] %vm4140_vm1, %v10798_v43  ;;  %v10783_v35 = vmax.f32 %v10775_v13, %v10727_v54 }
 0xed8   :  { %vm10791_vm7 = vcmp.le.f32.partialorder %v10783_v35, -1e+38  ;;  %v10649_v38 = vpop.f32.mrb[184].mxu1 }
 0xed9   :  { %v10799_v5 = vsel %vm10791_vm7, 0.0, %v10783_v35  ;;  %v10728_v61 = vsel %vm22899_vm9, %v10649_v38, -3.4e+38  ;;  %v10651_v50 = vpop.f32.mrb[185].mxu1 }
 0xeda   :  { %10807 = vst.msk [vmem:[%s21179_s20 + $0x18] sm:$0xff] %vm4140_vm1, %v10799_v5  ;;  %v10784_v46 = vmax.f32 %v10776_v28, %v10728_v61 }
 0xedc   :  { %vm10792_vm10 = vcmp.le.f32.partialorder %v10784_v46, -1e+38  ;;  %v10654_v41 = vpop.f32.mrb[186].mxu1 }
 0xedd   :  { %v10800_v39 = vsel %vm10792_vm10, 0.0, %v10784_v46  ;;  %v10729_v56 = vsel %vm22901_vm13, %v10654_v41, -3.4e+38  ;;  %v10656_v34 = vpop.f32.mrb[187].mxu1 }
 0xede   :  { %10808 = vst.msk [vmem:[%s21179_s20 + $0x20] sm:$0xff] %vm4140_vm1, %v10800_v39  ;;  %v10785_v12 = vmax.f32 %v10777_v55, %v10729_v56 }
 0xee0   :  { %vm10793_vm4 = vcmp.le.f32.partialorder %v10785_v12, -1e+38  ;;  %v10659_v24 = vpop.f32.mrb[188].mxu1 }
 0xee1   :  { %v10801_v1 = vsel %vm10793_vm4, 0.0, %v10785_v12  ;;  %v10730_v4 = vsel %vm22903_vm5, %v10659_v24, -3.4e+38  ;;  %v10661_v20 = vpop.f32.mrb[189].mxu1 }
 0xee2   :  { %10809 = vst.msk [vmem:[%s21179_s20 + $0x28] sm:$0xff] %vm4140_vm1, %v10801_v1  ;;  %v10786_v44 = vmax.f32 %v10778_v8, %v10730_v4 }
 0xee4   :  { %vm10794_vm8 = vcmp.le.f32.partialorder %v10786_v44, -1e+38  ;;  %v10664_v60 = vpop.f32.mrb[190].mxu1 }
 0xee5   :  { %v10802_v42 = vsel %vm10794_vm8, 0.0, %v10786_v44  ;;  %v10731_v0 = vsel %vm6961_vm0, %v10664_v60, -3.4e+38  ;;  %v10666_v7 = vpop.f32.mrb[191].mxu1 }
 0xee6   :  { %10810 = vst.msk [vmem:[%s21179_s20 + $0x30] sm:$0xff] %vm4140_vm1, %v10802_v42  ;;  %v10787_v26 = vmax.f32 %v10779_v11, %v10731_v0 }
 0xee8   :  { %vm10795_vm3 = vcmp.le.f32.partialorder %v10787_v26, -1e+38 }
 0xee9   :  { %v10803_v14 = vsel %vm10795_vm3, 0.0, %v10787_v26 }
 0xeea   :  { %10811 = vst.msk [vmem:[%s21179_s20 + $0x38] sm:$0xff] %vm4140_vm1, %v10803_v14 }

</bundles_post_ra>
